<compile_context>
chip_gen: v7x
topology: tpu7x:2x2x1
jax: 0.10.0
libtpu: 0.0.40
codegen_flags: <defaults>
</compile_context>

<pallas_src>
import functools

import jax
import jax.numpy as jnp
from jax import lax
from jax.experimental import pallas as pl
from jax.experimental.pallas import tpu as pltpu

NEG_SLOPE = 0.2   # LeakyReLU(0.2)
EPS = 1e-5        # InstanceNorm2d default eps


def _round_up(x, m):
    return (x + m - 1) // m * m


# ----------------------------------------------------------------------------
# Kernel 1: tiled conv-as-matmul (bf16 operands, f32 accumulator, fused bias
#           and optional LeakyReLU in the K-axis finalize step)
# ----------------------------------------------------------------------------
def _conv_mm_kernel(p_ref, w_ref, b_ref, o_ref, acc_ref, *, apply_act):
    @pl.when(pl.program_id(2) == 0)
    def _init():
        acc_ref[...] = jnp.zeros_like(acc_ref)

    acc_ref[...] += jnp.dot(p_ref[...], w_ref[...],
                            preferred_element_type=jnp.float32)

    @pl.when(pl.program_id(2) == pl.num_programs(2) - 1)
    def _finalize():
        acc = acc_ref[...] + b_ref[...]
        if apply_act:
            acc = jnp.where(acc >= 0.0, acc, NEG_SLOPE * acc)
        o_ref[...] = acc.astype(o_ref.dtype)


def conv_matmul(patches, w2d, b, apply_act, out_dtype=jnp.bfloat16):
    """patches (M, K) bf16, w2d (K, Cout), b (Cout,) -> (M, Cout) out_dtype."""
    M, K = patches.shape
    Cout = w2d.shape[1]
    assert K % 128 == 0, K        # caller pre-pads Cin so K is lane-exact
    assert Cout % 128 == 0, Cout  # caller pre-pads Cout (layer 1: 64 -> 128)

    # ---- adaptive tiles: never pad tiny late-layer M up to 256 -------------
    tm = min(256, M)
    if M % tm:                    # robustness fallback (not hit for this net)
        Mp = _round_up(M, tm)
        patches = jnp.pad(patches, ((0, Mp - M), (0, 0)))
    else:
        Mp = M
    tn = Cout                     # full-Cout tile: no patch re-read per j tile
    tk = min(2048, K)
    while K % tk:
        tk //= 2
    # v7x megacore: keep >=2 tiles on a parallel axis whenever possible.
    if (Mp // tm) * (Cout // tn) == 1:
        if Cout % 256 == 0:
            tn = Cout // 2
        elif tm % 32 == 0:
            tm //= 2

    w = w2d.astype(jnp.bfloat16)                    # weights are small
    b2 = b.reshape(1, Cout).astype(jnp.float32)

    grid = (Mp // tm, Cout // tn, K // tk)
    out_bytes = jnp.dtype(out_dtype).itemsize
    cost = pl.CostEstimate(
        flops=2 * Mp * K * Cout,
        transcendentals=0,
        bytes_accessed=(Mp * K * 2 * grid[1]          # patches re-read / j tile
                        + K * Cout * 2 * grid[0]      # weights re-read / i tile
                        + Mp * Cout * out_bytes
                        + Cout * 4 * grid[0] * grid[2]),
    )

    out = pl.pallas_call(
        functools.partial(_conv_mm_kernel, apply_act=apply_act),
        out_shape=jax.ShapeDtypeStruct((Mp, Cout), out_dtype),
        grid=grid,
        in_specs=[
            pl.BlockSpec((tm, tk), lambda i, j, k: (i, k)),
            pl.BlockSpec((tk, tn), lambda i, j, k: (k, j)),
            pl.BlockSpec((1, tn), lambda i, j, k: (0, j)),
        ],
        out_specs=pl.BlockSpec((tm, tn), lambda i, j, k: (i, j)),
        scratch_shapes=[pltpu.VMEM((tm, tn), jnp.float32)],
        compiler_params=pltpu.CompilerParams(
            dimension_semantics=("parallel", "parallel", "arbitrary")),
        cost_estimate=cost,
    )(patches, w, b2)
    return out if Mp == M else out[:M]


# ----------------------------------------------------------------------------
# Kernel 2: InstanceNorm2d (no affine, biased var) + LeakyReLU
#           bf16 in / bf16 out, statistics in f32 inside the kernel
# ----------------------------------------------------------------------------
def _inorm_lrelu_kernel(x_ref, o_ref):
    x = x_ref[...].astype(jnp.float32)                 # (1, S, tc)
    mean = jnp.mean(x, axis=1, keepdims=True)
    var = jnp.mean(jnp.square(x - mean), axis=1, keepdims=True)
    y = (x - mean) * lax.rsqrt(var + EPS)
    y = jnp.where(y >= 0.0, y, NEG_SLOPE * y)
    o_ref[...] = y.astype(o_ref.dtype)


def instance_norm_lrelu(x):
    """x: (N, S, C) bf16 -> (N, S, C) bf16."""
    N, S, C = x.shape
    assert C % 128 == 0, C
    tc = min(C, 512)              # lane-dense, one channel tile per instance
    while C % tc:
        tc //= 2
    return pl.pallas_call(
        _inorm_lrelu_kernel,
        out_shape=jax.ShapeDtypeStruct((N, S, C), x.dtype),
        grid=(N, C // tc),
        in_specs=[pl.BlockSpec((1, S, tc), lambda n, c: (n, 0, c))],
        out_specs=pl.BlockSpec((1, S, tc), lambda n, c: (n, 0, c)),
        compiler_params=pltpu.CompilerParams(
            dimension_semantics=("parallel", "parallel")),
    )(x)


# ----------------------------------------------------------------------------
# Kernel 3: fused final Conv(512->1, 4x4, s1, p1) + global avg-pool
#           out[n] = mean_s( patches[n, s, :] . w ) + b  -> pure VPU reduction
# ----------------------------------------------------------------------------
def _final_reduce_kernel(p_ref, w_ref, o_ref, acc_ref, *, inv_s):
    @pl.when(pl.program_id(1) == 0)
    def _init():
        acc_ref[...] = jnp.zeros_like(acc_ref)

    # Multiply/accumulate in f32: correct on v5e (no bf16 VPU) and cheap here.
    p = p_ref[...].astype(jnp.float32)                   # (1, S, tk)
    w = w_ref[...].astype(jnp.float32)                   # (1, tk)
    acc_ref[...] += jnp.sum(p * w[:, None, :], axis=1)   # (1, tk)

    @pl.when(pl.program_id(1) == pl.num_programs(1) - 1)
    def _finalize():
        total = jnp.sum(acc_ref[...]) * inv_s            # divide by TRUE S
        o_ref[...] = jnp.broadcast_to(total, o_ref.shape).astype(o_ref.dtype)


def final_conv_avgpool(x_nhwc, w, b):
    """Fused Conv(512->1, 4x4, s1, p1) + F.avg_pool2d(full) + flatten."""
    kh, kw_, cin, cout = w.shape                         # (4, 4, 512, 1)
    patches, (N, OH, OW) = im2col(x_nhwc, kh, 1, 1)      # bf16
    K = kh * kw_ * cin
    S = OH * OW
    tk = min(2048, K)
    while K % tk:
        tk //= 2

    p3 = patches.reshape(N, S, K)                        # no pad copy
    wv = w.reshape(1, K).astype(jnp.bfloat16)

    out = pl.pallas_call(
        functools.partial(_final_reduce_kernel, inv_s=1.0 / S),
        out_shape=jax.ShapeDtypeStruct((N, 1, 128), jnp.float32),
        grid=(N, K // tk),
        in_specs=[
            pl.BlockSpec((1, S, tk), lambda n, k: (n, 0, k)),
            pl.BlockSpec((1, tk), lambda n, k: (0, k)),
        ],
        out_specs=pl.BlockSpec((1, 1, 128), lambda n, k: (n, 0, 0)),
        scratch_shapes=[pltpu.VMEM((1, tk), jnp.float32)],
        compiler_params=pltpu.CompilerParams(
            dimension_semantics=("parallel", "arbitrary")),
    )(p3, wv)
    return out[:, 0, :1] + b.reshape(1, 1)               # (N, 1)


# ----------------------------------------------------------------------------
# Glue: im2col (data movement only), parameter setup, forward pass
# ----------------------------------------------------------------------------
def im2col(x, k, stride, pad):
    """x: (N, H, W, C) -> patches (N*OH*OW, k*k*C) and output grid dims."""
    xp = jnp.pad(x, ((0, 0), (pad, pad), (pad, pad), (0, 0)))
    N, Hp, Wp, C = xp.shape
    OH = (Hp - k) // stride + 1
    OW = (Wp - k) // stride + 1
    cols = []
    for di in range(k):
        for dj in range(k):
            cols.append(
                xp[:, di:di + stride * OH:stride, dj:dj + stride * OW:stride, :]
            )
    p = jnp.stack(cols, axis=3)                          # (N, OH, OW, k*k, C)
    return p.reshape(N * OH * OW, k * k * C), (N, OH, OW)


def init_params(key):
    """Deterministic synthetic weights, HWIO layout (kh, kw, Cin, Cout)."""
    dims = [(3, 64), (64, 128), (128, 256), (256, 512), (512, 1)]
    params = []
    for cin, cout in dims:
        key, kw_, kb_ = jax.random.split(key, 3)
        fan_in = cin * 4 * 4
        w = jax.random.normal(kw_, (4, 4, cin, cout), jnp.float32) / jnp.sqrt(fan_in)
        b = jax.random.normal(kb_, (cout,), jnp.float32) * 0.01
        params.append((w, b))
    return params


def discriminator_forward(x_nchw, params):
    """Pallas forward. Input NCHW (PyTorch convention), output (N, 1)."""
    y = jnp.transpose(x_nchw, (0, 2, 3, 1)).astype(jnp.bfloat16)   # NHWC bf16

    # ---- Layer 1: Conv(3->64, s2, p1) + LeakyReLU (fused in the matmul) ----
    # Pad Cin 3->8 so K = 4*4*8 = 128 (lane-exact, no K pad copy) and Cout
    # 64->128 (lane-dense unmasked stores).  Zero channels stay zero through
    # LeakyReLU and are annihilated in layer 2 by zero-padded weight rows.
    w1, b1 = params[0]
    cin_pad, cout_pad = 8, 128
    y = jnp.pad(y, ((0, 0), (0, 0), (0, 0), (0, cin_pad - 3)))
    w1p = jnp.pad(w1, ((0, 0), (0, 0), (0, cin_pad - 3), (0, cout_pad - 64)))
    b1p = jnp.pad(b1, (0, cout_pad - 64))
    patches, (N, OH, OW) = im2col(y, 4, 2, 1)
    out = conv_matmul(patches, w1p.reshape(4 * 4 * cin_pad, cout_pad), b1p,
                      apply_act=True, out_dtype=jnp.bfloat16)
    y = out.reshape(N, OH, OW, cout_pad)

    # ---- Layers 2-4: Conv(s2, p1) + InstanceNorm + LeakyReLU ---------------
    w2, b2 = params[1]
    w2p = jnp.pad(w2, ((0, 0), (0, 0), (0, cout_pad - 64), (0, 0)))  # Cin 64->128
    for (w, b) in [(w2p, b2), params[2], params[3]]:
        kh, kw_, cin, cout = w.shape
        patches, (N, OH, OW) = im2col(y, kh, 2, 1)
        out = conv_matmul(patches, w.reshape(kh * kw_ * cin, cout), b,
                          apply_act=False, out_dtype=jnp.bfloat16)
        out = instance_norm_lrelu(out.reshape(N, OH * OW, cout))
        y = out.reshape(N, OH, OW, cout)

    # ---- Fused Conv(512->1, 4x4, s1, p1) + avg_pool(full) + flatten(1) -----
    w5, b5 = params[4]
    return final_conv_avgpool(y, w5, b5)


# ----------------------------------------------------------------------------
# Pure-JAX f32 reference (for correctness check only)
# ----------------------------------------------------------------------------
def reference_forward(x_nchw, params):
    y = jnp.transpose(x_nchw, (0, 2, 3, 1)).astype(jnp.float32)
    strides = [2, 2, 2, 2, 1]
    for i, (w, b) in enumerate(params):
        y = lax.conv_general_dilated(
            y, w, (strides[i], strides[i]), [(1, 1), (1, 1)],
            dimension_numbers=("NHWC", "HWIO", "NHWC")) + b
        if i == 0:
            y = jnp.where(y >= 0, y, NEG_SLOPE * y)
        elif i in (1, 2, 3):
            m = jnp.mean(y, axis=(1, 2), keepdims=True)
            v = jnp.mean(jnp.square(y - m), axis=(1, 2), keepdims=True)
            y = (y - m) / jnp.sqrt(v + EPS)
            y = jnp.where(y >= 0, y, NEG_SLOPE * y)
    return jnp.mean(y, axis=(1, 2))   # (N, 1)


# ----------------------------------------------------------------------------
if __name__ == "__main__":
    key = jax.random.PRNGKey(0)
    key, kx = jax.random.split(key)
    # Small shape consistent with the module: 5 convs need >=32 spatial input.
    x = jax.random.normal(kx, (2, 3, 32, 32), jnp.float32)   # NCHW like PyTorch
    params = init_params(key)

    fwd = jax.jit(discriminator_forward)
    out = jax.block_until_ready(fwd(x, params))

    ref = reference_forward(x, params)
    assert out.shape == (2, 1), out.shape
    # bf16 activations + bf16 MXU operands (f32 accumulation/stats) vs f32 ref.
    assert jnp.allclose(out, ref, rtol=6e-2, atol=6e-2), (out, ref)

    print("KERNEL_OK")
</pallas_src>

<mosaic_0001>
module attributes {stable_mosaic.version = 11 : i64} {
  func.func @_conv_mm_kernel(%arg0: i32, %arg1: i32, %arg2: i32, %arg3: memref<256x128xbf16, #tpu.memory_space<vmem>>, %arg4: memref<128x128xbf16, #tpu.memory_space<vmem>>, %arg5: memref<1x128xf32, #tpu.memory_space<vmem>>, %arg6: memref<256x128xbf16, #tpu.memory_space<vmem>>, %arg7: memref<256x128xf32, #tpu.memory_space<vmem>>) attributes {dimension_semantics = [#tpu.dimension_semantics<parallel>, #tpu.dimension_semantics<parallel>, #tpu.dimension_semantics<arbitrary>], iteration_bounds = array<i64: 2, 1, 1>, scalar_prefetch = 0 : i64, scratch_operands = 1 : i64, tpu.core_type = #tpu.core_type<tc>, window_params = [{transform_indices = @transform_0, window_bounds = array<i64: 256, 128>}, {transform_indices = @transform_1, window_bounds = array<i64: 128, 128>}, {transform_indices = @transform_2, window_bounds = array<i64: 1, 128>}, {transform_indices = @transform_3, window_bounds = array<i64: 256, 128>}]} {
    %c0_i32 = arith.constant 0 : i32
    %0 = arith.cmpi eq, %arg2, %c0_i32 : i32
    %1 = arith.extui %0 : i1 to i32
    %c0_i32_0 = arith.constant 0 : i32
    %2 = arith.cmpi ne, %1, %c0_i32_0 : i32
    scf.if %2 {
      %cst_10 = arith.constant 0.000000e+00 : f32
      %12 = vector.broadcast %cst_10 : f32 to vector<256x128xf32>
      %c0_11 = arith.constant 0 : index
      %c0_12 = arith.constant 0 : index
      %13 = vector.load %arg7[%c0_11, %c0_12] : memref<256x128xf32, #tpu.memory_space<vmem>>, vector<256x128xf32>
      tpu.vector_store %arg7[%c0_11, %c0_12], %12 {strides = array<i32>} : memref<256x128xf32, #tpu.memory_space<vmem>>, vector<256x128xf32>,
    } else {
    }
    %c0 = arith.constant 0 : index
    %c0_1 = arith.constant 0 : index
    %3 = vector.load %arg7[%c0, %c0_1] : memref<256x128xf32, #tpu.memory_space<vmem>>, vector<256x128xf32>
    %c0_2 = arith.constant 0 : index
    %c0_3 = arith.constant 0 : index
    %4 = vector.load %arg3[%c0_2, %c0_3] : memref<256x128xbf16, #tpu.memory_space<vmem>>, vector<256x128xbf16>
    %c0_4 = arith.constant 0 : index
    %c0_5 = arith.constant 0 : index
    %5 = vector.load %arg4[%c0_4, %c0_5] : memref<128x128xbf16, #tpu.memory_space<vmem>>, vector<128x128xbf16>
    %cst = arith.constant dense<0.000000e+00> : vector<256x128xf32>
    %6 = tpu.matmul %4, %5, %cst {dimension_numbers = #tpu.dot_dimension_numbers<[1], [0], [0], [1], [0, 0, 1, 1], [], []>} : vector<256x128xbf16>, vector<128x128xbf16>, vector<256x128xf32> -> vector<256x128xf32>
    %7 = arith.addf %3, %6 : vector<256x128xf32>
    %c0_6 = arith.constant 0 : index
    %c0_7 = arith.constant 0 : index
    %8 = vector.load %arg7[%c0_6, %c0_7] : memref<256x128xf32, #tpu.memory_space<vmem>>, vector<256x128xf32>
    tpu.vector_store %arg7[%c0_6, %c0_7], %7 {strides = array<i32>} : memref<256x128xf32, #tpu.memory_space<vmem>>, vector<256x128xf32>,
    %c0_i32_8 = arith.constant 0 : i32
    %9 = arith.cmpi eq, %arg2, %c0_i32_8 : i32
    %10 = arith.extui %9 : i1 to i32
    %c0_i32_9 = arith.constant 0 : i32
    %11 = arith.cmpi ne, %10, %c0_i32_9 : i32
    scf.if %11 {
      %c0_10 = arith.constant 0 : index
      %c0_11 = arith.constant 0 : index
      %12 = vector.load %arg7[%c0_10, %c0_11] : memref<256x128xf32, #tpu.memory_space<vmem>>, vector<256x128xf32>
      %c0_12 = arith.constant 0 : index
      %c0_13 = arith.constant 0 : index
      %13 = vector.load %arg5[%c0_12, %c0_13] : memref<1x128xf32, #tpu.memory_space<vmem>>, vector<1x128xf32>
      %14 = vector.broadcast %13 : vector<1x128xf32> to vector<256x128xf32>
      %15 = arith.addf %12, %14 : vector<256x128xf32>
      %cst_14 = arith.constant 0.000000e+00 : f32
      %16 = vector.broadcast %cst_14 : f32 to vector<256x128xf32>
      %17 = arith.cmpf oge, %15, %16 : vector<256x128xf32>
      %cst_15 = arith.constant 2.000000e-01 : f32
      %18 = vector.broadcast %cst_15 : f32 to vector<256x128xf32>
      %19 = arith.mulf %18, %15 : vector<256x128xf32>
      %20 = arith.select %17, %15, %19 : vector<256x128xi1>, vector<256x128xf32>
      %21 = arith.truncf %20 : vector<256x128xf32> to vector<256x128xbf16>
      %c0_16 = arith.constant 0 : index
      %c0_17 = arith.constant 0 : index
      %22 = vector.load %arg6[%c0_16, %c0_17] : memref<256x128xbf16, #tpu.memory_space<vmem>>, vector<256x128xbf16>
      tpu.vector_store %arg6[%c0_16, %c0_17], %21 {strides = array<i32>} : memref<256x128xbf16, #tpu.memory_space<vmem>>, vector<256x128xbf16>,
    } else {
    }
    return
  }
  func.func @transform_0(%arg0: i32, %arg1: i32, %arg2: i32) -> (i32, i32) {
    %c0_i32 = arith.constant 0 : i32
    return %arg0, %arg2 : i32, i32
  }
  func.func @transform_1(%arg0: i32, %arg1: i32, %arg2: i32) -> (i32, i32) {
    %c0_i32 = arith.constant 0 : i32
    return %arg2, %arg1 : i32, i32
  }
  func.func @transform_2(%arg0: i32, %arg1: i32, %arg2: i32) -> (i32, i32) {
    %c0_i32 = arith.constant 0 : i32
    %c0_i32_0 = arith.constant 0 : i32
    return %c0_i32, %arg1 : i32, i32
  }
  func.func @transform_3(%arg0: i32, %arg1: i32, %arg2: i32) -> (i32, i32) {
    %c0_i32 = arith.constant 0 : i32
    return %arg0, %arg1 : i32, i32
  }
}

module attributes {stable_mosaic.version = 11 : i64} {
  func.func @_conv_mm_kernel(%arg0: i32, %arg1: i32, %arg2: i32, %arg3: memref<64x2048xbf16, #tpu.memory_space<vmem>>, %arg4: memref<2048x128xbf16, #tpu.memory_space<vmem>>, %arg5: memref<1x128xf32, #tpu.memory_space<vmem>>, %arg6: memref<64x128xbf16, #tpu.memory_space<vmem>>, %arg7: memref<64x128xf32, #tpu.memory_space<vmem>>) attributes {dimension_semantics = [#tpu.dimension_semantics<parallel>, #tpu.dimension_semantics<parallel>, #tpu.dimension_semantics<arbitrary>], iteration_bounds = array<i64: 2, 1, 1>, scalar_prefetch = 0 : i64, scratch_operands = 1 : i64, tpu.core_type = #tpu.core_type<tc>, window_params = [{transform_indices = @transform_0, window_bounds = array<i64: 64, 2048>}, {transform_indices = @transform_1, window_bounds = array<i64: 2048, 128>}, {transform_indices = @transform_2, window_bounds = array<i64: 1, 128>}, {transform_indices = @transform_3, window_bounds = array<i64: 64, 128>}]} {
    %c0_i32 = arith.constant 0 : i32
    %0 = arith.cmpi eq, %arg2, %c0_i32 : i32
    %1 = arith.extui %0 : i1 to i32
    %c0_i32_0 = arith.constant 0 : i32
    %2 = arith.cmpi ne, %1, %c0_i32_0 : i32
    scf.if %2 {
      %cst_10 = arith.constant 0.000000e+00 : f32
      %12 = vector.broadcast %cst_10 : f32 to vector<64x128xf32>
      %c0_11 = arith.constant 0 : index
      %c0_12 = arith.constant 0 : index
      %13 = vector.load %arg7[%c0_11, %c0_12] : memref<64x128xf32, #tpu.memory_space<vmem>>, vector<64x128xf32>
      tpu.vector_store %arg7[%c0_11, %c0_12], %12 {strides = array<i32>} : memref<64x128xf32, #tpu.memory_space<vmem>>, vector<64x128xf32>,
    } else {
    }
    %c0 = arith.constant 0 : index
    %c0_1 = arith.constant 0 : index
    %3 = vector.load %arg7[%c0, %c0_1] : memref<64x128xf32, #tpu.memory_space<vmem>>, vector<64x128xf32>
    %c0_2 = arith.constant 0 : index
    %c0_3 = arith.constant 0 : index
    %4 = vector.load %arg3[%c0_2, %c0_3] : memref<64x2048xbf16, #tpu.memory_space<vmem>>, vector<64x2048xbf16>
    %c0_4 = arith.constant 0 : index
    %c0_5 = arith.constant 0 : index
    %5 = vector.load %arg4[%c0_4, %c0_5] : memref<2048x128xbf16, #tpu.memory_space<vmem>>, vector<2048x128xbf16>
    %cst = arith.constant dense<0.000000e+00> : vector<64x128xf32>
    %6 = tpu.matmul %4, %5, %cst {dimension_numbers = #tpu.dot_dimension_numbers<[1], [0], [0], [1], [0, 0, 1, 1], [], []>} : vector<64x2048xbf16>, vector<2048x128xbf16>, vector<64x128xf32> -> vector<64x128xf32>
    %7 = arith.addf %3, %6 : vector<64x128xf32>
    %c0_6 = arith.constant 0 : index
    %c0_7 = arith.constant 0 : index
    %8 = vector.load %arg7[%c0_6, %c0_7] : memref<64x128xf32, #tpu.memory_space<vmem>>, vector<64x128xf32>
    tpu.vector_store %arg7[%c0_6, %c0_7], %7 {strides = array<i32>} : memref<64x128xf32, #tpu.memory_space<vmem>>, vector<64x128xf32>,
    %c0_i32_8 = arith.constant 0 : i32
    %9 = arith.cmpi eq, %arg2, %c0_i32_8 : i32
    %10 = arith.extui %9 : i1 to i32
    %c0_i32_9 = arith.constant 0 : i32
    %11 = arith.cmpi ne, %10, %c0_i32_9 : i32
    scf.if %11 {
      %c0_10 = arith.constant 0 : index
      %c0_11 = arith.constant 0 : index
      %12 = vector.load %arg7[%c0_10, %c0_11] : memref<64x128xf32, #tpu.memory_space<vmem>>, vector<64x128xf32>
      %c0_12 = arith.constant 0 : index
      %c0_13 = arith.constant 0 : index
      %13 = vector.load %arg5[%c0_12, %c0_13] : memref<1x128xf32, #tpu.memory_space<vmem>>, vector<1x128xf32>
      %14 = vector.broadcast %13 : vector<1x128xf32> to vector<64x128xf32>
      %15 = arith.addf %12, %14 : vector<64x128xf32>
      %16 = arith.truncf %15 : vector<64x128xf32> to vector<64x128xbf16>
      %c0_14 = arith.constant 0 : index
      %c0_15 = arith.constant 0 : index
      %17 = vector.load %arg6[%c0_14, %c0_15] : memref<64x128xbf16, #tpu.memory_space<vmem>>, vector<64x128xbf16>
      tpu.vector_store %arg6[%c0_14, %c0_15], %16 {strides = array<i32>} : memref<64x128xbf16, #tpu.memory_space<vmem>>, vector<64x128xbf16>,
    } else {
    }
    return
  }
  func.func @transform_0(%arg0: i32, %arg1: i32, %arg2: i32) -> (i32, i32) {
    %c0_i32 = arith.constant 0 : i32
    return %arg0, %arg2 : i32, i32
  }
  func.func @transform_1(%arg0: i32, %arg1: i32, %arg2: i32) -> (i32, i32) {
    %c0_i32 = arith.constant 0 : i32
    return %arg2, %arg1 : i32, i32
  }
  func.func @transform_2(%arg0: i32, %arg1: i32, %arg2: i32) -> (i32, i32) {
    %c0_i32 = arith.constant 0 : i32
    %c0_i32_0 = arith.constant 0 : i32
    return %c0_i32, %arg1 : i32, i32
  }
  func.func @transform_3(%arg0: i32, %arg1: i32, %arg2: i32) -> (i32, i32) {
    %c0_i32 = arith.constant 0 : i32
    return %arg0, %arg1 : i32, i32
  }
}

module attributes {stable_mosaic.version = 11 : i64} {
  func.func @_inorm_lrelu_kernel(%arg0: i32, %arg1: i32, %arg2: memref<1x64x128xbf16, #tpu.memory_space<vmem>>, %arg3: memref<1x64x128xbf16, #tpu.memory_space<vmem>>) attributes {dimension_semantics = [#tpu.dimension_semantics<parallel>, #tpu.dimension_semantics<parallel>], iteration_bounds = array<i64: 2, 1>, scalar_prefetch = 0 : i64, scratch_operands = 0 : i64, tpu.core_type = #tpu.core_type<tc>, window_params = [{transform_indices = @transform_0, window_bounds = array<i64: 1, 64, 128>}, {transform_indices = @transform_1, window_bounds = array<i64: 1, 64, 128>}]} {
    %c0 = arith.constant 0 : index
    %c0_0 = arith.constant 0 : index
    %c0_1 = arith.constant 0 : index
    %0 = vector.load %arg2[%c0, %c0_0, %c0_1] : memref<1x64x128xbf16, #tpu.memory_space<vmem>>, vector<1x64x128xbf16>
    %1 = arith.extf %0 : vector<1x64x128xbf16> to vector<1x64x128xf32>
    %cst = arith.constant dense<0.000000e+00> : vector<1x128xf32>
    %2 = vector.multi_reduction <add>, %1, %cst [1] : vector<1x64x128xf32> to vector<1x128xf32>
    %3 = vector.shape_cast %2 : vector<1x128xf32> to vector<1x1x128xf32>
    %cst_2 = arith.constant 6.400000e+01 : f32
    %4 = vector.broadcast %cst_2 : f32 to vector<1x1x128xf32>
    %5 = arith.divf %3, %4 : vector<1x1x128xf32>
    %6 = vector.broadcast %5 : vector<1x1x128xf32> to vector<1x64x128xf32>
    %7 = arith.subf %1, %6 : vector<1x64x128xf32>
    %8 = arith.mulf %7, %7 : vector<1x64x128xf32>
    %cst_3 = arith.constant dense<0.000000e+00> : vector<1x128xf32>
    %9 = vector.multi_reduction <add>, %8, %cst_3 [1] : vector<1x64x128xf32> to vector<1x128xf32>
    %10 = vector.shape_cast %9 : vector<1x128xf32> to vector<1x1x128xf32>
    %cst_4 = arith.constant 6.400000e+01 : f32
    %11 = vector.broadcast %cst_4 : f32 to vector<1x1x128xf32>
    %12 = arith.divf %10, %11 : vector<1x1x128xf32>
    %13 = vector.broadcast %5 : vector<1x1x128xf32> to vector<1x64x128xf32>
    %14 = arith.subf %1, %13 : vector<1x64x128xf32>
    %cst_5 = arith.constant 9.99999974E-6 : f32
    %15 = vector.broadcast %cst_5 : f32 to vector<1x1x128xf32>
    %16 = arith.addf %12, %15 : vector<1x1x128xf32>
    %17 = math.rsqrt %16 : vector<1x1x128xf32>
    %18 = vector.broadcast %17 : vector<1x1x128xf32> to vector<1x64x128xf32>
    %19 = arith.mulf %14, %18 : vector<1x64x128xf32>
    %cst_6 = arith.constant 0.000000e+00 : f32
    %20 = vector.broadcast %cst_6 : f32 to vector<1x64x128xf32>
    %21 = arith.cmpf oge, %19, %20 : vector<1x64x128xf32>
    %cst_7 = arith.constant 2.000000e-01 : f32
    %22 = vector.broadcast %cst_7 : f32 to vector<1x64x128xf32>
    %23 = arith.mulf %22, %19 : vector<1x64x128xf32>
    %24 = arith.select %21, %19, %23 : vector<1x64x128xi1>, vector<1x64x128xf32>
    %25 = arith.truncf %24 : vector<1x64x128xf32> to vector<1x64x128xbf16>
    %c0_8 = arith.constant 0 : index
    %c0_9 = arith.constant 0 : index
    %c0_10 = arith.constant 0 : index
    %26 = vector.load %arg3[%c0_8, %c0_9, %c0_10] : memref<1x64x128xbf16, #tpu.memory_space<vmem>>, vector<1x64x128xbf16>
    tpu.vector_store %arg3[%c0_8, %c0_9, %c0_10], %25 {strides = array<i32>} : memref<1x64x128xbf16, #tpu.memory_space<vmem>>, vector<1x64x128xbf16>,
    return
  }
  func.func @transform_0(%arg0: i32, %arg1: i32) -> (i32, i32, i32) {
    %c0_i32 = arith.constant 0 : i32
    %c0_i32_0 = arith.constant 0 : i32
    return %arg0, %c0_i32, %arg1 : i32, i32, i32
  }
  func.func @transform_1(%arg0: i32, %arg1: i32) -> (i32, i32, i32) {
    %c0_i32 = arith.constant 0 : i32
    %c0_i32_0 = arith.constant 0 : i32
    return %arg0, %c0_i32, %arg1 : i32, i32, i32
  }
}

module attributes {stable_mosaic.version = 11 : i64} {
  func.func @_conv_mm_kernel(%arg0: i32, %arg1: i32, %arg2: i32, %arg3: memref<32x2048xbf16, #tpu.memory_space<vmem>>, %arg4: memref<2048x128xbf16, #tpu.memory_space<vmem>>, %arg5: memref<1x128xf32, #tpu.memory_space<vmem>>, %arg6: memref<32x128xbf16, #tpu.memory_space<vmem>>, %arg7: memref<32x128xf32, #tpu.memory_space<vmem>>) attributes {dimension_semantics = [#tpu.dimension_semantics<parallel>, #tpu.dimension_semantics<parallel>, #tpu.dimension_semantics<arbitrary>], iteration_bounds = array<i64: 1, 2, 1>, scalar_prefetch = 0 : i64, scratch_operands = 1 : i64, tpu.core_type = #tpu.core_type<tc>, window_params = [{transform_indices = @transform_0, window_bounds = array<i64: 32, 2048>}, {transform_indices = @transform_1, window_bounds = array<i64: 2048, 128>}, {transform_indices = @transform_2, window_bounds = array<i64: 1, 128>}, {transform_indices = @transform_3, window_bounds = array<i64: 32, 128>}]} {
    %c0_i32 = arith.constant 0 : i32
    %0 = arith.cmpi eq, %arg2, %c0_i32 : i32
    %1 = arith.extui %0 : i1 to i32
    %c0_i32_0 = arith.constant 0 : i32
    %2 = arith.cmpi ne, %1, %c0_i32_0 : i32
    scf.if %2 {
      %cst_10 = arith.constant 0.000000e+00 : f32
      %12 = vector.broadcast %cst_10 : f32 to vector<32x128xf32>
      %c0_11 = arith.constant 0 : index
      %c0_12 = arith.constant 0 : index
      %13 = vector.load %arg7[%c0_11, %c0_12] : memref<32x128xf32, #tpu.memory_space<vmem>>, vector<32x128xf32>
      tpu.vector_store %arg7[%c0_11, %c0_12], %12 {strides = array<i32>} : memref<32x128xf32, #tpu.memory_space<vmem>>, vector<32x128xf32>,
    } else {
    }
    %c0 = arith.constant 0 : index
    %c0_1 = arith.constant 0 : index
    %3 = vector.load %arg7[%c0, %c0_1] : memref<32x128xf32, #tpu.memory_space<vmem>>, vector<32x128xf32>
    %c0_2 = arith.constant 0 : index
    %c0_3 = arith.constant 0 : index
    %4 = vector.load %arg3[%c0_2, %c0_3] : memref<32x2048xbf16, #tpu.memory_space<vmem>>, vector<32x2048xbf16>
    %c0_4 = arith.constant 0 : index
    %c0_5 = arith.constant 0 : index
    %5 = vector.load %arg4[%c0_4, %c0_5] : memref<2048x128xbf16, #tpu.memory_space<vmem>>, vector<2048x128xbf16>
    %cst = arith.constant dense<0.000000e+00> : vector<32x128xf32>
    %6 = tpu.matmul %4, %5, %cst {dimension_numbers = #tpu.dot_dimension_numbers<[1], [0], [0], [1], [0, 0, 1, 1], [], []>} : vector<32x2048xbf16>, vector<2048x128xbf16>, vector<32x128xf32> -> vector<32x128xf32>
    %7 = arith.addf %3, %6 : vector<32x128xf32>
    %c0_6 = arith.constant 0 : index
    %c0_7 = arith.constant 0 : index
    %8 = vector.load %arg7[%c0_6, %c0_7] : memref<32x128xf32, #tpu.memory_space<vmem>>, vector<32x128xf32>
    tpu.vector_store %arg7[%c0_6, %c0_7], %7 {strides = array<i32>} : memref<32x128xf32, #tpu.memory_space<vmem>>, vector<32x128xf32>,
    %c0_i32_8 = arith.constant 0 : i32
    %9 = arith.cmpi eq, %arg2, %c0_i32_8 : i32
    %10 = arith.extui %9 : i1 to i32
    %c0_i32_9 = arith.constant 0 : i32
    %11 = arith.cmpi ne, %10, %c0_i32_9 : i32
    scf.if %11 {
      %c0_10 = arith.constant 0 : index
      %c0_11 = arith.constant 0 : index
      %12 = vector.load %arg7[%c0_10, %c0_11] : memref<32x128xf32, #tpu.memory_space<vmem>>, vector<32x128xf32>
      %c0_12 = arith.constant 0 : index
      %c0_13 = arith.constant 0 : index
      %13 = vector.load %arg5[%c0_12, %c0_13] : memref<1x128xf32, #tpu.memory_space<vmem>>, vector<1x128xf32>
      %14 = vector.broadcast %13 : vector<1x128xf32> to vector<32x128xf32>
      %15 = arith.addf %12, %14 : vector<32x128xf32>
      %16 = arith.truncf %15 : vector<32x128xf32> to vector<32x128xbf16>
      %c0_14 = arith.constant 0 : index
      %c0_15 = arith.constant 0 : index
      %17 = vector.load %arg6[%c0_14, %c0_15] : memref<32x128xbf16, #tpu.memory_space<vmem>>, vector<32x128xbf16>
      tpu.vector_store %arg6[%c0_14, %c0_15], %16 {strides = array<i32>} : memref<32x128xbf16, #tpu.memory_space<vmem>>, vector<32x128xbf16>,
    } else {
    }
    return
  }
  func.func @transform_0(%arg0: i32, %arg1: i32, %arg2: i32) -> (i32, i32) {
    %c0_i32 = arith.constant 0 : i32
    return %arg0, %arg2 : i32, i32
  }
  func.func @transform_1(%arg0: i32, %arg1: i32, %arg2: i32) -> (i32, i32) {
    %c0_i32 = arith.constant 0 : i32
    return %arg2, %arg1 : i32, i32
  }
  func.func @transform_2(%arg0: i32, %arg1: i32, %arg2: i32) -> (i32, i32) {
    %c0_i32 = arith.constant 0 : i32
    %c0_i32_0 = arith.constant 0 : i32
    return %c0_i32, %arg1 : i32, i32
  }
  func.func @transform_3(%arg0: i32, %arg1: i32, %arg2: i32) -> (i32, i32) {
    %c0_i32 = arith.constant 0 : i32
    return %arg0, %arg1 : i32, i32
  }
}

module attributes {stable_mosaic.version = 11 : i64} {
  func.func @_inorm_lrelu_kernel(%arg0: i32, %arg1: i32, %arg2: memref<1x16x256xbf16, #tpu.memory_space<vmem>>, %arg3: memref<1x16x256xbf16, #tpu.memory_space<vmem>>) attributes {dimension_semantics = [#tpu.dimension_semantics<parallel>, #tpu.dimension_semantics<parallel>], iteration_bounds = array<i64: 2, 1>, scalar_prefetch = 0 : i64, scratch_operands = 0 : i64, tpu.core_type = #tpu.core_type<tc>, window_params = [{transform_indices = @transform_0, window_bounds = array<i64: 1, 16, 256>}, {transform_indices = @transform_1, window_bounds = array<i64: 1, 16, 256>}]} {
    %c0 = arith.constant 0 : index
    %c0_0 = arith.constant 0 : index
    %c0_1 = arith.constant 0 : index
    %0 = vector.load %arg2[%c0, %c0_0, %c0_1] : memref<1x16x256xbf16, #tpu.memory_space<vmem>>, vector<1x16x256xbf16>
    %1 = arith.extf %0 : vector<1x16x256xbf16> to vector<1x16x256xf32>
    %cst = arith.constant dense<0.000000e+00> : vector<1x256xf32>
    %2 = vector.multi_reduction <add>, %1, %cst [1] : vector<1x16x256xf32> to vector<1x256xf32>
    %3 = vector.shape_cast %2 : vector<1x256xf32> to vector<1x1x256xf32>
    %cst_2 = arith.constant 1.600000e+01 : f32
    %4 = vector.broadcast %cst_2 : f32 to vector<1x1x256xf32>
    %5 = arith.divf %3, %4 : vector<1x1x256xf32>
    %6 = vector.broadcast %5 : vector<1x1x256xf32> to vector<1x16x256xf32>
    %7 = arith.subf %1, %6 : vector<1x16x256xf32>
    %8 = arith.mulf %7, %7 : vector<1x16x256xf32>
    %cst_3 = arith.constant dense<0.000000e+00> : vector<1x256xf32>
    %9 = vector.multi_reduction <add>, %8, %cst_3 [1] : vector<1x16x256xf32> to vector<1x256xf32>
    %10 = vector.shape_cast %9 : vector<1x256xf32> to vector<1x1x256xf32>
    %cst_4 = arith.constant 1.600000e+01 : f32
    %11 = vector.broadcast %cst_4 : f32 to vector<1x1x256xf32>
    %12 = arith.divf %10, %11 : vector<1x1x256xf32>
    %13 = vector.broadcast %5 : vector<1x1x256xf32> to vector<1x16x256xf32>
    %14 = arith.subf %1, %13 : vector<1x16x256xf32>
    %cst_5 = arith.constant 9.99999974E-6 : f32
    %15 = vector.broadcast %cst_5 : f32 to vector<1x1x256xf32>
    %16 = arith.addf %12, %15 : vector<1x1x256xf32>
    %17 = math.rsqrt %16 : vector<1x1x256xf32>
    %18 = vector.broadcast %17 : vector<1x1x256xf32> to vector<1x16x256xf32>
    %19 = arith.mulf %14, %18 : vector<1x16x256xf32>
    %cst_6 = arith.constant 0.000000e+00 : f32
    %20 = vector.broadcast %cst_6 : f32 to vector<1x16x256xf32>
    %21 = arith.cmpf oge, %19, %20 : vector<1x16x256xf32>
    %cst_7 = arith.constant 2.000000e-01 : f32
    %22 = vector.broadcast %cst_7 : f32 to vector<1x16x256xf32>
    %23 = arith.mulf %22, %19 : vector<1x16x256xf32>
    %24 = arith.select %21, %19, %23 : vector<1x16x256xi1>, vector<1x16x256xf32>
    %25 = arith.truncf %24 : vector<1x16x256xf32> to vector<1x16x256xbf16>
    %c0_8 = arith.constant 0 : index
    %c0_9 = arith.constant 0 : index
    %c0_10 = arith.constant 0 : index
    %26 = vector.load %arg3[%c0_8, %c0_9, %c0_10] : memref<1x16x256xbf16, #tpu.memory_space<vmem>>, vector<1x16x256xbf16>
    tpu.vector_store %arg3[%c0_8, %c0_9, %c0_10], %25 {strides = array<i32>} : memref<1x16x256xbf16, #tpu.memory_space<vmem>>, vector<1x16x256xbf16>,
    return
  }
  func.func @transform_0(%arg0: i32, %arg1: i32) -> (i32, i32, i32) {
    %c0_i32 = arith.constant 0 : i32
    %c0_i32_0 = arith.constant 0 : i32
    return %arg0, %c0_i32, %arg1 : i32, i32, i32
  }
  func.func @transform_1(%arg0: i32, %arg1: i32) -> (i32, i32, i32) {
    %c0_i32 = arith.constant 0 : i32
    %c0_i32_0 = arith.constant 0 : i32
    return %arg0, %c0_i32, %arg1 : i32, i32, i32
  }
}

module attributes {stable_mosaic.version = 11 : i64} {
  func.func @_conv_mm_kernel(%arg0: i32, %arg1: i32, %arg2: i32, %arg3: memref<8x2048xbf16, #tpu.memory_space<vmem>>, %arg4: memref<2048x256xbf16, #tpu.memory_space<vmem>>, %arg5: memref<1x256xf32, #tpu.memory_space<vmem>>, %arg6: memref<8x256xbf16, #tpu.memory_space<vmem>>, %arg7: memref<8x256xf32, #tpu.memory_space<vmem>>) attributes {dimension_semantics = [#tpu.dimension_semantics<parallel>, #tpu.dimension_semantics<parallel>, #tpu.dimension_semantics<arbitrary>], iteration_bounds = array<i64: 1, 2, 2>, scalar_prefetch = 0 : i64, scratch_operands = 1 : i64, tpu.core_type = #tpu.core_type<tc>, window_params = [{transform_indices = @transform_0, window_bounds = array<i64: 8, 2048>}, {transform_indices = @transform_1, window_bounds = array<i64: 2048, 256>}, {transform_indices = @transform_2, window_bounds = array<i64: 1, 256>}, {transform_indices = @transform_3, window_bounds = array<i64: 8, 256>}]} {
    %c0_i32 = arith.constant 0 : i32
    %0 = arith.cmpi eq, %arg2, %c0_i32 : i32
    %1 = arith.extui %0 : i1 to i32
    %c0_i32_0 = arith.constant 0 : i32
    %2 = arith.cmpi ne, %1, %c0_i32_0 : i32
    scf.if %2 {
      %cst_9 = arith.constant 0.000000e+00 : f32
      %12 = vector.broadcast %cst_9 : f32 to vector<8x256xf32>
      %c0_10 = arith.constant 0 : index
      %c0_11 = arith.constant 0 : index
      %13 = vector.load %arg7[%c0_10, %c0_11] : memref<8x256xf32, #tpu.memory_space<vmem>>, vector<8x256xf32>
      tpu.vector_store %arg7[%c0_10, %c0_11], %12 {strides = array<i32>} : memref<8x256xf32, #tpu.memory_space<vmem>>, vector<8x256xf32>,
    } else {
    }
    %c0 = arith.constant 0 : index
    %c0_1 = arith.constant 0 : index
    %3 = vector.load %arg7[%c0, %c0_1] : memref<8x256xf32, #tpu.memory_space<vmem>>, vector<8x256xf32>
    %c0_2 = arith.constant 0 : index
    %c0_3 = arith.constant 0 : index
    %4 = vector.load %arg3[%c0_2, %c0_3] : memref<8x2048xbf16, #tpu.memory_space<vmem>>, vector<8x2048xbf16>
    %c0_4 = arith.constant 0 : index
    %c0_5 = arith.constant 0 : index
    %5 = vector.load %arg4[%c0_4, %c0_5] : memref<2048x256xbf16, #tpu.memory_space<vmem>>, vector<2048x256xbf16>
    %cst = arith.constant dense<0.000000e+00> : vector<8x256xf32>
    %6 = tpu.matmul %4, %5, %cst {dimension_numbers = #tpu.dot_dimension_numbers<[1], [0], [0], [1], [0, 0, 1, 1], [], []>} : vector<8x2048xbf16>, vector<2048x256xbf16>, vector<8x256xf32> -> vector<8x256xf32>
    %7 = arith.addf %3, %6 : vector<8x256xf32>
    %c0_6 = arith.constant 0 : index
    %c0_7 = arith.constant 0 : index
    %8 = vector.load %arg7[%c0_6, %c0_7] : memref<8x256xf32, #tpu.memory_space<vmem>>, vector<8x256xf32>
    tpu.vector_store %arg7[%c0_6, %c0_7], %7 {strides = array<i32>} : memref<8x256xf32, #tpu.memory_space<vmem>>, vector<8x256xf32>,
    %c1_i32 = arith.constant 1 : i32
    %9 = arith.cmpi eq, %arg2, %c1_i32 : i32
    %10 = arith.extui %9 : i1 to i32
    %c0_i32_8 = arith.constant 0 : i32
    %11 = arith.cmpi ne, %10, %c0_i32_8 : i32
    scf.if %11 {
      %c0_9 = arith.constant 0 : index
      %c0_10 = arith.constant 0 : index
      %12 = vector.load %arg7[%c0_9, %c0_10] : memref<8x256xf32, #tpu.memory_space<vmem>>, vector<8x256xf32>
      %c0_11 = arith.constant 0 : index
      %c0_12 = arith.constant 0 : index
      %13 = vector.load %arg5[%c0_11, %c0_12] : memref<1x256xf32, #tpu.memory_space<vmem>>, vector<1x256xf32>
      %14 = vector.broadcast %13 : vector<1x256xf32> to vector<8x256xf32>
      %15 = arith.addf %12, %14 : vector<8x256xf32>
      %16 = arith.truncf %15 : vector<8x256xf32> to vector<8x256xbf16>
      %c0_13 = arith.constant 0 : index
      %c0_14 = arith.constant 0 : index
      %17 = vector.load %arg6[%c0_13, %c0_14] : memref<8x256xbf16, #tpu.memory_space<vmem>>, vector<8x256xbf16>
      tpu.vector_store %arg6[%c0_13, %c0_14], %16 {strides = array<i32>} : memref<8x256xbf16, #tpu.memory_space<vmem>>, vector<8x256xbf16>,
    } else {
    }
    return
  }
  func.func @transform_0(%arg0: i32, %arg1: i32, %arg2: i32) -> (i32, i32) {
    %c0_i32 = arith.constant 0 : i32
    return %arg0, %arg2 : i32, i32
  }
  func.func @transform_1(%arg0: i32, %arg1: i32, %arg2: i32) -> (i32, i32) {
    %c0_i32 = arith.constant 0 : i32
    return %arg2, %arg1 : i32, i32
  }
  func.func @transform_2(%arg0: i32, %arg1: i32, %arg2: i32) -> (i32, i32) {
    %c0_i32 = arith.constant 0 : i32
    %c0_i32_0 = arith.constant 0 : i32
    return %c0_i32, %arg1 : i32, i32
  }
  func.func @transform_3(%arg0: i32, %arg1: i32, %arg2: i32) -> (i32, i32) {
    %c0_i32 = arith.constant 0 : i32
    return %arg0, %arg1 : i32, i32
  }
}

module attributes {stable_mosaic.version = 11 : i64} {
  func.func @_inorm_lrelu_kernel(%arg0: i32, %arg1: i32, %arg2: memref<1x4x512xbf16, #tpu.memory_space<vmem>>, %arg3: memref<1x4x512xbf16, #tpu.memory_space<vmem>>) attributes {dimension_semantics = [#tpu.dimension_semantics<parallel>, #tpu.dimension_semantics<parallel>], iteration_bounds = array<i64: 2, 1>, scalar_prefetch = 0 : i64, scratch_operands = 0 : i64, tpu.core_type = #tpu.core_type<tc>, window_params = [{transform_indices = @transform_0, window_bounds = array<i64: 1, 4, 512>}, {transform_indices = @transform_1, window_bounds = array<i64: 1, 4, 512>}]} {
    %c0 = arith.constant 0 : index
    %c0_0 = arith.constant 0 : index
    %c0_1 = arith.constant 0 : index
    %0 = vector.load %arg2[%c0, %c0_0, %c0_1] : memref<1x4x512xbf16, #tpu.memory_space<vmem>>, vector<1x4x512xbf16>
    %1 = arith.extf %0 : vector<1x4x512xbf16> to vector<1x4x512xf32>
    %cst = arith.constant dense<0.000000e+00> : vector<1x512xf32>
    %2 = vector.multi_reduction <add>, %1, %cst [1] : vector<1x4x512xf32> to vector<1x512xf32>
    %3 = vector.shape_cast %2 : vector<1x512xf32> to vector<1x1x512xf32>
    %cst_2 = arith.constant 4.000000e+00 : f32
    %4 = vector.broadcast %cst_2 : f32 to vector<1x1x512xf32>
    %5 = arith.divf %3, %4 : vector<1x1x512xf32>
    %6 = vector.broadcast %5 : vector<1x1x512xf32> to vector<1x4x512xf32>
    %7 = arith.subf %1, %6 : vector<1x4x512xf32>
    %8 = arith.mulf %7, %7 : vector<1x4x512xf32>
    %cst_3 = arith.constant dense<0.000000e+00> : vector<1x512xf32>
    %9 = vector.multi_reduction <add>, %8, %cst_3 [1] : vector<1x4x512xf32> to vector<1x512xf32>
    %10 = vector.shape_cast %9 : vector<1x512xf32> to vector<1x1x512xf32>
    %cst_4 = arith.constant 4.000000e+00 : f32
    %11 = vector.broadcast %cst_4 : f32 to vector<1x1x512xf32>
    %12 = arith.divf %10, %11 : vector<1x1x512xf32>
    %13 = vector.broadcast %5 : vector<1x1x512xf32> to vector<1x4x512xf32>
    %14 = arith.subf %1, %13 : vector<1x4x512xf32>
    %cst_5 = arith.constant 9.99999974E-6 : f32
    %15 = vector.broadcast %cst_5 : f32 to vector<1x1x512xf32>
    %16 = arith.addf %12, %15 : vector<1x1x512xf32>
    %17 = math.rsqrt %16 : vector<1x1x512xf32>
    %18 = vector.broadcast %17 : vector<1x1x512xf32> to vector<1x4x512xf32>
    %19 = arith.mulf %14, %18 : vector<1x4x512xf32>
    %cst_6 = arith.constant 0.000000e+00 : f32
    %20 = vector.broadcast %cst_6 : f32 to vector<1x4x512xf32>
    %21 = arith.cmpf oge, %19, %20 : vector<1x4x512xf32>
    %cst_7 = arith.constant 2.000000e-01 : f32
    %22 = vector.broadcast %cst_7 : f32 to vector<1x4x512xf32>
    %23 = arith.mulf %22, %19 : vector<1x4x512xf32>
    %24 = arith.select %21, %19, %23 : vector<1x4x512xi1>, vector<1x4x512xf32>
    %25 = arith.truncf %24 : vector<1x4x512xf32> to vector<1x4x512xbf16>
    %c0_8 = arith.constant 0 : index
    %c0_9 = arith.constant 0 : index
    %c0_10 = arith.constant 0 : index
    %26 = vector.load %arg3[%c0_8, %c0_9, %c0_10] : memref<1x4x512xbf16, #tpu.memory_space<vmem>>, vector<1x4x512xbf16>
    tpu.vector_store %arg3[%c0_8, %c0_9, %c0_10], %25 {strides = array<i32>} : memref<1x4x512xbf16, #tpu.memory_space<vmem>>, vector<1x4x512xbf16>,
    return
  }
  func.func @transform_0(%arg0: i32, %arg1: i32) -> (i32, i32, i32) {
    %c0_i32 = arith.constant 0 : i32
    %c0_i32_0 = arith.constant 0 : i32
    return %arg0, %c0_i32, %arg1 : i32, i32, i32
  }
  func.func @transform_1(%arg0: i32, %arg1: i32) -> (i32, i32, i32) {
    %c0_i32 = arith.constant 0 : i32
    %c0_i32_0 = arith.constant 0 : i32
    return %arg0, %c0_i32, %arg1 : i32, i32, i32
  }
}

module attributes {stable_mosaic.version = 11 : i64} {
  func.func @_final_reduce_kernel(%arg0: i32, %arg1: i32, %arg2: memref<1x1x2048xbf16, #tpu.memory_space<vmem>>, %arg3: memref<1x2048xbf16, #tpu.memory_space<vmem>>, %arg4: memref<1x1x128xf32, #tpu.memory_space<vmem>>, %arg5: memref<1x2048xf32, #tpu.memory_space<vmem>>) attributes {dimension_semantics = [#tpu.dimension_semantics<parallel>, #tpu.dimension_semantics<arbitrary>], iteration_bounds = array<i64: 2, 4>, scalar_prefetch = 0 : i64, scratch_operands = 1 : i64, tpu.core_type = #tpu.core_type<tc>, window_params = [{transform_indices = @transform_0, window_bounds = array<i64: 1, 1, 2048>}, {transform_indices = @transform_1, window_bounds = array<i64: 1, 2048>}, {transform_indices = @transform_2, window_bounds = array<i64: 1, 1, 128>}]} {
    %c0_i32 = arith.constant 0 : i32
    %0 = arith.cmpi eq, %arg1, %c0_i32 : i32
    %1 = arith.extui %0 : i1 to i32
    %c0_i32_0 = arith.constant 0 : i32
    %2 = arith.cmpi ne, %1, %c0_i32_0 : i32
    scf.if %2 {
      %cst_10 = arith.constant 0.000000e+00 : f32
      %16 = vector.broadcast %cst_10 : f32 to vector<1x2048xf32>
      %c0_11 = arith.constant 0 : index
      %c0_12 = arith.constant 0 : index
      %17 = vector.load %arg5[%c0_11, %c0_12] : memref<1x2048xf32, #tpu.memory_space<vmem>>, vector<1x2048xf32>
      tpu.vector_store %arg5[%c0_11, %c0_12], %16 {strides = array<i32>} : memref<1x2048xf32, #tpu.memory_space<vmem>>, vector<1x2048xf32>,
    } else {
    }
    %c0 = arith.constant 0 : index
    %c0_1 = arith.constant 0 : index
    %c0_2 = arith.constant 0 : index
    %3 = vector.load %arg2[%c0, %c0_1, %c0_2] : memref<1x1x2048xbf16, #tpu.memory_space<vmem>>, vector<1x1x2048xbf16>
    %4 = arith.extf %3 : vector<1x1x2048xbf16> to vector<1x1x2048xf32>
    %c0_3 = arith.constant 0 : index
    %c0_4 = arith.constant 0 : index
    %5 = vector.load %arg3[%c0_3, %c0_4] : memref<1x2048xbf16, #tpu.memory_space<vmem>>, vector<1x2048xbf16>
    %6 = arith.extf %5 : vector<1x2048xbf16> to vector<1x2048xf32>
    %c0_5 = arith.constant 0 : index
    %c0_6 = arith.constant 0 : index
    %7 = vector.load %arg5[%c0_5, %c0_6] : memref<1x2048xf32, #tpu.memory_space<vmem>>, vector<1x2048xf32>
    %8 = vector.shape_cast %6 : vector<1x2048xf32> to vector<1x1x2048xf32>
    %9 = arith.mulf %4, %8 : vector<1x1x2048xf32>
    %cst = arith.constant dense<0.000000e+00> : vector<1x2048xf32>
    %10 = vector.multi_reduction <add>, %9, %cst [1] : vector<1x1x2048xf32> to vector<1x2048xf32>
    %11 = arith.addf %7, %10 : vector<1x2048xf32>
    %c0_7 = arith.constant 0 : index
    %c0_8 = arith.constant 0 : index
    %12 = vector.load %arg5[%c0_7, %c0_8] : memref<1x2048xf32, #tpu.memory_space<vmem>>, vector<1x2048xf32>
    tpu.vector_store %arg5[%c0_7, %c0_8], %11 {strides = array<i32>} : memref<1x2048xf32, #tpu.memory_space<vmem>>, vector<1x2048xf32>,
    %c3_i32 = arith.constant 3 : i32
    %13 = arith.cmpi eq, %arg1, %c3_i32 : i32
    %14 = arith.extui %13 : i1 to i32
    %c0_i32_9 = arith.constant 0 : i32
    %15 = arith.cmpi ne, %14, %c0_i32_9 : i32
    scf.if %15 {
      %c0_10 = arith.constant 0 : index
      %c0_11 = arith.constant 0 : index
      %16 = vector.load %arg5[%c0_10, %c0_11] : memref<1x2048xf32, #tpu.memory_space<vmem>>, vector<1x2048xf32>
      %17 = vector.shape_cast %16 : vector<1x2048xf32> to vector<1x1x2048xf32>
      %cst_12 = arith.constant dense<0.000000e+00> : vector<1xf32>
      %18 = vector.multi_reduction <add>, %17, %cst_12 [1, 2] : vector<1x1x2048xf32> to vector<1xf32>
      %19 = vector.shape_cast %18 : vector<1xf32> to vector<1x1x1xf32>
      %20 = vector.extract %19[0, 0, 0] : f32 from vector<1x1x1xf32>
      %cst_13 = arith.constant 1.000000e+00 : f32
      %21 = arith.mulf %20, %cst_13 : f32
      %22 = vector.broadcast %21 : f32 to vector<1x1x128xf32>
      %c0_14 = arith.constant 0 : index
      %c0_15 = arith.constant 0 : index
      %c0_16 = arith.constant 0 : index
      %23 = vector.load %arg4[%c0_14, %c0_15, %c0_16] : memref<1x1x128xf32, #tpu.memory_space<vmem>>, vector<1x1x128xf32>
      tpu.vector_store %arg4[%c0_14, %c0_15, %c0_16], %22 {strides = array<i32>} : memref<1x1x128xf32, #tpu.memory_space<vmem>>, vector<1x1x128xf32>,
    } else {
    }
    return
  }
  func.func @transform_0(%arg0: i32, %arg1: i32) -> (i32, i32, i32) {
    %c0_i32 = arith.constant 0 : i32
    %c0_i32_0 = arith.constant 0 : i32
    return %arg0, %c0_i32, %arg1 : i32, i32, i32
  }
  func.func @transform_1(%arg0: i32, %arg1: i32) -> (i32, i32) {
    %c0_i32 = arith.constant 0 : i32
    %c0_i32_0 = arith.constant 0 : i32
    return %c0_i32, %arg1 : i32, i32
  }
  func.func @transform_2(%arg0: i32, %arg1: i32) -> (i32, i32, i32) {
    %c0_i32 = arith.constant 0 : i32
    %c0_i32_0 = arith.constant 0 : i32
    %c0_i32_1 = arith.constant 0 : i32
    return %arg0, %c0_i32, %c0_i32_0 : i32, i32, i32
  }
}

</mosaic_0001>

<bundles_post_ra>
// kernel: discriminator_forward.8
= control target key start
LH: loop header
LB: loop body
LE: loop exit
PB: predicated region body
PF: predicated region fallthrough
CT: control target
= control target key end

     0   :  { %s1563_s12 = smov 0   ;;  %s1565_s13 = smov 0   ;;  %s1706_s0 = inlined_call_operand.vmem [shape: bf16[512,128], index: 0, kind: input, shape index: {}]   ;;  %s1707_s1 = inlined_call_operand.vmem [shape: bf16[128,128], index: 1, kind: input, shape index: {}]   ;;  %s1708_s2 = inlined_call_operand.vmem [shape: f32[1,128], index: 2, kind: input, shape index: {}]   ;;  %s1709_s3 = inlined_call_operand.vmem [shape: bf16[512,128], index: 3, kind: output, shape index: {}]  }
   0x1   :  { %s1567_s14 = smov 0  }
   0x2 LB: > { %s32_s15 = sadd.s32 1, %s1537_s13  ;;  %p1192_p0 = scmp.ge.s32.totalorder %s1541_s14, 1  ;;  %s1541_s14 = sphi %s1567_s14, %s13_s14   ;;  %s1537_s13 = sphi %s1565_s13, %s1711_s13   ;;  %s1533_s12 = sphi %s1563_s12, %s1710_s12  }
   0x3   : > { %p34_p1 = scmp.ge.s32.totalorder %s32_s15, 2  ;;  %p188_p2 = scmp.lt.s32.totalorder %s1541_s14, 3 }
   0x5   : > { %s1713_s15 = smov (%p34_p1, %s32_s15), 0  ;;  %p189_p3 = pnand %p1192_p0, %p188_p2 }
   0x6   : > { %v1495_v0 = vld [vmem:[%s1707_s1] sm:$0xff] (!%p189_p3)   ;;  %s1193_s18 = sshll.u32 (!%p189_p3), %s1533_s12, 5  ;;  %v1496_v1 = vld [vmem:[%s1707_s1 + $0x8] sm:$0xff] (!%p189_p3)   ;;  %v1497_v2 = vld [vmem:[%s1707_s1 + $0x10] sm:$0xff] (!%p189_p3)  }
   0x7   : > { %192 = sbr.rel (%p189_p3) target bundleno = 294 (0x126), region = 32  ;;  %p230_p4 = scmp.lt.s32.totalorder (!%p189_p3), %s1193_s18, 63  ;;  %1407 = vmatprep.subr.bf16.mxu0 (!%p189_p3), %v1495_v0  ;;  %1455 = vmatprep.subr.bf16.mxu1 (!%p189_p3), %v1495_v0  ;;  %v1498_v3 = vld [vmem:[%s1707_s1 + $0x18] sm:$0xff] (!%p189_p3)   ;;  %v1499_v6 = vld [vmem:[%s1707_s1 + $0x20] sm:$0xff] (!%p189_p3)   ;;  %v1500_v7 = vld [vmem:[%s1707_s1 + $0x28] sm:$0xff] (!%p189_p3)  }
   0x8   : > { %1408 = vmatpush3.bf16.msra.mxu0 (!%p189_p3), %v1495_v0  ;;  %1463 = vmatpush3.bf16.msra.mxu1 (!%p189_p3), %v1495_v0  ;;  %v1501_v8 = vld [vmem:[%s1707_s1 + $0x30] sm:$0xff] (!%p189_p3)   ;;  %v1502_v9 = vld [vmem:[%s1707_s1 + $0x38] sm:$0xff] (!%p189_p3)   ;;  %v1634_v24 = vld [vmem:[%s1708_s2] ss:$0 sm:$0xff] (!%p189_p3) }
   0x9   : > { %1409 = vmatprep.subr.bf16.mxu0 (!%p189_p3), %v1496_v1  ;;  %1456 = vmatprep.subr.bf16.mxu1 (!%p189_p3), %v1496_v1 }
   0xc   : > { %1410 = vmatpush3.bf16.msra.mxu0 (!%p189_p3), %v1496_v1  ;;  %1464 = vmatpush3.bf16.msra.mxu1 (!%p189_p3), %v1496_v1 }
   0xd   : > { %1411 = vmatprep.subr.bf16.mxu0 (!%p189_p3), %v1497_v2  ;;  %1457 = vmatprep.subr.bf16.mxu1 (!%p189_p3), %v1497_v2 }
   0xe   : > { %s1715_s18 = smov (!%p230_p4, %s1193_s18), 63 }
   0xf   : > { %s1194_s23 = sshll.u32 %s1715_s18, 2 }
  0x10   : > { %s1598_s26 = scalar_lea.vmem %s1706_s0, %s1194_s23  ;;  %1412 = vmatpush3.bf16.msra.mxu0 %v1497_v2  ;;  %1465 = vmatpush3.bf16.msra.mxu1 %v1497_v2  ;;  %s1651_s17 = scalar_lea.vmem %s1709_s3, %s1194_s23 }
  0x11   : > { %v1503_v4 = vld [vmem:[%s1598_s26] sm:$0xff]   ;;  %1413 = vmatprep.subr.bf16.mxu0 %v1498_v3  ;;  %1458 = vmatprep.subr.bf16.mxu1 %v1498_v3  ;;  %v1505_v10 = vld [vmem:[%s1598_s26 + $0x8] sm:$0xff]   ;;  %v1507_v12 = vld [vmem:[%s1598_s26 + $0x10] sm:$0xff]  }
  0x12   : > { %v1504_v5 = vld [vmem:[%s1598_s26 + $0x40] sm:$0xff]   ;;  %1423 = vmatprep.mubr.bf16.mxu0 %v1503_v4  ;;  %v1506_v11 = vld [vmem:[%s1598_s26 + $0x48] sm:$0xff]   ;;  %v1508_v13 = vld [vmem:[%s1598_s26 + $0x50] sm:$0xff]  }
  0x13   : > { %1439 = vmatprep.mubr.bf16.mxu1 %v1504_v5  ;;  %v1509_v14 = vld [vmem:[%s1598_s26 + $0x18] sm:$0xff]   ;;  %v1511_v16 = vld [vmem:[%s1598_s26 + $0x20] sm:$0xff]   ;;  %v1513_v18 = vld [vmem:[%s1598_s26 + $0x28] sm:$0xff]  }
  0x14   : > { %1414 = vmatpush3.bf16.msra.mxu0 %v1498_v3  ;;  %1466 = vmatpush3.bf16.msra.mxu1 %v1498_v3  ;;  %v1510_v15 = vld [vmem:[%s1598_s26 + $0x58] sm:$0xff]   ;;  %v1512_v17 = vld [vmem:[%s1598_s26 + $0x60] sm:$0xff]   ;;  %v1514_v19 = vld [vmem:[%s1598_s26 + $0x68] sm:$0xff]  }
  0x15   : > { %1415 = vmatprep.subr.bf16.mxu0 %v1499_v6  ;;  %1459 = vmatprep.subr.bf16.mxu1 %v1499_v6  ;;  %v1515_v20 = vld [vmem:[%s1598_s26 + $0x30] sm:$0xff]   ;;  %v1517_v22 = vld [vmem:[%s1598_s26 + $0x38] sm:$0xff]  }
  0x16   : > { %v1516_v21 = vld [vmem:[%s1598_s26 + $0x70] sm:$0xff]   ;;  %v1518_v23 = vld [vmem:[%s1598_s26 + $0x78] sm:$0xff]  }
  0x18   : > { %1416 = vmatpush3.bf16.msra.mxu0 %v1499_v6  ;;  %1467 = vmatpush3.bf16.msra.mxu1 %v1499_v6 }
  0x19   : > { %1417 = vmatprep.subr.bf16.mxu0 %v1500_v7  ;;  %1460 = vmatprep.subr.bf16.mxu1 %v1500_v7 }
  0x1c   : > { %1418 = vmatpush3.bf16.msra.mxu0 %v1500_v7  ;;  %1468 = vmatpush3.bf16.msra.mxu1 %v1500_v7 }
  0x1d   : > { %1419 = vmatprep.subr.bf16.mxu0 %v1501_v8  ;;  %1461 = vmatprep.subr.bf16.mxu1 %v1501_v8 }
  0x20   : > { %1420 = vmatpush3.bf16.msra.mxu0 %v1501_v8  ;;  %1469 = vmatpush3.bf16.msra.mxu1 %v1501_v8 }
  0x21   : > { %1421 = vmatprep.subr.bf16.mxu0 %v1502_v9  ;;  %1462 = vmatprep.subr.bf16.mxu1 %v1502_v9 }
  0x24   : > { %1422 = vmatpush3.bf16.msra.mxu0 %v1502_v9  ;;  %1470 = vmatpush3.bf16.msra.mxu1 %v1502_v9 }
  0x27   : > { %1424 = vmatmul.mubr.bf16.vlgmr.msra.gmra.mrb[0].mxu0 %v1505_v10  ;;  %1440 = vmatmul.mubr.bf16.vlgmr.msra.gmra.mrb[0].mxu1 %v1506_v11 }
  0x28   : > { %1427 = vmatprep.mubr.bf16.mxu0 %v1507_v12  ;;  %1443 = vmatprep.mubr.bf16.mxu1 %v1508_v13 }
  0x2f   : > { %1428 = vmatmul.mubr.bf16.gmra.mrb[4].mxu0 %v1509_v14  ;;  %1444 = vmatmul.mubr.bf16.gmra.mrb[4].mxu1 %v1510_v15 }
  0x30   : > { %1431 = vmatprep.mubr.bf16.mxu0 %v1511_v16  ;;  %1447 = vmatprep.mubr.bf16.mxu1 %v1512_v17 }
  0x37   : > { %1432 = vmatmul.mubr.bf16.gmra.mrb[8].mxu0 %v1513_v18  ;;  %1448 = vmatmul.mubr.bf16.gmra.mrb[8].mxu1 %v1514_v19 }
  0x38   : > { %1435 = vmatprep.mubr.bf16.mxu0 %v1515_v20  ;;  %1451 = vmatprep.mubr.bf16.mxu1 %v1516_v21 }
  0x3f   : > { %1436 = vmatmul.mubr.bf16.gmra.mrb[12].mxu0 %v1517_v22  ;;  %1452 = vmatmul.mubr.bf16.gmra.mrb[12].mxu1 %v1518_v23 }
  0xfa   : > { %v1425_v25 = vpop.f32.mrb[0].mxu0  ;;  %v1441_v26 = vpop.f32.mrb[0].mxu1 }
  0xfb   : > { %v789_v27 = vadd.f32 %v1425_v25, %v1634_v24  ;;  %v805_v28 = vadd.f32 %v1441_v26, %v1634_v24  ;;  %v554_v29 = vpop.f32.mrb[1].mxu0  ;;  %v618_v30 = vpop.f32.mrb[1].mxu1 }
  0xfc   : > { %v787_v31 = vadd.f32 %v1634_v24, %v554_v29  ;;  %v803_v32 = vadd.f32 %v1634_v24, %v618_v30  ;;  %v1426_v33 = vpop.f32.mrb[2].mxu0  ;;  %v1442_v34 = vpop.f32.mrb[2].mxu1 }
  0xfd   : > { %vm821_vm0 = vcmp.ge.f32.partialorder %v789_v27, 0.0  ;;  %v853_v35 = vmul.f32 0.2, %v789_v27  ;;  %vm837_vm1 = vcmp.ge.f32.partialorder %v805_v28, 0.0  ;;  %v869_v36 = vmul.f32 0.2, %v805_v28 }
  0xfe   : > { %vm819_vm2 = vcmp.ge.f32.partialorder %v787_v31, 0.0  ;;  %v851_v37 = vmul.f32 0.2, %v787_v31  ;;  %vm835_vm3 = vcmp.ge.f32.partialorder %v803_v32, 0.0  ;;  %v867_v38 = vmul.f32 0.2, %v803_v32 }
  0xff   : > { %v790_v39 = vadd.f32 %v1426_v33, %v1634_v24  ;;  %v806_v40 = vadd.f32 %v1442_v34, %v1634_v24  ;;  %v557_v41 = vpop.f32.mrb[3].mxu0  ;;  %v621_v42 = vpop.f32.mrb[3].mxu1  ;;  %v885_v43 = vsel %vm821_vm0, %v789_v27, %v853_v35  ;;  %v901_v44 = vsel %vm837_vm1, %v805_v28, %v869_v36 }
 0x100   : > { %v788_v45 = vadd.f32 %v1634_v24, %v557_v41  ;;  %v804_v46 = vadd.f32 %v1634_v24, %v621_v42  ;;  %v883_v51 = vsel %vm819_vm2, %v787_v31, %v851_v37  ;;  %v899_v52 = vsel %vm835_vm3, %v803_v32, %v867_v38 }
 0x101   : > { %vm822_vm4 = vcmp.ge.f32.partialorder %v790_v39, 0.0  ;;  %v854_v47 = vmul.f32 0.2, %v790_v39  ;;  %vm838_vm5 = vcmp.ge.f32.partialorder %v806_v40, 0.0  ;;  %v870_v48 = vmul.f32 0.2, %v806_v40 }
 0x102   : > { %vm820_vm6 = vcmp.ge.f32.partialorder %v788_v45, 0.0  ;;  %v852_v49 = vmul.f32 0.2, %v788_v45  ;;  %vm836_vm7 = vcmp.ge.f32.partialorder %v804_v46, 0.0  ;;  %v868_v50 = vmul.f32 0.2, %v804_v46 }
 0x103   : > { %v886_v53 = vsel %vm822_vm4, %v790_v39, %v854_v47  ;;  %v902_v54 = vsel %vm838_vm5, %v806_v40, %v870_v48  ;;  %v1429_v55 = vpop.f32.mrb[4].mxu0  ;;  %v1445_v56 = vpop.f32.mrb[4].mxu1 }
 0x104   : > { %v1296_v57 = vpack.c.bf16 %v886_v53, %v885_v43  ;;  %v1336_v58 = vpack.c.bf16 %v902_v54, %v901_v44  ;;  %v884_v59 = vsel %vm820_vm6, %v788_v45, %v852_v49  ;;  %v900_v60 = vsel %vm836_vm7, %v804_v46, %v868_v50  ;;  %v570_v61 = vpop.f32.mrb[5].mxu0  ;;  %v634_v62 = vpop.f32.mrb[5].mxu1 }
 0x105   : > { %v1291_v63 = vpack.c.bf16 %v884_v59, %v883_v51  ;;  %v1331_v0 = vpack.c.bf16 %v900_v60, %v899_v52  ;;  %v793_v1 = vadd.f32 %v1429_v55, %v1634_v24  ;;  %v809_v2 = vadd.f32 %v1445_v56, %v1634_v24  ;;  %v1430_v3 = vpop.f32.mrb[6].mxu0  ;;  %v1446_v4 = vpop.f32.mrb[6].mxu1 }
 0x106   : > { %1368 = vst [vmem:[%s1651_s17 + $0x8] sm:$0xff] %v1296_v57   ;;  %1376 = vst [vmem:[%s1651_s17 + $0x48] sm:$0xff] %v1336_v58   ;;  %v791_v5 = vadd.f32 %v1634_v24, %v570_v61  ;;  %v807_v6 = vadd.f32 %v1634_v24, %v634_v62  ;;  %v794_v7 = vadd.f32 %v1430_v3, %v1634_v24  ;;  %v573_v9 = vpop.f32.mrb[7].mxu0  ;;  %v637_v10 = vpop.f32.mrb[7].mxu1 }
 0x107   : > { %v810_v8 = vadd.f32 %v1446_v4, %v1634_v24  ;;  %1292 = vst [vmem:[%s1651_s17] sm:$0xff] %v1291_v63   ;;  %1375 = vst [vmem:[%s1651_s17 + $0x40] sm:$0xff] %v1331_v0   ;;  %vm825_vm8 = vcmp.ge.f32.partialorder %v793_v1, 0.0  ;;  %v857_v11 = vmul.f32 0.2, %v793_v1  ;;  %vm841_vm9 = vcmp.ge.f32.partialorder %v809_v2, 0.0 }
 0x108   : > { %v873_v12 = vmul.f32 0.2, %v809_v2  ;;  %vm823_vm10 = vcmp.ge.f32.partialorder %v791_v5, 0.0  ;;  %v855_v13 = vmul.f32 0.2, %v791_v5  ;;  %vm839_vm11 = vcmp.ge.f32.partialorder %v807_v6, 0.0 }
 0x109   : > { %v889_v14 = vsel %vm825_vm8, %v793_v1, %v857_v11  ;;  %v871_v15 = vmul.f32 0.2, %v807_v6  ;;  %vm826_vm12 = vcmp.ge.f32.partialorder %v794_v7, 0.0  ;;  %v858_v16 = vmul.f32 0.2, %v794_v7 }
 0x10a   : > { %v905_v17 = vsel %vm841_vm9, %v809_v2, %v873_v12  ;;  %v887_v18 = vsel %vm823_vm10, %v791_v5, %v855_v13  ;;  %vm842_vm13 = vcmp.ge.f32.partialorder %v810_v8, 0.0  ;;  %v874_v19 = vmul.f32 0.2, %v810_v8  ;;  %v1433_v20 = vpop.f32.mrb[8].mxu0  ;;  %v1449_v21 = vpop.f32.mrb[8].mxu1 }
 0x10b   : > { %v890_v22 = vsel %vm826_vm12, %v794_v7, %v858_v16  ;;  %v792_v23 = vadd.f32 %v1634_v24, %v573_v9  ;;  %v808_v25 = vadd.f32 %v1634_v24, %v637_v10  ;;  %v797_v26 = vadd.f32 %v1433_v20, %v1634_v24  ;;  %v586_v27 = vpop.f32.mrb[9].mxu0  ;;  %v650_v28 = vpop.f32.mrb[9].mxu1 }
 0x10c   : > { %v1306_v29 = vpack.c.bf16 %v890_v22, %v889_v14  ;;  %v906_v30 = vsel %vm842_vm13, %v810_v8, %v874_v19  ;;  %v813_v31 = vadd.f32 %v1449_v21, %v1634_v24  ;;  %v795_v32 = vadd.f32 %v1634_v24, %v586_v27  ;;  %v1434_v33 = vpop.f32.mrb[10].mxu0  ;;  %v1450_v34 = vpop.f32.mrb[10].mxu1 }
 0x10d   : > { %v1346_v35 = vpack.c.bf16 %v906_v30, %v905_v17  ;;  %vm824_vm14 = vcmp.ge.f32.partialorder %v792_v23, 0.0  ;;  %v856_v36 = vmul.f32 0.2, %v792_v23  ;;  %vm840_vm15 = vcmp.ge.f32.partialorder %v808_v25, 0.0  ;;  %v589_v37 = vpop.f32.mrb[11].mxu0  ;;  %v653_v38 = vpop.f32.mrb[11].mxu1 }
 0x10e   : > { %1370 = vst [vmem:[%s1651_s17 + $0x18] sm:$0xff] %v1306_v29   ;;  %v872_v39 = vmul.f32 0.2, %v808_v25  ;;  %vm829_vm0 = vcmp.ge.f32.partialorder %v797_v26, 0.0  ;;  %v861_v40 = vmul.f32 0.2, %v797_v26  ;;  %v903_v41 = vsel %vm839_vm11, %v807_v6, %v871_v15 }
 0x10f   : > { %vm845_vm1 = vcmp.ge.f32.partialorder %v813_v31, 0.0  ;;  %1378 = vst [vmem:[%s1651_s17 + $0x58] sm:$0xff] %v1346_v35   ;;  %v888_v42 = vsel %vm824_vm14, %v792_v23, %v856_v36  ;;  %v877_v43 = vmul.f32 0.2, %v813_v31  ;;  %vm827_vm2 = vcmp.ge.f32.partialorder %v795_v32, 0.0 }
 0x110   : > { %v1301_v44 = vpack.c.bf16 %v888_v42, %v887_v18  ;;  %v904_v45 = vsel %vm840_vm15, %v808_v25, %v872_v39  ;;  %v859_v46 = vmul.f32 0.2, %v795_v32  ;;  %v811_v47 = vadd.f32 %v1634_v24, %v650_v28 }
 0x111   : > { %v1341_v48 = vpack.c.bf16 %v904_v45, %v903_v41  ;;  %v893_v49 = vsel %vm829_vm0, %v797_v26, %v861_v40  ;;  %v909_v50 = vsel %vm845_vm1, %v813_v31, %v877_v43  ;;  %v798_v51 = vadd.f32 %v1434_v33, %v1634_v24 }
 0x112   : > { %1369 = vst [vmem:[%s1651_s17 + $0x10] sm:$0xff] %v1301_v44   ;;  %vm843_vm3 = vcmp.ge.f32.partialorder %v811_v47, 0.0  ;;  %v875_v52 = vmul.f32 0.2, %v811_v47  ;;  %v814_v53 = vadd.f32 %v1450_v34, %v1634_v24  ;;  %v796_v54 = vadd.f32 %v1634_v24, %v589_v37  ;;  %v1437_v55 = vpop.f32.mrb[12].mxu0  ;;  %v1453_v56 = vpop.f32.mrb[12].mxu1 }
 0x113   : > { %1377 = vst [vmem:[%s1651_s17 + $0x50] sm:$0xff] %v1341_v48   ;;  %vm830_vm4 = vcmp.ge.f32.partialorder %v798_v51, 0.0  ;;  %v862_v57 = vmul.f32 0.2, %v798_v51  ;;  %v812_v58 = vadd.f32 %v1634_v24, %v653_v38  ;;  %v801_v59 = vadd.f32 %v1437_v55, %v1634_v24  ;;  %v602_v60 = vpop.f32.mrb[13].mxu0  ;;  %v666_v61 = vpop.f32.mrb[13].mxu1 }
 0x114   : > { %v891_v62 = vsel %vm827_vm2, %v795_v32, %v859_v46  ;;  %vm846_vm5 = vcmp.ge.f32.partialorder %v814_v53, 0.0  ;;  %v878_v63 = vmul.f32 0.2, %v814_v53  ;;  %vm828_vm6 = vcmp.ge.f32.partialorder %v796_v54, 0.0  ;;  %v1438_v0 = vpop.f32.mrb[14].mxu0  ;;  %v1454_v1 = vpop.f32.mrb[14].mxu1 }
 0x115   : > { %v894_v2 = vsel %vm830_vm4, %v798_v51, %v862_v57  ;;  %v860_v3 = vmul.f32 0.2, %v796_v54  ;;  %vm844_vm7 = vcmp.ge.f32.partialorder %v812_v58, 0.0  ;;  %v876_v4 = vmul.f32 0.2, %v812_v58  ;;  %v605_v5 = vpop.f32.mrb[15].mxu0 }
 0x116   : > { %v907_v6 = vsel %vm843_vm3, %v811_v47, %v875_v52  ;;  %v1316_v7 = vpack.c.bf16 %v894_v2, %v893_v49  ;;  %v910_v8 = vsel %vm846_vm5, %v814_v53, %v878_v63  ;;  %v865_v9 = vmul.f32 0.2, %v801_v59  ;;  %v669_v10 = vpop.f32.mrb[15].mxu1 }
 0x117   : > { %v1356_v11 = vpack.c.bf16 %v910_v8, %v909_v50  ;;  %v892_v12 = vsel %vm828_vm6, %v796_v54, %v860_v3  ;;  %v908_v13 = vsel %vm844_vm7, %v812_v58, %v876_v4  ;;  %v817_v14 = vadd.f32 %v1453_v56, %v1634_v24 }
 0x118   : > { %1372 = vst [vmem:[%s1651_s17 + $0x28] sm:$0xff] %v1316_v7   ;;  %v1311_v15 = vpack.c.bf16 %v892_v12, %v891_v62  ;;  %v1351_v16 = vpack.c.bf16 %v908_v13, %v907_v6  ;;  %vm833_vm8 = vcmp.ge.f32.partialorder %v801_v59, 0.0  ;;  %v799_v17 = vadd.f32 %v1634_v24, %v602_v60 }
 0x119   : > { %1380 = vst [vmem:[%s1651_s17 + $0x68] sm:$0xff] %v1356_v11   ;;  %vm849_vm9 = vcmp.ge.f32.partialorder %v817_v14, 0.0  ;;  %v881_v18 = vmul.f32 0.2, %v817_v14  ;;  %v815_v19 = vadd.f32 %v1634_v24, %v666_v61  ;;  %v802_v20 = vadd.f32 %v1438_v0, %v1634_v24 }
 0x11a   : > { %1371 = vst [vmem:[%s1651_s17 + $0x20] sm:$0xff] %v1311_v15   ;;  %1379 = vst [vmem:[%s1651_s17 + $0x60] sm:$0xff] %v1351_v16   ;;  %v863_v21 = vmul.f32 0.2, %v799_v17  ;;  %v818_v22 = vadd.f32 %v1454_v1, %v1634_v24  ;;  %v800_v23 = vadd.f32 %v1634_v24, %v605_v5  ;;  %v897_v25 = vsel %vm833_vm8, %v801_v59, %v865_v9 }
 0x11b   : > { %vm831_vm10 = vcmp.ge.f32.partialorder %v799_v17, 0.0  ;;  %vm834_vm11 = vcmp.ge.f32.partialorder %v802_v20, 0.0  ;;  %v913_v26 = vsel %vm849_vm9, %v817_v14, %v881_v18  ;;  %v866_v27 = vmul.f32 0.2, %v802_v20 }
 0x11c   : > { %vm850_vm12 = vcmp.ge.f32.partialorder %v818_v22, 0.0  ;;  %v882_v28 = vmul.f32 0.2, %v818_v22  ;;  %vm847_vm13 = vcmp.ge.f32.partialorder %v815_v19, 0.0  ;;  %vm832_vm14 = vcmp.ge.f32.partialorder %v800_v23, 0.0 }
 0x11d   : > { %v864_v29 = vmul.f32 0.2, %v800_v23  ;;  %v816_v30 = vadd.f32 %v1634_v24, %v669_v10  ;;  %v895_v31 = vsel %vm831_vm10, %v799_v17, %v863_v21  ;;  %v879_v32 = vmul.f32 0.2, %v815_v19 }
 0x11e   : > { %v898_v33 = vsel %vm834_vm11, %v802_v20, %v866_v27  ;;  %v914_v34 = vsel %vm850_vm12, %v818_v22, %v882_v28 }
 0x11f   : > { %v1326_v35 = vpack.c.bf16 %v898_v33, %v897_v25  ;;  %v1366_v36 = vpack.c.bf16 %v914_v34, %v913_v26  ;;  %v896_v37 = vsel %vm832_vm14, %v800_v23, %v864_v29  ;;  %vm848_vm15 = vcmp.ge.f32.partialorder %v816_v30, 0.0 }
 0x120   : > { %v1321_v38 = vpack.c.bf16 %v896_v37, %v895_v31  ;;  %v880_v39 = vmul.f32 0.2, %v816_v30  ;;  %v911_v40 = vsel %vm847_vm13, %v815_v19, %v879_v32 }
 0x121   : > { %1374 = vst [vmem:[%s1651_s17 + $0x38] sm:$0xff] %v1326_v35   ;;  %1382 = vst [vmem:[%s1651_s17 + $0x78] sm:$0xff] %v1366_v36  }
 0x122   : > { %1373 = vst [vmem:[%s1651_s17 + $0x30] sm:$0xff] %v1321_v38   ;;  %v912_v41 = vsel %vm848_vm15, %v816_v30, %v880_v39 }
 0x123   : > { %v1361_v42 = vpack.c.bf16 %v912_v41, %v911_v40 }
 0x125   : > { %1381 = vst [vmem:[%s1651_s17 + $0x70] sm:$0xff] %v1361_v42  }
 0x126 PF: > { %s13_s14 = sadd.s32 1, %s1541_s14   ;;  %s1710_s12 = smov %s1537_s13 }
 0x127   : > { %p10_p5 = scmp.ge.s32.totalorder %s13_s14, 4   ;;  %s1711_s13 = smov %s1713_s15 }
 0x129   :  { %12 = sbr.rel (!%p10_p5) target bundleno = 2 (0x2), region = 76 }

// kernel: discriminator_forward.10
= control target key start
LH: loop header
LB: loop body
LE: loop exit
PB: predicated region body
PF: predicated region fallthrough
CT: control target
= control target key end

     0   :  { %s497_s6 = smov 0   ;;  %s499_s7 = smov 0   ;;  %s537_s0 = inlined_call_operand.vmem [shape: bf16[2,64,128], index: 0, kind: input, shape index: {}]   ;;  %s538_s1 = inlined_call_operand.vmem [shape: bf16[2,64,128], index: 1, kind: output, shape index: {}]  }
   0x1   :  { %s501_s8 = smov 0  }
   0x2 LB: > { %s23_s9 = sadd.s32 1, %s481_s7  ;;  %p370_p0 = scmp.ge.s32.totalorder %s485_s8, 1  ;;  %s485_s8 = sphi %s501_s8, %s11_s8   ;;  %s481_s7 = sphi %s499_s7, %s540_s7   ;;  %s477_s6 = sphi %s497_s6, %s539_s6  }
   0x3   : > { %p25_p1 = scmp.ge.s32.totalorder %s23_s9, 2  ;;  %p106_p2 = scmp.lt.s32.totalorder %s485_s8, 3 }
   0x5   : > { %s542_s9 = smov (%p25_p1, %s23_s9), 0  ;;  %p107_p3 = pnand %p370_p0, %p106_p2 }
   0x6   : > { %p132_p4 = scmp.lt.s32.totalorder (!%p107_p3), %s477_s6, 1 }
   0x7   : > { %110 = sbr.rel (%p107_p3) target bundleno = 106 (0x6a), region = 24 }
   0xe   : > { %s544_s6 = smov (!%p132_p4, %s477_s6), 1 }
   0xf   : > { %s385_s10 = sshll.u32 %s544_s6, 5 }
  0x10   : > { %s139_s13 = scalar_lea.vmem %s537_s0, %s385_s10  ;;  %s147_s16 = scalar_lea.vmem %s538_s1, %s385_s10 }
  0x11   : > { %v396_v0 = vld [vmem:[%s139_s13] sm:$0xff]   ;;  %v431_v1 = vld [vmem:[%s139_s13 + $0x8] sm:$0xff]   ;;  %v432_v5 = vld [vmem:[%s139_s13 + $0x10] sm:$0xff]  }
  0x12   : > { %v397_v2 = vunpack.c.l.bf16 %v396_v0  ;;  %v398_v3 = vunpack.c.h.bf16 %v396_v0  ;;  %v401_v4 = vunpack.c.l.bf16 %v431_v1  ;;  %v402_v6 = vunpack.c.h.bf16 %v431_v1  ;;  %v433_v10 = vld [vmem:[%s139_s13 + $0x18] sm:$0xff]  }
  0x13   : > { %v405_v8 = vunpack.c.l.bf16 %v432_v5  ;;  %v406_v11 = vunpack.c.h.bf16 %v432_v5  ;;  %v409_v13 = vunpack.c.l.bf16 %v433_v10  ;;  %v410_v15 = vunpack.c.h.bf16 %v433_v10 }
  0x14   : > { %v164_v7 = vadd.f32 %v398_v3, %v397_v2 }
  0x16   : > { %v165_v9 = vadd.f32 %v401_v4, %v164_v7 }
  0x18   : > { %v166_v12 = vadd.f32 %v402_v6, %v165_v9 }
  0x1a   : > { %v167_v14 = vadd.f32 %v405_v8, %v166_v12 }
  0x1c   : > { %v168_v16 = vadd.f32 %v406_v11, %v167_v14 }
  0x1e   : > { %v169_v17 = vadd.f32 %v409_v13, %v168_v16 }
  0x20   : > { %v170_v18 = vadd.f32 %v410_v15, %v169_v17 }
  0x22   : > { %v171_v19 = vrot.slane %v170_v18, 4 }
  0x24   : > { %v172_v20 = vadd.f32 %v171_v19, %v170_v18 }
  0x26   : > { %v173_v21 = vrot.slane %v172_v20, 2 }
  0x28   : > { %v174_v22 = vadd.f32 %v173_v21, %v172_v20 }
  0x2a   : > { %v175_v23 = vrot.slane %v174_v22, 1 }
  0x2c   : > { %v176_v24 = vadd.f32 %v175_v23, %v174_v22 }
  0x2e   : > { %v178_v25 = vmul.f32 0.015625, %v176_v24 }
  0x30   : > { %v179_v26 = vsub.f32 %v397_v2, %v178_v25  ;;  %v180_v27 = vsub.f32 %v398_v3, %v178_v25  ;;  %v181_v28 = vsub.f32 %v401_v4, %v178_v25  ;;  %v182_v29 = vsub.f32 %v402_v6, %v178_v25 }
  0x31   : > { %v183_v30 = vsub.f32 %v405_v8, %v178_v25  ;;  %v184_v34 = vsub.f32 %v406_v11, %v178_v25  ;;  %v185_v37 = vsub.f32 %v409_v13, %v178_v25  ;;  %v186_v40 = vsub.f32 %v410_v15, %v178_v25 }
  0x32   : > { %v187_v31 = vmul.f32 %v179_v26, %v179_v26  ;;  %v188_v32 = vmul.f32 %v180_v27, %v180_v27  ;;  %v189_v33 = vmul.f32 %v181_v28, %v181_v28  ;;  %v190_v35 = vmul.f32 %v182_v29, %v182_v29 }
  0x33   : > { %v191_v38 = vmul.f32 %v183_v30, %v183_v30  ;;  %v192_v41 = vmul.f32 %v184_v34, %v184_v34  ;;  %v193_v43 = vmul.f32 %v185_v37, %v185_v37  ;;  %v194_v45 = vmul.f32 %v186_v40, %v186_v40 }
  0x34   : > { %v195_v36 = vadd.f32 %v188_v32, %v187_v31 }
  0x36   : > { %v196_v39 = vadd.f32 %v195_v36, %v189_v33 }
  0x38   : > { %v197_v42 = vadd.f32 %v196_v39, %v190_v35 }
  0x3a   : > { %v198_v44 = vadd.f32 %v197_v42, %v191_v38 }
  0x3c   : > { %v199_v46 = vadd.f32 %v198_v44, %v192_v41 }
  0x3e   : > { %v200_v47 = vadd.f32 %v199_v46, %v193_v43 }
  0x40   : > { %v201_v48 = vadd.f32 %v200_v47, %v194_v45 }
  0x42   : > { %v202_v49 = vrot.slane %v201_v48, 4 }
  0x44   : > { %v203_v50 = vadd.f32 %v202_v49, %v201_v48 }
  0x46   : > { %v204_v51 = vrot.slane %v203_v50, 2 }
  0x48   : > { %v205_v52 = vadd.f32 %v204_v51, %v203_v50 }
  0x4a   : > { %v206_v53 = vrot.slane %v205_v52, 1 }
  0x4c   : > { %v207_v54 = vadd.f32 %v206_v53, %v205_v52 }
  0x4e   : > { %v208_v55 = vmul.f32 0.015625, %v207_v54 }
  0x50   : > { %v209_v56 = vadd.f32 1e-05, %v208_v55 }
  0x52   : > { %461 = vrsqrt.f32 %v209_v56 }
  0x5c   : > { %v462_v57 = vpop.eup %461 }
  0x5d   : > { %v211_v58 = vmul.f32 %v462_v57, %v179_v26  ;;  %v212_v59 = vmul.f32 %v462_v57, %v180_v27  ;;  %v213_v60 = vmul.f32 %v462_v57, %v181_v28  ;;  %v214_v61 = vmul.f32 %v462_v57, %v182_v29 }
  0x5e   : > { %v215_v62 = vmul.f32 %v462_v57, %v183_v30  ;;  %v216_v63 = vmul.f32 %v462_v57, %v184_v34  ;;  %v217_v0 = vmul.f32 %v462_v57, %v185_v37  ;;  %v218_v1 = vmul.f32 %v462_v57, %v186_v40 }
  0x5f   : > { %vm219_vm0 = vcmp.ge.f32.partialorder %v211_v58, 0.0  ;;  %vm220_vm1 = vcmp.ge.f32.partialorder %v212_v59, 0.0  ;;  %v227_v2 = vmul.f32 0.2, %v211_v58  ;;  %v228_v3 = vmul.f32 0.2, %v212_v59 }
  0x60   : > { %vm221_vm2 = vcmp.ge.f32.partialorder %v213_v60, 0.0  ;;  %vm222_vm3 = vcmp.ge.f32.partialorder %v214_v61, 0.0  ;;  %v229_v4 = vmul.f32 0.2, %v213_v60  ;;  %v230_v5 = vmul.f32 0.2, %v214_v61 }
  0x61   : > { %v235_v6 = vsel %vm219_vm0, %v211_v58, %v227_v2  ;;  %v236_v7 = vsel %vm220_vm1, %v212_v59, %v228_v3  ;;  %vm223_vm4 = vcmp.ge.f32.partialorder %v215_v62, 0.0  ;;  %vm224_vm5 = vcmp.ge.f32.partialorder %v216_v63, 0.0 }
  0x62   : > { %v414_v8 = vpack.c.bf16 %v236_v7, %v235_v6  ;;  %v237_v9 = vsel %vm221_vm2, %v213_v60, %v229_v4  ;;  %v238_v10 = vsel %vm222_vm3, %v214_v61, %v230_v5  ;;  %v231_v11 = vmul.f32 0.2, %v215_v62 }
  0x63   : > { %v419_v12 = vpack.c.bf16 %v238_v10, %v237_v9  ;;  %v232_v13 = vmul.f32 0.2, %v216_v63  ;;  %vm225_vm6 = vcmp.ge.f32.partialorder %v217_v0, 0.0  ;;  %vm226_vm7 = vcmp.ge.f32.partialorder %v218_v1, 0.0 }
  0x64   : > { %415 = vst [vmem:[%s147_s16] sm:$0xff] %v414_v8   ;;  %v239_v14 = vsel %vm223_vm4, %v215_v62, %v231_v11  ;;  %v233_v15 = vmul.f32 0.2, %v217_v0  ;;  %v234_v16 = vmul.f32 0.2, %v218_v1 }
  0x65   : > { %434 = vst [vmem:[%s147_s16 + $0x8] sm:$0xff] %v419_v12   ;;  %v240_v17 = vsel %vm224_vm5, %v216_v63, %v232_v13 }
  0x66   : > { %v424_v18 = vpack.c.bf16 %v240_v17, %v239_v14  ;;  %v241_v19 = vsel %vm225_vm6, %v217_v0, %v233_v15  ;;  %v242_v20 = vsel %vm226_vm7, %v218_v1, %v234_v16 }
  0x67   : > { %v429_v21 = vpack.c.bf16 %v242_v20, %v241_v19 }
  0x68   : > { %435 = vst [vmem:[%s147_s16 + $0x10] sm:$0xff] %v424_v18  }
  0x69   : > { %436 = vst [vmem:[%s147_s16 + $0x18] sm:$0xff] %v429_v21  }
  0x6a PF: > { %s11_s8 = sadd.s32 1, %s485_s8   ;;  %s539_s6 = smov %s481_s7 }
  0x6b   : > { %p8_p5 = scmp.ge.s32.totalorder %s11_s8, 4   ;;  %s540_s7 = smov %s542_s9 }
  0x6d   :  { %10 = sbr.rel (!%p8_p5) target bundleno = 2 (0x2), region = 54 }

// kernel: discriminator_forward.9
= control target key start
LH: loop header
LB: loop body
LE: loop exit
PB: predicated region body
PF: predicated region fallthrough
CT: control target
= control target key end

     0   :  { %s3175_s12 = smov 0   ;;  %s3177_s13 = smov 0   ;;  %s3720_s0 = inlined_call_operand.vmem [shape: bf16[128,2048], index: 0, kind: input, shape index: {}]   ;;  %s3721_s1 = inlined_call_operand.vmem [shape: bf16[2048,128], index: 1, kind: input, shape index: {}]   ;;  %s3722_s2 = inlined_call_operand.vmem [shape: f32[1,128], index: 2, kind: input, shape index: {}]   ;;  %s3723_s3 = inlined_call_operand.vmem [shape: bf16[128,128], index: 3, kind: output, shape index: {}]  }
   0x1   :  { %s3179_s14 = smov 0  }
   0x2 LB: > { %s32_s15 = sadd.s32 1, %s3149_s13  ;;  %p2418_p0 = scmp.ge.s32.totalorder %s3153_s14, 1  ;;  %s3153_s14 = sphi %s3179_s14, %s13_s14   ;;  %s3149_s13 = sphi %s3177_s13, %s3725_s13   ;;  %s3145_s12 = sphi %s3175_s12, %s3724_s12  }
   0x3   : > { %p34_p1 = scmp.ge.s32.totalorder %s32_s15, 2  ;;  %p191_p2 = scmp.lt.s32.totalorder %s3153_s14, 3 }
   0x5   : > { %s3727_s15 = smov (%p34_p1, %s32_s15), 0  ;;  %p192_p3 = pnand %p2418_p0, %p191_p2 }
   0x6   : > { %v3003_v0 = vld [vmem:[%s3721_s1 + $0x40] sm:$0xff] (!%p192_p3)   ;;  %v3007_v4 = vld [vmem:[%s3721_s1 + $0x48] sm:$0xff] (!%p192_p3)   ;;  %v3011_v8 = vld [vmem:[%s3721_s1 + $0x50] sm:$0xff] (!%p192_p3)   ;;  %s2419_s25 = sshll.u32 (!%p192_p3), %s3145_s12, 3 }
   0x7   : > { %195 = sbr.rel (%p192_p3) target bundleno = 386 (0x182), region = 32  ;;  %v3004_v1 = vld [vmem:[%s3721_s1 + $0xc0] sm:$0xff] (!%p192_p3)   ;;  %2659 = vmatprep.subr.bf16.mxu0 (!%p192_p3), %v3003_v0  ;;  %v3008_v5 = vld [vmem:[%s3721_s1 + $0xc8] sm:$0xff] (!%p192_p3)   ;;  %v3012_v9 = vld [vmem:[%s3721_s1 + $0xd0] sm:$0xff] (!%p192_p3)   ;;  %p236_p4 = scmp.lt.s32.totalorder (!%p192_p3), %s2419_s25, 15 }
   0x8   : > { %v3005_v2 = vld [vmem:[%s3721_s1] sm:$0xff] (!%p192_p3)   ;;  %2699 = vmatprep.subr.bf16.mxu1 (!%p192_p3), %v3004_v1  ;;  %v3009_v6 = vld [vmem:[%s3721_s1 + $0x8] sm:$0xff] (!%p192_p3)   ;;  %v3013_v10 = vld [vmem:[%s3721_s1 + $0x10] sm:$0xff] (!%p192_p3)  }
   0x9   : > { %v3006_v3 = vld [vmem:[%s3721_s1 + $0x80] sm:$0xff] (!%p192_p3)   ;;  %2660 = vmatpush3.bf16.msra.mxu0 (!%p192_p3), %v3005_v2  ;;  %v3010_v7 = vld [vmem:[%s3721_s1 + $0x88] sm:$0xff] (!%p192_p3)   ;;  %v3014_v11 = vld [vmem:[%s3721_s1 + $0x90] sm:$0xff] (!%p192_p3)  }
   0xa   : > { %2700 = vmatpush3.bf16.msra.mxu1 (!%p192_p3), %v3006_v3  ;;  %2661 = vmatprep.subr.bf16.mxu0 (!%p192_p3), %v3007_v4  ;;  %v3015_v12 = vld [vmem:[%s3721_s1 + $0x58] sm:$0xff] (!%p192_p3)   ;;  %v3019_v16 = vld [vmem:[%s3721_s1 + $0x60] sm:$0xff] (!%p192_p3)   ;;  %v3023_v20 = vld [vmem:[%s3721_s1 + $0x68] sm:$0xff] (!%p192_p3)  }
   0xb   : > { %2701 = vmatprep.subr.bf16.mxu1 (!%p192_p3), %v3008_v5  ;;  %v3016_v13 = vld [vmem:[%s3721_s1 + $0xd8] sm:$0xff] (!%p192_p3)   ;;  %v3020_v17 = vld [vmem:[%s3721_s1 + $0xe0] sm:$0xff] (!%p192_p3)   ;;  %v3024_v21 = vld [vmem:[%s3721_s1 + $0xe8] sm:$0xff] (!%p192_p3)  }
   0xc   : > { %v3017_v14 = vld [vmem:[%s3721_s1 + $0x18] sm:$0xff] (!%p192_p3)   ;;  %v3021_v18 = vld [vmem:[%s3721_s1 + $0x20] sm:$0xff] (!%p192_p3)   ;;  %v3025_v22 = vld [vmem:[%s3721_s1 + $0x28] sm:$0xff] (!%p192_p3)  }
   0xd   : > { %2662 = vmatpush3.bf16.msra.mxu0 (!%p192_p3), %v3009_v6  ;;  %v3018_v15 = vld [vmem:[%s3721_s1 + $0x98] sm:$0xff] (!%p192_p3)   ;;  %v3022_v19 = vld [vmem:[%s3721_s1 + $0xa0] sm:$0xff] (!%p192_p3)   ;;  %v3026_v23 = vld [vmem:[%s3721_s1 + $0xa8] sm:$0xff] (!%p192_p3)  }
   0xe   : > { %2702 = vmatpush3.bf16.msra.mxu1 %v3010_v7  ;;  %2663 = vmatprep.subr.bf16.mxu0 %v3011_v8  ;;  %s3729_s25 = smov (!%p236_p4, %s2419_s25), 15  ;;  %v3027_v24 = vld [vmem:[%s3721_s1 + $0x70] sm:$0xff]   ;;  %v3031_v28 = vld [vmem:[%s3721_s1 + $0x78] sm:$0xff]   ;;  %v3035_v40 = vld [vmem:[%s3721_s1 + $0x140] sm:$0xff]  }
   0xf   : > { %2703 = vmatprep.subr.bf16.mxu1 %v3012_v9  ;;  %v3028_v25 = vld [vmem:[%s3721_s1 + $0xf0] sm:$0xff]   ;;  %s2627_s24 = sshll.u32 %s3729_s25, 6  ;;  %v3032_v29 = vld [vmem:[%s3721_s1 + $0xf8] sm:$0xff]   ;;  %v3036_v41 = vld [vmem:[%s3721_s1 + $0x1c0] sm:$0xff]   ;;  %s2423_s6 = sshll.u32 %s3729_s25, 2 }
  0x10   : > { %v3029_v26 = vld [vmem:[%s3721_s1 + $0x30] sm:$0xff]   ;;  %s3292_s12 = scalar_lea.vmem %s3720_s0, %s2627_s24  ;;  %v3033_v30 = vld [vmem:[%s3721_s1 + $0x38] sm:$0xff]   ;;  %v3037_v42 = vld [vmem:[%s3721_s1 + $0x100] sm:$0xff]   ;;  %s3693_s9 = scalar_lea.vmem %s3723_s3, %s2423_s6 }
  0x11   : > { %2664 = vmatpush3.bf16.msra.mxu0 %v3013_v10  ;;  %v3030_v27 = vld [vmem:[%s3721_s1 + $0xb0] sm:$0xff]   ;;  %v3034_v31 = vld [vmem:[%s3721_s1 + $0xb8] sm:$0xff]   ;;  %v288_v32 = vld [vmem:[%s3292_s12] sm:$0xff] }
  0x12   : > { %2704 = vmatpush3.bf16.msra.mxu1 %v3014_v11  ;;  %2665 = vmatprep.subr.bf16.mxu0 %v3015_v12  ;;  %v296_v33 = vld [vmem:[%s3292_s12 + $0x40] sm:$0xff]  ;;  %v289_v34 = vld [vmem:[%s3292_s12 + $0x8] sm:$0xff]  ;;  %v3043_v56 = vld [vmem:[%s3721_s1 + $0x150] sm:$0xff]  }
  0x13   : > { %2705 = vmatprep.subr.bf16.mxu1 %v3016_v13  ;;  %v2424_v35 = vcombine.low %v288_v32, %v296_v33  ;;  %v2425_v36 = vcombine.high %v288_v32, %v296_v33  ;;  %v297_v37 = vld [vmem:[%s3292_s12 + $0x48] sm:$0xff]  ;;  %v3038_v43 = vld [vmem:[%s3721_s1 + $0x180] sm:$0xff]   ;;  %v3044_v57 = vld [vmem:[%s3721_s1 + $0x1d0] sm:$0xff]  }
  0x14   : > { %v2426_v38 = vcombine.low %v289_v34, %v297_v37  ;;  %v2427_v39 = vcombine.high %v289_v34, %v297_v37  ;;  %v3039_v44 = vld [vmem:[%s3721_s1 + $0x148] sm:$0xff]   ;;  %v304_v48 = vld [vmem:[%s3292_s12 + $0x80] sm:$0xff]  ;;  %v3045_v58 = vld [vmem:[%s3721_s1 + $0x110] sm:$0xff]  }
  0x15   : > { %2666 = vmatpush3.bf16.msra.mxu0 %v3017_v14  ;;  %1728 = vmatprep.mubr.bf16.mxu0 %v2425_v36  ;;  %v3040_v45 = vld [vmem:[%s3721_s1 + $0x1c8] sm:$0xff]   ;;  %v312_v49 = vld [vmem:[%s3292_s12 + $0xc0] sm:$0xff]  ;;  %v3046_v59 = vld [vmem:[%s3721_s1 + $0x190] sm:$0xff]  }
  0x16   : > { %2706 = vmatpush3.bf16.msra.mxu1 %v3018_v15  ;;  %2667 = vmatprep.subr.bf16.mxu0 %v3019_v16  ;;  %v3041_v46 = vld [vmem:[%s3721_s1 + $0x108] sm:$0xff]   ;;  %v2441_v50 = vcombine.high %v304_v48, %v312_v49  ;;  %v2440_v53 = vcombine.low %v304_v48, %v312_v49  ;;  %v3047_v60 = vld [vmem:[%s3721_s1 + $0x158] sm:$0xff]   ;;  %v320_v0 = vld [vmem:[%s3292_s12 + $0x100] sm:$0xff] }
  0x17   : > { %2707 = vmatprep.subr.bf16.mxu1 %v3020_v17  ;;  %1793 = vmatprep.mubr.bf16.mxu1 %v2427_v39  ;;  %v3042_v47 = vld [vmem:[%s3721_s1 + $0x188] sm:$0xff]   ;;  %v3048_v61 = vld [vmem:[%s3721_s1 + $0x1d8] sm:$0xff]   ;;  %v328_v1 = vld [vmem:[%s3292_s12 + $0x140] sm:$0xff] }
  0x18   : > { %v305_v51 = vld [vmem:[%s3292_s12 + $0x88] sm:$0xff]  ;;  %v3049_v62 = vld [vmem:[%s3721_s1 + $0x118] sm:$0xff]   ;;  %v2457_v4 = vcombine.high %v320_v0, %v328_v1  ;;  %v2456_v6 = vcombine.low %v320_v0, %v328_v1  ;;  %v3051_v8 = vld [vmem:[%s3721_s1 + $0x160] sm:$0xff]  }
  0x19   : > { %2668 = vmatpush3.bf16.msra.mxu0 %v3021_v18  ;;  %v313_v52 = vld [vmem:[%s3292_s12 + $0xc8] sm:$0xff]  ;;  %v3050_v63 = vld [vmem:[%s3721_s1 + $0x198] sm:$0xff]   ;;  %v3052_v9 = vld [vmem:[%s3721_s1 + $0x1e0] sm:$0xff]  }
  0x1a   : > { %2708 = vmatpush3.bf16.msra.mxu1 %v3022_v19  ;;  %2669 = vmatprep.subr.bf16.mxu0 %v3023_v20  ;;  %v2443_v54 = vcombine.high %v305_v51, %v313_v52  ;;  %v2442_v55 = vcombine.low %v305_v51, %v313_v52  ;;  %v321_v2 = vld [vmem:[%s3292_s12 + $0x108] sm:$0xff]  ;;  %v3053_v10 = vld [vmem:[%s3721_s1 + $0x120] sm:$0xff]   ;;  %v290_v32 = vld [vmem:[%s3292_s12 + $0x10] sm:$0xff] }
  0x1b   : > { %2709 = vmatprep.subr.bf16.mxu1 %v3024_v21  ;;  %v329_v3 = vld [vmem:[%s3292_s12 + $0x148] sm:$0xff]  ;;  %v3054_v11 = vld [vmem:[%s3721_s1 + $0x1a0] sm:$0xff]   ;;  %v298_v33 = vld [vmem:[%s3292_s12 + $0x50] sm:$0xff] }
  0x1c   : > { %v2459_v5 = vcombine.high %v321_v2, %v329_v3  ;;  %v2458_v7 = vcombine.low %v321_v2, %v329_v3  ;;  %v3055_v12 = vld [vmem:[%s3721_s1 + $0x168] sm:$0xff]   ;;  %v336_v16 = vld [vmem:[%s3292_s12 + $0x180] sm:$0xff]  ;;  %v2428_v34 = vcombine.low %v290_v32, %v298_v33  ;;  %v291_v36 = vld [vmem:[%s3292_s12 + $0x18] sm:$0xff] }
  0x1d   : > { %2670 = vmatpush3.bf16.msra.mxu0 %v3025_v22  ;;  %v3056_v13 = vld [vmem:[%s3721_s1 + $0x1e8] sm:$0xff]   ;;  %v344_v17 = vld [vmem:[%s3292_s12 + $0x1c0] sm:$0xff]  ;;  %v299_v37 = vld [vmem:[%s3292_s12 + $0x58] sm:$0xff] }
  0x1e   : > { %2710 = vmatpush3.bf16.msra.mxu1 %v3026_v23  ;;  %2671 = vmatprep.subr.bf16.mxu0 %v3027_v24  ;;  %v3057_v14 = vld [vmem:[%s3721_s1 + $0x128] sm:$0xff]   ;;  %v2473_v19 = vcombine.high %v336_v16, %v344_v17  ;;  %v2472_v21 = vcombine.low %v336_v16, %v344_v17  ;;  %v3059_v24 = vld [vmem:[%s3721_s1 + $0x170] sm:$0xff]   ;;  %v2431_v39 = vcombine.high %v291_v36, %v299_v37  ;;  %v315_v51 = vld [vmem:[%s3292_s12 + $0xd8] sm:$0xff] }
  0x1f   : > { %2711 = vmatprep.subr.bf16.mxu1 %v3028_v25  ;;  %v3058_v15 = vld [vmem:[%s3721_s1 + $0x1a8] sm:$0xff]   ;;  %v3060_v25 = vld [vmem:[%s3721_s1 + $0x1f0] sm:$0xff]   ;;  %v323_v2 = vld [vmem:[%s3292_s12 + $0x118] sm:$0xff] }
  0x20   : > { %v337_v18 = vld [vmem:[%s3292_s12 + $0x188] sm:$0xff]  ;;  %v306_v48 = vld [vmem:[%s3292_s12 + $0x90] sm:$0xff] }
  0x21   : > { %2672 = vmatpush3.bf16.msra.mxu0 %v3029_v26  ;;  %v345_v20 = vld [vmem:[%s3292_s12 + $0x1c8] sm:$0xff]  ;;  %v3061_v26 = vld [vmem:[%s3721_s1 + $0x130] sm:$0xff]  }
  0x22   : > { %2712 = vmatpush3.bf16.msra.mxu1 %v3030_v27  ;;  %2673 = vmatprep.subr.bf16.mxu0 %v3031_v28  ;;  %v2475_v22 = vcombine.high %v337_v18, %v345_v20  ;;  %v2474_v23 = vcombine.low %v337_v18, %v345_v20  ;;  %v3062_v27 = vld [vmem:[%s3721_s1 + $0x1b0] sm:$0xff]   ;;  %v3063_v28 = vld [vmem:[%s3721_s1 + $0x178] sm:$0xff]  }
  0x23   : > { %2713 = vmatprep.subr.bf16.mxu1 %v3032_v29  ;;  %v3064_v29 = vld [vmem:[%s3721_s1 + $0x1f8] sm:$0xff]   ;;  %v314_v49 = vld [vmem:[%s3292_s12 + $0xd0] sm:$0xff] }
  0x24   : > { %v2445_v52 = vcombine.high %v306_v48, %v314_v49  ;;  %v322_v0 = vld [vmem:[%s3292_s12 + $0x110] sm:$0xff]  ;;  %v347_v20 = vld [vmem:[%s3292_s12 + $0x1d8] sm:$0xff] }
  0x25   : > { %2674 = vmatpush3.bf16.msra.mxu0 %v3033_v30  ;;  %v3065_v30 = vld [vmem:[%s3721_s1 + $0x138] sm:$0xff]   ;;  %v330_v1 = vld [vmem:[%s3292_s12 + $0x150] sm:$0xff] }
  0x26   : > { %2714 = vmatpush3.bf16.msra.mxu1 %v3034_v31  ;;  %2739 = vmatprep.subr.bf16.mxu0 %v3035_v40  ;;  %v3066_v31 = vld [vmem:[%s3721_s1 + $0x1b8] sm:$0xff]   ;;  %v3067_v40 = vld [vmem:[%s3721_s1 + $0x240] sm:$0xff]   ;;  %v2461_v3 = vcombine.high %v322_v0, %v330_v1  ;;  %v338_v16 = vld [vmem:[%s3292_s12 + $0x190] sm:$0xff] }
  0x27   : > { %2779 = vmatprep.subr.bf16.mxu1 %v3036_v41  ;;  %v3068_v41 = vld [vmem:[%s3721_s1 + $0x2c0] sm:$0xff]   ;;  %v346_v17 = vld [vmem:[%s3292_s12 + $0x1d0] sm:$0xff] }
  0x28   : > { %1729 = vmatmul.mubr.bf16.vlgmr.msra.gmra.mrb[0].mxu0 %v2424_v35  ;;  %v2429_v35 = vcombine.high %v290_v32, %v298_v33  ;;  %v2477_v18 = vcombine.high %v338_v16, %v346_v17  ;;  %v292_v32 = vld [vmem:[%s3292_s12 + $0x20] sm:$0xff] }
  0x29   : > { %1794 = vmatmul.mubr.bf16.vlgmr.msra.gmra.mrb[0].mxu1 %v2426_v38  ;;  %2740 = vmatpush3.bf16.msra.mxu0 %v3037_v42  ;;  %v2430_v38 = vcombine.low %v291_v36, %v299_v37  ;;  %v3069_v42 = vld [vmem:[%s3721_s1 + $0x200] sm:$0xff]  }
  0x2a   : > { %2780 = vmatpush3.bf16.msra.mxu1 %v3038_v43  ;;  %2741 = vmatprep.subr.bf16.mxu0 %v3039_v44  ;;  %v3070_v43 = vld [vmem:[%s3721_s1 + $0x280] sm:$0xff]   ;;  %v3071_v44 = vld [vmem:[%s3721_s1 + $0x248] sm:$0xff]  }
  0x2b   : > { %2781 = vmatprep.subr.bf16.mxu1 %v3040_v45  ;;  %1736 = vmatprep.mubr.bf16.mxu0 %v2441_v50  ;;  %v3072_v45 = vld [vmem:[%s3721_s1 + $0x2c8] sm:$0xff]   ;;  %v307_v50 = vld [vmem:[%s3292_s12 + $0x98] sm:$0xff]  ;;  %v300_v33 = vld [vmem:[%s3292_s12 + $0x60] sm:$0xff] }
  0x2c   : > { %1801 = vmatprep.mubr.bf16.mxu1 %v2443_v54  ;;  %v2444_v54 = vcombine.low %v306_v48, %v314_v49  ;;  %v2432_v36 = vcombine.low %v292_v32, %v300_v33  ;;  %v2433_v37 = vcombine.high %v292_v32, %v300_v33  ;;  %v308_v48 = vld [vmem:[%s3292_s12 + $0xa0] sm:$0xff]  ;;  %v294_v32 = vld [vmem:[%s3292_s12 + $0x30] sm:$0xff] }
  0x2d   : > { %2742 = vmatpush3.bf16.msra.mxu0 %v3041_v46  ;;  %v3073_v46 = vld [vmem:[%s3721_s1 + $0x208] sm:$0xff]   ;;  %v316_v49 = vld [vmem:[%s3292_s12 + $0xe0] sm:$0xff]  ;;  %v302_v33 = vld [vmem:[%s3292_s12 + $0x70] sm:$0xff] }
  0x2e   : > { %2782 = vmatpush3.bf16.msra.mxu1 %v3042_v47  ;;  %2743 = vmatprep.subr.bf16.mxu0 %v3043_v56  ;;  %v3074_v47 = vld [vmem:[%s3721_s1 + $0x288] sm:$0xff]   ;;  %v3075_v56 = vld [vmem:[%s3721_s1 + $0x250] sm:$0xff]  }
  0x2f   : > { %2783 = vmatprep.subr.bf16.mxu1 %v3044_v57  ;;  %v3076_v57 = vld [vmem:[%s3721_s1 + $0x2d0] sm:$0xff]  }
  0x30   : > { %1737 = vmatmul.mubr.bf16.gmra.mrb[4].mxu0 %v2440_v53  ;;  %v2447_v53 = vcombine.high %v307_v50, %v315_v51 }
  0x31   : > { %1802 = vmatmul.mubr.bf16.gmra.mrb[4].mxu1 %v2442_v55  ;;  %2744 = vmatpush3.bf16.msra.mxu0 %v3045_v58  ;;  %v2446_v55 = vcombine.low %v307_v50, %v315_v51  ;;  %v3077_v58 = vld [vmem:[%s3721_s1 + $0x210] sm:$0xff]   ;;  %v309_v50 = vld [vmem:[%s3292_s12 + $0xa8] sm:$0xff]  ;;  %v2449_v51 = vcombine.high %v308_v48, %v316_v49 }
  0x32   : > { %2784 = vmatpush3.bf16.msra.mxu1 %v3046_v59  ;;  %2745 = vmatprep.subr.bf16.mxu0 %v3047_v60  ;;  %v3078_v59 = vld [vmem:[%s3721_s1 + $0x290] sm:$0xff]   ;;  %v3079_v60 = vld [vmem:[%s3721_s1 + $0x258] sm:$0xff]  }
  0x33   : > { %2785 = vmatprep.subr.bf16.mxu1 %v3048_v61  ;;  %1744 = vmatprep.mubr.bf16.mxu0 %v2457_v4  ;;  %v3080_v61 = vld [vmem:[%s3721_s1 + $0x2d8] sm:$0xff]  }
  0x34   : > { %1809 = vmatprep.mubr.bf16.mxu1 %v2459_v5  ;;  %v331_v4 = vld [vmem:[%s3292_s12 + $0x158] sm:$0xff]  ;;  %v2460_v5 = vcombine.low %v322_v0, %v330_v1  ;;  %v324_v0 = vld [vmem:[%s3292_s12 + $0x120] sm:$0xff] }
  0x35   : > { %2746 = vmatpush3.bf16.msra.mxu0 %v3049_v62  ;;  %v3081_v62 = vld [vmem:[%s3721_s1 + $0x218] sm:$0xff]   ;;  %v332_v1 = vld [vmem:[%s3292_s12 + $0x160] sm:$0xff] }
  0x36   : > { %2786 = vmatpush3.bf16.msra.mxu1 %v3050_v63  ;;  %2747 = vmatprep.subr.bf16.mxu0 %v3051_v8  ;;  %v3082_v63 = vld [vmem:[%s3721_s1 + $0x298] sm:$0xff]   ;;  %v3083_v8 = vld [vmem:[%s3721_s1 + $0x260] sm:$0xff]  }
  0x37   : > { %2787 = vmatprep.subr.bf16.mxu1 %v3052_v9  ;;  %v3084_v9 = vld [vmem:[%s3721_s1 + $0x2e0] sm:$0xff]  }
  0x38   : > { %1745 = vmatmul.mubr.bf16.gmra.mrb[8].mxu0 %v2456_v6  ;;  %v2463_v6 = vcombine.high %v323_v2, %v331_v4 }
  0x39   : > { %1810 = vmatmul.mubr.bf16.gmra.mrb[8].mxu1 %v2458_v7  ;;  %2748 = vmatpush3.bf16.msra.mxu0 %v3053_v10  ;;  %v2462_v7 = vcombine.low %v323_v2, %v331_v4  ;;  %v3085_v10 = vld [vmem:[%s3721_s1 + $0x220] sm:$0xff]   ;;  %v2465_v2 = vcombine.high %v324_v0, %v332_v1  ;;  %v333_v4 = vld [vmem:[%s3292_s12 + $0x168] sm:$0xff] }
  0x3a   : > { %2788 = vmatpush3.bf16.msra.mxu1 %v3054_v11  ;;  %2749 = vmatprep.subr.bf16.mxu0 %v3055_v12  ;;  %v3086_v11 = vld [vmem:[%s3721_s1 + $0x2a0] sm:$0xff]   ;;  %v3087_v12 = vld [vmem:[%s3721_s1 + $0x268] sm:$0xff]  }
  0x3b   : > { %2789 = vmatprep.subr.bf16.mxu1 %v3056_v13  ;;  %1752 = vmatprep.mubr.bf16.mxu0 %v2473_v19  ;;  %v3088_v13 = vld [vmem:[%s3721_s1 + $0x2e8] sm:$0xff]   ;;  %v339_v19 = vld [vmem:[%s3292_s12 + $0x198] sm:$0xff] }
  0x3c   : > { %1817 = vmatprep.mubr.bf16.mxu1 %v2475_v22  ;;  %v2479_v22 = vcombine.high %v339_v19, %v347_v20 }
  0x3d   : > { %2750 = vmatpush3.bf16.msra.mxu0 %v3057_v14  ;;  %v3089_v14 = vld [vmem:[%s3721_s1 + $0x228] sm:$0xff]  }
  0x3e   : > { %2790 = vmatpush3.bf16.msra.mxu1 %v3058_v15  ;;  %2751 = vmatprep.subr.bf16.mxu0 %v3059_v24  ;;  %v3090_v15 = vld [vmem:[%s3721_s1 + $0x2a8] sm:$0xff]   ;;  %v3091_v24 = vld [vmem:[%s3721_s1 + $0x270] sm:$0xff]  }
  0x3f   : > { %2791 = vmatprep.subr.bf16.mxu1 %v3060_v25  ;;  %v3092_v25 = vld [vmem:[%s3721_s1 + $0x2f0] sm:$0xff]  }
  0x40   : > { %1753 = vmatmul.mubr.bf16.gmra.mrb[12].mxu0 %v2472_v21  ;;  %v2476_v21 = vcombine.low %v338_v16, %v346_v17  ;;  %v340_v16 = vld [vmem:[%s3292_s12 + $0x1a0] sm:$0xff] }
  0x41   : > { %1818 = vmatmul.mubr.bf16.gmra.mrb[12].mxu1 %v2474_v23  ;;  %2752 = vmatpush3.bf16.msra.mxu0 %v3061_v26  ;;  %v2478_v23 = vcombine.low %v339_v19, %v347_v20  ;;  %v3093_v26 = vld [vmem:[%s3721_s1 + $0x230] sm:$0xff]   ;;  %v348_v17 = vld [vmem:[%s3292_s12 + $0x1e0] sm:$0xff]  ;;  %v349_v19 = vld [vmem:[%s3292_s12 + $0x1e8] sm:$0xff] }
  0x42   : > { %2792 = vmatpush3.bf16.msra.mxu1 %v3062_v27  ;;  %2753 = vmatprep.subr.bf16.mxu0 %v3063_v28  ;;  %v3094_v27 = vld [vmem:[%s3721_s1 + $0x2b0] sm:$0xff]   ;;  %v3095_v28 = vld [vmem:[%s3721_s1 + $0x278] sm:$0xff]   ;;  %v2481_v20 = vcombine.high %v340_v16, %v348_v17 }
  0x43   : > { %2793 = vmatprep.subr.bf16.mxu1 %v3064_v29  ;;  %1858 = vmatprep.mubr.bf16.mxu0 %v2429_v35  ;;  %v3096_v29 = vld [vmem:[%s3721_s1 + $0x2f8] sm:$0xff]   ;;  %v301_v35 = vld [vmem:[%s3292_s12 + $0x68] sm:$0xff] }
  0x44   : > { %1923 = vmatprep.mubr.bf16.mxu1 %v2431_v39 }
  0x45   : > { %2754 = vmatpush3.bf16.msra.mxu0 %v3065_v30  ;;  %v3097_v30 = vld [vmem:[%s3721_s1 + $0x238] sm:$0xff]  }
  0x46   : > { %2794 = vmatpush3.bf16.msra.mxu1 %v3066_v31  ;;  %2819 = vmatprep.subr.bf16.mxu0 %v3067_v40  ;;  %v3098_v31 = vld [vmem:[%s3721_s1 + $0x2b8] sm:$0xff]   ;;  %v3099_v40 = vld [vmem:[%s3721_s1 + $0x340] sm:$0xff]  }
  0x47   : > { %2859 = vmatprep.subr.bf16.mxu1 %v3068_v41  ;;  %v3100_v41 = vld [vmem:[%s3721_s1 + $0x3c0] sm:$0xff]  }
  0x48   : > { %1859 = vmatmul.mubr.bf16.vlgmr.msra.gmra.mrb[16].mxu0 %v2428_v34  ;;  %v293_v34 = vld [vmem:[%s3292_s12 + $0x28] sm:$0xff] }
  0x49   : > { %1924 = vmatmul.mubr.bf16.vlgmr.msra.gmra.mrb[16].mxu1 %v2430_v38  ;;  %2820 = vmatpush3.bf16.msra.mxu0 %v3069_v42  ;;  %v2434_v38 = vcombine.low %v293_v34, %v301_v35  ;;  %v2435_v39 = vcombine.high %v293_v34, %v301_v35  ;;  %v3101_v42 = vld [vmem:[%s3721_s1 + $0x300] sm:$0xff]   ;;  %v295_v34 = vld [vmem:[%s3292_s12 + $0x38] sm:$0xff]  ;;  %v2436_v35 = vcombine.low %v294_v32, %v302_v33 }
  0x4a   : > { %2860 = vmatpush3.bf16.msra.mxu1 %v3070_v43  ;;  %2821 = vmatprep.subr.bf16.mxu0 %v3071_v44  ;;  %v3102_v43 = vld [vmem:[%s3721_s1 + $0x380] sm:$0xff]   ;;  %v3103_v44 = vld [vmem:[%s3721_s1 + $0x348] sm:$0xff]  }
  0x4b   : > { %2861 = vmatprep.subr.bf16.mxu1 %v3072_v45  ;;  %1866 = vmatprep.mubr.bf16.mxu0 %v2445_v52  ;;  %v3104_v45 = vld [vmem:[%s3721_s1 + $0x3c8] sm:$0xff]  }
  0x4c   : > { %1931 = vmatprep.mubr.bf16.mxu1 %v2447_v53  ;;  %v317_v52 = vld [vmem:[%s3292_s12 + $0xe8] sm:$0xff]  ;;  %v2448_v53 = vcombine.low %v308_v48, %v316_v49  ;;  %v327_v48 = vld [vmem:[%s3292_s12 + $0x138] sm:$0xff] }
  0x4d   : > { %2822 = vmatpush3.bf16.msra.mxu0 %v3073_v46  ;;  %v3105_v46 = vld [vmem:[%s3721_s1 + $0x308] sm:$0xff]   ;;  %v335_v49 = vld [vmem:[%s3292_s12 + $0x178] sm:$0xff] }
  0x4e   : > { %2862 = vmatpush3.bf16.msra.mxu1 %v3074_v47  ;;  %2823 = vmatprep.subr.bf16.mxu0 %v3075_v56  ;;  %v3106_v47 = vld [vmem:[%s3721_s1 + $0x388] sm:$0xff]   ;;  %v3107_v56 = vld [vmem:[%s3721_s1 + $0x350] sm:$0xff]  }
  0x4f   : > { %2863 = vmatprep.subr.bf16.mxu1 %v3076_v57  ;;  %v3108_v57 = vld [vmem:[%s3721_s1 + $0x3d0] sm:$0xff]  }
  0x50   : > { %1867 = vmatmul.mubr.bf16.gmra.mrb[20].mxu0 %v2444_v54  ;;  %v2451_v54 = vcombine.high %v309_v50, %v317_v52 }
  0x51   : > { %1932 = vmatmul.mubr.bf16.gmra.mrb[20].mxu1 %v2446_v55  ;;  %2824 = vmatpush3.bf16.msra.mxu0 %v3077_v58  ;;  %v2450_v55 = vcombine.low %v309_v50, %v317_v52  ;;  %v3109_v58 = vld [vmem:[%s3721_s1 + $0x310] sm:$0xff]  }
  0x52   : > { %2864 = vmatpush3.bf16.msra.mxu1 %v3078_v59  ;;  %2825 = vmatprep.subr.bf16.mxu0 %v3079_v60  ;;  %v3110_v59 = vld [vmem:[%s3721_s1 + $0x390] sm:$0xff]   ;;  %v3111_v60 = vld [vmem:[%s3721_s1 + $0x358] sm:$0xff]  }
  0x53   : > { %2865 = vmatprep.subr.bf16.mxu1 %v3080_v61  ;;  %1874 = vmatprep.mubr.bf16.mxu0 %v2461_v3  ;;  %v3112_v61 = vld [vmem:[%s3721_s1 + $0x3d8] sm:$0xff]   ;;  %v325_v3 = vld [vmem:[%s3292_s12 + $0x128] sm:$0xff] }
  0x54   : > { %1939 = vmatprep.mubr.bf16.mxu1 %v2463_v6  ;;  %v2467_v6 = vcombine.high %v325_v3, %v333_v4 }
  0x55   : > { %2826 = vmatpush3.bf16.msra.mxu0 %v3081_v62  ;;  %v3113_v62 = vld [vmem:[%s3721_s1 + $0x318] sm:$0xff]  }
  0x56   : > { %2866 = vmatpush3.bf16.msra.mxu1 %v3082_v63  ;;  %2827 = vmatprep.subr.bf16.mxu0 %v3083_v8  ;;  %v3114_v63 = vld [vmem:[%s3721_s1 + $0x398] sm:$0xff]   ;;  %v3115_v8 = vld [vmem:[%s3721_s1 + $0x360] sm:$0xff]  }
  0x57   : > { %2867 = vmatprep.subr.bf16.mxu1 %v3084_v9  ;;  %v3116_v9 = vld [vmem:[%s3721_s1 + $0x3e0] sm:$0xff]  }
  0x58   : > { %1875 = vmatmul.mubr.bf16.gmra.mrb[24].mxu0 %v2460_v5  ;;  %v2464_v5 = vcombine.low %v324_v0, %v332_v1 }
  0x59   : > { %1940 = vmatmul.mubr.bf16.gmra.mrb[24].mxu1 %v2462_v7  ;;  %2828 = vmatpush3.bf16.msra.mxu0 %v3085_v10  ;;  %v2466_v7 = vcombine.low %v325_v3, %v333_v4  ;;  %v3117_v10 = vld [vmem:[%s3721_s1 + $0x320] sm:$0xff]  }
  0x5a   : > { %2868 = vmatpush3.bf16.msra.mxu1 %v3086_v11  ;;  %2829 = vmatprep.subr.bf16.mxu0 %v3087_v12  ;;  %v3118_v11 = vld [vmem:[%s3721_s1 + $0x3a0] sm:$0xff]   ;;  %v3119_v12 = vld [vmem:[%s3721_s1 + $0x368] sm:$0xff]  }
  0x5b   : > { %2869 = vmatprep.subr.bf16.mxu1 %v3088_v13  ;;  %1882 = vmatprep.mubr.bf16.mxu0 %v2477_v18  ;;  %v3120_v13 = vld [vmem:[%s3721_s1 + $0x3e8] sm:$0xff]  }
  0x5c   : > { %1947 = vmatprep.mubr.bf16.mxu1 %v2479_v22  ;;  %v341_v18 = vld [vmem:[%s3292_s12 + $0x1a8] sm:$0xff]  ;;  %v2480_v22 = vcombine.low %v340_v16, %v348_v17 }
  0x5d   : > { %2830 = vmatpush3.bf16.msra.mxu0 %v3089_v14  ;;  %v3121_v14 = vld [vmem:[%s3721_s1 + $0x328] sm:$0xff]  }
  0x5e   : > { %2870 = vmatpush3.bf16.msra.mxu1 %v3090_v15  ;;  %2831 = vmatprep.subr.bf16.mxu0 %v3091_v24  ;;  %v3122_v15 = vld [vmem:[%s3721_s1 + $0x3a8] sm:$0xff]   ;;  %v3123_v24 = vld [vmem:[%s3721_s1 + $0x370] sm:$0xff]  }
  0x5f   : > { %2871 = vmatprep.subr.bf16.mxu1 %v3092_v25  ;;  %v3124_v25 = vld [vmem:[%s3721_s1 + $0x3f0] sm:$0xff]  }
  0x60   : > { %1883 = vmatmul.mubr.bf16.gmra.mrb[28].mxu0 %v2476_v21  ;;  %v2483_v21 = vcombine.high %v341_v18, %v349_v19 }
  0x61   : > { %1948 = vmatmul.mubr.bf16.gmra.mrb[28].mxu1 %v2478_v23  ;;  %2832 = vmatpush3.bf16.msra.mxu0 %v3093_v26  ;;  %v2482_v23 = vcombine.low %v341_v18, %v349_v19  ;;  %v3125_v26 = vld [vmem:[%s3721_s1 + $0x330] sm:$0xff]  }
  0x62   : > { %2872 = vmatpush3.bf16.msra.mxu1 %v3094_v27  ;;  %2833 = vmatprep.subr.bf16.mxu0 %v3095_v28  ;;  %v3126_v27 = vld [vmem:[%s3721_s1 + $0x3b0] sm:$0xff]   ;;  %v3127_v28 = vld [vmem:[%s3721_s1 + $0x378] sm:$0xff]  }
  0x63   : > { %2873 = vmatprep.subr.bf16.mxu1 %v3096_v29  ;;  %1988 = vmatprep.mubr.bf16.mxu0 %v2433_v37  ;;  %v3128_v29 = vld [vmem:[%s3721_s1 + $0x3f8] sm:$0xff]  }
  0x64   : > { %2053 = vmatprep.mubr.bf16.mxu1 %v2435_v39  ;;  %v303_v37 = vld [vmem:[%s3292_s12 + $0x78] sm:$0xff]  ;;  %v318_v39 = vld [vmem:[%s3292_s12 + $0xf0] sm:$0xff] }
  0x65   : > { %2834 = vmatpush3.bf16.msra.mxu0 %v3097_v30  ;;  %v3129_v30 = vld [vmem:[%s3721_s1 + $0x338] sm:$0xff]  }
  0x66   : > { %2874 = vmatpush3.bf16.msra.mxu1 %v3098_v31  ;;  %2899 = vmatprep.subr.bf16.mxu0 %v3099_v40  ;;  %v3130_v31 = vld [vmem:[%s3721_s1 + $0x3b8] sm:$0xff]   ;;  %v2438_v40 = vcombine.low %v295_v34, %v303_v37 }
  0x67   : > { %2939 = vmatprep.subr.bf16.mxu1 %v3100_v41  ;;  %v2439_v41 = vcombine.high %v295_v34, %v303_v37 }
  0x68   : > { %1989 = vmatmul.mubr.bf16.vlgmr.msra.gmra.mrb[32].mxu0 %v2432_v36  ;;  %v2437_v36 = vcombine.high %v294_v32, %v302_v33 }
  0x69   : > { %2054 = vmatmul.mubr.bf16.vlgmr.msra.gmra.mrb[32].mxu1 %v2434_v38  ;;  %2900 = vmatpush3.bf16.msra.mxu0 %v3101_v42  ;;  %v310_v38 = vld [vmem:[%s3292_s12 + $0xb0] sm:$0xff] }
  0x6a   : > { %2940 = vmatpush3.bf16.msra.mxu1 %v3102_v43  ;;  %2901 = vmatprep.subr.bf16.mxu0 %v3103_v44  ;;  %v2453_v42 = vcombine.high %v310_v38, %v318_v39  ;;  %v311_v43 = vld [vmem:[%s3292_s12 + $0xb8] sm:$0xff]  ;;  %v2452_v50 = vcombine.low %v310_v38, %v318_v39 }
  0x6b   : > { %2941 = vmatprep.subr.bf16.mxu1 %v3104_v45  ;;  %1996 = vmatprep.mubr.bf16.mxu0 %v2449_v51  ;;  %v319_v44 = vld [vmem:[%s3292_s12 + $0xf8] sm:$0xff] }
  0x6c   : > { %2061 = vmatprep.mubr.bf16.mxu1 %v2451_v54  ;;  %v2455_v45 = vcombine.high %v311_v43, %v319_v44  ;;  %v2454_v51 = vcombine.low %v311_v43, %v319_v44  ;;  %v342_v54 = vld [vmem:[%s3292_s12 + $0x1b0] sm:$0xff] }
  0x6d   : > { %2902 = vmatpush3.bf16.msra.mxu0 %v3105_v46  ;;  %v326_v46 = vld [vmem:[%s3292_s12 + $0x130] sm:$0xff] }
  0x6e   : > { %2942 = vmatpush3.bf16.msra.mxu1 %v3106_v47  ;;  %2903 = vmatprep.subr.bf16.mxu0 %v3107_v56  ;;  %v334_v47 = vld [vmem:[%s3292_s12 + $0x170] sm:$0xff]  ;;  %v343_v56 = vld [vmem:[%s3292_s12 + $0x1b8] sm:$0xff] }
  0x6f   : > { %2943 = vmatprep.subr.bf16.mxu1 %v3108_v57  ;;  %v2469_v52 = vcombine.high %v326_v46, %v334_v47  ;;  %v351_v57 = vld [vmem:[%s3292_s12 + $0x1f8] sm:$0xff] }
  0x70   : > { %1997 = vmatmul.mubr.bf16.gmra.mrb[36].mxu0 %v2448_v53  ;;  %v2471_v53 = vcombine.high %v327_v48, %v335_v49 }
  0x71   : > { %2062 = vmatmul.mubr.bf16.gmra.mrb[36].mxu1 %v2450_v55  ;;  %2904 = vmatpush3.bf16.msra.mxu0 %v3109_v58  ;;  %v350_v55 = vld [vmem:[%s3292_s12 + $0x1f0] sm:$0xff]  ;;  %v2468_v58 = vcombine.low %v326_v46, %v334_v47 }
  0x72   : > { %2944 = vmatpush3.bf16.msra.mxu1 %v3110_v59  ;;  %2905 = vmatprep.subr.bf16.mxu0 %v3111_v60  ;;  %v2470_v59 = vcombine.low %v327_v48, %v335_v49  ;;  %v2485_v60 = vcombine.high %v342_v54, %v350_v55 }
  0x73   : > { %2945 = vmatprep.subr.bf16.mxu1 %v3112_v61  ;;  %2004 = vmatprep.mubr.bf16.mxu0 %v2465_v2  ;;  %v2487_v61 = vcombine.high %v343_v56, %v351_v57 }
  0x74   : > { %2069 = vmatprep.mubr.bf16.mxu1 %v2467_v6 }
  0x75   : > { %2906 = vmatpush3.bf16.msra.mxu0 %v3113_v62  ;;  %v2484_v62 = vcombine.low %v342_v54, %v350_v55 }
  0x76   : > { %2946 = vmatpush3.bf16.msra.mxu1 %v3114_v63  ;;  %2907 = vmatprep.subr.bf16.mxu0 %v3115_v8  ;;  %v2486_v63 = vcombine.low %v343_v56, %v351_v57 }
  0x77   : > { %2947 = vmatprep.subr.bf16.mxu1 %v3116_v9 }
  0x78   : > { %2005 = vmatmul.mubr.bf16.gmra.mrb[40].mxu0 %v2464_v5 }
  0x79   : > { %2070 = vmatmul.mubr.bf16.gmra.mrb[40].mxu1 %v2466_v7  ;;  %2908 = vmatpush3.bf16.msra.mxu0 %v3117_v10 }
  0x7a   : > { %2948 = vmatpush3.bf16.msra.mxu1 %v3118_v11  ;;  %2909 = vmatprep.subr.bf16.mxu0 %v3119_v12 }
  0x7b   : > { %2949 = vmatprep.subr.bf16.mxu1 %v3120_v13  ;;  %2012 = vmatprep.mubr.bf16.mxu0 %v2481_v20 }
  0x7c   : > { %2077 = vmatprep.mubr.bf16.mxu1 %v2483_v21 }
  0x7d   : > { %2910 = vmatpush3.bf16.msra.mxu0 %v3121_v14 }
  0x7e   : > { %2950 = vmatpush3.bf16.msra.mxu1 %v3122_v15  ;;  %2911 = vmatprep.subr.bf16.mxu0 %v3123_v24 }
  0x7f   : > { %2951 = vmatprep.subr.bf16.mxu1 %v3124_v25 }
  0x80   : > { %2013 = vmatmul.mubr.bf16.gmra.mrb[44].mxu0 %v2480_v22 }
  0x81   : > { %2078 = vmatmul.mubr.bf16.gmra.mrb[44].mxu1 %v2482_v23  ;;  %2912 = vmatpush3.bf16.msra.mxu0 %v3125_v26 }
  0x82   : > { %2952 = vmatpush3.bf16.msra.mxu1 %v3126_v27  ;;  %2913 = vmatprep.subr.bf16.mxu0 %v3127_v28 }
  0x83   : > { %2953 = vmatprep.subr.bf16.mxu1 %v3128_v29  ;;  %2118 = vmatprep.mubr.bf16.mxu0 %v2437_v36 }
  0x84   : > { %2183 = vmatprep.mubr.bf16.mxu1 %v2439_v41 }
  0x85   : > { %2914 = vmatpush3.bf16.msra.mxu0 %v3129_v30 }
  0x86   : > { %2954 = vmatpush3.bf16.msra.mxu1 %v3130_v31 }
  0x88   : > { %2119 = vmatmul.mubr.bf16.vlgmr.msra.gmra.mrb[48].mxu0 %v2436_v35 }
  0x89   : > { %2184 = vmatmul.mubr.bf16.vlgmr.msra.gmra.mrb[48].mxu1 %v2438_v40  ;;  %2126 = vmatprep.mubr.bf16.mxu0 %v2453_v42 }
  0x8a   : > { %2191 = vmatprep.mubr.bf16.mxu1 %v2455_v45 }
  0x90   : > { %2127 = vmatmul.mubr.bf16.gmra.mrb[52].mxu0 %v2452_v50 }
  0x91   : > { %2192 = vmatmul.mubr.bf16.gmra.mrb[52].mxu1 %v2454_v51  ;;  %2134 = vmatprep.mubr.bf16.mxu0 %v2469_v52 }
  0x92   : > { %2199 = vmatprep.mubr.bf16.mxu1 %v2471_v53 }
  0x98   : > { %2135 = vmatmul.mubr.bf16.gmra.mrb[56].mxu0 %v2468_v58 }
  0x99   : > { %2200 = vmatmul.mubr.bf16.gmra.mrb[56].mxu1 %v2470_v59  ;;  %2142 = vmatprep.mubr.bf16.mxu0 %v2485_v60 }
  0x9a   : > { %2207 = vmatprep.mubr.bf16.mxu1 %v2487_v61 }
  0xa0   : > { %2143 = vmatmul.mubr.bf16.gmra.mrb[60].mxu0 %v2484_v62 }
  0xa1   : > { %2208 = vmatmul.mubr.bf16.gmra.mrb[60].mxu1 %v2486_v63 }
  0xfb   : > { %v2675_v0 = vpop.f32.mrb[0].mxu0 }
  0xfc   : > { %v2715_v1 = vpop.f32.mrb[0].mxu1  ;;  %v2676_v2 = vpop.f32.mrb[1].mxu0 }
  0xfd   : > { %v2677_v3 = vadd.f32 %v2676_v2, %v2675_v0  ;;  %v2716_v4 = vpop.f32.mrb[1].mxu1  ;;  %v2678_v5 = vpop.f32.mrb[2].mxu0 }
  0xfe   : > { %v2717_v6 = vadd.f32 %v2716_v4, %v2715_v1  ;;  %v2718_v7 = vpop.f32.mrb[2].mxu1  ;;  %v2679_v8 = vpop.f32.mrb[3].mxu0 }
  0xff   : > { %v2680_v9 = vadd.f32 %v2679_v8, %v2678_v5  ;;  %v2719_v10 = vpop.f32.mrb[3].mxu1 }
 0x100   : > { %v1796_v11 = vadd.f32 %v2717_v6, %v2677_v3  ;;  %v2720_v12 = vadd.f32 %v2719_v10, %v2718_v7 }
 0x102   : > { %v1799_v13 = vadd.f32 %v2720_v12, %v2680_v9 }
 0x103   : > { %v2681_v14 = vpop.f32.mrb[4].mxu0 }
 0x104   : > { %v2721_v15 = vpop.f32.mrb[4].mxu1  ;;  %v2682_v16 = vpop.f32.mrb[5].mxu0 }
 0x105   : > { %v2683_v17 = vadd.f32 %v2682_v16, %v2681_v14  ;;  %v2722_v18 = vpop.f32.mrb[5].mxu1  ;;  %v2684_v19 = vpop.f32.mrb[6].mxu0 }
 0x106   : > { %v2723_v20 = vadd.f32 %v2722_v18, %v2721_v15  ;;  %v2724_v21 = vpop.f32.mrb[6].mxu1  ;;  %v2685_v22 = vpop.f32.mrb[7].mxu0 }
 0x107   : > { %v2686_v23 = vadd.f32 %v2685_v22, %v2684_v19  ;;  %v2725_v24 = vpop.f32.mrb[7].mxu1 }
 0x108   : > { %v1804_v25 = vadd.f32 %v2723_v20, %v2683_v17  ;;  %v2726_v26 = vadd.f32 %v2725_v24, %v2724_v21 }
 0x10a   : > { %v1807_v27 = vadd.f32 %v2726_v26, %v2686_v23 }
 0x10b   : > { %v2687_v28 = vpop.f32.mrb[8].mxu0 }
 0x10c   : > { %v2727_v29 = vpop.f32.mrb[8].mxu1  ;;  %v2688_v30 = vpop.f32.mrb[9].mxu0 }
 0x10d   : > { %v2728_v31 = vpop.f32.mrb[9].mxu1  ;;  %v2689_v32 = vadd.f32 %v2688_v30, %v2687_v28  ;;  %v2690_v34 = vpop.f32.mrb[10].mxu0 }
 0x10e   : > { %v2729_v33 = vadd.f32 %v2728_v31, %v2727_v29  ;;  %v2730_v35 = vpop.f32.mrb[10].mxu1  ;;  %v2691_v36 = vpop.f32.mrb[11].mxu0 }
 0x10f   : > { %v2731_v37 = vpop.f32.mrb[11].mxu1  ;;  %v2692_v39 = vadd.f32 %v2691_v36, %v2690_v34 }
 0x110   : > { %v1812_v38 = vadd.f32 %v2729_v33, %v2689_v32  ;;  %v2732_v40 = vadd.f32 %v2731_v37, %v2730_v35 }
 0x112   : > { %v1815_v41 = vadd.f32 %v2732_v40, %v2692_v39 }
 0x113   : > { %v2693_v42 = vpop.f32.mrb[12].mxu0 }
 0x114   : > { %v2733_v43 = vpop.f32.mrb[12].mxu1  ;;  %v2694_v44 = vpop.f32.mrb[13].mxu0 }
 0x115   : > { %v2695_v45 = vadd.f32 %v2694_v44, %v2693_v42  ;;  %v2734_v46 = vpop.f32.mrb[13].mxu1  ;;  %v2696_v47 = vpop.f32.mrb[14].mxu0 }
 0x116   : > { %v2735_v48 = vadd.f32 %v2734_v46, %v2733_v43  ;;  %v2736_v49 = vpop.f32.mrb[14].mxu1  ;;  %v2697_v50 = vpop.f32.mrb[15].mxu0 }
 0x117   : > { %v2698_v51 = vadd.f32 %v2697_v50, %v2696_v47  ;;  %v2737_v52 = vpop.f32.mrb[15].mxu1 }
 0x118   : > { %v1820_v53 = vadd.f32 %v2735_v48, %v2695_v45  ;;  %v2738_v54 = vadd.f32 %v2737_v52, %v2736_v49 }
 0x11a   : > { %v3652_v55 = vadd.f32 %v2738_v54, %v2698_v51 }
 0x11b   : > { %v2755_v56 = vpop.f32.mrb[16].mxu0 }
 0x11c   : > { %v2795_v57 = vpop.f32.mrb[16].mxu1  ;;  %v2756_v58 = vpop.f32.mrb[17].mxu0 }
 0x11d   : > { %v2757_v59 = vadd.f32 %v2756_v58, %v2755_v56  ;;  %v2796_v60 = vpop.f32.mrb[17].mxu1  ;;  %v2758_v61 = vpop.f32.mrb[18].mxu0 }
 0x11e   : > { %v2797_v62 = vadd.f32 %v2796_v60, %v2795_v57  ;;  %v2798_v63 = vpop.f32.mrb[18].mxu1  ;;  %v2759_v0 = vpop.f32.mrb[19].mxu0 }
 0x11f   : > { %v1861_v1 = vadd.f32 %v2757_v59, %v1796_v11  ;;  %v2760_v2 = vadd.f32 %v2759_v0, %v2758_v61  ;;  %v2799_v3 = vpop.f32.mrb[19].mxu1 }
 0x120   : > { %v2800_v4 = vadd.f32 %v2799_v3, %v2798_v63 }
 0x121   : > { %v1926_v5 = vadd.f32 %v2797_v62, %v1861_v1  ;;  %v1864_v6 = vadd.f32 %v2760_v2, %v1799_v13 }
 0x123   : > { %v3654_v7 = vadd.f32 %v2800_v4, %v1864_v6  ;;  %v2761_v8 = vpop.f32.mrb[20].mxu0 }
 0x124   : > { %v2801_v9 = vpop.f32.mrb[20].mxu1  ;;  %v2762_v10 = vpop.f32.mrb[21].mxu0 }
 0x125   : > { %v2802_v12 = vpop.f32.mrb[21].mxu1  ;;  %v2763_v14 = vadd.f32 %v2762_v10, %v2761_v8  ;;  %v2764_v16 = vpop.f32.mrb[22].mxu0 }
 0x126   : > { %v2803_v15 = vadd.f32 %v2802_v12, %v2801_v9  ;;  %v2804_v17 = vpop.f32.mrb[22].mxu1  ;;  %v2765_v18 = vpop.f32.mrb[23].mxu0 }
 0x127   : > { %v2805_v19 = vpop.f32.mrb[23].mxu1  ;;  %v1869_v20 = vadd.f32 %v2763_v14, %v1804_v25  ;;  %v2766_v21 = vadd.f32 %v2765_v18, %v2764_v16 }
 0x128   : > { %v2806_v11 = vadd.f32 %v2805_v19, %v2804_v17 }
 0x129   : > { %v1934_v22 = vadd.f32 %v2803_v15, %v1869_v20  ;;  %v1872_v23 = vadd.f32 %v2766_v21, %v1807_v27 }
 0x12b   : > { %v3656_v24 = vadd.f32 %v2806_v11, %v1872_v23  ;;  %v2767_v13 = vpop.f32.mrb[24].mxu0 }
 0x12c   : > { %v2807_v26 = vpop.f32.mrb[24].mxu1  ;;  %v2768_v28 = vpop.f32.mrb[25].mxu0 }
 0x12d   : > { %v2769_v29 = vadd.f32 %v2768_v28, %v2767_v13  ;;  %v2808_v30 = vpop.f32.mrb[25].mxu1  ;;  %v2770_v31 = vpop.f32.mrb[26].mxu0 }
 0x12e   : > { %v2809_v32 = vadd.f32 %v2808_v30, %v2807_v26  ;;  %v2810_v33 = vpop.f32.mrb[26].mxu1  ;;  %v2771_v34 = vpop.f32.mrb[27].mxu0 }
 0x12f   : > { %v1877_v35 = vadd.f32 %v2769_v29, %v1812_v38  ;;  %v2772_v36 = vadd.f32 %v2771_v34, %v2770_v31  ;;  %v2811_v37 = vpop.f32.mrb[27].mxu1 }
 0x130   : > { %v2812_v39 = vadd.f32 %v2811_v37, %v2810_v33 }
 0x131   : > { %v1942_v25 = vadd.f32 %v2809_v32, %v1877_v35  ;;  %v1880_v40 = vadd.f32 %v2772_v36, %v1815_v41 }
 0x133   : > { %v3658_v42 = vadd.f32 %v2812_v39, %v1880_v40  ;;  %v2773_v27 = vpop.f32.mrb[28].mxu0 }
 0x134   : > { %v2813_v43 = vpop.f32.mrb[28].mxu1  ;;  %v2774_v44 = vpop.f32.mrb[29].mxu0 }
 0x135   : > { %v2775_v45 = vadd.f32 %v2774_v44, %v2773_v27  ;;  %v2814_v46 = vpop.f32.mrb[29].mxu1  ;;  %v2776_v47 = vpop.f32.mrb[30].mxu0 }
 0x136   : > { %v2815_v48 = vadd.f32 %v2814_v46, %v2813_v43  ;;  %v2816_v49 = vpop.f32.mrb[30].mxu1  ;;  %v2777_v50 = vpop.f32.mrb[31].mxu0 }
 0x137   : > { %v1885_v51 = vadd.f32 %v2775_v45, %v1820_v53  ;;  %v2778_v52 = vadd.f32 %v2777_v50, %v2776_v47  ;;  %v2817_v54 = vpop.f32.mrb[31].mxu1 }
 0x138   : > { %v2818_v38 = vadd.f32 %v2817_v54, %v2816_v49 }
 0x139   : > { %v1950_v56 = vadd.f32 %v2815_v48, %v1885_v51  ;;  %v1888_v57 = vadd.f32 %v2778_v52, %v3652_v55 }
 0x13b   : > { %v3661_v58 = vadd.f32 %v2818_v38, %v1888_v57  ;;  %v2835_v41 = vpop.f32.mrb[32].mxu0 }
 0x13c   : > { %v2875_v59 = vpop.f32.mrb[32].mxu1  ;;  %v2836_v60 = vpop.f32.mrb[33].mxu0 }
 0x13d   : > { %v2876_v61 = vpop.f32.mrb[33].mxu1  ;;  %v2837_v62 = vadd.f32 %v2836_v60, %v2835_v41  ;;  %v2838_v0 = vpop.f32.mrb[34].mxu0 }
 0x13e   : > { %v2877_v63 = vadd.f32 %v2876_v61, %v2875_v59  ;;  %v2878_v1 = vpop.f32.mrb[34].mxu1  ;;  %v2839_v2 = vpop.f32.mrb[35].mxu0 }
 0x13f   : > { %v2879_v3 = vpop.f32.mrb[35].mxu1  ;;  %v1991_v4 = vadd.f32 %v2837_v62, %v1926_v5  ;;  %v2840_v53 = vadd.f32 %v2839_v2, %v2838_v0 }
 0x140   : > { %v2880_v6 = vadd.f32 %v2879_v3, %v2878_v1 }
 0x141   : > { %v2056_v8 = vadd.f32 %v2877_v63, %v1991_v4  ;;  %v1994_v9 = vadd.f32 %v2840_v53, %v3654_v7 }
 0x143   : > { %v3664_v10 = vadd.f32 %v2880_v6, %v1994_v9  ;;  %v2841_v55 = vpop.f32.mrb[36].mxu0 }
 0x144   : > { %v2881_v12 = vpop.f32.mrb[36].mxu1  ;;  %v2842_v14 = vpop.f32.mrb[37].mxu0 }
 0x145   : > { %v2843_v15 = vadd.f32 %v2842_v14, %v2841_v55  ;;  %v2882_v16 = vpop.f32.mrb[37].mxu1  ;;  %v2844_v17 = vpop.f32.mrb[38].mxu0 }
 0x146   : > { %v2883_v18 = vadd.f32 %v2882_v16, %v2881_v12  ;;  %v2884_v19 = vpop.f32.mrb[38].mxu1  ;;  %v2845_v20 = vpop.f32.mrb[39].mxu0 }
 0x147   : > { %v1999_v21 = vadd.f32 %v2843_v15, %v1934_v22  ;;  %v2846_v11 = vadd.f32 %v2845_v20, %v2844_v17  ;;  %v2885_v23 = vpop.f32.mrb[39].mxu1 }
 0x148   : > { %v2886_v5 = vadd.f32 %v2885_v23, %v2884_v19 }
 0x149   : > { %v3666_v13 = vadd.f32 %v2883_v18, %v1999_v21  ;;  %v2002_v26 = vadd.f32 %v2846_v11, %v3656_v24 }
 0x14b   : > { %v3669_v7 = vadd.f32 %v2886_v5, %v2002_v26  ;;  %v2847_v28 = vpop.f32.mrb[40].mxu0 }
 0x14c   : > { %v2887_v29 = vpop.f32.mrb[40].mxu1  ;;  %v2848_v30 = vpop.f32.mrb[41].mxu0 }
 0x14d   : > { %v2849_v31 = vadd.f32 %v2848_v30, %v2847_v28  ;;  %v2888_v32 = vpop.f32.mrb[41].mxu1  ;;  %v2850_v33 = vpop.f32.mrb[42].mxu0 }
 0x14e   : > { %v2889_v34 = vadd.f32 %v2888_v32, %v2887_v29  ;;  %v2890_v35 = vpop.f32.mrb[42].mxu1  ;;  %v2851_v36 = vpop.f32.mrb[43].mxu0 }
 0x14f   : > { %v2007_v37 = vadd.f32 %v2849_v31, %v1942_v25  ;;  %v2852_v22 = vadd.f32 %v2851_v36, %v2850_v33  ;;  %v2891_v39 = vpop.f32.mrb[43].mxu1 }
 0x150   : > { %v2892_v40 = vadd.f32 %v2891_v39, %v2890_v35 }
 0x151   : > { %v3671_v27 = vadd.f32 %v2889_v34, %v2007_v37  ;;  %v2010_v43 = vadd.f32 %v2852_v22, %v3658_v42 }
 0x153   : > { %v3674_v24 = vadd.f32 %v2892_v40, %v2010_v43  ;;  %v2853_v44 = vpop.f32.mrb[44].mxu0 }
 0x154   : > { %v2893_v45 = vpop.f32.mrb[44].mxu1  ;;  %v2854_v46 = vpop.f32.mrb[45].mxu0 }
 0x155   : > { %v2894_v47 = vpop.f32.mrb[45].mxu1  ;;  %v2855_v48 = vadd.f32 %v2854_v46, %v2853_v44  ;;  %v2856_v50 = vpop.f32.mrb[46].mxu0 }
 0x156   : > { %v2895_v49 = vadd.f32 %v2894_v47, %v2893_v45  ;;  %v2896_v51 = vpop.f32.mrb[46].mxu1  ;;  %v2857_v52 = vpop.f32.mrb[47].mxu0 }
 0x157   : > { %v2897_v54 = vpop.f32.mrb[47].mxu1  ;;  %v2015_v25 = vadd.f32 %v2855_v48, %v1950_v56  ;;  %v2858_v38 = vadd.f32 %v2857_v52, %v2856_v50 }
 0x158   : > { %v2898_v57 = vadd.f32 %v2897_v54, %v2896_v51 }
 0x159   : > { %v3676_v41 = vadd.f32 %v2895_v49, %v2015_v25  ;;  %v2018_v59 = vadd.f32 %v2858_v38, %v3661_v58  ;;  %v3685_v58 = vld [vmem:[%s3722_s2] ss:$0 sm:$0xff] }
 0x15b   : > { %v3679_v42 = vadd.f32 %v2898_v57, %v2018_v59  ;;  %v2915_v60 = vpop.f32.mrb[48].mxu0 }
 0x15c   : > { %v2955_v61 = vpop.f32.mrb[48].mxu1  ;;  %v2916_v62 = vpop.f32.mrb[49].mxu0 }
 0x15d   : > { %v2917_v63 = vadd.f32 %v2916_v62, %v2915_v60  ;;  %v2956_v0 = vpop.f32.mrb[49].mxu1  ;;  %v2918_v1 = vpop.f32.mrb[50].mxu0 }
 0x15e   : > { %v2957_v2 = vadd.f32 %v2956_v0, %v2955_v61  ;;  %v2958_v3 = vpop.f32.mrb[50].mxu1  ;;  %v2919_v4 = vpop.f32.mrb[51].mxu0 }
 0x15f   : > { %v2121_v53 = vadd.f32 %v2917_v63, %v2056_v8  ;;  %v2920_v56 = vadd.f32 %v2919_v4, %v2918_v1  ;;  %v2959_v6 = vpop.f32.mrb[51].mxu1 }
 0x160   : > { %v2960_v9 = vadd.f32 %v2959_v6, %v2958_v3 }
 0x161   : > { %v2186_v55 = vadd.f32 %v2957_v2, %v2121_v53  ;;  %v2124_v12 = vadd.f32 %v2920_v56, %v3664_v10 }
 0x163   : > { %v2189_v14 = vadd.f32 %v2960_v9, %v2124_v12  ;;  %v2921_v15 = vpop.f32.mrb[52].mxu0  ;;  %v2250_v18 = vadd.f32 %v3685_v58, %v2186_v55 }
 0x164   : > { %v2961_v16 = vpop.f32.mrb[52].mxu1  ;;  %v2922_v17 = vpop.f32.mrb[53].mxu0 }
 0x165   : > { %v2251_v8 = vadd.f32 %v3685_v58, %v2189_v14  ;;  %v2923_v19 = vadd.f32 %v2922_v17, %v2921_v15  ;;  %v2962_v20 = vpop.f32.mrb[53].mxu1  ;;  %v2924_v21 = vpop.f32.mrb[54].mxu0 }
 0x166   : > { %v2963_v10 = vadd.f32 %v2962_v20, %v2961_v16  ;;  %v2964_v11 = vpop.f32.mrb[54].mxu1  ;;  %v2925_v23 = vpop.f32.mrb[55].mxu0 }
 0x167   : > { %v2639_v5 = vpack.c.bf16 %v2251_v8, %v2250_v18  ;;  %v2129_v26 = vadd.f32 %v2923_v19, %v3666_v13  ;;  %v2926_v28 = vadd.f32 %v2925_v23, %v2924_v21  ;;  %v2965_v29 = vpop.f32.mrb[55].mxu1 }
 0x168   : > { %v2966_v30 = vadd.f32 %v2965_v29, %v2964_v11 }
 0x169   : > { %2640 = vst [vmem:[%s3693_s9] sm:$0xff] %v2639_v5   ;;  %v2194_v31 = vadd.f32 %v2963_v10, %v2129_v26  ;;  %v2132_v32 = vadd.f32 %v2926_v28, %v3669_v7 }
 0x16b   : > { %v2197_v33 = vadd.f32 %v2966_v30, %v2132_v32  ;;  %v2927_v34 = vpop.f32.mrb[56].mxu0  ;;  %v2252_v37 = vadd.f32 %v3685_v58, %v2194_v31 }
 0x16c   : > { %v2967_v35 = vpop.f32.mrb[56].mxu1  ;;  %v2928_v36 = vpop.f32.mrb[57].mxu0 }
 0x16d   : > { %v2253_v22 = vadd.f32 %v3685_v58, %v2197_v33  ;;  %v2929_v39 = vadd.f32 %v2928_v36, %v2927_v34  ;;  %v2968_v40 = vpop.f32.mrb[57].mxu1  ;;  %v2930_v43 = vpop.f32.mrb[58].mxu0 }
 0x16e   : > { %v2969_v13 = vadd.f32 %v2968_v40, %v2967_v35  ;;  %v2970_v44 = vpop.f32.mrb[58].mxu1  ;;  %v2931_v45 = vpop.f32.mrb[59].mxu0 }
 0x16f   : > { %v2644_v46 = vpack.c.bf16 %v2253_v22, %v2252_v37  ;;  %v2137_v47 = vadd.f32 %v2929_v39, %v3671_v27  ;;  %v2932_v48 = vadd.f32 %v2931_v45, %v2930_v43  ;;  %v2971_v7 = vpop.f32.mrb[59].mxu1 }
 0x170   : > { %v2972_v49 = vadd.f32 %v2971_v7, %v2970_v44 }
 0x171   : > { %2656 = vst [vmem:[%s3693_s9 + $0x8] sm:$0xff] %v2644_v46   ;;  %v2202_v50 = vadd.f32 %v2969_v13, %v2137_v47  ;;  %v2140_v51 = vadd.f32 %v2932_v48, %v3674_v24 }
 0x173   : > { %v2205_v52 = vadd.f32 %v2972_v49, %v2140_v51  ;;  %v2933_v54 = vpop.f32.mrb[60].mxu0  ;;  %v2254_v57 = vadd.f32 %v3685_v58, %v2202_v50 }
 0x174   : > { %v2973_v25 = vpop.f32.mrb[60].mxu1  ;;  %v2934_v38 = vpop.f32.mrb[61].mxu0 }
 0x175   : > { %v2255_v59 = vadd.f32 %v3685_v58, %v2205_v52  ;;  %v2935_v60 = vadd.f32 %v2934_v38, %v2933_v54  ;;  %v2974_v61 = vpop.f32.mrb[61].mxu1  ;;  %v2936_v62 = vpop.f32.mrb[62].mxu0 }
 0x176   : > { %v2975_v27 = vadd.f32 %v2974_v61, %v2973_v25  ;;  %v2976_v63 = vpop.f32.mrb[62].mxu1  ;;  %v2937_v0 = vpop.f32.mrb[63].mxu0 }
 0x177   : > { %v2649_v1 = vpack.c.bf16 %v2255_v59, %v2254_v57  ;;  %v2145_v2 = vadd.f32 %v2935_v60, %v3676_v41  ;;  %v2938_v24 = vadd.f32 %v2937_v0, %v2936_v62  ;;  %v2977_v3 = vpop.f32.mrb[63].mxu1 }
 0x178   : > { %v2978_v4 = vadd.f32 %v2977_v3, %v2976_v63 }
 0x179   : > { %2657 = vst [vmem:[%s3693_s9 + $0x10] sm:$0xff] %v2649_v1   ;;  %v2210_v53 = vadd.f32 %v2975_v27, %v2145_v2  ;;  %v2148_v56 = vadd.f32 %v2938_v24, %v3679_v42 }
 0x17b   : > { %v2213_v6 = vadd.f32 %v2978_v4, %v2148_v56  ;;  %v2256_v9 = vadd.f32 %v3685_v58, %v2210_v53 }
 0x17d   : > { %v2257_v55 = vadd.f32 %v3685_v58, %v2213_v6 }
 0x17f   : > { %v2654_v12 = vpack.c.bf16 %v2257_v55, %v2256_v9 }
 0x181   : > { %2658 = vst [vmem:[%s3693_s9 + $0x18] sm:$0xff] %v2654_v12  }
 0x182 PF: > { %s13_s14 = sadd.s32 1, %s3153_s14   ;;  %s3724_s12 = smov %s3149_s13 }
 0x183   : > { %p10_p5 = scmp.ge.s32.totalorder %s13_s14, 4   ;;  %s3725_s13 = smov %s3727_s15 }
 0x185   :  { %12 = sbr.rel (!%p10_p5) target bundleno = 2 (0x2), region = 76 }

// kernel: discriminator_forward.12
= control target key start
LH: loop header
LB: loop body
LE: loop exit
PB: predicated region body
PF: predicated region fallthrough
CT: control target
= control target key end

     0   :  { %s403_s6 = smov 0   ;;  %s405_s7 = smov 0   ;;  %s443_s0 = inlined_call_operand.vmem [shape: bf16[2,16,256], index: 0, kind: input, shape index: {}]   ;;  %s444_s1 = inlined_call_operand.vmem [shape: bf16[2,16,256], index: 1, kind: output, shape index: {}]  }
   0x1   :  { %s407_s8 = smov 0  }
   0x2 LB: > { %s23_s9 = sadd.s32 1, %s387_s7  ;;  %p328_p0 = scmp.ge.s32.totalorder %s391_s8, 1  ;;  %s391_s8 = sphi %s407_s8, %s11_s8   ;;  %s387_s7 = sphi %s405_s7, %s446_s7   ;;  %s383_s6 = sphi %s403_s6, %s445_s6  }
   0x3   : > { %p25_p1 = scmp.ge.s32.totalorder %s23_s9, 2  ;;  %p108_p2 = scmp.lt.s32.totalorder %s391_s8, 3 }
   0x5   : > { %s448_s9 = smov (%p25_p1, %s23_s9), 0  ;;  %p109_p3 = pnand %p328_p0, %p108_p2 }
   0x6   : > { %p137_p4 = scmp.lt.s32.totalorder (!%p109_p3), %s383_s6, 1 }
   0x7   : > { %112 = sbr.rel (%p109_p3) target bundleno = 78 (0x4e), region = 24 }
   0xe   : > { %s450_s6 = smov (!%p137_p4, %s383_s6), 1 }
   0xf   : > { %s337_s10 = sshll.u32 %s450_s6, 4 }
  0x10   : > { %s144_s13 = scalar_lea.vmem %s443_s0, %s337_s10  ;;  %s154_s16 = scalar_lea.vmem %s444_s1, %s337_s10 }
  0x11   : > { %v156_v0 = vld [vmem:[%s144_s13] sm:$0xff]  ;;  %v157_v1 = vld [vmem:[%s144_s13 + $0x8] sm:$0xff] }
  0x12   : > { %v158_v2 = vunpack.c.l.bf16 %v156_v0  ;;  %v159_v3 = vunpack.c.h.bf16 %v156_v0  ;;  %v160_v4 = vunpack.c.l.bf16 %v157_v1  ;;  %v161_v5 = vunpack.c.h.bf16 %v157_v1 }
  0x14   : > { %v162_v6 = vadd.f32 %v160_v4, %v158_v2  ;;  %v169_v7 = vadd.f32 %v161_v5, %v159_v3 }
  0x16   : > { %v163_v8 = vrot.slane %v162_v6, 4  ;;  %v170_v9 = vrot.slane %v169_v7, 4 }
  0x18   : > { %v164_v10 = vadd.f32 %v163_v8, %v162_v6  ;;  %v171_v11 = vadd.f32 %v170_v9, %v169_v7 }
  0x1a   : > { %v165_v12 = vrot.slane %v164_v10, 2  ;;  %v172_v13 = vrot.slane %v171_v11, 2 }
  0x1c   : > { %v166_v14 = vadd.f32 %v165_v12, %v164_v10  ;;  %v173_v15 = vadd.f32 %v172_v13, %v171_v11 }
  0x1e   : > { %v167_v16 = vrot.slane %v166_v14, 1  ;;  %v174_v17 = vrot.slane %v173_v15, 1 }
  0x20   : > { %v168_v18 = vadd.f32 %v167_v16, %v166_v14  ;;  %v175_v19 = vadd.f32 %v174_v17, %v173_v15 }
  0x22   : > { %v177_v20 = vmul.f32 0.0625, %v168_v18  ;;  %v178_v21 = vmul.f32 0.0625, %v175_v19 }
  0x24   : > { %v179_v22 = vsub.f32 %v158_v2, %v177_v20  ;;  %v180_v23 = vsub.f32 %v159_v3, %v178_v21  ;;  %v181_v24 = vsub.f32 %v160_v4, %v177_v20  ;;  %v182_v25 = vsub.f32 %v161_v5, %v178_v21 }
  0x26   : > { %v183_v26 = vmul.f32 %v179_v22, %v179_v22  ;;  %v184_v27 = vmul.f32 %v180_v23, %v180_v23  ;;  %v185_v28 = vmul.f32 %v181_v24, %v181_v24  ;;  %v186_v29 = vmul.f32 %v182_v25, %v182_v25 }
  0x28   : > { %v187_v30 = vadd.f32 %v185_v28, %v183_v26  ;;  %v194_v31 = vadd.f32 %v186_v29, %v184_v27 }
  0x2a   : > { %v188_v32 = vrot.slane %v187_v30, 4  ;;  %v195_v33 = vrot.slane %v194_v31, 4 }
  0x2c   : > { %v189_v34 = vadd.f32 %v188_v32, %v187_v30  ;;  %v196_v35 = vadd.f32 %v195_v33, %v194_v31 }
  0x2e   : > { %v190_v36 = vrot.slane %v189_v34, 2  ;;  %v197_v37 = vrot.slane %v196_v35, 2 }
  0x30   : > { %v191_v38 = vadd.f32 %v190_v36, %v189_v34  ;;  %v198_v39 = vadd.f32 %v197_v37, %v196_v35 }
  0x32   : > { %v192_v40 = vrot.slane %v191_v38, 1  ;;  %v199_v41 = vrot.slane %v198_v39, 1 }
  0x34   : > { %v193_v42 = vadd.f32 %v192_v40, %v191_v38  ;;  %v200_v43 = vadd.f32 %v199_v41, %v198_v39 }
  0x36   : > { %v201_v44 = vmul.f32 0.0625, %v193_v42  ;;  %v202_v45 = vmul.f32 0.0625, %v200_v43 }
  0x38   : > { %v203_v46 = vadd.f32 1e-05, %v201_v44  ;;  %v204_v47 = vadd.f32 1e-05, %v202_v45 }
  0x3a   : > { %365 = vrsqrt.f32 %v203_v46 }
  0x3b   : > { %367 = vrsqrt.f32 %v204_v47 }
  0x44   : > { %v366_v48 = vpop.eup %365 }
  0x45   : > { %v368_v49 = vpop.eup %367  ;;  %v207_v50 = vmul.f32 %v366_v48, %v179_v22  ;;  %v209_v51 = vmul.f32 %v366_v48, %v181_v24 }
  0x46   : > { %v208_v52 = vmul.f32 %v368_v49, %v180_v23  ;;  %v210_v53 = vmul.f32 %v368_v49, %v182_v25 }
  0x47   : > { %vm211_vm0 = vcmp.ge.f32.partialorder %v207_v50, 0.0  ;;  %v215_v54 = vmul.f32 0.2, %v207_v50  ;;  %vm213_vm1 = vcmp.ge.f32.partialorder %v209_v51, 0.0  ;;  %v217_v55 = vmul.f32 0.2, %v209_v51 }
  0x48   : > { %vm212_vm2 = vcmp.ge.f32.partialorder %v208_v52, 0.0  ;;  %v216_v56 = vmul.f32 0.2, %v208_v52  ;;  %vm214_vm3 = vcmp.ge.f32.partialorder %v210_v53, 0.0  ;;  %v218_v57 = vmul.f32 0.2, %v210_v53 }
  0x49   : > { %v219_v58 = vsel %vm211_vm0, %v207_v50, %v215_v54  ;;  %v221_v59 = vsel %vm213_vm1, %v209_v51, %v217_v55 }
  0x4a   : > { %v220_v60 = vsel %vm212_vm2, %v208_v52, %v216_v56  ;;  %v222_v61 = vsel %vm214_vm3, %v210_v53, %v218_v57 }
  0x4b   : > { %v339_v62 = vpack.c.bf16 %v220_v60, %v219_v58  ;;  %v340_v63 = vpack.c.bf16 %v222_v61, %v221_v59 }
  0x4d   : > { %235 = vst [vmem:[%s154_s16] sm:$0xff] %v339_v62  ;;  %236 = vst [vmem:[%s154_s16 + $0x8] sm:$0xff] %v340_v63 }
  0x4e PF: > { %s11_s8 = sadd.s32 1, %s391_s8   ;;  %s445_s6 = smov %s387_s7 }
  0x4f   : > { %p8_p5 = scmp.ge.s32.totalorder %s11_s8, 4   ;;  %s446_s7 = smov %s448_s9 }
  0x51   :  { %10 = sbr.rel (!%p8_p5) target bundleno = 2 (0x2), region = 54 }

// kernel: discriminator_forward.11
= control target key start
LH: loop header
LB: loop body
LE: loop exit
PB: predicated region body
PF: predicated region fallthrough
CT: control target
= control target key end

     0   :  { %s3787_s12 = smov 0   ;;  %s3789_s13 = smov 0   ;;  %s4626_s0 = inlined_call_operand.vmem [shape: bf16[32,2048], index: 0, kind: input, shape index: {}]   ;;  %s4627_s1 = inlined_call_operand.vmem [shape: bf16[2048,256], index: 1, kind: input, shape index: {}]   ;;  %s4628_s2 = inlined_call_operand.vmem [shape: f32[1,256], index: 2, kind: input, shape index: {}]   ;;  %s4629_s3 = inlined_call_operand.vmem [shape: bf16[32,256], index: 3, kind: output, shape index: {}]  }
   0x1   :  { %s3791_s14 = smov 0   ;;  %s3793_s15 = smov 0  }
   0x2   :  { %s3795_s16 = smov 0  }
   0x3 LB: > { %s28_s17 = sadd.s32 1, %s3761_s15  ;;  %s3141_s18 = sadd.s32 4294967295, %s3765_s16   ;;  %s3765_s16 = sphi %s3795_s16, %s13_s16   ;;  %s3761_s15 = sphi %s3793_s15, %s4634_s15   ;;  %s3757_s14 = sphi %s3791_s14, %s4633_s14   ;;  %s3753_s13 = sphi %s3789_s13, %s4632_s13   ;;  %s3749_s12 = sphi %s3787_s12, %s4631_s12  }
   0x4   : > { %p30_p0 = scmp.ge.s32.totalorder %s28_s17, 2  ;;  %p76_p1 = scmp.ne.s32.totalorder %s3753_s13, %s3749_s12 }
   0x5   : > { %p77_p2 = scmp.eq.s32.totalorder %s3765_s16, 0  ;;  %p134_p4 = scmp.eq.s32.totalorder %s3141_s18, 1 }
   0x6   : > { %s4636_s17 = smov (%p30_p0, %s28_s17), 0  ;;  %s69_s20 = sadd.s32 1, %s3753_s13 }
   0x7   : > { %p78_p3 = por %p77_p2, %p76_p1  ;;  %s65_s19 = ssub.s32 %s3761_s15, %s4636_s17 }
   0x8   : > { %p67_p5 = scmp.eq.s32.totalorder %s65_s19, 0  ;;  %p3822_p6 = por %p134_p4, %p76_p1 }
   0x9   : > { %p3145_p7 = scmp.ge.s32.totalorder %s3765_s16, 2 }
   0xa   : > { %s3827_s22 = scalar_select %p67_p5, %s3753_s13, %s69_s20  }
   0xb   : > { %171 = sbr.rel (%p3145_p7) target bundleno = 192 (0xc0), region = 20 }
  0x12   : > { %174 = sbr.rel (!%p78_p3) target bundleno = 192 (0xc0), region = 24  ;;  %s176_s23 = sand.u32 (%p78_p3), 1, %s3753_s13  }
  0x13   : > { %s3147_s24 = sshll.u32 (%p78_p3), %s3761_s15, 2  ;;  %s3146_s25 = sshll.u32 (%p78_p3), %s176_s23, 10 }
  0x14   : > { %s3835_s28 = scalar_lea.vmem (%p78_p3), %s4627_s1, %s3147_s24  ;;  %s3839_s29 = scalar_lea.vmem (%p78_p3), [#allocation3], %s3146_s25 }
  0x15   : > { %v199_v0 = vld [vmem:[%s3835_s28] sm:$0xf] (%p78_p3)  ;;  %v201_v1 = vld [vmem:[%s3835_s28 + $0x8] sm:$0xf] (%p78_p3)  ;;  %v203_v2 = vld [vmem:[%s3835_s28 + $0x10] sm:$0xf] (%p78_p3) }
  0x16   : > { %200 = vst [vmem:[%s3839_s29] sm:$0xf] (%p78_p3), %v199_v0  ;;  %202 = vst [vmem:[%s3839_s29 + $0x4] sm:$0xf] (%p78_p3), %v201_v1  ;;  %v205_v3 = vld [vmem:[%s3835_s28 + $0x18] sm:$0xf] (%p78_p3) }
  0x17   : > { %v207_v4 = vld [vmem:[%s3835_s28 + $0x20] sm:$0xf] (%p78_p3)  ;;  %204 = vst [vmem:[%s3839_s29 + $0x8] sm:$0xf] (%p78_p3), %v203_v2  ;;  %206 = vst [vmem:[%s3839_s29 + $0xc] sm:$0xf] (%p78_p3), %v205_v3 }
  0x18   : > { %208 = vst [vmem:[%s3839_s29 + $0x10] sm:$0xf] (%p78_p3), %v207_v4  ;;  %v209_v5 = vld [vmem:[%s3835_s28 + $0x28] sm:$0xf] (%p78_p3)  ;;  %v211_v6 = vld [vmem:[%s3835_s28 + $0x30] sm:$0xf] (%p78_p3) }
  0x19   : > { %v213_v7 = vld [vmem:[%s3835_s28 + $0x38] sm:$0xf]  ;;  %210 = vst [vmem:[%s3839_s29 + $0x14] sm:$0xf] %v209_v5  ;;  %212 = vst [vmem:[%s3839_s29 + $0x18] sm:$0xf] %v211_v6 }
  0x1a   : > { %214 = vst [vmem:[%s3839_s29 + $0x1c] sm:$0xf] %v213_v7  ;;  %v215_v8 = vld [vmem:[%s3835_s28 + $0x40] sm:$0xf]  ;;  %v217_v9 = vld [vmem:[%s3835_s28 + $0x48] sm:$0xf] }
  0x1b   : > { %v219_v10 = vld [vmem:[%s3835_s28 + $0x50] sm:$0xf]  ;;  %216 = vst [vmem:[%s3839_s29 + $0x20] sm:$0xf] %v215_v8  ;;  %218 = vst [vmem:[%s3839_s29 + $0x24] sm:$0xf] %v217_v9 }
  0x1c   : > { %220 = vst [vmem:[%s3839_s29 + $0x28] sm:$0xf] %v219_v10  ;;  %v221_v11 = vld [vmem:[%s3835_s28 + $0x58] sm:$0xf]  ;;  %v223_v12 = vld [vmem:[%s3835_s28 + $0x60] sm:$0xf] }
  0x1d   : > { %v225_v13 = vld [vmem:[%s3835_s28 + $0x68] sm:$0xf]  ;;  %222 = vst [vmem:[%s3839_s29 + $0x2c] sm:$0xf] %v221_v11  ;;  %224 = vst [vmem:[%s3839_s29 + $0x30] sm:$0xf] %v223_v12 }
  0x1e   : > { %226 = vst [vmem:[%s3839_s29 + $0x34] sm:$0xf] %v225_v13  ;;  %v227_v14 = vld [vmem:[%s3835_s28 + $0x70] sm:$0xf]  ;;  %v229_v15 = vld [vmem:[%s3835_s28 + $0x78] sm:$0xf] }
  0x1f   : > { %v231_v16 = vld [vmem:[%s3835_s28 + $0x80] sm:$0xf]  ;;  %228 = vst [vmem:[%s3839_s29 + $0x38] sm:$0xf] %v227_v14  ;;  %230 = vst [vmem:[%s3839_s29 + $0x3c] sm:$0xf] %v229_v15 }
  0x20   : > { %232 = vst [vmem:[%s3839_s29 + $0x40] sm:$0xf] %v231_v16  ;;  %v233_v17 = vld [vmem:[%s3835_s28 + $0x88] sm:$0xf]  ;;  %v235_v18 = vld [vmem:[%s3835_s28 + $0x90] sm:$0xf] }
  0x21   : > { %v237_v19 = vld [vmem:[%s3835_s28 + $0x98] sm:$0xf]  ;;  %234 = vst [vmem:[%s3839_s29 + $0x44] sm:$0xf] %v233_v17  ;;  %236 = vst [vmem:[%s3839_s29 + $0x48] sm:$0xf] %v235_v18 }
  0x22   : > { %238 = vst [vmem:[%s3839_s29 + $0x4c] sm:$0xf] %v237_v19  ;;  %v239_v20 = vld [vmem:[%s3835_s28 + $0xa0] sm:$0xf]  ;;  %v241_v21 = vld [vmem:[%s3835_s28 + $0xa8] sm:$0xf] }
  0x23   : > { %v243_v22 = vld [vmem:[%s3835_s28 + $0xb0] sm:$0xf]  ;;  %240 = vst [vmem:[%s3839_s29 + $0x50] sm:$0xf] %v239_v20  ;;  %242 = vst [vmem:[%s3839_s29 + $0x54] sm:$0xf] %v241_v21 }
  0x24   : > { %244 = vst [vmem:[%s3839_s29 + $0x58] sm:$0xf] %v243_v22  ;;  %v245_v23 = vld [vmem:[%s3835_s28 + $0xb8] sm:$0xf]  ;;  %v247_v24 = vld [vmem:[%s3835_s28 + $0xc0] sm:$0xf] }
  0x25   : > { %v249_v25 = vld [vmem:[%s3835_s28 + $0xc8] sm:$0xf]  ;;  %246 = vst [vmem:[%s3839_s29 + $0x5c] sm:$0xf] %v245_v23  ;;  %248 = vst [vmem:[%s3839_s29 + $0x60] sm:$0xf] %v247_v24 }
  0x26   : > { %250 = vst [vmem:[%s3839_s29 + $0x64] sm:$0xf] %v249_v25  ;;  %v251_v26 = vld [vmem:[%s3835_s28 + $0xd0] sm:$0xf]  ;;  %v253_v27 = vld [vmem:[%s3835_s28 + $0xd8] sm:$0xf] }
  0x27   : > { %v255_v28 = vld [vmem:[%s3835_s28 + $0xe0] sm:$0xf]  ;;  %252 = vst [vmem:[%s3839_s29 + $0x68] sm:$0xf] %v251_v26  ;;  %254 = vst [vmem:[%s3839_s29 + $0x6c] sm:$0xf] %v253_v27 }
  0x28   : > { %256 = vst [vmem:[%s3839_s29 + $0x70] sm:$0xf] %v255_v28  ;;  %v257_v29 = vld [vmem:[%s3835_s28 + $0xe8] sm:$0xf]  ;;  %v259_v30 = vld [vmem:[%s3835_s28 + $0xf0] sm:$0xf] }
  0x29   : > { %v261_v31 = vld [vmem:[%s3835_s28 + $0xf8] sm:$0xf]  ;;  %258 = vst [vmem:[%s3839_s29 + $0x74] sm:$0xf] %v257_v29  ;;  %260 = vst [vmem:[%s3839_s29 + $0x78] sm:$0xf] %v259_v30 }
  0x2a   : > { %262 = vst [vmem:[%s3839_s29 + $0x7c] sm:$0xf] %v261_v31  ;;  %v263_v32 = vld [vmem:[%s3835_s28 + $0x100] sm:$0xf]  ;;  %v265_v33 = vld [vmem:[%s3835_s28 + $0x108] sm:$0xf] }
  0x2b   : > { %v267_v34 = vld [vmem:[%s3835_s28 + $0x110] sm:$0xf]  ;;  %264 = vst [vmem:[%s3839_s29 + $0x80] sm:$0xf] %v263_v32  ;;  %266 = vst [vmem:[%s3839_s29 + $0x84] sm:$0xf] %v265_v33 }
  0x2c   : > { %268 = vst [vmem:[%s3839_s29 + $0x88] sm:$0xf] %v267_v34  ;;  %v269_v35 = vld [vmem:[%s3835_s28 + $0x118] sm:$0xf]  ;;  %v271_v36 = vld [vmem:[%s3835_s28 + $0x120] sm:$0xf] }
  0x2d   : > { %v273_v37 = vld [vmem:[%s3835_s28 + $0x128] sm:$0xf]  ;;  %270 = vst [vmem:[%s3839_s29 + $0x8c] sm:$0xf] %v269_v35  ;;  %272 = vst [vmem:[%s3839_s29 + $0x90] sm:$0xf] %v271_v36 }
  0x2e   : > { %274 = vst [vmem:[%s3839_s29 + $0x94] sm:$0xf] %v273_v37  ;;  %v275_v38 = vld [vmem:[%s3835_s28 + $0x130] sm:$0xf]  ;;  %v277_v39 = vld [vmem:[%s3835_s28 + $0x138] sm:$0xf] }
  0x2f   : > { %v279_v40 = vld [vmem:[%s3835_s28 + $0x140] sm:$0xf]  ;;  %276 = vst [vmem:[%s3839_s29 + $0x98] sm:$0xf] %v275_v38  ;;  %278 = vst [vmem:[%s3839_s29 + $0x9c] sm:$0xf] %v277_v39 }
  0x30   : > { %280 = vst [vmem:[%s3839_s29 + $0xa0] sm:$0xf] %v279_v40  ;;  %v281_v41 = vld [vmem:[%s3835_s28 + $0x148] sm:$0xf]  ;;  %v283_v42 = vld [vmem:[%s3835_s28 + $0x150] sm:$0xf] }
  0x31   : > { %v285_v43 = vld [vmem:[%s3835_s28 + $0x158] sm:$0xf]  ;;  %282 = vst [vmem:[%s3839_s29 + $0xa4] sm:$0xf] %v281_v41  ;;  %284 = vst [vmem:[%s3839_s29 + $0xa8] sm:$0xf] %v283_v42 }
  0x32   : > { %286 = vst [vmem:[%s3839_s29 + $0xac] sm:$0xf] %v285_v43  ;;  %v287_v44 = vld [vmem:[%s3835_s28 + $0x160] sm:$0xf]  ;;  %v289_v45 = vld [vmem:[%s3835_s28 + $0x168] sm:$0xf] }
  0x33   : > { %v291_v46 = vld [vmem:[%s3835_s28 + $0x170] sm:$0xf]  ;;  %288 = vst [vmem:[%s3839_s29 + $0xb0] sm:$0xf] %v287_v44  ;;  %290 = vst [vmem:[%s3839_s29 + $0xb4] sm:$0xf] %v289_v45 }
  0x34   : > { %292 = vst [vmem:[%s3839_s29 + $0xb8] sm:$0xf] %v291_v46  ;;  %v293_v47 = vld [vmem:[%s3835_s28 + $0x178] sm:$0xf]  ;;  %v295_v48 = vld [vmem:[%s3835_s28 + $0x180] sm:$0xf] }
  0x35   : > { %v297_v49 = vld [vmem:[%s3835_s28 + $0x188] sm:$0xf]  ;;  %294 = vst [vmem:[%s3839_s29 + $0xbc] sm:$0xf] %v293_v47  ;;  %296 = vst [vmem:[%s3839_s29 + $0xc0] sm:$0xf] %v295_v48 }
  0x36   : > { %298 = vst [vmem:[%s3839_s29 + $0xc4] sm:$0xf] %v297_v49  ;;  %v299_v50 = vld [vmem:[%s3835_s28 + $0x190] sm:$0xf]  ;;  %v301_v51 = vld [vmem:[%s3835_s28 + $0x198] sm:$0xf] }
  0x37   : > { %v303_v52 = vld [vmem:[%s3835_s28 + $0x1a0] sm:$0xf]  ;;  %300 = vst [vmem:[%s3839_s29 + $0xc8] sm:$0xf] %v299_v50  ;;  %302 = vst [vmem:[%s3839_s29 + $0xcc] sm:$0xf] %v301_v51 }
  0x38   : > { %304 = vst [vmem:[%s3839_s29 + $0xd0] sm:$0xf] %v303_v52  ;;  %v305_v53 = vld [vmem:[%s3835_s28 + $0x1a8] sm:$0xf]  ;;  %v307_v54 = vld [vmem:[%s3835_s28 + $0x1b0] sm:$0xf] }
  0x39   : > { %v309_v55 = vld [vmem:[%s3835_s28 + $0x1b8] sm:$0xf]  ;;  %306 = vst [vmem:[%s3839_s29 + $0xd4] sm:$0xf] %v305_v53  ;;  %308 = vst [vmem:[%s3839_s29 + $0xd8] sm:$0xf] %v307_v54 }
  0x3a   : > { %310 = vst [vmem:[%s3839_s29 + $0xdc] sm:$0xf] %v309_v55  ;;  %v311_v56 = vld [vmem:[%s3835_s28 + $0x1c0] sm:$0xf]  ;;  %v313_v57 = vld [vmem:[%s3835_s28 + $0x1c8] sm:$0xf] }
  0x3b   : > { %v315_v58 = vld [vmem:[%s3835_s28 + $0x1d0] sm:$0xf]  ;;  %312 = vst [vmem:[%s3839_s29 + $0xe0] sm:$0xf] %v311_v56  ;;  %314 = vst [vmem:[%s3839_s29 + $0xe4] sm:$0xf] %v313_v57 }
  0x3c   : > { %316 = vst [vmem:[%s3839_s29 + $0xe8] sm:$0xf] %v315_v58  ;;  %v317_v59 = vld [vmem:[%s3835_s28 + $0x1d8] sm:$0xf]  ;;  %v319_v60 = vld [vmem:[%s3835_s28 + $0x1e0] sm:$0xf] }
  0x3d   : > { %v321_v61 = vld [vmem:[%s3835_s28 + $0x1e8] sm:$0xf]  ;;  %318 = vst [vmem:[%s3839_s29 + $0xec] sm:$0xf] %v317_v59  ;;  %320 = vst [vmem:[%s3839_s29 + $0xf0] sm:$0xf] %v319_v60 }
  0x3e   : > { %322 = vst [vmem:[%s3839_s29 + $0xf4] sm:$0xf] %v321_v61  ;;  %v323_v62 = vld [vmem:[%s3835_s28 + $0x1f0] sm:$0xf]  ;;  %v325_v63 = vld [vmem:[%s3835_s28 + $0x1f8] sm:$0xf] }
  0x3f   : > { %v327_v0 = vld [vmem:[%s3835_s28 + $0x200] sm:$0xf]  ;;  %324 = vst [vmem:[%s3839_s29 + $0xf8] sm:$0xf] %v323_v62  ;;  %326 = vst [vmem:[%s3839_s29 + $0xfc] sm:$0xf] %v325_v63 }
  0x40   : > { %328 = vst [vmem:[%s3839_s29 + $0x100] sm:$0xf] %v327_v0  ;;  %v329_v1 = vld [vmem:[%s3835_s28 + $0x208] sm:$0xf]  ;;  %v331_v2 = vld [vmem:[%s3835_s28 + $0x210] sm:$0xf] }
  0x41   : > { %v333_v3 = vld [vmem:[%s3835_s28 + $0x218] sm:$0xf]  ;;  %330 = vst [vmem:[%s3839_s29 + $0x104] sm:$0xf] %v329_v1  ;;  %332 = vst [vmem:[%s3839_s29 + $0x108] sm:$0xf] %v331_v2 }
  0x42   : > { %334 = vst [vmem:[%s3839_s29 + $0x10c] sm:$0xf] %v333_v3  ;;  %v335_v4 = vld [vmem:[%s3835_s28 + $0x220] sm:$0xf]  ;;  %v337_v5 = vld [vmem:[%s3835_s28 + $0x228] sm:$0xf] }
  0x43   : > { %v339_v6 = vld [vmem:[%s3835_s28 + $0x230] sm:$0xf]  ;;  %336 = vst [vmem:[%s3839_s29 + $0x110] sm:$0xf] %v335_v4  ;;  %338 = vst [vmem:[%s3839_s29 + $0x114] sm:$0xf] %v337_v5 }
  0x44   : > { %340 = vst [vmem:[%s3839_s29 + $0x118] sm:$0xf] %v339_v6  ;;  %v341_v7 = vld [vmem:[%s3835_s28 + $0x238] sm:$0xf]  ;;  %v343_v8 = vld [vmem:[%s3835_s28 + $0x240] sm:$0xf] }
  0x45   : > { %v345_v9 = vld [vmem:[%s3835_s28 + $0x248] sm:$0xf]  ;;  %342 = vst [vmem:[%s3839_s29 + $0x11c] sm:$0xf] %v341_v7  ;;  %344 = vst [vmem:[%s3839_s29 + $0x120] sm:$0xf] %v343_v8 }
  0x46   : > { %346 = vst [vmem:[%s3839_s29 + $0x124] sm:$0xf] %v345_v9  ;;  %v347_v10 = vld [vmem:[%s3835_s28 + $0x250] sm:$0xf]  ;;  %v349_v11 = vld [vmem:[%s3835_s28 + $0x258] sm:$0xf] }
  0x47   : > { %v351_v12 = vld [vmem:[%s3835_s28 + $0x260] sm:$0xf]  ;;  %348 = vst [vmem:[%s3839_s29 + $0x128] sm:$0xf] %v347_v10  ;;  %350 = vst [vmem:[%s3839_s29 + $0x12c] sm:$0xf] %v349_v11 }
  0x48   : > { %352 = vst [vmem:[%s3839_s29 + $0x130] sm:$0xf] %v351_v12  ;;  %v353_v13 = vld [vmem:[%s3835_s28 + $0x268] sm:$0xf]  ;;  %v355_v14 = vld [vmem:[%s3835_s28 + $0x270] sm:$0xf] }
  0x49   : > { %v357_v15 = vld [vmem:[%s3835_s28 + $0x278] sm:$0xf]  ;;  %354 = vst [vmem:[%s3839_s29 + $0x134] sm:$0xf] %v353_v13  ;;  %356 = vst [vmem:[%s3839_s29 + $0x138] sm:$0xf] %v355_v14 }
  0x4a   : > { %358 = vst [vmem:[%s3839_s29 + $0x13c] sm:$0xf] %v357_v15  ;;  %v359_v16 = vld [vmem:[%s3835_s28 + $0x280] sm:$0xf]  ;;  %v361_v17 = vld [vmem:[%s3835_s28 + $0x288] sm:$0xf] }
  0x4b   : > { %v363_v18 = vld [vmem:[%s3835_s28 + $0x290] sm:$0xf]  ;;  %360 = vst [vmem:[%s3839_s29 + $0x140] sm:$0xf] %v359_v16  ;;  %362 = vst [vmem:[%s3839_s29 + $0x144] sm:$0xf] %v361_v17 }
  0x4c   : > { %364 = vst [vmem:[%s3839_s29 + $0x148] sm:$0xf] %v363_v18  ;;  %v365_v19 = vld [vmem:[%s3835_s28 + $0x298] sm:$0xf]  ;;  %v367_v20 = vld [vmem:[%s3835_s28 + $0x2a0] sm:$0xf] }
  0x4d   : > { %v369_v21 = vld [vmem:[%s3835_s28 + $0x2a8] sm:$0xf]  ;;  %366 = vst [vmem:[%s3839_s29 + $0x14c] sm:$0xf] %v365_v19  ;;  %368 = vst [vmem:[%s3839_s29 + $0x150] sm:$0xf] %v367_v20 }
  0x4e   : > { %370 = vst [vmem:[%s3839_s29 + $0x154] sm:$0xf] %v369_v21  ;;  %v371_v22 = vld [vmem:[%s3835_s28 + $0x2b0] sm:$0xf]  ;;  %v373_v23 = vld [vmem:[%s3835_s28 + $0x2b8] sm:$0xf] }
  0x4f   : > { %v375_v24 = vld [vmem:[%s3835_s28 + $0x2c0] sm:$0xf]  ;;  %372 = vst [vmem:[%s3839_s29 + $0x158] sm:$0xf] %v371_v22  ;;  %374 = vst [vmem:[%s3839_s29 + $0x15c] sm:$0xf] %v373_v23 }
  0x50   : > { %376 = vst [vmem:[%s3839_s29 + $0x160] sm:$0xf] %v375_v24  ;;  %v377_v25 = vld [vmem:[%s3835_s28 + $0x2c8] sm:$0xf]  ;;  %v379_v26 = vld [vmem:[%s3835_s28 + $0x2d0] sm:$0xf] }
  0x51   : > { %v381_v27 = vld [vmem:[%s3835_s28 + $0x2d8] sm:$0xf]  ;;  %378 = vst [vmem:[%s3839_s29 + $0x164] sm:$0xf] %v377_v25  ;;  %380 = vst [vmem:[%s3839_s29 + $0x168] sm:$0xf] %v379_v26 }
  0x52   : > { %382 = vst [vmem:[%s3839_s29 + $0x16c] sm:$0xf] %v381_v27  ;;  %v383_v28 = vld [vmem:[%s3835_s28 + $0x2e0] sm:$0xf]  ;;  %v385_v29 = vld [vmem:[%s3835_s28 + $0x2e8] sm:$0xf] }
  0x53   : > { %v387_v30 = vld [vmem:[%s3835_s28 + $0x2f0] sm:$0xf]  ;;  %384 = vst [vmem:[%s3839_s29 + $0x170] sm:$0xf] %v383_v28  ;;  %386 = vst [vmem:[%s3839_s29 + $0x174] sm:$0xf] %v385_v29 }
  0x54   : > { %388 = vst [vmem:[%s3839_s29 + $0x178] sm:$0xf] %v387_v30  ;;  %v389_v31 = vld [vmem:[%s3835_s28 + $0x2f8] sm:$0xf]  ;;  %v391_v32 = vld [vmem:[%s3835_s28 + $0x300] sm:$0xf] }
  0x55   : > { %v393_v33 = vld [vmem:[%s3835_s28 + $0x308] sm:$0xf]  ;;  %390 = vst [vmem:[%s3839_s29 + $0x17c] sm:$0xf] %v389_v31  ;;  %392 = vst [vmem:[%s3839_s29 + $0x180] sm:$0xf] %v391_v32 }
  0x56   : > { %394 = vst [vmem:[%s3839_s29 + $0x184] sm:$0xf] %v393_v33  ;;  %v395_v34 = vld [vmem:[%s3835_s28 + $0x310] sm:$0xf]  ;;  %v397_v35 = vld [vmem:[%s3835_s28 + $0x318] sm:$0xf] }
  0x57   : > { %v399_v36 = vld [vmem:[%s3835_s28 + $0x320] sm:$0xf]  ;;  %396 = vst [vmem:[%s3839_s29 + $0x188] sm:$0xf] %v395_v34  ;;  %398 = vst [vmem:[%s3839_s29 + $0x18c] sm:$0xf] %v397_v35 }
  0x58   : > { %400 = vst [vmem:[%s3839_s29 + $0x190] sm:$0xf] %v399_v36  ;;  %v401_v37 = vld [vmem:[%s3835_s28 + $0x328] sm:$0xf]  ;;  %v403_v38 = vld [vmem:[%s3835_s28 + $0x330] sm:$0xf] }
  0x59   : > { %v405_v39 = vld [vmem:[%s3835_s28 + $0x338] sm:$0xf]  ;;  %402 = vst [vmem:[%s3839_s29 + $0x194] sm:$0xf] %v401_v37  ;;  %404 = vst [vmem:[%s3839_s29 + $0x198] sm:$0xf] %v403_v38 }
  0x5a   : > { %406 = vst [vmem:[%s3839_s29 + $0x19c] sm:$0xf] %v405_v39  ;;  %v407_v40 = vld [vmem:[%s3835_s28 + $0x340] sm:$0xf]  ;;  %v409_v41 = vld [vmem:[%s3835_s28 + $0x348] sm:$0xf] }
  0x5b   : > { %v411_v42 = vld [vmem:[%s3835_s28 + $0x350] sm:$0xf]  ;;  %408 = vst [vmem:[%s3839_s29 + $0x1a0] sm:$0xf] %v407_v40  ;;  %410 = vst [vmem:[%s3839_s29 + $0x1a4] sm:$0xf] %v409_v41 }
  0x5c   : > { %412 = vst [vmem:[%s3839_s29 + $0x1a8] sm:$0xf] %v411_v42  ;;  %v413_v43 = vld [vmem:[%s3835_s28 + $0x358] sm:$0xf]  ;;  %v415_v44 = vld [vmem:[%s3835_s28 + $0x360] sm:$0xf] }
  0x5d   : > { %v417_v45 = vld [vmem:[%s3835_s28 + $0x368] sm:$0xf]  ;;  %414 = vst [vmem:[%s3839_s29 + $0x1ac] sm:$0xf] %v413_v43  ;;  %416 = vst [vmem:[%s3839_s29 + $0x1b0] sm:$0xf] %v415_v44 }
  0x5e   : > { %418 = vst [vmem:[%s3839_s29 + $0x1b4] sm:$0xf] %v417_v45  ;;  %v419_v46 = vld [vmem:[%s3835_s28 + $0x370] sm:$0xf]  ;;  %v421_v47 = vld [vmem:[%s3835_s28 + $0x378] sm:$0xf] }
  0x5f   : > { %v423_v48 = vld [vmem:[%s3835_s28 + $0x380] sm:$0xf]  ;;  %420 = vst [vmem:[%s3839_s29 + $0x1b8] sm:$0xf] %v419_v46  ;;  %422 = vst [vmem:[%s3839_s29 + $0x1bc] sm:$0xf] %v421_v47 }
  0x60   : > { %424 = vst [vmem:[%s3839_s29 + $0x1c0] sm:$0xf] %v423_v48  ;;  %v425_v49 = vld [vmem:[%s3835_s28 + $0x388] sm:$0xf]  ;;  %v427_v50 = vld [vmem:[%s3835_s28 + $0x390] sm:$0xf] }
  0x61   : > { %v429_v51 = vld [vmem:[%s3835_s28 + $0x398] sm:$0xf]  ;;  %426 = vst [vmem:[%s3839_s29 + $0x1c4] sm:$0xf] %v425_v49  ;;  %428 = vst [vmem:[%s3839_s29 + $0x1c8] sm:$0xf] %v427_v50 }
  0x62   : > { %430 = vst [vmem:[%s3839_s29 + $0x1cc] sm:$0xf] %v429_v51  ;;  %v431_v52 = vld [vmem:[%s3835_s28 + $0x3a0] sm:$0xf]  ;;  %v433_v53 = vld [vmem:[%s3835_s28 + $0x3a8] sm:$0xf] }
  0x63   : > { %v435_v54 = vld [vmem:[%s3835_s28 + $0x3b0] sm:$0xf]  ;;  %432 = vst [vmem:[%s3839_s29 + $0x1d0] sm:$0xf] %v431_v52  ;;  %434 = vst [vmem:[%s3839_s29 + $0x1d4] sm:$0xf] %v433_v53 }
  0x64   : > { %436 = vst [vmem:[%s3839_s29 + $0x1d8] sm:$0xf] %v435_v54  ;;  %v437_v55 = vld [vmem:[%s3835_s28 + $0x3b8] sm:$0xf]  ;;  %v439_v56 = vld [vmem:[%s3835_s28 + $0x3c0] sm:$0xf] }
  0x65   : > { %v441_v57 = vld [vmem:[%s3835_s28 + $0x3c8] sm:$0xf]  ;;  %438 = vst [vmem:[%s3839_s29 + $0x1dc] sm:$0xf] %v437_v55  ;;  %440 = vst [vmem:[%s3839_s29 + $0x1e0] sm:$0xf] %v439_v56 }
  0x66   : > { %442 = vst [vmem:[%s3839_s29 + $0x1e4] sm:$0xf] %v441_v57  ;;  %v443_v58 = vld [vmem:[%s3835_s28 + $0x3d0] sm:$0xf]  ;;  %v445_v59 = vld [vmem:[%s3835_s28 + $0x3d8] sm:$0xf] }
  0x67   : > { %v447_v60 = vld [vmem:[%s3835_s28 + $0x3e0] sm:$0xf]  ;;  %444 = vst [vmem:[%s3839_s29 + $0x1e8] sm:$0xf] %v443_v58  ;;  %446 = vst [vmem:[%s3839_s29 + $0x1ec] sm:$0xf] %v445_v59 }
  0x68   : > { %448 = vst [vmem:[%s3839_s29 + $0x1f0] sm:$0xf] %v447_v60  ;;  %v449_v61 = vld [vmem:[%s3835_s28 + $0x3e8] sm:$0xf]  ;;  %v451_v62 = vld [vmem:[%s3835_s28 + $0x3f0] sm:$0xf] }
  0x69   : > { %v453_v63 = vld [vmem:[%s3835_s28 + $0x3f8] sm:$0xf]  ;;  %450 = vst [vmem:[%s3839_s29 + $0x1f4] sm:$0xf] %v449_v61  ;;  %452 = vst [vmem:[%s3839_s29 + $0x1f8] sm:$0xf] %v451_v62 }
  0x6a   : > { %454 = vst [vmem:[%s3839_s29 + $0x1fc] sm:$0xf] %v453_v63  ;;  %v455_v0 = vld [vmem:[%s3835_s28 + $0x400] sm:$0xf]  ;;  %v457_v1 = vld [vmem:[%s3835_s28 + $0x408] sm:$0xf] }
  0x6b   : > { %v459_v2 = vld [vmem:[%s3835_s28 + $0x410] sm:$0xf]  ;;  %456 = vst [vmem:[%s3839_s29 + $0x200] sm:$0xf] %v455_v0  ;;  %458 = vst [vmem:[%s3839_s29 + $0x204] sm:$0xf] %v457_v1 }
  0x6c   : > { %460 = vst [vmem:[%s3839_s29 + $0x208] sm:$0xf] %v459_v2  ;;  %v461_v3 = vld [vmem:[%s3835_s28 + $0x418] sm:$0xf]  ;;  %v463_v4 = vld [vmem:[%s3835_s28 + $0x420] sm:$0xf] }
  0x6d   : > { %v465_v5 = vld [vmem:[%s3835_s28 + $0x428] sm:$0xf]  ;;  %462 = vst [vmem:[%s3839_s29 + $0x20c] sm:$0xf] %v461_v3  ;;  %464 = vst [vmem:[%s3839_s29 + $0x210] sm:$0xf] %v463_v4 }
  0x6e   : > { %466 = vst [vmem:[%s3839_s29 + $0x214] sm:$0xf] %v465_v5  ;;  %v467_v6 = vld [vmem:[%s3835_s28 + $0x430] sm:$0xf]  ;;  %v469_v7 = vld [vmem:[%s3835_s28 + $0x438] sm:$0xf] }
  0x6f   : > { %v471_v8 = vld [vmem:[%s3835_s28 + $0x440] sm:$0xf]  ;;  %468 = vst [vmem:[%s3839_s29 + $0x218] sm:$0xf] %v467_v6  ;;  %470 = vst [vmem:[%s3839_s29 + $0x21c] sm:$0xf] %v469_v7 }
  0x70   : > { %472 = vst [vmem:[%s3839_s29 + $0x220] sm:$0xf] %v471_v8  ;;  %v473_v9 = vld [vmem:[%s3835_s28 + $0x448] sm:$0xf]  ;;  %v475_v10 = vld [vmem:[%s3835_s28 + $0x450] sm:$0xf] }
  0x71   : > { %v477_v11 = vld [vmem:[%s3835_s28 + $0x458] sm:$0xf]  ;;  %474 = vst [vmem:[%s3839_s29 + $0x224] sm:$0xf] %v473_v9  ;;  %476 = vst [vmem:[%s3839_s29 + $0x228] sm:$0xf] %v475_v10 }
  0x72   : > { %478 = vst [vmem:[%s3839_s29 + $0x22c] sm:$0xf] %v477_v11  ;;  %v479_v12 = vld [vmem:[%s3835_s28 + $0x460] sm:$0xf]  ;;  %v481_v13 = vld [vmem:[%s3835_s28 + $0x468] sm:$0xf] }
  0x73   : > { %v483_v14 = vld [vmem:[%s3835_s28 + $0x470] sm:$0xf]  ;;  %480 = vst [vmem:[%s3839_s29 + $0x230] sm:$0xf] %v479_v12  ;;  %482 = vst [vmem:[%s3839_s29 + $0x234] sm:$0xf] %v481_v13 }
  0x74   : > { %484 = vst [vmem:[%s3839_s29 + $0x238] sm:$0xf] %v483_v14  ;;  %v485_v15 = vld [vmem:[%s3835_s28 + $0x478] sm:$0xf]  ;;  %v487_v16 = vld [vmem:[%s3835_s28 + $0x480] sm:$0xf] }
  0x75   : > { %v489_v17 = vld [vmem:[%s3835_s28 + $0x488] sm:$0xf]  ;;  %486 = vst [vmem:[%s3839_s29 + $0x23c] sm:$0xf] %v485_v15  ;;  %488 = vst [vmem:[%s3839_s29 + $0x240] sm:$0xf] %v487_v16 }
  0x76   : > { %490 = vst [vmem:[%s3839_s29 + $0x244] sm:$0xf] %v489_v17  ;;  %v491_v18 = vld [vmem:[%s3835_s28 + $0x490] sm:$0xf]  ;;  %v493_v19 = vld [vmem:[%s3835_s28 + $0x498] sm:$0xf] }
  0x77   : > { %v495_v20 = vld [vmem:[%s3835_s28 + $0x4a0] sm:$0xf]  ;;  %492 = vst [vmem:[%s3839_s29 + $0x248] sm:$0xf] %v491_v18  ;;  %494 = vst [vmem:[%s3839_s29 + $0x24c] sm:$0xf] %v493_v19 }
  0x78   : > { %496 = vst [vmem:[%s3839_s29 + $0x250] sm:$0xf] %v495_v20  ;;  %v497_v21 = vld [vmem:[%s3835_s28 + $0x4a8] sm:$0xf]  ;;  %v499_v22 = vld [vmem:[%s3835_s28 + $0x4b0] sm:$0xf] }
  0x79   : > { %v501_v23 = vld [vmem:[%s3835_s28 + $0x4b8] sm:$0xf]  ;;  %498 = vst [vmem:[%s3839_s29 + $0x254] sm:$0xf] %v497_v21  ;;  %500 = vst [vmem:[%s3839_s29 + $0x258] sm:$0xf] %v499_v22 }
  0x7a   : > { %502 = vst [vmem:[%s3839_s29 + $0x25c] sm:$0xf] %v501_v23  ;;  %v503_v24 = vld [vmem:[%s3835_s28 + $0x4c0] sm:$0xf]  ;;  %v505_v25 = vld [vmem:[%s3835_s28 + $0x4c8] sm:$0xf] }
  0x7b   : > { %v507_v26 = vld [vmem:[%s3835_s28 + $0x4d0] sm:$0xf]  ;;  %504 = vst [vmem:[%s3839_s29 + $0x260] sm:$0xf] %v503_v24  ;;  %506 = vst [vmem:[%s3839_s29 + $0x264] sm:$0xf] %v505_v25 }
  0x7c   : > { %508 = vst [vmem:[%s3839_s29 + $0x268] sm:$0xf] %v507_v26  ;;  %v509_v27 = vld [vmem:[%s3835_s28 + $0x4d8] sm:$0xf]  ;;  %v511_v28 = vld [vmem:[%s3835_s28 + $0x4e0] sm:$0xf] }
  0x7d   : > { %v513_v29 = vld [vmem:[%s3835_s28 + $0x4e8] sm:$0xf]  ;;  %510 = vst [vmem:[%s3839_s29 + $0x26c] sm:$0xf] %v509_v27  ;;  %512 = vst [vmem:[%s3839_s29 + $0x270] sm:$0xf] %v511_v28 }
  0x7e   : > { %514 = vst [vmem:[%s3839_s29 + $0x274] sm:$0xf] %v513_v29  ;;  %v515_v30 = vld [vmem:[%s3835_s28 + $0x4f0] sm:$0xf]  ;;  %v517_v31 = vld [vmem:[%s3835_s28 + $0x4f8] sm:$0xf] }
  0x7f   : > { %v519_v32 = vld [vmem:[%s3835_s28 + $0x500] sm:$0xf]  ;;  %516 = vst [vmem:[%s3839_s29 + $0x278] sm:$0xf] %v515_v30  ;;  %518 = vst [vmem:[%s3839_s29 + $0x27c] sm:$0xf] %v517_v31 }
  0x80   : > { %520 = vst [vmem:[%s3839_s29 + $0x280] sm:$0xf] %v519_v32  ;;  %v521_v33 = vld [vmem:[%s3835_s28 + $0x508] sm:$0xf]  ;;  %v523_v34 = vld [vmem:[%s3835_s28 + $0x510] sm:$0xf] }
  0x81   : > { %v525_v35 = vld [vmem:[%s3835_s28 + $0x518] sm:$0xf]  ;;  %522 = vst [vmem:[%s3839_s29 + $0x284] sm:$0xf] %v521_v33  ;;  %524 = vst [vmem:[%s3839_s29 + $0x288] sm:$0xf] %v523_v34 }
  0x82   : > { %526 = vst [vmem:[%s3839_s29 + $0x28c] sm:$0xf] %v525_v35  ;;  %v527_v36 = vld [vmem:[%s3835_s28 + $0x520] sm:$0xf]  ;;  %v529_v37 = vld [vmem:[%s3835_s28 + $0x528] sm:$0xf] }
  0x83   : > { %v531_v38 = vld [vmem:[%s3835_s28 + $0x530] sm:$0xf]  ;;  %528 = vst [vmem:[%s3839_s29 + $0x290] sm:$0xf] %v527_v36  ;;  %530 = vst [vmem:[%s3839_s29 + $0x294] sm:$0xf] %v529_v37 }
  0x84   : > { %532 = vst [vmem:[%s3839_s29 + $0x298] sm:$0xf] %v531_v38  ;;  %v533_v39 = vld [vmem:[%s3835_s28 + $0x538] sm:$0xf]  ;;  %v535_v40 = vld [vmem:[%s3835_s28 + $0x540] sm:$0xf] }
  0x85   : > { %v537_v41 = vld [vmem:[%s3835_s28 + $0x548] sm:$0xf]  ;;  %534 = vst [vmem:[%s3839_s29 + $0x29c] sm:$0xf] %v533_v39  ;;  %536 = vst [vmem:[%s3839_s29 + $0x2a0] sm:$0xf] %v535_v40 }
  0x86   : > { %538 = vst [vmem:[%s3839_s29 + $0x2a4] sm:$0xf] %v537_v41  ;;  %v539_v42 = vld [vmem:[%s3835_s28 + $0x550] sm:$0xf]  ;;  %v541_v43 = vld [vmem:[%s3835_s28 + $0x558] sm:$0xf] }
  0x87   : > { %v543_v44 = vld [vmem:[%s3835_s28 + $0x560] sm:$0xf]  ;;  %540 = vst [vmem:[%s3839_s29 + $0x2a8] sm:$0xf] %v539_v42  ;;  %542 = vst [vmem:[%s3839_s29 + $0x2ac] sm:$0xf] %v541_v43 }
  0x88   : > { %544 = vst [vmem:[%s3839_s29 + $0x2b0] sm:$0xf] %v543_v44  ;;  %v545_v45 = vld [vmem:[%s3835_s28 + $0x568] sm:$0xf]  ;;  %v547_v46 = vld [vmem:[%s3835_s28 + $0x570] sm:$0xf] }
  0x89   : > { %v549_v47 = vld [vmem:[%s3835_s28 + $0x578] sm:$0xf]  ;;  %546 = vst [vmem:[%s3839_s29 + $0x2b4] sm:$0xf] %v545_v45  ;;  %548 = vst [vmem:[%s3839_s29 + $0x2b8] sm:$0xf] %v547_v46 }
  0x8a   : > { %550 = vst [vmem:[%s3839_s29 + $0x2bc] sm:$0xf] %v549_v47  ;;  %v551_v48 = vld [vmem:[%s3835_s28 + $0x580] sm:$0xf]  ;;  %v553_v49 = vld [vmem:[%s3835_s28 + $0x588] sm:$0xf] }
  0x8b   : > { %v555_v50 = vld [vmem:[%s3835_s28 + $0x590] sm:$0xf]  ;;  %552 = vst [vmem:[%s3839_s29 + $0x2c0] sm:$0xf] %v551_v48  ;;  %554 = vst [vmem:[%s3839_s29 + $0x2c4] sm:$0xf] %v553_v49 }
  0x8c   : > { %556 = vst [vmem:[%s3839_s29 + $0x2c8] sm:$0xf] %v555_v50  ;;  %v557_v51 = vld [vmem:[%s3835_s28 + $0x598] sm:$0xf]  ;;  %v559_v52 = vld [vmem:[%s3835_s28 + $0x5a0] sm:$0xf] }
  0x8d   : > { %v561_v53 = vld [vmem:[%s3835_s28 + $0x5a8] sm:$0xf]  ;;  %558 = vst [vmem:[%s3839_s29 + $0x2cc] sm:$0xf] %v557_v51  ;;  %560 = vst [vmem:[%s3839_s29 + $0x2d0] sm:$0xf] %v559_v52 }
  0x8e   : > { %562 = vst [vmem:[%s3839_s29 + $0x2d4] sm:$0xf] %v561_v53  ;;  %v563_v54 = vld [vmem:[%s3835_s28 + $0x5b0] sm:$0xf]  ;;  %v565_v55 = vld [vmem:[%s3835_s28 + $0x5b8] sm:$0xf] }
  0x8f   : > { %v567_v56 = vld [vmem:[%s3835_s28 + $0x5c0] sm:$0xf]  ;;  %564 = vst [vmem:[%s3839_s29 + $0x2d8] sm:$0xf] %v563_v54  ;;  %566 = vst [vmem:[%s3839_s29 + $0x2dc] sm:$0xf] %v565_v55 }
  0x90   : > { %568 = vst [vmem:[%s3839_s29 + $0x2e0] sm:$0xf] %v567_v56  ;;  %v569_v57 = vld [vmem:[%s3835_s28 + $0x5c8] sm:$0xf]  ;;  %v571_v58 = vld [vmem:[%s3835_s28 + $0x5d0] sm:$0xf] }
  0x91   : > { %v573_v59 = vld [vmem:[%s3835_s28 + $0x5d8] sm:$0xf]  ;;  %570 = vst [vmem:[%s3839_s29 + $0x2e4] sm:$0xf] %v569_v57  ;;  %572 = vst [vmem:[%s3839_s29 + $0x2e8] sm:$0xf] %v571_v58 }
  0x92   : > { %574 = vst [vmem:[%s3839_s29 + $0x2ec] sm:$0xf] %v573_v59  ;;  %v575_v60 = vld [vmem:[%s3835_s28 + $0x5e0] sm:$0xf]  ;;  %v577_v61 = vld [vmem:[%s3835_s28 + $0x5e8] sm:$0xf] }
  0x93   : > { %v579_v62 = vld [vmem:[%s3835_s28 + $0x5f0] sm:$0xf]  ;;  %576 = vst [vmem:[%s3839_s29 + $0x2f0] sm:$0xf] %v575_v60  ;;  %578 = vst [vmem:[%s3839_s29 + $0x2f4] sm:$0xf] %v577_v61 }
  0x94   : > { %580 = vst [vmem:[%s3839_s29 + $0x2f8] sm:$0xf] %v579_v62  ;;  %v581_v63 = vld [vmem:[%s3835_s28 + $0x5f8] sm:$0xf]  ;;  %v583_v0 = vld [vmem:[%s3835_s28 + $0x600] sm:$0xf] }
  0x95   : > { %v585_v1 = vld [vmem:[%s3835_s28 + $0x608] sm:$0xf]  ;;  %582 = vst [vmem:[%s3839_s29 + $0x2fc] sm:$0xf] %v581_v63  ;;  %584 = vst [vmem:[%s3839_s29 + $0x300] sm:$0xf] %v583_v0 }
  0x96   : > { %586 = vst [vmem:[%s3839_s29 + $0x304] sm:$0xf] %v585_v1  ;;  %v587_v2 = vld [vmem:[%s3835_s28 + $0x610] sm:$0xf]  ;;  %v589_v3 = vld [vmem:[%s3835_s28 + $0x618] sm:$0xf] }
  0x97   : > { %v591_v4 = vld [vmem:[%s3835_s28 + $0x620] sm:$0xf]  ;;  %588 = vst [vmem:[%s3839_s29 + $0x308] sm:$0xf] %v587_v2  ;;  %590 = vst [vmem:[%s3839_s29 + $0x30c] sm:$0xf] %v589_v3 }
  0x98   : > { %592 = vst [vmem:[%s3839_s29 + $0x310] sm:$0xf] %v591_v4  ;;  %v593_v5 = vld [vmem:[%s3835_s28 + $0x628] sm:$0xf]  ;;  %v595_v6 = vld [vmem:[%s3835_s28 + $0x630] sm:$0xf] }
  0x99   : > { %v597_v7 = vld [vmem:[%s3835_s28 + $0x638] sm:$0xf]  ;;  %594 = vst [vmem:[%s3839_s29 + $0x314] sm:$0xf] %v593_v5  ;;  %596 = vst [vmem:[%s3839_s29 + $0x318] sm:$0xf] %v595_v6 }
  0x9a   : > { %598 = vst [vmem:[%s3839_s29 + $0x31c] sm:$0xf] %v597_v7  ;;  %v599_v8 = vld [vmem:[%s3835_s28 + $0x640] sm:$0xf]  ;;  %v601_v9 = vld [vmem:[%s3835_s28 + $0x648] sm:$0xf] }
  0x9b   : > { %v603_v10 = vld [vmem:[%s3835_s28 + $0x650] sm:$0xf]  ;;  %600 = vst [vmem:[%s3839_s29 + $0x320] sm:$0xf] %v599_v8  ;;  %602 = vst [vmem:[%s3839_s29 + $0x324] sm:$0xf] %v601_v9 }
  0x9c   : > { %604 = vst [vmem:[%s3839_s29 + $0x328] sm:$0xf] %v603_v10  ;;  %v605_v11 = vld [vmem:[%s3835_s28 + $0x658] sm:$0xf]  ;;  %v607_v12 = vld [vmem:[%s3835_s28 + $0x660] sm:$0xf] }
  0x9d   : > { %v609_v13 = vld [vmem:[%s3835_s28 + $0x668] sm:$0xf]  ;;  %606 = vst [vmem:[%s3839_s29 + $0x32c] sm:$0xf] %v605_v11  ;;  %608 = vst [vmem:[%s3839_s29 + $0x330] sm:$0xf] %v607_v12 }
  0x9e   : > { %610 = vst [vmem:[%s3839_s29 + $0x334] sm:$0xf] %v609_v13  ;;  %v611_v14 = vld [vmem:[%s3835_s28 + $0x670] sm:$0xf]  ;;  %v613_v15 = vld [vmem:[%s3835_s28 + $0x678] sm:$0xf] }
  0x9f   : > { %v615_v16 = vld [vmem:[%s3835_s28 + $0x680] sm:$0xf]  ;;  %612 = vst [vmem:[%s3839_s29 + $0x338] sm:$0xf] %v611_v14  ;;  %614 = vst [vmem:[%s3839_s29 + $0x33c] sm:$0xf] %v613_v15 }
  0xa0   : > { %616 = vst [vmem:[%s3839_s29 + $0x340] sm:$0xf] %v615_v16  ;;  %v617_v17 = vld [vmem:[%s3835_s28 + $0x688] sm:$0xf]  ;;  %v619_v18 = vld [vmem:[%s3835_s28 + $0x690] sm:$0xf] }
  0xa1   : > { %v621_v19 = vld [vmem:[%s3835_s28 + $0x698] sm:$0xf]  ;;  %618 = vst [vmem:[%s3839_s29 + $0x344] sm:$0xf] %v617_v17  ;;  %620 = vst [vmem:[%s3839_s29 + $0x348] sm:$0xf] %v619_v18 }
  0xa2   : > { %622 = vst [vmem:[%s3839_s29 + $0x34c] sm:$0xf] %v621_v19  ;;  %v623_v20 = vld [vmem:[%s3835_s28 + $0x6a0] sm:$0xf]  ;;  %v625_v21 = vld [vmem:[%s3835_s28 + $0x6a8] sm:$0xf] }
  0xa3   : > { %v627_v22 = vld [vmem:[%s3835_s28 + $0x6b0] sm:$0xf]  ;;  %624 = vst [vmem:[%s3839_s29 + $0x350] sm:$0xf] %v623_v20  ;;  %626 = vst [vmem:[%s3839_s29 + $0x354] sm:$0xf] %v625_v21 }
  0xa4   : > { %628 = vst [vmem:[%s3839_s29 + $0x358] sm:$0xf] %v627_v22  ;;  %v629_v23 = vld [vmem:[%s3835_s28 + $0x6b8] sm:$0xf]  ;;  %v631_v24 = vld [vmem:[%s3835_s28 + $0x6c0] sm:$0xf] }
  0xa5   : > { %v633_v25 = vld [vmem:[%s3835_s28 + $0x6c8] sm:$0xf]  ;;  %630 = vst [vmem:[%s3839_s29 + $0x35c] sm:$0xf] %v629_v23  ;;  %632 = vst [vmem:[%s3839_s29 + $0x360] sm:$0xf] %v631_v24 }
  0xa6   : > { %634 = vst [vmem:[%s3839_s29 + $0x364] sm:$0xf] %v633_v25  ;;  %v635_v26 = vld [vmem:[%s3835_s28 + $0x6d0] sm:$0xf]  ;;  %v637_v27 = vld [vmem:[%s3835_s28 + $0x6d8] sm:$0xf] }
  0xa7   : > { %v639_v28 = vld [vmem:[%s3835_s28 + $0x6e0] sm:$0xf]  ;;  %636 = vst [vmem:[%s3839_s29 + $0x368] sm:$0xf] %v635_v26  ;;  %638 = vst [vmem:[%s3839_s29 + $0x36c] sm:$0xf] %v637_v27 }
  0xa8   : > { %640 = vst [vmem:[%s3839_s29 + $0x370] sm:$0xf] %v639_v28  ;;  %v641_v29 = vld [vmem:[%s3835_s28 + $0x6e8] sm:$0xf]  ;;  %v643_v30 = vld [vmem:[%s3835_s28 + $0x6f0] sm:$0xf] }
  0xa9   : > { %v645_v31 = vld [vmem:[%s3835_s28 + $0x6f8] sm:$0xf]  ;;  %642 = vst [vmem:[%s3839_s29 + $0x374] sm:$0xf] %v641_v29  ;;  %644 = vst [vmem:[%s3839_s29 + $0x378] sm:$0xf] %v643_v30 }
  0xaa   : > { %646 = vst [vmem:[%s3839_s29 + $0x37c] sm:$0xf] %v645_v31  ;;  %v647_v32 = vld [vmem:[%s3835_s28 + $0x700] sm:$0xf]  ;;  %v649_v33 = vld [vmem:[%s3835_s28 + $0x708] sm:$0xf] }
  0xab   : > { %v651_v34 = vld [vmem:[%s3835_s28 + $0x710] sm:$0xf]  ;;  %648 = vst [vmem:[%s3839_s29 + $0x380] sm:$0xf] %v647_v32  ;;  %650 = vst [vmem:[%s3839_s29 + $0x384] sm:$0xf] %v649_v33 }
  0xac   : > { %652 = vst [vmem:[%s3839_s29 + $0x388] sm:$0xf] %v651_v34  ;;  %v653_v35 = vld [vmem:[%s3835_s28 + $0x718] sm:$0xf]  ;;  %v655_v36 = vld [vmem:[%s3835_s28 + $0x720] sm:$0xf] }
  0xad   : > { %v657_v37 = vld [vmem:[%s3835_s28 + $0x728] sm:$0xf]  ;;  %654 = vst [vmem:[%s3839_s29 + $0x38c] sm:$0xf] %v653_v35  ;;  %656 = vst [vmem:[%s3839_s29 + $0x390] sm:$0xf] %v655_v36 }
  0xae   : > { %658 = vst [vmem:[%s3839_s29 + $0x394] sm:$0xf] %v657_v37  ;;  %v659_v38 = vld [vmem:[%s3835_s28 + $0x730] sm:$0xf]  ;;  %v661_v39 = vld [vmem:[%s3835_s28 + $0x738] sm:$0xf] }
  0xaf   : > { %v663_v40 = vld [vmem:[%s3835_s28 + $0x740] sm:$0xf]  ;;  %660 = vst [vmem:[%s3839_s29 + $0x398] sm:$0xf] %v659_v38  ;;  %662 = vst [vmem:[%s3839_s29 + $0x39c] sm:$0xf] %v661_v39 }
  0xb0   : > { %664 = vst [vmem:[%s3839_s29 + $0x3a0] sm:$0xf] %v663_v40  ;;  %v665_v41 = vld [vmem:[%s3835_s28 + $0x748] sm:$0xf]  ;;  %v667_v42 = vld [vmem:[%s3835_s28 + $0x750] sm:$0xf] }
  0xb1   : > { %v669_v43 = vld [vmem:[%s3835_s28 + $0x758] sm:$0xf]  ;;  %666 = vst [vmem:[%s3839_s29 + $0x3a4] sm:$0xf] %v665_v41  ;;  %668 = vst [vmem:[%s3839_s29 + $0x3a8] sm:$0xf] %v667_v42 }
  0xb2   : > { %670 = vst [vmem:[%s3839_s29 + $0x3ac] sm:$0xf] %v669_v43  ;;  %v671_v44 = vld [vmem:[%s3835_s28 + $0x760] sm:$0xf]  ;;  %v673_v45 = vld [vmem:[%s3835_s28 + $0x768] sm:$0xf] }
  0xb3   : > { %v675_v46 = vld [vmem:[%s3835_s28 + $0x770] sm:$0xf]  ;;  %672 = vst [vmem:[%s3839_s29 + $0x3b0] sm:$0xf] %v671_v44  ;;  %674 = vst [vmem:[%s3839_s29 + $0x3b4] sm:$0xf] %v673_v45 }
  0xb4   : > { %676 = vst [vmem:[%s3839_s29 + $0x3b8] sm:$0xf] %v675_v46  ;;  %v677_v47 = vld [vmem:[%s3835_s28 + $0x778] sm:$0xf]  ;;  %v679_v48 = vld [vmem:[%s3835_s28 + $0x780] sm:$0xf] }
  0xb5   : > { %v681_v49 = vld [vmem:[%s3835_s28 + $0x788] sm:$0xf]  ;;  %678 = vst [vmem:[%s3839_s29 + $0x3bc] sm:$0xf] %v677_v47  ;;  %680 = vst [vmem:[%s3839_s29 + $0x3c0] sm:$0xf] %v679_v48 }
  0xb6   : > { %682 = vst [vmem:[%s3839_s29 + $0x3c4] sm:$0xf] %v681_v49  ;;  %v683_v50 = vld [vmem:[%s3835_s28 + $0x790] sm:$0xf]  ;;  %v685_v51 = vld [vmem:[%s3835_s28 + $0x798] sm:$0xf] }
  0xb7   : > { %v687_v52 = vld [vmem:[%s3835_s28 + $0x7a0] sm:$0xf]  ;;  %684 = vst [vmem:[%s3839_s29 + $0x3c8] sm:$0xf] %v683_v50  ;;  %686 = vst [vmem:[%s3839_s29 + $0x3cc] sm:$0xf] %v685_v51 }
  0xb8   : > { %688 = vst [vmem:[%s3839_s29 + $0x3d0] sm:$0xf] %v687_v52  ;;  %v689_v53 = vld [vmem:[%s3835_s28 + $0x7a8] sm:$0xf]  ;;  %v691_v54 = vld [vmem:[%s3835_s28 + $0x7b0] sm:$0xf] }
  0xb9   : > { %v693_v55 = vld [vmem:[%s3835_s28 + $0x7b8] sm:$0xf]  ;;  %690 = vst [vmem:[%s3839_s29 + $0x3d4] sm:$0xf] %v689_v53  ;;  %692 = vst [vmem:[%s3839_s29 + $0x3d8] sm:$0xf] %v691_v54 }
  0xba   : > { %694 = vst [vmem:[%s3839_s29 + $0x3dc] sm:$0xf] %v693_v55  ;;  %v695_v56 = vld [vmem:[%s3835_s28 + $0x7c0] sm:$0xf]  ;;  %v697_v57 = vld [vmem:[%s3835_s28 + $0x7c8] sm:$0xf] }
  0xbb   : > { %v699_v58 = vld [vmem:[%s3835_s28 + $0x7d0] sm:$0xf]  ;;  %696 = vst [vmem:[%s3839_s29 + $0x3e0] sm:$0xf] %v695_v56  ;;  %698 = vst [vmem:[%s3839_s29 + $0x3e4] sm:$0xf] %v697_v57 }
  0xbc   : > { %700 = vst [vmem:[%s3839_s29 + $0x3e8] sm:$0xf] %v699_v58  ;;  %v701_v59 = vld [vmem:[%s3835_s28 + $0x7d8] sm:$0xf]  ;;  %v703_v60 = vld [vmem:[%s3835_s28 + $0x7e0] sm:$0xf] }
  0xbd   : > { %v705_v61 = vld [vmem:[%s3835_s28 + $0x7e8] sm:$0xf]  ;;  %702 = vst [vmem:[%s3839_s29 + $0x3ec] sm:$0xf] %v701_v59  ;;  %704 = vst [vmem:[%s3839_s29 + $0x3f0] sm:$0xf] %v703_v60 }
  0xbe   : > { %706 = vst [vmem:[%s3839_s29 + $0x3f4] sm:$0xf] %v705_v61  ;;  %v707_v62 = vld [vmem:[%s3835_s28 + $0x7f0] sm:$0xf]  ;;  %v709_v63 = vld [vmem:[%s3835_s28 + $0x7f8] sm:$0xf] }
  0xbf   : > { %708 = vst [vmem:[%s3839_s29 + $0x3f8] sm:$0xf] %v707_v62  ;;  %710 = vst [vmem:[%s3839_s29 + $0x3fc] sm:$0xf] %v709_v63 }
  0xc0 PF: > { %p3148_p8 = scmp.ge.s32.totalorder %s3765_s16, 1  ;;  %p1250_p9 = scmp.lt.s32.totalorder %s3765_s16, 3 }
  0xc2   : > { %p1251_p10 = pnand %p3148_p8, %p1250_p9 }
  0xc3   : > { %s1257_s30 = sand.u32 (!%p1251_p10), 1, %s3749_s12   ;;  %v4357_v0 = vld [vmem:[%s4626_s0] sm:$0xff] (!%p1251_p10)  ;;  %v4367_v2 = vld [vmem:[%s4626_s0 + $0x8] sm:$0xff] (!%p1251_p10)  ;;  %p1305_p11 = scmp.lt.s32.totalorder (!%p1251_p10), %s3757_s14, 1 }
  0xc4   : > { %1254 = sbr.rel (%p1251_p10) target bundleno = 570 (0x23a), region = 69  ;;  %v4362_v1 = vld [vmem:[%s4626_s0 + $0x40] sm:$0xff] (!%p1251_p10)  ;;  %s3149_s10 = sshll.u32 (!%p1251_p10), %s1257_s30, 10  ;;  %v4376_v4 = vld [vmem:[%s4626_s0 + $0x48] sm:$0xff] (!%p1251_p10) }
  0xc5   : > { %v3152_v3 = vcombine.high (!%p1251_p10), %v4357_v0, %v4362_v1  ;;  %v3154_v5 = vcombine.high (!%p1251_p10), %v4367_v2, %v4376_v4  ;;  %s4380_s19 = scalar_lea.vmem (!%p1251_p10), [#allocation3], %s3149_s10  ;;  %v1338_v35 = vld [vmem:[%s4626_s0 + $0x80] sm:$0xff] (!%p1251_p10)  ;;  %v1339_v38 = vld [vmem:[%s4626_s0 + $0x88] sm:$0xff] (!%p1251_p10)  ;;  %v3151_v42 = vcombine.low (!%p1251_p10), %v4357_v0, %v4362_v1  ;;  %v3153_v43 = vcombine.low (!%p1251_p10), %v4367_v2, %v4376_v4  ;;  %s3150_s4 = sshll.u32 (!%p1251_p10), %s1257_s30, 4 }
  0xc6   : > { %v3599_v6 = vld [vmem:[%s4380_s19 + $0x40] sm:$0xff] (!%p1251_p10)   ;;  %v3603_v10 = vld [vmem:[%s4380_s19 + $0x48] sm:$0xff] (!%p1251_p10)   ;;  %v3607_v14 = vld [vmem:[%s4380_s19 + $0x50] sm:$0xff] (!%p1251_p10)   ;;  %s1291_s5 = scalar_lea.vmem (!%p1251_p10), [#allocation4], %s3150_s4 }
  0xc7   : > { %2570 = vmatprep.mubr.bf16.mxu0 (!%p1251_p10), %v3152_v3  ;;  %v3600_v7 = vld [vmem:[%s4380_s19 + $0xc0] sm:$0xff] (!%p1251_p10)   ;;  %2619 = vmatprep.mubr.bf16.mxu1 (!%p1251_p10), %v3154_v5  ;;  %v3604_v11 = vld [vmem:[%s4380_s19 + $0xc8] sm:$0xff] (!%p1251_p10)   ;;  %v3608_v15 = vld [vmem:[%s4380_s19 + $0xd0] sm:$0xff] (!%p1251_p10)  }
  0xc8   : > { %3335 = vmatprep.subr.bf16.mxu0 (!%p1251_p10), %v3599_v6  ;;  %v3601_v8 = vld [vmem:[%s4380_s19] sm:$0xff] (!%p1251_p10)   ;;  %3363 = vmatprep.subr.bf16.mxu1 (!%p1251_p10), %v3600_v7  ;;  %v3605_v12 = vld [vmem:[%s4380_s19 + $0x8] sm:$0xff] (!%p1251_p10)   ;;  %v3609_v16 = vld [vmem:[%s4380_s19 + $0x10] sm:$0xff] (!%p1251_p10)  }
  0xc9   : > { %v3602_v9 = vld [vmem:[%s4380_s19 + $0x80] sm:$0xff] (!%p1251_p10)   ;;  %3336 = vmatpush3.bf16.msra.mxu0 (!%p1251_p10), %v3601_v8  ;;  %v3606_v13 = vld [vmem:[%s4380_s19 + $0x88] sm:$0xff] (!%p1251_p10)   ;;  %v3610_v17 = vld [vmem:[%s4380_s19 + $0x90] sm:$0xff] (!%p1251_p10)  }
  0xca   : > { %3364 = vmatpush3.bf16.msra.mxu1 (!%p1251_p10), %v3602_v9  ;;  %3337 = vmatprep.subr.bf16.mxu0 (!%p1251_p10), %v3603_v10  ;;  %v3611_v18 = vld [vmem:[%s4380_s19 + $0x58] sm:$0xff] (!%p1251_p10)   ;;  %v3615_v22 = vld [vmem:[%s4380_s19 + $0x60] sm:$0xff] (!%p1251_p10)   ;;  %v3619_v26 = vld [vmem:[%s4380_s19 + $0x68] sm:$0xff] (!%p1251_p10)  }
  0xcb   : > { %3365 = vmatprep.subr.bf16.mxu1 %v3604_v11  ;;  %v3612_v19 = vld [vmem:[%s4380_s19 + $0xd8] sm:$0xff]   ;;  %v3616_v23 = vld [vmem:[%s4380_s19 + $0xe0] sm:$0xff]   ;;  %v3620_v27 = vld [vmem:[%s4380_s19 + $0xe8] sm:$0xff]   ;;  %s1306_s26 = scalar_select %p1305_p11, %s3757_s14, 1 }
  0xcc   : > { %v3613_v20 = vld [vmem:[%s4380_s19 + $0x18] sm:$0xff]   ;;  %v3617_v24 = vld [vmem:[%s4380_s19 + $0x20] sm:$0xff]   ;;  %v3621_v28 = vld [vmem:[%s4380_s19 + $0x28] sm:$0xff]   ;;  %s3317_s12 = sshll.u32 (%p3822_p6), %s3757_s14, 2 }
  0xcd   : > { %3338 = vmatpush3.bf16.msra.mxu0 %v3605_v12  ;;  %v3614_v21 = vld [vmem:[%s4380_s19 + $0x98] sm:$0xff]   ;;  %v3618_v25 = vld [vmem:[%s4380_s19 + $0xa0] sm:$0xff]   ;;  %v3622_v29 = vld [vmem:[%s4380_s19 + $0xa8] sm:$0xff]   ;;  %s1307_s29 = scalar_lea.vmem %s4628_s2, %s1306_s26  ;;  %s2987_s7 = scalar_lea.vmem (%p3822_p6), %s4629_s3, %s3317_s12 }
  0xce   : > { %3366 = vmatpush3.bf16.msra.mxu1 %v3606_v13  ;;  %3339 = vmatprep.subr.bf16.mxu0 %v3607_v14  ;;  %v3623_v30 = vld [vmem:[%s4380_s19 + $0x70] sm:$0xff]   ;;  %v3627_v34 = vld [vmem:[%s4380_s19 + $0x78] sm:$0xff]   ;;  %v1346_v36 = vld [vmem:[%s4626_s0 + $0xc0] sm:$0xff] }
  0xcf   : > { %3367 = vmatprep.subr.bf16.mxu1 %v3608_v15  ;;  %v3624_v31 = vld [vmem:[%s4380_s19 + $0xf0] sm:$0xff]   ;;  %v3628_v37 = vld [vmem:[%s4380_s19 + $0xf8] sm:$0xff]   ;;  %v1347_v39 = vld [vmem:[%s4626_s0 + $0xc8] sm:$0xff]  ;;  %v3168_v46 = vcombine.high %v1338_v35, %v1346_v36  ;;  %v3167_v54 = vcombine.low %v1338_v35, %v1346_v36 }
  0xd0   : > { %v3625_v32 = vld [vmem:[%s4380_s19 + $0x30] sm:$0xff]   ;;  %v3629_v40 = vld [vmem:[%s4380_s19 + $0x38] sm:$0xff]   ;;  %v3631_v44 = vld [vmem:[%s4380_s19 + $0x140] sm:$0xff]   ;;  %v3170_v48 = vcombine.high %v1339_v38, %v1347_v39  ;;  %v3169_v56 = vcombine.low %v1339_v38, %v1347_v39 }
  0xd1   : > { %3340 = vmatpush3.bf16.msra.mxu0 %v3609_v16  ;;  %v3626_v33 = vld [vmem:[%s4380_s19 + $0xb0] sm:$0xff]   ;;  %v3630_v41 = vld [vmem:[%s4380_s19 + $0xb8] sm:$0xff]   ;;  %v3632_v45 = vld [vmem:[%s4380_s19 + $0x1c0] sm:$0xff]  }
  0xd2   : > { %3368 = vmatpush3.bf16.msra.mxu1 %v3610_v17  ;;  %3341 = vmatprep.subr.bf16.mxu0 %v3611_v18  ;;  %v3633_v47 = vld [vmem:[%s4380_s19 + $0x100] sm:$0xff]   ;;  %v3635_v50 = vld [vmem:[%s4380_s19 + $0x148] sm:$0xff]   ;;  %v3639_v55 = vld [vmem:[%s4380_s19 + $0x150] sm:$0xff]  }
  0xd3   : > { %3369 = vmatprep.subr.bf16.mxu1 %v3612_v19  ;;  %v3634_v49 = vld [vmem:[%s4380_s19 + $0x180] sm:$0xff]   ;;  %v3636_v51 = vld [vmem:[%s4380_s19 + $0x1c8] sm:$0xff]   ;;  %v3640_v57 = vld [vmem:[%s4380_s19 + $0x1d0] sm:$0xff]  }
  0xd4   : > { %v3637_v52 = vld [vmem:[%s4380_s19 + $0x108] sm:$0xff]   ;;  %v3641_v58 = vld [vmem:[%s4380_s19 + $0x110] sm:$0xff]   ;;  %v3643_v60 = vld [vmem:[%s4380_s19 + $0x158] sm:$0xff]  }
  0xd5   : > { %3342 = vmatpush3.bf16.msra.mxu0 %v3613_v20  ;;  %v3638_v53 = vld [vmem:[%s4380_s19 + $0x188] sm:$0xff]   ;;  %v3642_v59 = vld [vmem:[%s4380_s19 + $0x190] sm:$0xff]   ;;  %v3644_v61 = vld [vmem:[%s4380_s19 + $0x1d8] sm:$0xff]  }
  0xd6   : > { %3370 = vmatpush3.bf16.msra.mxu1 %v3614_v21  ;;  %3343 = vmatprep.subr.bf16.mxu0 %v3615_v22  ;;  %v3645_v62 = vld [vmem:[%s4380_s19 + $0x118] sm:$0xff]   ;;  %v3647_v0 = vld [vmem:[%s4380_s19 + $0x160] sm:$0xff]   ;;  %v3651_v4 = vld [vmem:[%s4380_s19 + $0x168] sm:$0xff]  }
  0xd7   : > { %3371 = vmatprep.subr.bf16.mxu1 %v3616_v23  ;;  %v3646_v63 = vld [vmem:[%s4380_s19 + $0x198] sm:$0xff]   ;;  %v3648_v1 = vld [vmem:[%s4380_s19 + $0x1e0] sm:$0xff]   ;;  %v3652_v5 = vld [vmem:[%s4380_s19 + $0x1e8] sm:$0xff]  }
  0xd8   : > { %v3649_v2 = vld [vmem:[%s4380_s19 + $0x120] sm:$0xff]   ;;  %v3653_v6 = vld [vmem:[%s4380_s19 + $0x128] sm:$0xff]   ;;  %v3655_v8 = vld [vmem:[%s4380_s19 + $0x170] sm:$0xff]  }
  0xd9   : > { %3344 = vmatpush3.bf16.msra.mxu0 %v3617_v24  ;;  %v3650_v3 = vld [vmem:[%s4380_s19 + $0x1a0] sm:$0xff]   ;;  %v3654_v7 = vld [vmem:[%s4380_s19 + $0x1a8] sm:$0xff]   ;;  %v3656_v9 = vld [vmem:[%s4380_s19 + $0x1f0] sm:$0xff]  }
  0xda   : > { %3372 = vmatpush3.bf16.msra.mxu1 %v3618_v25  ;;  %3345 = vmatprep.subr.bf16.mxu0 %v3619_v26  ;;  %v3657_v10 = vld [vmem:[%s4380_s19 + $0x130] sm:$0xff]   ;;  %v3659_v12 = vld [vmem:[%s4380_s19 + $0x178] sm:$0xff]   ;;  %v3663_v24 = vld [vmem:[%s4380_s19 + $0x240] sm:$0xff]  }
  0xdb   : > { %3373 = vmatprep.subr.bf16.mxu1 %v3620_v27  ;;  %v3658_v11 = vld [vmem:[%s4380_s19 + $0x1b0] sm:$0xff]   ;;  %v3660_v14 = vld [vmem:[%s4380_s19 + $0x1f8] sm:$0xff]   ;;  %v3664_v25 = vld [vmem:[%s4380_s19 + $0x2c0] sm:$0xff]  }
  0xdc   : > { %v1324_v13 = vld [vmem:[%s4626_s0 + $0x10] sm:$0xff]  ;;  %v3661_v15 = vld [vmem:[%s4380_s19 + $0x138] sm:$0xff]   ;;  %v3665_v26 = vld [vmem:[%s4380_s19 + $0x200] sm:$0xff]  }
  0xdd   : > { %3346 = vmatpush3.bf16.msra.mxu0 %v3621_v28  ;;  %v3662_v16 = vld [vmem:[%s4380_s19 + $0x1b8] sm:$0xff]   ;;  %v1332_v17 = vld [vmem:[%s4626_s0 + $0x50] sm:$0xff]  ;;  %v3666_v27 = vld [vmem:[%s4380_s19 + $0x280] sm:$0xff]  }
  0xde   : > { %3374 = vmatpush3.bf16.msra.mxu1 %v3622_v29  ;;  %3347 = vmatprep.subr.bf16.mxu0 %v3623_v30  ;;  %v1325_v18 = vld [vmem:[%s4626_s0 + $0x18] sm:$0xff]  ;;  %v3155_v20 = vcombine.low %v1324_v13, %v1332_v17  ;;  %v3156_v21 = vcombine.high %v1324_v13, %v1332_v17  ;;  %v3667_v28 = vld [vmem:[%s4380_s19 + $0x248] sm:$0xff]   ;;  %v3671_v36 = vld [vmem:[%s4380_s19 + $0x250] sm:$0xff]  }
  0xdf   : > { %3375 = vmatprep.subr.bf16.mxu1 %v3624_v31  ;;  %v1333_v19 = vld [vmem:[%s4626_s0 + $0x58] sm:$0xff]  ;;  %v3668_v29 = vld [vmem:[%s4380_s19 + $0x2c8] sm:$0xff]   ;;  %v1350_v17 = vld [vmem:[%s4626_s0 + $0xe0] sm:$0xff] }
  0xe0   : > { %v3157_v22 = vcombine.low %v1325_v18, %v1333_v19  ;;  %v3158_v23 = vcombine.high %v1325_v18, %v1333_v19  ;;  %v3669_v30 = vld [vmem:[%s4380_s19 + $0x208] sm:$0xff]   ;;  %v1341_v38 = vld [vmem:[%s4626_s0 + $0x98] sm:$0xff] }
  0xe1   : > { %3348 = vmatpush3.bf16.msra.mxu0 %v3625_v32  ;;  %v3670_v31 = vld [vmem:[%s4380_s19 + $0x288] sm:$0xff]   ;;  %v1340_v32 = vld [vmem:[%s4626_s0 + $0x90] sm:$0xff]  ;;  %v1349_v39 = vld [vmem:[%s4626_s0 + $0xd8] sm:$0xff] }
  0xe2   : > { %3376 = vmatpush3.bf16.msra.mxu1 %v3626_v33  ;;  %3349 = vmatprep.subr.bf16.mxu0 %v3627_v34  ;;  %v1348_v33 = vld [vmem:[%s4626_s0 + $0xd0] sm:$0xff]  ;;  %v3700_v13 = vld [vmem:[%s4380_s19 + $0x3c8] sm:$0xff]  }
  0xe3   : > { %3377 = vmatprep.subr.bf16.mxu1 %v3628_v37  ;;  %v3172_v34 = vcombine.high %v1340_v32, %v1348_v33  ;;  %v3171_v35 = vcombine.low %v1340_v32, %v1348_v33  ;;  %v3672_v37 = vld [vmem:[%s4380_s19 + $0x2d0] sm:$0xff]   ;;  %v3711_v32 = vld [vmem:[%s4380_s19 + $0x360] sm:$0xff]  }
  0xe4   : > { %v3712_v33 = vld [vmem:[%s4380_s19 + $0x3e0] sm:$0xff]  }
  0xe5   : > { %3350 = vmatpush3.bf16.msra.mxu0 %v3629_v40  ;;  %v3174_v40 = vcombine.high %v1341_v38, %v1349_v39 }
  0xe6   : > { %3378 = vmatpush3.bf16.msra.mxu1 %v3630_v41  ;;  %3391 = vmatprep.subr.bf16.mxu0 %v3631_v44  ;;  %v3673_v41 = vld [vmem:[%s4380_s19 + $0x210] sm:$0xff]   ;;  %v3675_v44 = vld [vmem:[%s4380_s19 + $0x258] sm:$0xff]  }
  0xe7   : > { %3419 = vmatprep.subr.bf16.mxu1 %v3632_v45  ;;  %v3676_v45 = vld [vmem:[%s4380_s19 + $0x2d8] sm:$0xff]  }
  0xe8   : > { %2571 = vmatmul.mubr.bf16.vlgmr.msra.gmra.mrb[0].mxu0 %v3151_v42  ;;  %v3173_v42 = vcombine.low %v1341_v38, %v1349_v39  ;;  %v3717_v38 = vld [vmem:[%s4380_s19 + $0x328] sm:$0xff]  }
  0xe9   : > { %2620 = vmatmul.mubr.bf16.vlgmr.msra.gmra.mrb[0].mxu1 %v3153_v43  ;;  %3392 = vmatpush3.bf16.msra.mxu0 %v3633_v47  ;;  %v3674_v43 = vld [vmem:[%s4380_s19 + $0x290] sm:$0xff]   ;;  %v3678_v47 = vld [vmem:[%s4380_s19 + $0x298] sm:$0xff]   ;;  %v3718_v39 = vld [vmem:[%s4380_s19 + $0x3a8] sm:$0xff]  }
  0xea   : > { %3420 = vmatpush3.bf16.msra.mxu1 %v3634_v49  ;;  %2578 = vmatprep.mubr.bf16.mxu0 %v3168_v46  ;;  %v3677_v46 = vld [vmem:[%s4380_s19 + $0x218] sm:$0xff]   ;;  %v3680_v49 = vld [vmem:[%s4380_s19 + $0x2e0] sm:$0xff]  }
  0xeb   : > { %3393 = vmatprep.subr.bf16.mxu0 %v3635_v50  ;;  %2627 = vmatprep.mubr.bf16.mxu1 %v3170_v48  ;;  %v3679_v48 = vld [vmem:[%s4380_s19 + $0x260] sm:$0xff]  }
  0xec   : > { %3421 = vmatprep.subr.bf16.mxu1 %v3636_v51  ;;  %v3681_v50 = vld [vmem:[%s4380_s19 + $0x220] sm:$0xff]  }
  0xed   : > { %3394 = vmatpush3.bf16.msra.mxu0 %v3637_v52  ;;  %v3682_v51 = vld [vmem:[%s4380_s19 + $0x2a0] sm:$0xff]   ;;  %v3683_v52 = vld [vmem:[%s4380_s19 + $0x268] sm:$0xff]  }
  0xee   : > { %3422 = vmatpush3.bf16.msra.mxu1 %v3638_v53  ;;  %3395 = vmatprep.subr.bf16.mxu0 %v3639_v55  ;;  %v3684_v53 = vld [vmem:[%s4380_s19 + $0x2e8] sm:$0xff]  }
  0xef   : > { %3423 = vmatprep.subr.bf16.mxu1 %v3640_v57  ;;  %v3686_v55 = vld [vmem:[%s4380_s19 + $0x2a8] sm:$0xff]   ;;  %v3688_v57 = vld [vmem:[%s4380_s19 + $0x2f0] sm:$0xff]  }
  0xf0   : > { %2579 = vmatmul.mubr.bf16.gmra.mrb[4].mxu0 %v3167_v54  ;;  %v3685_v54 = vld [vmem:[%s4380_s19 + $0x228] sm:$0xff]  }
  0xf1   : > { %3396 = vmatpush3.bf16.msra.mxu0 %v3641_v58  ;;  %2628 = vmatmul.mubr.bf16.gmra.mrb[4].mxu1 %v3169_v56  ;;  %v3687_v56 = vld [vmem:[%s4380_s19 + $0x270] sm:$0xff]  }
  0xf2   : > { %3424 = vmatpush3.bf16.msra.mxu1 %v3642_v59  ;;  %3397 = vmatprep.subr.bf16.mxu0 %v3643_v60  ;;  %v3689_v58 = vld [vmem:[%s4380_s19 + $0x230] sm:$0xff]   ;;  %v3691_v60 = vld [vmem:[%s4380_s19 + $0x278] sm:$0xff]  }
  0xf3   : > { %3425 = vmatprep.subr.bf16.mxu1 %v3644_v61  ;;  %2668 = vmatprep.mubr.bf16.mxu0 %v3156_v21  ;;  %v3690_v59 = vld [vmem:[%s4380_s19 + $0x2b0] sm:$0xff]   ;;  %v3692_v61 = vld [vmem:[%s4380_s19 + $0x2f8] sm:$0xff]  }
  0xf4   : > { %2717 = vmatprep.mubr.bf16.mxu1 %v3158_v23  ;;  %v3704_v21 = vld [vmem:[%s4380_s19 + $0x3d0] sm:$0xff]   ;;  %v1351_v23 = vld [vmem:[%s4626_s0 + $0xe8] sm:$0xff] }
  0xf5   : > { %3398 = vmatpush3.bf16.msra.mxu0 %v3645_v62  ;;  %v3693_v62 = vld [vmem:[%s4380_s19 + $0x238] sm:$0xff]  }
  0xf6   : > { %3426 = vmatpush3.bf16.msra.mxu1 %v3646_v63  ;;  %3399 = vmatprep.subr.bf16.mxu0 %v3647_v0  ;;  %v3694_v63 = vld [vmem:[%s4380_s19 + $0x2b8] sm:$0xff]   ;;  %v1326_v0 = vld [vmem:[%s4626_s0 + $0x20] sm:$0xff] }
  0xf7   : > { %3427 = vmatprep.subr.bf16.mxu1 %v3648_v1  ;;  %v1334_v1 = vld [vmem:[%s4626_s0 + $0x60] sm:$0xff] }
  0xf9   : > { %3400 = vmatpush3.bf16.msra.mxu0 %v3649_v2  ;;  %v3159_v2 = vcombine.low %v1326_v0, %v1334_v1 }
  0xfa   : > { %3428 = vmatpush3.bf16.msra.mxu1 %v3650_v3  ;;  %3401 = vmatprep.subr.bf16.mxu0 %v3651_v4  ;;  %v3160_v3 = vcombine.high %v1326_v0, %v1334_v1  ;;  %v1327_v4 = vld [vmem:[%s4626_s0 + $0x28] sm:$0xff] }
  0xfb   : > { %3429 = vmatprep.subr.bf16.mxu1 %v3652_v5  ;;  %v1335_v5 = vld [vmem:[%s4626_s0 + $0x68] sm:$0xff] }
  0xfd   : > { %3402 = vmatpush3.bf16.msra.mxu0 %v3653_v6  ;;  %v3161_v6 = vcombine.low %v1327_v4, %v1335_v5 }
  0xfe   : > { %3430 = vmatpush3.bf16.msra.mxu1 %v3654_v7  ;;  %3403 = vmatprep.subr.bf16.mxu0 %v3655_v8  ;;  %v3162_v7 = vcombine.high %v1327_v4, %v1335_v5  ;;  %v3695_v8 = vld [vmem:[%s4380_s19 + $0x340] sm:$0xff]  }
  0xff   : > { %3431 = vmatprep.subr.bf16.mxu1 %v3656_v9  ;;  %v3696_v9 = vld [vmem:[%s4380_s19 + $0x3c0] sm:$0xff]  }
 0x101   : > { %3404 = vmatpush3.bf16.msra.mxu0 %v3657_v10  ;;  %v3697_v10 = vld [vmem:[%s4380_s19 + $0x300] sm:$0xff]  }
 0x102   : > { %3432 = vmatpush3.bf16.msra.mxu1 %v3658_v11  ;;  %3405 = vmatprep.subr.bf16.mxu0 %v3659_v12  ;;  %v3698_v11 = vld [vmem:[%s4380_s19 + $0x380] sm:$0xff]   ;;  %v3699_v12 = vld [vmem:[%s4380_s19 + $0x348] sm:$0xff]  }
 0x103   : > { %3433 = vmatprep.subr.bf16.mxu1 %v3660_v14  ;;  %v3701_v14 = vld [vmem:[%s4380_s19 + $0x308] sm:$0xff]  }
 0x105   : > { %3406 = vmatpush3.bf16.msra.mxu0 %v3661_v15  ;;  %v3702_v15 = vld [vmem:[%s4380_s19 + $0x388] sm:$0xff]  }
 0x106   : > { %3434 = vmatpush3.bf16.msra.mxu1 %v3662_v16  ;;  %3447 = vmatprep.subr.bf16.mxu0 %v3663_v24  ;;  %v1342_v16 = vld [vmem:[%s4626_s0 + $0xa0] sm:$0xff] }
 0x107   : > { %3475 = vmatprep.subr.bf16.mxu1 %v3664_v25  ;;  %v3176_v18 = vcombine.high %v1342_v16, %v1350_v17  ;;  %v3175_v19 = vcombine.low %v1342_v16, %v1350_v17  ;;  %v3705_v25 = vld [vmem:[%s4380_s19 + $0x310] sm:$0xff]  }
 0x108   : > { %2669 = vmatmul.mubr.bf16.vlgmr.msra.gmra.mrb[8].mxu0 %v3155_v20  ;;  %v3703_v20 = vld [vmem:[%s4380_s19 + $0x350] sm:$0xff]  }
 0x109   : > { %2718 = vmatmul.mubr.bf16.vlgmr.msra.gmra.mrb[8].mxu1 %v3157_v22  ;;  %3448 = vmatpush3.bf16.msra.mxu0 %v3665_v26  ;;  %v1343_v22 = vld [vmem:[%s4626_s0 + $0xa8] sm:$0xff] }
 0x10a   : > { %3476 = vmatpush3.bf16.msra.mxu1 %v3666_v27  ;;  %3449 = vmatprep.subr.bf16.mxu0 %v3667_v28  ;;  %v3178_v24 = vcombine.high %v1343_v22, %v1351_v23  ;;  %v3177_v26 = vcombine.low %v1343_v22, %v1351_v23  ;;  %v3706_v27 = vld [vmem:[%s4380_s19 + $0x390] sm:$0xff]   ;;  %v3707_v28 = vld [vmem:[%s4380_s19 + $0x358] sm:$0xff]  }
 0x10b   : > { %3477 = vmatprep.subr.bf16.mxu1 %v3668_v29  ;;  %2676 = vmatprep.mubr.bf16.mxu0 %v3172_v34  ;;  %v3708_v29 = vld [vmem:[%s4380_s19 + $0x3d8] sm:$0xff]   ;;  %v3713_v34 = vld [vmem:[%s4380_s19 + $0x320] sm:$0xff]  }
 0x10c   : > { %2725 = vmatprep.mubr.bf16.mxu1 %v3174_v40  ;;  %v3719_v40 = vld [vmem:[%s4380_s19 + $0x370] sm:$0xff]  }
 0x10d   : > { %3450 = vmatpush3.bf16.msra.mxu0 %v3669_v30  ;;  %v3709_v30 = vld [vmem:[%s4380_s19 + $0x318] sm:$0xff]  }
 0x10e   : > { %3478 = vmatpush3.bf16.msra.mxu1 %v3670_v31  ;;  %3451 = vmatprep.subr.bf16.mxu0 %v3671_v36  ;;  %v3710_v31 = vld [vmem:[%s4380_s19 + $0x398] sm:$0xff]   ;;  %v3715_v36 = vld [vmem:[%s4380_s19 + $0x368] sm:$0xff]  }
 0x10f   : > { %3479 = vmatprep.subr.bf16.mxu1 %v3672_v37  ;;  %v3716_v37 = vld [vmem:[%s4380_s19 + $0x3e8] sm:$0xff]  }
 0x110   : > { %2677 = vmatmul.mubr.bf16.gmra.mrb[12].mxu0 %v3171_v35  ;;  %v3714_v35 = vld [vmem:[%s4380_s19 + $0x3a0] sm:$0xff]  }
 0x111   : > { %3452 = vmatpush3.bf16.msra.mxu0 %v3673_v41  ;;  %2726 = vmatmul.mubr.bf16.gmra.mrb[12].mxu1 %v3173_v42  ;;  %v3720_v41 = vld [vmem:[%s4380_s19 + $0x3f0] sm:$0xff]  }
 0x112   : > { %3480 = vmatpush3.bf16.msra.mxu1 %v3674_v43  ;;  %3453 = vmatprep.subr.bf16.mxu0 %v3675_v44  ;;  %v3721_v42 = vld [vmem:[%s4380_s19 + $0x330] sm:$0xff]   ;;  %v3723_v44 = vld [vmem:[%s4380_s19 + $0x378] sm:$0xff]  }
 0x113   : > { %3481 = vmatprep.subr.bf16.mxu1 %v3676_v45  ;;  %2766 = vmatprep.mubr.bf16.mxu0 %v3160_v3  ;;  %v3722_v43 = vld [vmem:[%s4380_s19 + $0x3b0] sm:$0xff]   ;;  %v3724_v45 = vld [vmem:[%s4380_s19 + $0x3f8] sm:$0xff]  }
 0x114   : > { %2815 = vmatprep.mubr.bf16.mxu1 %v3162_v7 }
 0x115   : > { %3454 = vmatpush3.bf16.msra.mxu0 %v3677_v46  ;;  %v3725_v46 = vld [vmem:[%s4380_s19 + $0x338] sm:$0xff]  }
 0x116   : > { %3482 = vmatpush3.bf16.msra.mxu1 %v3678_v47  ;;  %3455 = vmatprep.subr.bf16.mxu0 %v3679_v48  ;;  %v3726_v47 = vld [vmem:[%s4380_s19 + $0x3b8] sm:$0xff]   ;;  %v1328_v48 = vld [vmem:[%s4626_s0 + $0x30] sm:$0xff] }
 0x117   : > { %3483 = vmatprep.subr.bf16.mxu1 %v3680_v49  ;;  %v1336_v49 = vld [vmem:[%s4626_s0 + $0x70] sm:$0xff] }
 0x119   : > { %3456 = vmatpush3.bf16.msra.mxu0 %v3681_v50  ;;  %v1329_v50 = vld [vmem:[%s4626_s0 + $0x38] sm:$0xff] }
 0x11a   : > { %3484 = vmatpush3.bf16.msra.mxu1 %v3682_v51  ;;  %3457 = vmatprep.subr.bf16.mxu0 %v3683_v52  ;;  %v3163_v51 = vcombine.low %v1328_v48, %v1336_v49  ;;  %v3164_v52 = vcombine.high %v1328_v48, %v1336_v49 }
 0x11b   : > { %3485 = vmatprep.subr.bf16.mxu1 %v3684_v53  ;;  %v1337_v53 = vld [vmem:[%s4626_s0 + $0x78] sm:$0xff] }
 0x11d   : > { %3458 = vmatpush3.bf16.msra.mxu0 %v3685_v54  ;;  %v1344_v54 = vld [vmem:[%s4626_s0 + $0xb0] sm:$0xff] }
 0x11e   : > { %3486 = vmatpush3.bf16.msra.mxu1 %v3686_v55  ;;  %3459 = vmatprep.subr.bf16.mxu0 %v3687_v56  ;;  %v1352_v55 = vld [vmem:[%s4626_s0 + $0xf0] sm:$0xff]  ;;  %v3165_v56 = vcombine.low %v1329_v50, %v1337_v53 }
 0x11f   : > { %3487 = vmatprep.subr.bf16.mxu1 %v3688_v57  ;;  %v3166_v57 = vcombine.high %v1329_v50, %v1337_v53 }
 0x121   : > { %3460 = vmatpush3.bf16.msra.mxu0 %v3689_v58  ;;  %v3180_v58 = vcombine.high %v1344_v54, %v1352_v55 }
 0x122   : > { %3488 = vmatpush3.bf16.msra.mxu1 %v3690_v59  ;;  %3461 = vmatprep.subr.bf16.mxu0 %v3691_v60  ;;  %v1345_v59 = vld [vmem:[%s4626_s0 + $0xb8] sm:$0xff] }
 0x123   : > { %3489 = vmatprep.subr.bf16.mxu1 %v3692_v61  ;;  %v1353_v60 = vld [vmem:[%s4626_s0 + $0xf8] sm:$0xff] }
 0x124   : > { %v3182_v61 = vcombine.high %v1345_v59, %v1353_v60 }
 0x125   : > { %3462 = vmatpush3.bf16.msra.mxu0 %v3693_v62  ;;  %v3179_v62 = vcombine.low %v1344_v54, %v1352_v55 }
 0x126   : > { %3490 = vmatpush3.bf16.msra.mxu1 %v3694_v63  ;;  %3503 = vmatprep.subr.bf16.mxu0 %v3695_v8  ;;  %v3181_v63 = vcombine.low %v1345_v59, %v1353_v60 }
 0x127   : > { %3531 = vmatprep.subr.bf16.mxu1 %v3696_v9 }
 0x128   : > { %2767 = vmatmul.mubr.bf16.vlgmr.msra.gmra.mrb[16].mxu0 %v3159_v2 }
 0x129   : > { %2816 = vmatmul.mubr.bf16.vlgmr.msra.gmra.mrb[16].mxu1 %v3161_v6  ;;  %3504 = vmatpush3.bf16.msra.mxu0 %v3697_v10 }
 0x12a   : > { %3532 = vmatpush3.bf16.msra.mxu1 %v3698_v11  ;;  %3505 = vmatprep.subr.bf16.mxu0 %v3699_v12 }
 0x12b   : > { %3533 = vmatprep.subr.bf16.mxu1 %v3700_v13  ;;  %2774 = vmatprep.mubr.bf16.mxu0 %v3176_v18 }
 0x12c   : > { %2823 = vmatprep.mubr.bf16.mxu1 %v3178_v24 }
 0x12d   : > { %3506 = vmatpush3.bf16.msra.mxu0 %v3701_v14 }
 0x12e   : > { %3534 = vmatpush3.bf16.msra.mxu1 %v3702_v15  ;;  %3507 = vmatprep.subr.bf16.mxu0 %v3703_v20 }
 0x12f   : > { %3535 = vmatprep.subr.bf16.mxu1 %v3704_v21 }
 0x130   : > { %2775 = vmatmul.mubr.bf16.gmra.mrb[20].mxu0 %v3175_v19 }
 0x131   : > { %3508 = vmatpush3.bf16.msra.mxu0 %v3705_v25  ;;  %2824 = vmatmul.mubr.bf16.gmra.mrb[20].mxu1 %v3177_v26 }
 0x132   : > { %3536 = vmatpush3.bf16.msra.mxu1 %v3706_v27  ;;  %3509 = vmatprep.subr.bf16.mxu0 %v3707_v28 }
 0x133   : > { %3537 = vmatprep.subr.bf16.mxu1 %v3708_v29  ;;  %2864 = vmatprep.mubr.bf16.mxu0 %v3164_v52 }
 0x134   : > { %2913 = vmatprep.mubr.bf16.mxu1 %v3166_v57 }
 0x135   : > { %3510 = vmatpush3.bf16.msra.mxu0 %v3709_v30 }
 0x136   : > { %3538 = vmatpush3.bf16.msra.mxu1 %v3710_v31  ;;  %3511 = vmatprep.subr.bf16.mxu0 %v3711_v32 }
 0x137   : > { %3539 = vmatprep.subr.bf16.mxu1 %v3712_v33 }
 0x139   : > { %3512 = vmatpush3.bf16.msra.mxu0 %v3713_v34 }
 0x13a   : > { %3540 = vmatpush3.bf16.msra.mxu1 %v3714_v35  ;;  %3513 = vmatprep.subr.bf16.mxu0 %v3715_v36 }
 0x13b   : > { %3541 = vmatprep.subr.bf16.mxu1 %v3716_v37 }
 0x13d   : > { %3514 = vmatpush3.bf16.msra.mxu0 %v3717_v38 }
 0x13e   : > { %3542 = vmatpush3.bf16.msra.mxu1 %v3718_v39  ;;  %3515 = vmatprep.subr.bf16.mxu0 %v3719_v40 }
 0x13f   : > { %3543 = vmatprep.subr.bf16.mxu1 %v3720_v41 }
 0x141   : > { %3516 = vmatpush3.bf16.msra.mxu0 %v3721_v42 }
 0x142   : > { %3544 = vmatpush3.bf16.msra.mxu1 %v3722_v43  ;;  %3517 = vmatprep.subr.bf16.mxu0 %v3723_v44 }
 0x143   : > { %3545 = vmatprep.subr.bf16.mxu1 %v3724_v45 }
 0x145   : > { %3518 = vmatpush3.bf16.msra.mxu0 %v3725_v46 }
 0x146   : > { %3546 = vmatpush3.bf16.msra.mxu1 %v3726_v47 }
 0x148   : > { %2865 = vmatmul.mubr.bf16.vlgmr.msra.gmra.mrb[24].mxu0 %v3163_v51 }
 0x149   : > { %2914 = vmatmul.mubr.bf16.vlgmr.msra.gmra.mrb[24].mxu1 %v3165_v56  ;;  %2872 = vmatprep.mubr.bf16.mxu0 %v3180_v58 }
 0x14a   : > { %2921 = vmatprep.mubr.bf16.mxu1 %v3182_v61 }
 0x150   : > { %2873 = vmatmul.mubr.bf16.gmra.mrb[28].mxu0 %v3179_v62 }
 0x151   : > { %2922 = vmatmul.mubr.bf16.gmra.mrb[28].mxu1 %v3181_v63 }
 0x1bb   : > { %v3351_v0 = vpop.f32.mrb[0].mxu0 }
 0x1bc   : > { %v3379_v1 = vpop.f32.mrb[0].mxu1  ;;  %v3352_v2 = vpop.f32.mrb[1].mxu0 }
 0x1bd   : > { %v3353_v3 = vadd.f32 %v3352_v2, %v3351_v0  ;;  %v3380_v4 = vpop.f32.mrb[1].mxu1  ;;  %v3354_v5 = vpop.f32.mrb[2].mxu0 }
 0x1be   : > { %v3381_v6 = vadd.f32 %v3380_v4, %v3379_v1  ;;  %v3382_v7 = vpop.f32.mrb[2].mxu1  ;;  %v3355_v8 = vpop.f32.mrb[3].mxu0 }
 0x1bf   : > { %v3356_v9 = vadd.f32 %v3355_v8, %v3354_v5  ;;  %v3383_v10 = vpop.f32.mrb[3].mxu1 }
 0x1c0   : > { %v2622_v11 = vadd.f32 %v3381_v6, %v3353_v3  ;;  %v3384_v12 = vadd.f32 %v3383_v10, %v3382_v7 }
 0x1c2   : > { %v2625_v13 = vadd.f32 %v3384_v12, %v3356_v9 }
 0x1c3   : > { %v3357_v14 = vpop.f32.mrb[4].mxu0 }
 0x1c4   : > { %v3385_v15 = vpop.f32.mrb[4].mxu1  ;;  %v3358_v16 = vpop.f32.mrb[5].mxu0 }
 0x1c5   : > { %v3359_v17 = vadd.f32 %v3358_v16, %v3357_v14  ;;  %v3386_v18 = vpop.f32.mrb[5].mxu1  ;;  %v3360_v19 = vpop.f32.mrb[6].mxu0 }
 0x1c6   : > { %v3387_v20 = vadd.f32 %v3386_v18, %v3385_v15  ;;  %v3388_v21 = vpop.f32.mrb[6].mxu1  ;;  %v3361_v22 = vpop.f32.mrb[7].mxu0 }
 0x1c7   : > { %v3362_v23 = vadd.f32 %v3361_v22, %v3360_v19  ;;  %v3389_v24 = vpop.f32.mrb[7].mxu1 }
 0x1c8   : > { %v2630_v25 = vadd.f32 %v3387_v20, %v3359_v17  ;;  %v3390_v26 = vadd.f32 %v3389_v24, %v3388_v21 }
 0x1ca   : > { %v2633_v27 = vadd.f32 %v3390_v26, %v3362_v23 }
 0x1db   : > { %v3407_v28 = vpop.f32.mrb[8].mxu0 }
 0x1dc   : > { %v3435_v29 = vpop.f32.mrb[8].mxu1  ;;  %v3408_v30 = vpop.f32.mrb[9].mxu0 }
 0x1dd   : > { %v3436_v31 = vpop.f32.mrb[9].mxu1  ;;  %v3409_v32 = vadd.f32 %v3408_v30, %v3407_v28  ;;  %v3410_v34 = vpop.f32.mrb[10].mxu0 }
 0x1de   : > { %v3437_v33 = vadd.f32 %v3436_v31, %v3435_v29  ;;  %v3438_v35 = vpop.f32.mrb[10].mxu1  ;;  %v3411_v36 = vpop.f32.mrb[11].mxu0 }
 0x1df   : > { %v3439_v37 = vpop.f32.mrb[11].mxu1  ;;  %v2671_v38 = vadd.f32 %v3409_v32, %v2622_v11  ;;  %v3412_v39 = vadd.f32 %v3411_v36, %v3410_v34 }
 0x1e0   : > { %v3440_v40 = vadd.f32 %v3439_v37, %v3438_v35 }
 0x1e1   : > { %v2720_v41 = vadd.f32 %v3437_v33, %v2671_v38  ;;  %v2674_v42 = vadd.f32 %v3412_v39, %v2625_v13 }
 0x1e3   : > { %v2723_v43 = vadd.f32 %v3440_v40, %v2674_v42  ;;  %v3413_v44 = vpop.f32.mrb[12].mxu0 }
 0x1e4   : > { %v3414_v45 = vpop.f32.mrb[13].mxu0  ;;  %v3441_v50 = vpop.f32.mrb[12].mxu1 }
 0x1e5   : > { %v3415_v46 = vadd.f32 %v3414_v45, %v3413_v44  ;;  %v3416_v47 = vpop.f32.mrb[14].mxu0  ;;  %v3442_v52 = vpop.f32.mrb[13].mxu1 }
 0x1e6   : > { %v3417_v48 = vpop.f32.mrb[15].mxu0  ;;  %v3443_v54 = vadd.f32 %v3442_v52, %v3441_v50  ;;  %v3444_v55 = vpop.f32.mrb[14].mxu1 }
 0x1e7   : > { %v2679_v49 = vadd.f32 %v3415_v46, %v2630_v25  ;;  %v3418_v51 = vadd.f32 %v3417_v48, %v3416_v47  ;;  %v3445_v56 = vpop.f32.mrb[15].mxu1 }
 0x1e8   : > { %v3446_v58 = vadd.f32 %v3445_v56, %v3444_v55 }
 0x1e9   : > { %v2682_v53 = vadd.f32 %v3418_v51, %v2633_v27  ;;  %v2728_v57 = vadd.f32 %v3443_v54, %v2679_v49 }
 0x1eb   : > { %v2731_v59 = vadd.f32 %v3446_v58, %v2682_v53 }
 0x1fb   : > { %v3463_v60 = vpop.f32.mrb[16].mxu0 }
 0x1fc   : > { %v3491_v61 = vpop.f32.mrb[16].mxu1  ;;  %v3464_v62 = vpop.f32.mrb[17].mxu0 }
 0x1fd   : > { %v3465_v63 = vadd.f32 %v3464_v62, %v3463_v60  ;;  %v3492_v0 = vpop.f32.mrb[17].mxu1  ;;  %v3466_v1 = vpop.f32.mrb[18].mxu0 }
 0x1fe   : > { %v3493_v2 = vadd.f32 %v3492_v0, %v3491_v61  ;;  %v3494_v3 = vpop.f32.mrb[18].mxu1  ;;  %v3467_v4 = vpop.f32.mrb[19].mxu0 }
 0x1ff   : > { %v2769_v5 = vadd.f32 %v3465_v63, %v2720_v41  ;;  %v3468_v6 = vadd.f32 %v3467_v4, %v3466_v1  ;;  %v3495_v7 = vpop.f32.mrb[19].mxu1 }
 0x200   : > { %v3496_v8 = vadd.f32 %v3495_v7, %v3494_v3 }
 0x201   : > { %v2818_v9 = vadd.f32 %v3493_v2, %v2769_v5  ;;  %v2772_v10 = vadd.f32 %v3468_v6, %v2723_v43  ;;  %v3311_v43 = vld [vmem:[%s1307_s29] ss:$0 sm:$0xff] }
 0x203   : > { %v2821_v11 = vadd.f32 %v3496_v8, %v2772_v10  ;;  %v3469_v12 = vpop.f32.mrb[20].mxu0 }
 0x204   : > { %v3470_v13 = vpop.f32.mrb[21].mxu0  ;;  %v3497_v16 = vpop.f32.mrb[20].mxu1 }
 0x205   : > { %v3471_v14 = vadd.f32 %v3470_v13, %v3469_v12  ;;  %v3472_v15 = vpop.f32.mrb[22].mxu0  ;;  %v3498_v20 = vpop.f32.mrb[21].mxu1 }
 0x206   : > { %v3473_v17 = vpop.f32.mrb[23].mxu0  ;;  %v3499_v21 = vadd.f32 %v3498_v20, %v3497_v16  ;;  %v3500_v22 = vpop.f32.mrb[22].mxu1 }
 0x207   : > { %v2777_v18 = vadd.f32 %v3471_v14, %v2728_v57  ;;  %v3474_v19 = vadd.f32 %v3473_v17, %v3472_v15  ;;  %v3501_v24 = vpop.f32.mrb[23].mxu1 }
 0x208   : > { %v3502_v26 = vadd.f32 %v3501_v24, %v3500_v22 }
 0x209   : > { %v2780_v23 = vadd.f32 %v3474_v19, %v2731_v59  ;;  %v2826_v25 = vadd.f32 %v3499_v21, %v2777_v18 }
 0x20b   : > { %v2829_v27 = vadd.f32 %v3502_v26, %v2780_v23 }
 0x21b   : > { %v3519_v28 = vpop.f32.mrb[24].mxu0 }
 0x21c   : > { %v3547_v29 = vpop.f32.mrb[24].mxu1  ;;  %v3520_v30 = vpop.f32.mrb[25].mxu0 }
 0x21d   : > { %v3521_v31 = vadd.f32 %v3520_v30, %v3519_v28  ;;  %v3548_v32 = vpop.f32.mrb[25].mxu1  ;;  %v3522_v33 = vpop.f32.mrb[26].mxu0 }
 0x21e   : > { %v3549_v34 = vadd.f32 %v3548_v32, %v3547_v29  ;;  %v3550_v35 = vpop.f32.mrb[26].mxu1  ;;  %v3523_v36 = vpop.f32.mrb[27].mxu0 }
 0x21f   : > { %v2867_v37 = vadd.f32 %v3521_v31, %v2818_v9  ;;  %v3524_v38 = vadd.f32 %v3523_v36, %v3522_v33  ;;  %v3551_v39 = vpop.f32.mrb[27].mxu1 }
 0x220   : > { %v3552_v40 = vadd.f32 %v3551_v39, %v3550_v35 }
 0x221   : > { %v2916_v41 = vadd.f32 %v3549_v34, %v2867_v37  ;;  %v2870_v42 = vadd.f32 %v3524_v38, %v2821_v11 }
 0x223   : > { %v2919_v44 = vadd.f32 %v3552_v40, %v2870_v42  ;;  %v3525_v45 = vpop.f32.mrb[28].mxu0  ;;  %v2952_v48 = vadd.f32 %v3311_v43, %v2916_v41 }
 0x224   : > { %v3553_v46 = vpop.f32.mrb[28].mxu1  ;;  %v3526_v47 = vpop.f32.mrb[29].mxu0 }
 0x225   : > { %v2953_v49 = vadd.f32 %v3311_v43, %v2919_v44  ;;  %v3527_v50 = vadd.f32 %v3526_v47, %v3525_v45  ;;  %v3554_v51 = vpop.f32.mrb[29].mxu1  ;;  %v3528_v52 = vpop.f32.mrb[30].mxu0 }
 0x226   : > { %v3555_v53 = vadd.f32 %v3554_v51, %v3553_v46  ;;  %v3556_v54 = vpop.f32.mrb[30].mxu1  ;;  %v3529_v55 = vpop.f32.mrb[31].mxu0 }
 0x227   : > { %v3327_v56 = vpack.c.bf16 %v2953_v49, %v2952_v48  ;;  %v2875_v57 = vadd.f32 %v3527_v50, %v2826_v25  ;;  %v3530_v58 = vadd.f32 %v3529_v55, %v3528_v52  ;;  %v3557_v59 = vpop.f32.mrb[31].mxu1 }
 0x228   : > { %v3558_v60 = vadd.f32 %v3557_v59, %v3556_v54 }
 0x229   : > { %3328 = vst [vmem:[%s1291_s5] sm:$0xff] %v3327_v56   ;;  %v2924_v61 = vadd.f32 %v3555_v53, %v2875_v57  ;;  %v2878_v62 = vadd.f32 %v3530_v58, %v2829_v27 }
 0x22b   : > { %v2927_v63 = vadd.f32 %v3558_v60, %v2878_v62  ;;  %v2954_v0 = vadd.f32 %v3311_v43, %v2924_v61  ;;  %2982 = sbr.rel (!%p3822_p6) target bundleno = 570 (0x23a), region = 85 }
 0x22d   : > { %v2955_v1 = vadd.f32 %v3311_v43, %v2927_v63 }
 0x22f   : > { %v3332_v2 = vpack.c.bf16 %v2955_v1, %v2954_v0 }
 0x230   : > { %v3003_v3 = vld [vmem:[%s1291_s5] sm:$0xf] (%p3822_p6)  ;;  %v3005_v4 = vld [vmem:[%s1291_s5 + $0x4] sm:$0xf] (%p3822_p6) }
 0x231   : > { %3334 = vst [vmem:[%s1291_s5 + $0x8] sm:$0xff] %v3332_v2   ;;  %3004 = vst [vmem:[%s2987_s7] sm:$0xf] (%p3822_p6), %v3003_v3 }
 0x232   : > { %3006 = vst [vmem:[%s2987_s7 + $0x8] sm:$0xf] %v3005_v4 }
 0x238   : > { %v3007_v5 = vld [vmem:[%s1291_s5 + $0x8] sm:$0xf]  ;;  %v3009_v6 = vld [vmem:[%s1291_s5 + $0xc] sm:$0xf] }
 0x239   : > { %3008 = vst [vmem:[%s2987_s7 + $0x10] sm:$0xf] %v3007_v5  ;;  %3010 = vst [vmem:[%s2987_s7 + $0x18] sm:$0xf] %v3009_v6 }
 0x23a PF: > { %s13_s16 = sadd.s32 1, %s3765_s16   ;;  %s4631_s12 = smov %s3753_s13 }
 0x23b   : > { %p10_p12 = scmp.ge.s32.totalorder %s13_s16, 4   ;;  %s4632_s13 = smov %s3827_s22 }
 0x23c   : > { %s4633_s14 = smov %s3761_s15  ;;  %s4634_s15 = smov %s4636_s17 }
 0x23d   :  { %12 = sbr.rel (!%p10_p12) target bundleno = 3 (0x3), region = 163 }

// kernel: discriminator_forward.14
= control target key start
LH: loop header
LB: loop body
LE: loop exit
PB: predicated region body
PF: predicated region fallthrough
CT: control target
= control target key end

     0   :  { %s476_s6 = smov 0   ;;  %s478_s7 = smov 0   ;;  %s524_s0 = inlined_call_operand.vmem [shape: bf16[2,4,512], index: 0, kind: input, shape index: {}]   ;;  %s525_s1 = inlined_call_operand.vmem [shape: bf16[2,4,512], index: 1, kind: output, shape index: {}]  }
   0x1   :  { %s480_s8 = smov 0  }
   0x2 LB: > { %s23_s9 = sadd.s32 1, %s459_s7  ;;  %p397_p0 = scmp.ge.s32.totalorder %s463_s8, 1  ;;  %s463_s8 = sphi %s480_s8, %s11_s8   ;;  %s459_s7 = sphi %s478_s7, %s527_s7   ;;  %s455_s6 = sphi %s476_s6, %s526_s6  }
   0x3   : > { %p25_p1 = scmp.ge.s32.totalorder %s23_s9, 2  ;;  %p108_p2 = scmp.lt.s32.totalorder %s463_s8, 3 }
   0x5   : > { %s529_s9 = smov (%p25_p1, %s23_s9), 0  ;;  %p109_p3 = pnand %p397_p0, %p108_p2 }
   0x6   : > { %p137_p4 = scmp.lt.s32.totalorder (!%p109_p3), %s455_s6, 1  ;;  %vm165_vm0 = vcmask (!%p109_p3), 1043456  }
   0x7   : > { %112 = sbr.rel (%p109_p3) target bundleno = 90 (0x5a), region = 24 }
   0xe   : > { %s531_s6 = smov (!%p137_p4, %s455_s6), 1 }
   0xf   : > { %s406_s10 = sshll.u32 %s531_s6, 3 }
  0x10   : > { %s144_s13 = scalar_lea.vmem %s524_s0, %s406_s10  ;;  %s154_s16 = scalar_lea.vmem %s525_s1, %s406_s10 }
  0x11   : > { %v156_v0 = vld [vmem:[%s144_s13] sm:$0xff] }
  0x12   : > { %v157_v1 = vunpack.c.l.bf16 %v156_v0  ;;  %v158_v2 = vunpack.c.h.bf16 %v156_v0 }
  0x14   : > { %v161_v3 = vcombine.high %v157_v1, %v157_v1  ;;  %v162_v4 = vcombine.high %v158_v2, %v158_v2  ;;  %v166_v5 = vsel %vm165_vm0, %v157_v1, 0.0  ;;  %v180_v6 = vsel %vm165_vm0, %v158_v2, 0.0 }
  0x15   : > { %v167_v7 = vrot.slane %v166_v5, 4  ;;  %v181_v8 = vrot.slane %v180_v6, 4 }
  0x16   : > { %v173_v9 = vsel %vm165_vm0, %v161_v3, 0.0  ;;  %v187_v10 = vsel %vm165_vm0, %v162_v4, 0.0 }
  0x17   : > { %v168_v11 = vadd.f32 %v167_v7, %v166_v5  ;;  %v174_v12 = vrot.slane %v173_v9, 4  ;;  %v182_v13 = vadd.f32 %v181_v8, %v180_v6  ;;  %v188_v14 = vrot.slane %v187_v10, 4 }
  0x19   : > { %v169_v15 = vrot.slane %v168_v11, 2  ;;  %v175_v16 = vadd.f32 %v174_v12, %v173_v9  ;;  %v183_v17 = vrot.slane %v182_v13, 2  ;;  %v189_v18 = vadd.f32 %v188_v14, %v187_v10 }
  0x1b   : > { %v170_v19 = vadd.f32 %v169_v15, %v168_v11  ;;  %v176_v20 = vrot.slane %v175_v16, 2  ;;  %v184_v21 = vadd.f32 %v183_v17, %v182_v13  ;;  %v190_v22 = vrot.slane %v189_v18, 2 }
  0x1d   : > { %v171_v23 = vrot.slane %v170_v19, 1  ;;  %v177_v24 = vadd.f32 %v176_v20, %v175_v16  ;;  %v185_v25 = vrot.slane %v184_v21, 1  ;;  %v191_v26 = vadd.f32 %v190_v22, %v189_v18 }
  0x1e   : > { %v465_v20 = vmov 1983009808   ;;  %v292_v22 = vlaneseq }
  0x1f   : > { %v172_v27 = vadd.f32 %v171_v23, %v170_v19  ;;  %v178_v28 = vrot.slane %v177_v24, 1  ;;  %v186_v29 = vadd.f32 %v185_v25, %v184_v21  ;;  %v192_v30 = vrot.slane %v191_v26, 1 }
  0x20   : > { %v290_v21 = vunpack.c.l.s4 %v465_v20 }
  0x21   : > { %v179_v31 = vadd.f32 %v178_v28, %v177_v24  ;;  %v193_v32 = vadd.f32 %v192_v30, %v191_v26  ;;  %v195_v33 = vmul.f32 0.25, %v172_v27  ;;  %v197_v34 = vmul.f32 0.25, %v186_v29 }
  0x22   : > { %v291_v28 = vunpack.c.0.s8 %v290_v21  ;;  %v293_v29 = vshrl.u32 %v292_v22, 7 }
  0x23   : > { %v196_v35 = vmul.f32 0.25, %v179_v31  ;;  %v198_v36 = vmul.f32 0.25, %v193_v32 }
  0x25   : > { %v203_v37 = vcombine.low %v195_v33, %v196_v35  ;;  %v204_v38 = vcombine.low %v197_v34, %v198_v36  ;;  %v294_v35 = vsub.s32 %v291_v28, %v293_v29 }
  0x27   : > { %v207_v39 = vsub.f32 %v157_v1, %v203_v37  ;;  %v208_v40 = vsub.f32 %v158_v2, %v204_v38 }
  0x29   : > { %v209_v41 = vmul.f32 %v207_v39, %v207_v39  ;;  %v210_v42 = vmul.f32 %v208_v40, %v208_v40 }
  0x2b   : > { %v213_v43 = vcombine.high %v209_v41, %v209_v41  ;;  %v214_v44 = vcombine.high %v210_v42, %v210_v42  ;;  %v217_v45 = vsel %vm165_vm0, %v209_v41, 0.0  ;;  %v231_v46 = vsel %vm165_vm0, %v210_v42, 0.0 }
  0x2c   : > { %v218_v47 = vrot.slane %v217_v45, 4  ;;  %v232_v48 = vrot.slane %v231_v46, 4 }
  0x2d   : > { %v224_v49 = vsel %vm165_vm0, %v213_v43, 0.0  ;;  %v238_v50 = vsel %vm165_vm0, %v214_v44, 0.0 }
  0x2e   : > { %v219_v51 = vadd.f32 %v218_v47, %v217_v45  ;;  %v225_v52 = vrot.slane %v224_v49, 4  ;;  %v233_v53 = vadd.f32 %v232_v48, %v231_v46  ;;  %v239_v54 = vrot.slane %v238_v50, 4 }
  0x30   : > { %v220_v55 = vrot.slane %v219_v51, 2  ;;  %v226_v56 = vadd.f32 %v225_v52, %v224_v49  ;;  %v234_v57 = vrot.slane %v233_v53, 2  ;;  %v240_v58 = vadd.f32 %v239_v54, %v238_v50 }
  0x32   : > { %v221_v59 = vadd.f32 %v220_v55, %v219_v51  ;;  %v227_v60 = vrot.slane %v226_v56, 2  ;;  %v235_v61 = vadd.f32 %v234_v57, %v233_v53  ;;  %v241_v62 = vrot.slane %v240_v58, 2 }
  0x34   : > { %v222_v63 = vrot.slane %v221_v59, 1  ;;  %v228_v0 = vadd.f32 %v227_v60, %v226_v56  ;;  %v236_v1 = vrot.slane %v235_v61, 1  ;;  %v242_v2 = vadd.f32 %v241_v62, %v240_v58 }
  0x36   : > { %v223_v3 = vadd.f32 %v222_v63, %v221_v59  ;;  %v229_v4 = vrot.slane %v228_v0, 1  ;;  %v237_v5 = vadd.f32 %v236_v1, %v235_v61  ;;  %v243_v6 = vrot.slane %v242_v2, 1 }
  0x38   : > { %v230_v7 = vadd.f32 %v229_v4, %v228_v0  ;;  %v244_v8 = vadd.f32 %v243_v6, %v242_v2  ;;  %v245_v9 = vmul.f32 0.25, %v223_v3  ;;  %v247_v10 = vmul.f32 0.25, %v237_v5 }
  0x3a   : > { %v246_v11 = vmul.f32 0.25, %v230_v7  ;;  %v248_v12 = vmul.f32 0.25, %v244_v8  ;;  %v249_v13 = vadd.f32 1e-05, %v245_v9  ;;  %v251_v14 = vadd.f32 1e-05, %v247_v10 }
  0x3c   : > { %v250_v15 = vadd.f32 1e-05, %v246_v11  ;;  %v252_v16 = vadd.f32 1e-05, %v248_v12  ;;  %433 = vrsqrt.f32 %v249_v13 }
  0x3d   : > { %435 = vrsqrt.f32 %v251_v14 }
  0x3e   : > { %437 = vrsqrt.f32 %v250_v15 }
  0x3f   : > { %439 = vrsqrt.f32 %v252_v16 }
  0x46   : > { %v434_v17 = vpop.eup %433 }
  0x47   : > { %v436_v18 = vpop.eup %435 }
  0x48   : > { %v438_v19 = vpop.eup %437 }
  0x49   : > { %v440_v23 = vpop.eup %439  ;;  %v261_v24 = vcombine.low %v434_v17, %v438_v19 }
  0x4a   : > { %v262_v25 = vcombine.low %v436_v18, %v440_v23 }
  0x4b   : > { %v265_v26 = vmul.f32 %v261_v24, %v207_v39 }
  0x4c   : > { %v266_v27 = vmul.f32 %v262_v25, %v208_v40 }
  0x4d   : > { %vm267_vm1 = vcmp.ge.f32.partialorder %v265_v26, 0.0  ;;  %v269_v30 = vmul.f32 0.2, %v265_v26 }
  0x4e   : > { %vm268_vm2 = vcmp.ge.f32.partialorder %v266_v27, 0.0  ;;  %v270_v31 = vmul.f32 0.2, %v266_v27 }
  0x4f   : > { %v271_v32 = vsel %vm267_vm1, %v265_v26, %v269_v30 }
  0x50   : > { %v272_v33 = vsel %vm268_vm2, %v266_v27, %v270_v31  ;;  %v275_v34 = vcombine.high %v271_v32, %v271_v32 }
  0x51   : > { %v276_v36 = vcombine.high %v272_v33, %v272_v33 }
  0x52   : > { %v402_v37 = vpack.c.bf16 %v275_v34, %v271_v32 }
  0x53   : > { %v403_v38 = vpack.c.bf16 %v276_v36, %v272_v33 }
  0x54   : > { %v295_v41 = vrot.slane %v402_v37, %v294_v35 }
  0x55   : > { %v302_v42 = vrot.slane %v403_v38, %v294_v35 }
  0x57   : > { %v303_v39 = vcombine.low %v295_v41, %v302_v42 }
  0x59   : > { %305 = vst [vmem:[%s154_s16] sm:$0xff] %v303_v39 }
  0x5a PF: > { %s11_s8 = sadd.s32 1, %s463_s8   ;;  %s526_s6 = smov %s459_s7 }
  0x5b   : > { %p8_p5 = scmp.ge.s32.totalorder %s11_s8, 4   ;;  %s527_s7 = smov %s529_s9 }
  0x5d   :  { %10 = sbr.rel (!%p8_p5) target bundleno = 2 (0x2), region = 54 }

// kernel: discriminator_forward.13
= control target key start
LH: loop header
LB: loop body
LE: loop exit
PB: predicated region body
PF: predicated region fallthrough
CT: control target
= control target key end

     0   :  { %s4239_s12 = smov 0   ;;  %s4241_s13 = smov 0   ;;  %s5168_s0 = inlined_call_operand.vmem [shape: bf16[8,4096], index: 0, kind: input, shape index: {}]   ;;  %s5169_s1 = inlined_call_operand.vmem [shape: bf16[4096,512], index: 1, kind: input, shape index: {}]   ;;  %s5170_s2 = inlined_call_operand.vmem [shape: f32[1,512], index: 2, kind: input, shape index: {}]   ;;  %s5171_s3 = inlined_call_operand.vmem [shape: bf16[8,512], index: 3, kind: output, shape index: {}]  }
   0x1   :  { %s4243_s14 = smov 0   ;;  %s4245_s15 = smov 0  }
   0x2   :  { %s4247_s16 = smov 0   ;;  %s4249_s17 = smov 0  }
   0x3   :  { %s4251_s18 = smov 0  }
   0x4 LB: > { %s25_s19 = sadd.s32 1, %s4208_s16  ;;  %s28_s20 = sadd.s32 1, %s4212_s17  ;;  %s4216_s18 = sphi %s4251_s18, %s13_s18   ;;  %s4212_s17 = sphi %s4249_s17, %s5177_s17   ;;  %s4208_s16 = sphi %s4247_s16, %s5176_s16   ;;  %s4204_s15 = sphi %s4245_s15, %s5175_s15   ;;  %s4200_s14 = sphi %s4243_s14, %s5174_s14   ;;  %s4196_s13 = sphi %s4241_s13, %s5173_s13   ;;  %s4192_s12 = sphi %s4239_s12, %s5172_s12  }
   0x5   : > { %p26_p0 = scmp.ge.s32.totalorder %s25_s19, 2  ;;  %p76_p1 = scmp.ne.s32.totalorder %s4196_s13, %s4192_s12 }
   0x6   : > { %p77_p2 = scmp.eq.s32.totalorder %s4216_s18, 0  ;;  %s69_s24 = sadd.s32 1, %s4196_s13 }
   0x7   : > { %s5179_s19 = smov (%p26_p0, %s25_s19), 0  ;;  %s5181_s20 = smov (!%p26_p0, %s28_s20), %s4212_s17 }
   0x8   : > { %p78_p3 = por %p77_p2, %p76_p1  ;;  %p30_p4 = scmp.ge.s32.totalorder %s5181_s20, 2 }
   0x9   : > { %s64_s21 = ssub.s32 %s4208_s16, %s5179_s19  ;;  %p3413_p6 = scmp.ge.s32.totalorder %s4216_s18, 4 }
   0xa   : > { %s5183_s20 = smov (%p30_p4, %s5181_s20), 0 }
   0xb   : > { %s65_s22 = ssub.s32 %s4212_s17, %s5183_s20  ;;  %156 = sbr.rel (%p3413_p6) target bundleno = 153 (0x99), region = 16 }
   0xc   : > { %s66_s23 = sor.u32 %s65_s22, %s64_s21 }
   0xd   : > { %p67_p5 = scmp.eq.s32.totalorder %s66_s23, 0 }
   0xf   : > { %s4290_s25 = scalar_select %p67_p5, %s4196_s13, %s69_s24  }
  0x12   : > { %172 = sbr.rel (!%p78_p3) target bundleno = 153 (0x99), region = 24  ;;  %s174_s26 = sand.u32 (%p78_p3), 1, %s4196_s13  }
  0x13   : > { %s3416_s27 = sshll.u32 (%p78_p3), %s4212_s17, 1  ;;  %s3414_s28 = sshll.u32 (%p78_p3), %s174_s26, 11 }
  0x14   : > { %s3703_s29 = sshll.u32 (%p78_p3), %s4208_s16, 10  ;;  %s4304_s8 = scalar_lea.vmem (%p78_p3), [#allocation3], %s3414_s28 }
  0x15   : > { %s180_s30 = sadd.s32 (%p78_p3), %s3703_s29, %s3416_s27 }
  0x16   : > { %s3418_s4 = sshll.u32 (%p78_p3), %s180_s30, 2 }
  0x17   : > { %s4299_s7 = scalar_lea.vmem (%p78_p3), %s5169_s1, %s3418_s4 }
  0x18   : > { %v720_v0 = vld [vmem:[%s4299_s7] sm:$0xff] (%p78_p3)  ;;  %v722_v1 = vld [vmem:[%s4299_s7 + $0x10] sm:$0xff] (%p78_p3) }
  0x19   : > { %v724_v2 = vld [vmem:[%s4299_s7 + $0x20] sm:$0xff]  ;;  %721 = vst [vmem:[%s4304_s8] sm:$0xff] %v720_v0  ;;  %723 = vst [vmem:[%s4304_s8 + $0x8] sm:$0xff] %v722_v1  ;;  %v726_v3 = vld [vmem:[%s4299_s7 + $0x30] sm:$0xff] }
  0x1a   : > { %725 = vst [vmem:[%s4304_s8 + $0x10] sm:$0xff] %v724_v2  ;;  %v728_v4 = vld [vmem:[%s4299_s7 + $0x40] sm:$0xff]  ;;  %v730_v5 = vld [vmem:[%s4299_s7 + $0x50] sm:$0xff]  ;;  %727 = vst [vmem:[%s4304_s8 + $0x18] sm:$0xff] %v726_v3 }
  0x1b   : > { %729 = vst [vmem:[%s4304_s8 + $0x20] sm:$0xff] %v728_v4  ;;  %731 = vst [vmem:[%s4304_s8 + $0x28] sm:$0xff] %v730_v5  ;;  %v732_v6 = vld [vmem:[%s4299_s7 + $0x60] sm:$0xff]  ;;  %v734_v7 = vld [vmem:[%s4299_s7 + $0x70] sm:$0xff] }
  0x1c   : > { %v736_v8 = vld [vmem:[%s4299_s7 + $0x80] sm:$0xff]  ;;  %733 = vst [vmem:[%s4304_s8 + $0x30] sm:$0xff] %v732_v6  ;;  %735 = vst [vmem:[%s4304_s8 + $0x38] sm:$0xff] %v734_v7  ;;  %v738_v9 = vld [vmem:[%s4299_s7 + $0x90] sm:$0xff] }
  0x1d   : > { %737 = vst [vmem:[%s4304_s8 + $0x40] sm:$0xff] %v736_v8  ;;  %v740_v10 = vld [vmem:[%s4299_s7 + $0xa0] sm:$0xff]  ;;  %v742_v11 = vld [vmem:[%s4299_s7 + $0xb0] sm:$0xff]  ;;  %739 = vst [vmem:[%s4304_s8 + $0x48] sm:$0xff] %v738_v9 }
  0x1e   : > { %741 = vst [vmem:[%s4304_s8 + $0x50] sm:$0xff] %v740_v10  ;;  %743 = vst [vmem:[%s4304_s8 + $0x58] sm:$0xff] %v742_v11  ;;  %v744_v12 = vld [vmem:[%s4299_s7 + $0xc0] sm:$0xff]  ;;  %v746_v13 = vld [vmem:[%s4299_s7 + $0xd0] sm:$0xff] }
  0x1f   : > { %v748_v14 = vld [vmem:[%s4299_s7 + $0xe0] sm:$0xff]  ;;  %745 = vst [vmem:[%s4304_s8 + $0x60] sm:$0xff] %v744_v12  ;;  %747 = vst [vmem:[%s4304_s8 + $0x68] sm:$0xff] %v746_v13  ;;  %v750_v15 = vld [vmem:[%s4299_s7 + $0xf0] sm:$0xff] }
  0x20   : > { %749 = vst [vmem:[%s4304_s8 + $0x70] sm:$0xff] %v748_v14  ;;  %v752_v16 = vld [vmem:[%s4299_s7 + $0x100] sm:$0xff]  ;;  %v754_v17 = vld [vmem:[%s4299_s7 + $0x110] sm:$0xff]  ;;  %751 = vst [vmem:[%s4304_s8 + $0x78] sm:$0xff] %v750_v15 }
  0x21   : > { %753 = vst [vmem:[%s4304_s8 + $0x80] sm:$0xff] %v752_v16  ;;  %755 = vst [vmem:[%s4304_s8 + $0x88] sm:$0xff] %v754_v17  ;;  %v756_v18 = vld [vmem:[%s4299_s7 + $0x120] sm:$0xff]  ;;  %v758_v19 = vld [vmem:[%s4299_s7 + $0x130] sm:$0xff] }
  0x22   : > { %v760_v20 = vld [vmem:[%s4299_s7 + $0x140] sm:$0xff]  ;;  %757 = vst [vmem:[%s4304_s8 + $0x90] sm:$0xff] %v756_v18  ;;  %759 = vst [vmem:[%s4304_s8 + $0x98] sm:$0xff] %v758_v19  ;;  %v762_v21 = vld [vmem:[%s4299_s7 + $0x150] sm:$0xff] }
  0x23   : > { %761 = vst [vmem:[%s4304_s8 + $0xa0] sm:$0xff] %v760_v20  ;;  %v764_v22 = vld [vmem:[%s4299_s7 + $0x160] sm:$0xff]  ;;  %v766_v23 = vld [vmem:[%s4299_s7 + $0x170] sm:$0xff]  ;;  %763 = vst [vmem:[%s4304_s8 + $0xa8] sm:$0xff] %v762_v21 }
  0x24   : > { %765 = vst [vmem:[%s4304_s8 + $0xb0] sm:$0xff] %v764_v22  ;;  %767 = vst [vmem:[%s4304_s8 + $0xb8] sm:$0xff] %v766_v23  ;;  %v768_v24 = vld [vmem:[%s4299_s7 + $0x180] sm:$0xff]  ;;  %v770_v25 = vld [vmem:[%s4299_s7 + $0x190] sm:$0xff] }
  0x25   : > { %v772_v26 = vld [vmem:[%s4299_s7 + $0x1a0] sm:$0xff]  ;;  %769 = vst [vmem:[%s4304_s8 + $0xc0] sm:$0xff] %v768_v24  ;;  %771 = vst [vmem:[%s4304_s8 + $0xc8] sm:$0xff] %v770_v25  ;;  %v774_v27 = vld [vmem:[%s4299_s7 + $0x1b0] sm:$0xff] }
  0x26   : > { %773 = vst [vmem:[%s4304_s8 + $0xd0] sm:$0xff] %v772_v26  ;;  %v776_v28 = vld [vmem:[%s4299_s7 + $0x1c0] sm:$0xff]  ;;  %v778_v29 = vld [vmem:[%s4299_s7 + $0x1d0] sm:$0xff]  ;;  %775 = vst [vmem:[%s4304_s8 + $0xd8] sm:$0xff] %v774_v27 }
  0x27   : > { %777 = vst [vmem:[%s4304_s8 + $0xe0] sm:$0xff] %v776_v28  ;;  %779 = vst [vmem:[%s4304_s8 + $0xe8] sm:$0xff] %v778_v29  ;;  %v780_v30 = vld [vmem:[%s4299_s7 + $0x1e0] sm:$0xff]  ;;  %v782_v31 = vld [vmem:[%s4299_s7 + $0x1f0] sm:$0xff] }
  0x28   : > { %v784_v32 = vld [vmem:[%s4299_s7 + $0x200] sm:$0xff]  ;;  %781 = vst [vmem:[%s4304_s8 + $0xf0] sm:$0xff] %v780_v30  ;;  %783 = vst [vmem:[%s4304_s8 + $0xf8] sm:$0xff] %v782_v31  ;;  %v786_v33 = vld [vmem:[%s4299_s7 + $0x210] sm:$0xff] }
  0x29   : > { %785 = vst [vmem:[%s4304_s8 + $0x100] sm:$0xff] %v784_v32  ;;  %v788_v34 = vld [vmem:[%s4299_s7 + $0x220] sm:$0xff]  ;;  %v790_v35 = vld [vmem:[%s4299_s7 + $0x230] sm:$0xff]  ;;  %787 = vst [vmem:[%s4304_s8 + $0x108] sm:$0xff] %v786_v33 }
  0x2a   : > { %789 = vst [vmem:[%s4304_s8 + $0x110] sm:$0xff] %v788_v34  ;;  %791 = vst [vmem:[%s4304_s8 + $0x118] sm:$0xff] %v790_v35  ;;  %v792_v36 = vld [vmem:[%s4299_s7 + $0x240] sm:$0xff]  ;;  %v794_v37 = vld [vmem:[%s4299_s7 + $0x250] sm:$0xff] }
  0x2b   : > { %v796_v38 = vld [vmem:[%s4299_s7 + $0x260] sm:$0xff]  ;;  %793 = vst [vmem:[%s4304_s8 + $0x120] sm:$0xff] %v792_v36  ;;  %795 = vst [vmem:[%s4304_s8 + $0x128] sm:$0xff] %v794_v37  ;;  %v798_v39 = vld [vmem:[%s4299_s7 + $0x270] sm:$0xff] }
  0x2c   : > { %797 = vst [vmem:[%s4304_s8 + $0x130] sm:$0xff] %v796_v38  ;;  %v800_v40 = vld [vmem:[%s4299_s7 + $0x280] sm:$0xff]  ;;  %v802_v41 = vld [vmem:[%s4299_s7 + $0x290] sm:$0xff]  ;;  %799 = vst [vmem:[%s4304_s8 + $0x138] sm:$0xff] %v798_v39 }
  0x2d   : > { %801 = vst [vmem:[%s4304_s8 + $0x140] sm:$0xff] %v800_v40  ;;  %803 = vst [vmem:[%s4304_s8 + $0x148] sm:$0xff] %v802_v41  ;;  %v804_v42 = vld [vmem:[%s4299_s7 + $0x2a0] sm:$0xff]  ;;  %v806_v43 = vld [vmem:[%s4299_s7 + $0x2b0] sm:$0xff] }
  0x2e   : > { %v808_v44 = vld [vmem:[%s4299_s7 + $0x2c0] sm:$0xff]  ;;  %805 = vst [vmem:[%s4304_s8 + $0x150] sm:$0xff] %v804_v42  ;;  %807 = vst [vmem:[%s4304_s8 + $0x158] sm:$0xff] %v806_v43  ;;  %v810_v45 = vld [vmem:[%s4299_s7 + $0x2d0] sm:$0xff] }
  0x2f   : > { %809 = vst [vmem:[%s4304_s8 + $0x160] sm:$0xff] %v808_v44  ;;  %v812_v46 = vld [vmem:[%s4299_s7 + $0x2e0] sm:$0xff]  ;;  %v814_v47 = vld [vmem:[%s4299_s7 + $0x2f0] sm:$0xff]  ;;  %811 = vst [vmem:[%s4304_s8 + $0x168] sm:$0xff] %v810_v45 }
  0x30   : > { %813 = vst [vmem:[%s4304_s8 + $0x170] sm:$0xff] %v812_v46  ;;  %815 = vst [vmem:[%s4304_s8 + $0x178] sm:$0xff] %v814_v47  ;;  %v816_v48 = vld [vmem:[%s4299_s7 + $0x300] sm:$0xff]  ;;  %v818_v49 = vld [vmem:[%s4299_s7 + $0x310] sm:$0xff] }
  0x31   : > { %v820_v50 = vld [vmem:[%s4299_s7 + $0x320] sm:$0xff]  ;;  %817 = vst [vmem:[%s4304_s8 + $0x180] sm:$0xff] %v816_v48  ;;  %819 = vst [vmem:[%s4304_s8 + $0x188] sm:$0xff] %v818_v49  ;;  %v822_v51 = vld [vmem:[%s4299_s7 + $0x330] sm:$0xff] }
  0x32   : > { %821 = vst [vmem:[%s4304_s8 + $0x190] sm:$0xff] %v820_v50  ;;  %v824_v52 = vld [vmem:[%s4299_s7 + $0x340] sm:$0xff]  ;;  %v826_v53 = vld [vmem:[%s4299_s7 + $0x350] sm:$0xff]  ;;  %823 = vst [vmem:[%s4304_s8 + $0x198] sm:$0xff] %v822_v51 }
  0x33   : > { %825 = vst [vmem:[%s4304_s8 + $0x1a0] sm:$0xff] %v824_v52  ;;  %827 = vst [vmem:[%s4304_s8 + $0x1a8] sm:$0xff] %v826_v53  ;;  %v828_v54 = vld [vmem:[%s4299_s7 + $0x360] sm:$0xff]  ;;  %v830_v55 = vld [vmem:[%s4299_s7 + $0x370] sm:$0xff] }
  0x34   : > { %v832_v56 = vld [vmem:[%s4299_s7 + $0x380] sm:$0xff]  ;;  %829 = vst [vmem:[%s4304_s8 + $0x1b0] sm:$0xff] %v828_v54  ;;  %831 = vst [vmem:[%s4304_s8 + $0x1b8] sm:$0xff] %v830_v55  ;;  %v834_v57 = vld [vmem:[%s4299_s7 + $0x390] sm:$0xff] }
  0x35   : > { %833 = vst [vmem:[%s4304_s8 + $0x1c0] sm:$0xff] %v832_v56  ;;  %v836_v58 = vld [vmem:[%s4299_s7 + $0x3a0] sm:$0xff]  ;;  %v838_v59 = vld [vmem:[%s4299_s7 + $0x3b0] sm:$0xff]  ;;  %835 = vst [vmem:[%s4304_s8 + $0x1c8] sm:$0xff] %v834_v57 }
  0x36   : > { %837 = vst [vmem:[%s4304_s8 + $0x1d0] sm:$0xff] %v836_v58  ;;  %839 = vst [vmem:[%s4304_s8 + $0x1d8] sm:$0xff] %v838_v59  ;;  %v840_v60 = vld [vmem:[%s4299_s7 + $0x3c0] sm:$0xff]  ;;  %v842_v61 = vld [vmem:[%s4299_s7 + $0x3d0] sm:$0xff] }
  0x37   : > { %v844_v62 = vld [vmem:[%s4299_s7 + $0x3e0] sm:$0xff]  ;;  %841 = vst [vmem:[%s4304_s8 + $0x1e0] sm:$0xff] %v840_v60  ;;  %843 = vst [vmem:[%s4304_s8 + $0x1e8] sm:$0xff] %v842_v61  ;;  %v846_v63 = vld [vmem:[%s4299_s7 + $0x3f0] sm:$0xff] }
  0x38   : > { %845 = vst [vmem:[%s4304_s8 + $0x1f0] sm:$0xff] %v844_v62  ;;  %v848_v0 = vld [vmem:[%s4299_s7 + $0x400] sm:$0xff]  ;;  %v850_v1 = vld [vmem:[%s4299_s7 + $0x410] sm:$0xff]  ;;  %847 = vst [vmem:[%s4304_s8 + $0x1f8] sm:$0xff] %v846_v63 }
  0x39   : > { %849 = vst [vmem:[%s4304_s8 + $0x200] sm:$0xff] %v848_v0  ;;  %851 = vst [vmem:[%s4304_s8 + $0x208] sm:$0xff] %v850_v1  ;;  %v852_v2 = vld [vmem:[%s4299_s7 + $0x420] sm:$0xff]  ;;  %v854_v3 = vld [vmem:[%s4299_s7 + $0x430] sm:$0xff] }
  0x3a   : > { %v856_v4 = vld [vmem:[%s4299_s7 + $0x440] sm:$0xff]  ;;  %853 = vst [vmem:[%s4304_s8 + $0x210] sm:$0xff] %v852_v2  ;;  %855 = vst [vmem:[%s4304_s8 + $0x218] sm:$0xff] %v854_v3  ;;  %v858_v5 = vld [vmem:[%s4299_s7 + $0x450] sm:$0xff] }
  0x3b   : > { %857 = vst [vmem:[%s4304_s8 + $0x220] sm:$0xff] %v856_v4  ;;  %v860_v6 = vld [vmem:[%s4299_s7 + $0x460] sm:$0xff]  ;;  %v862_v7 = vld [vmem:[%s4299_s7 + $0x470] sm:$0xff]  ;;  %859 = vst [vmem:[%s4304_s8 + $0x228] sm:$0xff] %v858_v5 }
  0x3c   : > { %861 = vst [vmem:[%s4304_s8 + $0x230] sm:$0xff] %v860_v6  ;;  %863 = vst [vmem:[%s4304_s8 + $0x238] sm:$0xff] %v862_v7  ;;  %v864_v8 = vld [vmem:[%s4299_s7 + $0x480] sm:$0xff]  ;;  %v866_v9 = vld [vmem:[%s4299_s7 + $0x490] sm:$0xff] }
  0x3d   : > { %v868_v10 = vld [vmem:[%s4299_s7 + $0x4a0] sm:$0xff]  ;;  %865 = vst [vmem:[%s4304_s8 + $0x240] sm:$0xff] %v864_v8  ;;  %867 = vst [vmem:[%s4304_s8 + $0x248] sm:$0xff] %v866_v9  ;;  %v870_v11 = vld [vmem:[%s4299_s7 + $0x4b0] sm:$0xff] }
  0x3e   : > { %869 = vst [vmem:[%s4304_s8 + $0x250] sm:$0xff] %v868_v10  ;;  %v872_v12 = vld [vmem:[%s4299_s7 + $0x4c0] sm:$0xff]  ;;  %v874_v13 = vld [vmem:[%s4299_s7 + $0x4d0] sm:$0xff]  ;;  %871 = vst [vmem:[%s4304_s8 + $0x258] sm:$0xff] %v870_v11 }
  0x3f   : > { %873 = vst [vmem:[%s4304_s8 + $0x260] sm:$0xff] %v872_v12  ;;  %875 = vst [vmem:[%s4304_s8 + $0x268] sm:$0xff] %v874_v13  ;;  %v876_v14 = vld [vmem:[%s4299_s7 + $0x4e0] sm:$0xff]  ;;  %v878_v15 = vld [vmem:[%s4299_s7 + $0x4f0] sm:$0xff] }
  0x40   : > { %v880_v16 = vld [vmem:[%s4299_s7 + $0x500] sm:$0xff]  ;;  %877 = vst [vmem:[%s4304_s8 + $0x270] sm:$0xff] %v876_v14  ;;  %879 = vst [vmem:[%s4304_s8 + $0x278] sm:$0xff] %v878_v15  ;;  %v882_v17 = vld [vmem:[%s4299_s7 + $0x510] sm:$0xff] }
  0x41   : > { %881 = vst [vmem:[%s4304_s8 + $0x280] sm:$0xff] %v880_v16  ;;  %v884_v18 = vld [vmem:[%s4299_s7 + $0x520] sm:$0xff]  ;;  %v886_v19 = vld [vmem:[%s4299_s7 + $0x530] sm:$0xff]  ;;  %883 = vst [vmem:[%s4304_s8 + $0x288] sm:$0xff] %v882_v17 }
  0x42   : > { %885 = vst [vmem:[%s4304_s8 + $0x290] sm:$0xff] %v884_v18  ;;  %887 = vst [vmem:[%s4304_s8 + $0x298] sm:$0xff] %v886_v19  ;;  %v888_v20 = vld [vmem:[%s4299_s7 + $0x540] sm:$0xff]  ;;  %v890_v21 = vld [vmem:[%s4299_s7 + $0x550] sm:$0xff] }
  0x43   : > { %v892_v22 = vld [vmem:[%s4299_s7 + $0x560] sm:$0xff]  ;;  %889 = vst [vmem:[%s4304_s8 + $0x2a0] sm:$0xff] %v888_v20  ;;  %891 = vst [vmem:[%s4304_s8 + $0x2a8] sm:$0xff] %v890_v21  ;;  %v894_v23 = vld [vmem:[%s4299_s7 + $0x570] sm:$0xff] }
  0x44   : > { %893 = vst [vmem:[%s4304_s8 + $0x2b0] sm:$0xff] %v892_v22  ;;  %v896_v24 = vld [vmem:[%s4299_s7 + $0x580] sm:$0xff]  ;;  %v898_v25 = vld [vmem:[%s4299_s7 + $0x590] sm:$0xff]  ;;  %895 = vst [vmem:[%s4304_s8 + $0x2b8] sm:$0xff] %v894_v23 }
  0x45   : > { %897 = vst [vmem:[%s4304_s8 + $0x2c0] sm:$0xff] %v896_v24  ;;  %899 = vst [vmem:[%s4304_s8 + $0x2c8] sm:$0xff] %v898_v25  ;;  %v900_v26 = vld [vmem:[%s4299_s7 + $0x5a0] sm:$0xff]  ;;  %v902_v27 = vld [vmem:[%s4299_s7 + $0x5b0] sm:$0xff] }
  0x46   : > { %v904_v28 = vld [vmem:[%s4299_s7 + $0x5c0] sm:$0xff]  ;;  %901 = vst [vmem:[%s4304_s8 + $0x2d0] sm:$0xff] %v900_v26  ;;  %903 = vst [vmem:[%s4304_s8 + $0x2d8] sm:$0xff] %v902_v27  ;;  %v906_v29 = vld [vmem:[%s4299_s7 + $0x5d0] sm:$0xff] }
  0x47   : > { %905 = vst [vmem:[%s4304_s8 + $0x2e0] sm:$0xff] %v904_v28  ;;  %v908_v30 = vld [vmem:[%s4299_s7 + $0x5e0] sm:$0xff]  ;;  %v910_v31 = vld [vmem:[%s4299_s7 + $0x5f0] sm:$0xff]  ;;  %907 = vst [vmem:[%s4304_s8 + $0x2e8] sm:$0xff] %v906_v29 }
  0x48   : > { %909 = vst [vmem:[%s4304_s8 + $0x2f0] sm:$0xff] %v908_v30  ;;  %911 = vst [vmem:[%s4304_s8 + $0x2f8] sm:$0xff] %v910_v31  ;;  %v912_v32 = vld [vmem:[%s4299_s7 + $0x600] sm:$0xff]  ;;  %v914_v33 = vld [vmem:[%s4299_s7 + $0x610] sm:$0xff] }
  0x49   : > { %v916_v34 = vld [vmem:[%s4299_s7 + $0x620] sm:$0xff]  ;;  %913 = vst [vmem:[%s4304_s8 + $0x300] sm:$0xff] %v912_v32  ;;  %915 = vst [vmem:[%s4304_s8 + $0x308] sm:$0xff] %v914_v33  ;;  %v918_v35 = vld [vmem:[%s4299_s7 + $0x630] sm:$0xff] }
  0x4a   : > { %917 = vst [vmem:[%s4304_s8 + $0x310] sm:$0xff] %v916_v34  ;;  %v920_v36 = vld [vmem:[%s4299_s7 + $0x640] sm:$0xff]  ;;  %v922_v37 = vld [vmem:[%s4299_s7 + $0x650] sm:$0xff]  ;;  %919 = vst [vmem:[%s4304_s8 + $0x318] sm:$0xff] %v918_v35 }
  0x4b   : > { %921 = vst [vmem:[%s4304_s8 + $0x320] sm:$0xff] %v920_v36  ;;  %923 = vst [vmem:[%s4304_s8 + $0x328] sm:$0xff] %v922_v37  ;;  %v924_v38 = vld [vmem:[%s4299_s7 + $0x660] sm:$0xff]  ;;  %v926_v39 = vld [vmem:[%s4299_s7 + $0x670] sm:$0xff] }
  0x4c   : > { %v928_v40 = vld [vmem:[%s4299_s7 + $0x680] sm:$0xff]  ;;  %925 = vst [vmem:[%s4304_s8 + $0x330] sm:$0xff] %v924_v38  ;;  %927 = vst [vmem:[%s4304_s8 + $0x338] sm:$0xff] %v926_v39  ;;  %v930_v41 = vld [vmem:[%s4299_s7 + $0x690] sm:$0xff] }
  0x4d   : > { %929 = vst [vmem:[%s4304_s8 + $0x340] sm:$0xff] %v928_v40  ;;  %v932_v42 = vld [vmem:[%s4299_s7 + $0x6a0] sm:$0xff]  ;;  %v934_v43 = vld [vmem:[%s4299_s7 + $0x6b0] sm:$0xff]  ;;  %931 = vst [vmem:[%s4304_s8 + $0x348] sm:$0xff] %v930_v41 }
  0x4e   : > { %933 = vst [vmem:[%s4304_s8 + $0x350] sm:$0xff] %v932_v42  ;;  %935 = vst [vmem:[%s4304_s8 + $0x358] sm:$0xff] %v934_v43  ;;  %v936_v44 = vld [vmem:[%s4299_s7 + $0x6c0] sm:$0xff]  ;;  %v938_v45 = vld [vmem:[%s4299_s7 + $0x6d0] sm:$0xff] }
  0x4f   : > { %v940_v46 = vld [vmem:[%s4299_s7 + $0x6e0] sm:$0xff]  ;;  %937 = vst [vmem:[%s4304_s8 + $0x360] sm:$0xff] %v936_v44  ;;  %939 = vst [vmem:[%s4304_s8 + $0x368] sm:$0xff] %v938_v45  ;;  %v942_v47 = vld [vmem:[%s4299_s7 + $0x6f0] sm:$0xff] }
  0x50   : > { %941 = vst [vmem:[%s4304_s8 + $0x370] sm:$0xff] %v940_v46  ;;  %v944_v48 = vld [vmem:[%s4299_s7 + $0x700] sm:$0xff]  ;;  %v946_v49 = vld [vmem:[%s4299_s7 + $0x710] sm:$0xff]  ;;  %943 = vst [vmem:[%s4304_s8 + $0x378] sm:$0xff] %v942_v47 }
  0x51   : > { %945 = vst [vmem:[%s4304_s8 + $0x380] sm:$0xff] %v944_v48  ;;  %947 = vst [vmem:[%s4304_s8 + $0x388] sm:$0xff] %v946_v49  ;;  %v948_v50 = vld [vmem:[%s4299_s7 + $0x720] sm:$0xff]  ;;  %v950_v51 = vld [vmem:[%s4299_s7 + $0x730] sm:$0xff] }
  0x52   : > { %v952_v52 = vld [vmem:[%s4299_s7 + $0x740] sm:$0xff]  ;;  %949 = vst [vmem:[%s4304_s8 + $0x390] sm:$0xff] %v948_v50  ;;  %951 = vst [vmem:[%s4304_s8 + $0x398] sm:$0xff] %v950_v51  ;;  %v954_v53 = vld [vmem:[%s4299_s7 + $0x750] sm:$0xff] }
  0x53   : > { %953 = vst [vmem:[%s4304_s8 + $0x3a0] sm:$0xff] %v952_v52  ;;  %v956_v54 = vld [vmem:[%s4299_s7 + $0x760] sm:$0xff]  ;;  %v958_v55 = vld [vmem:[%s4299_s7 + $0x770] sm:$0xff]  ;;  %955 = vst [vmem:[%s4304_s8 + $0x3a8] sm:$0xff] %v954_v53 }
  0x54   : > { %957 = vst [vmem:[%s4304_s8 + $0x3b0] sm:$0xff] %v956_v54  ;;  %959 = vst [vmem:[%s4304_s8 + $0x3b8] sm:$0xff] %v958_v55  ;;  %v960_v56 = vld [vmem:[%s4299_s7 + $0x780] sm:$0xff]  ;;  %v962_v57 = vld [vmem:[%s4299_s7 + $0x790] sm:$0xff] }
  0x55   : > { %v964_v58 = vld [vmem:[%s4299_s7 + $0x7a0] sm:$0xff]  ;;  %961 = vst [vmem:[%s4304_s8 + $0x3c0] sm:$0xff] %v960_v56  ;;  %963 = vst [vmem:[%s4304_s8 + $0x3c8] sm:$0xff] %v962_v57  ;;  %v966_v59 = vld [vmem:[%s4299_s7 + $0x7b0] sm:$0xff] }
  0x56   : > { %965 = vst [vmem:[%s4304_s8 + $0x3d0] sm:$0xff] %v964_v58  ;;  %v968_v60 = vld [vmem:[%s4299_s7 + $0x7c0] sm:$0xff]  ;;  %v970_v61 = vld [vmem:[%s4299_s7 + $0x7d0] sm:$0xff]  ;;  %967 = vst [vmem:[%s4304_s8 + $0x3d8] sm:$0xff] %v966_v59 }
  0x57   : > { %969 = vst [vmem:[%s4304_s8 + $0x3e0] sm:$0xff] %v968_v60  ;;  %971 = vst [vmem:[%s4304_s8 + $0x3e8] sm:$0xff] %v970_v61  ;;  %v972_v62 = vld [vmem:[%s4299_s7 + $0x7e0] sm:$0xff]  ;;  %v974_v63 = vld [vmem:[%s4299_s7 + $0x7f0] sm:$0xff] }
  0x58   : > { %v976_v0 = vld [vmem:[%s4299_s7 + $0x800] sm:$0xff]  ;;  %973 = vst [vmem:[%s4304_s8 + $0x3f0] sm:$0xff] %v972_v62  ;;  %975 = vst [vmem:[%s4304_s8 + $0x3f8] sm:$0xff] %v974_v63  ;;  %v978_v1 = vld [vmem:[%s4299_s7 + $0x810] sm:$0xff] }
  0x59   : > { %977 = vst [vmem:[%s4304_s8 + $0x400] sm:$0xff] %v976_v0  ;;  %v980_v2 = vld [vmem:[%s4299_s7 + $0x820] sm:$0xff]  ;;  %v982_v3 = vld [vmem:[%s4299_s7 + $0x830] sm:$0xff]  ;;  %979 = vst [vmem:[%s4304_s8 + $0x408] sm:$0xff] %v978_v1 }
  0x5a   : > { %981 = vst [vmem:[%s4304_s8 + $0x410] sm:$0xff] %v980_v2  ;;  %983 = vst [vmem:[%s4304_s8 + $0x418] sm:$0xff] %v982_v3  ;;  %v984_v4 = vld [vmem:[%s4299_s7 + $0x840] sm:$0xff]  ;;  %v986_v5 = vld [vmem:[%s4299_s7 + $0x850] sm:$0xff] }
  0x5b   : > { %v988_v6 = vld [vmem:[%s4299_s7 + $0x860] sm:$0xff]  ;;  %985 = vst [vmem:[%s4304_s8 + $0x420] sm:$0xff] %v984_v4  ;;  %987 = vst [vmem:[%s4304_s8 + $0x428] sm:$0xff] %v986_v5  ;;  %v990_v7 = vld [vmem:[%s4299_s7 + $0x870] sm:$0xff] }
  0x5c   : > { %989 = vst [vmem:[%s4304_s8 + $0x430] sm:$0xff] %v988_v6  ;;  %v992_v8 = vld [vmem:[%s4299_s7 + $0x880] sm:$0xff]  ;;  %v994_v9 = vld [vmem:[%s4299_s7 + $0x890] sm:$0xff]  ;;  %991 = vst [vmem:[%s4304_s8 + $0x438] sm:$0xff] %v990_v7 }
  0x5d   : > { %993 = vst [vmem:[%s4304_s8 + $0x440] sm:$0xff] %v992_v8  ;;  %995 = vst [vmem:[%s4304_s8 + $0x448] sm:$0xff] %v994_v9  ;;  %v996_v10 = vld [vmem:[%s4299_s7 + $0x8a0] sm:$0xff]  ;;  %v998_v11 = vld [vmem:[%s4299_s7 + $0x8b0] sm:$0xff] }
  0x5e   : > { %v1000_v12 = vld [vmem:[%s4299_s7 + $0x8c0] sm:$0xff]  ;;  %997 = vst [vmem:[%s4304_s8 + $0x450] sm:$0xff] %v996_v10  ;;  %999 = vst [vmem:[%s4304_s8 + $0x458] sm:$0xff] %v998_v11  ;;  %v1002_v13 = vld [vmem:[%s4299_s7 + $0x8d0] sm:$0xff] }
  0x5f   : > { %1001 = vst [vmem:[%s4304_s8 + $0x460] sm:$0xff] %v1000_v12  ;;  %v1004_v14 = vld [vmem:[%s4299_s7 + $0x8e0] sm:$0xff]  ;;  %v1006_v15 = vld [vmem:[%s4299_s7 + $0x8f0] sm:$0xff]  ;;  %1003 = vst [vmem:[%s4304_s8 + $0x468] sm:$0xff] %v1002_v13 }
  0x60   : > { %1005 = vst [vmem:[%s4304_s8 + $0x470] sm:$0xff] %v1004_v14  ;;  %1007 = vst [vmem:[%s4304_s8 + $0x478] sm:$0xff] %v1006_v15  ;;  %v1008_v16 = vld [vmem:[%s4299_s7 + $0x900] sm:$0xff]  ;;  %v1010_v17 = vld [vmem:[%s4299_s7 + $0x910] sm:$0xff] }
  0x61   : > { %v1012_v18 = vld [vmem:[%s4299_s7 + $0x920] sm:$0xff]  ;;  %1009 = vst [vmem:[%s4304_s8 + $0x480] sm:$0xff] %v1008_v16  ;;  %1011 = vst [vmem:[%s4304_s8 + $0x488] sm:$0xff] %v1010_v17  ;;  %v1014_v19 = vld [vmem:[%s4299_s7 + $0x930] sm:$0xff] }
  0x62   : > { %1013 = vst [vmem:[%s4304_s8 + $0x490] sm:$0xff] %v1012_v18  ;;  %v1016_v20 = vld [vmem:[%s4299_s7 + $0x940] sm:$0xff]  ;;  %v1018_v21 = vld [vmem:[%s4299_s7 + $0x950] sm:$0xff]  ;;  %1015 = vst [vmem:[%s4304_s8 + $0x498] sm:$0xff] %v1014_v19 }
  0x63   : > { %1017 = vst [vmem:[%s4304_s8 + $0x4a0] sm:$0xff] %v1016_v20  ;;  %1019 = vst [vmem:[%s4304_s8 + $0x4a8] sm:$0xff] %v1018_v21  ;;  %v1020_v22 = vld [vmem:[%s4299_s7 + $0x960] sm:$0xff]  ;;  %v1022_v23 = vld [vmem:[%s4299_s7 + $0x970] sm:$0xff] }
  0x64   : > { %v1024_v24 = vld [vmem:[%s4299_s7 + $0x980] sm:$0xff]  ;;  %1021 = vst [vmem:[%s4304_s8 + $0x4b0] sm:$0xff] %v1020_v22  ;;  %1023 = vst [vmem:[%s4304_s8 + $0x4b8] sm:$0xff] %v1022_v23  ;;  %v1026_v25 = vld [vmem:[%s4299_s7 + $0x990] sm:$0xff] }
  0x65   : > { %1025 = vst [vmem:[%s4304_s8 + $0x4c0] sm:$0xff] %v1024_v24  ;;  %v1028_v26 = vld [vmem:[%s4299_s7 + $0x9a0] sm:$0xff]  ;;  %v1030_v27 = vld [vmem:[%s4299_s7 + $0x9b0] sm:$0xff]  ;;  %1027 = vst [vmem:[%s4304_s8 + $0x4c8] sm:$0xff] %v1026_v25 }
  0x66   : > { %1029 = vst [vmem:[%s4304_s8 + $0x4d0] sm:$0xff] %v1028_v26  ;;  %1031 = vst [vmem:[%s4304_s8 + $0x4d8] sm:$0xff] %v1030_v27  ;;  %v1032_v28 = vld [vmem:[%s4299_s7 + $0x9c0] sm:$0xff]  ;;  %v1034_v29 = vld [vmem:[%s4299_s7 + $0x9d0] sm:$0xff] }
  0x67   : > { %v1036_v30 = vld [vmem:[%s4299_s7 + $0x9e0] sm:$0xff]  ;;  %1033 = vst [vmem:[%s4304_s8 + $0x4e0] sm:$0xff] %v1032_v28  ;;  %1035 = vst [vmem:[%s4304_s8 + $0x4e8] sm:$0xff] %v1034_v29  ;;  %v1038_v31 = vld [vmem:[%s4299_s7 + $0x9f0] sm:$0xff] }
  0x68   : > { %1037 = vst [vmem:[%s4304_s8 + $0x4f0] sm:$0xff] %v1036_v30  ;;  %v1040_v32 = vld [vmem:[%s4299_s7 + $0xa00] sm:$0xff]  ;;  %v1042_v33 = vld [vmem:[%s4299_s7 + $0xa10] sm:$0xff]  ;;  %1039 = vst [vmem:[%s4304_s8 + $0x4f8] sm:$0xff] %v1038_v31 }
  0x69   : > { %1041 = vst [vmem:[%s4304_s8 + $0x500] sm:$0xff] %v1040_v32  ;;  %1043 = vst [vmem:[%s4304_s8 + $0x508] sm:$0xff] %v1042_v33  ;;  %v1044_v34 = vld [vmem:[%s4299_s7 + $0xa20] sm:$0xff]  ;;  %v1046_v35 = vld [vmem:[%s4299_s7 + $0xa30] sm:$0xff] }
  0x6a   : > { %v1048_v36 = vld [vmem:[%s4299_s7 + $0xa40] sm:$0xff]  ;;  %1045 = vst [vmem:[%s4304_s8 + $0x510] sm:$0xff] %v1044_v34  ;;  %1047 = vst [vmem:[%s4304_s8 + $0x518] sm:$0xff] %v1046_v35  ;;  %v1050_v37 = vld [vmem:[%s4299_s7 + $0xa50] sm:$0xff] }
  0x6b   : > { %1049 = vst [vmem:[%s4304_s8 + $0x520] sm:$0xff] %v1048_v36  ;;  %v1052_v38 = vld [vmem:[%s4299_s7 + $0xa60] sm:$0xff]  ;;  %v1054_v39 = vld [vmem:[%s4299_s7 + $0xa70] sm:$0xff]  ;;  %1051 = vst [vmem:[%s4304_s8 + $0x528] sm:$0xff] %v1050_v37 }
  0x6c   : > { %1053 = vst [vmem:[%s4304_s8 + $0x530] sm:$0xff] %v1052_v38  ;;  %1055 = vst [vmem:[%s4304_s8 + $0x538] sm:$0xff] %v1054_v39  ;;  %v1056_v40 = vld [vmem:[%s4299_s7 + $0xa80] sm:$0xff]  ;;  %v1058_v41 = vld [vmem:[%s4299_s7 + $0xa90] sm:$0xff] }
  0x6d   : > { %v1060_v42 = vld [vmem:[%s4299_s7 + $0xaa0] sm:$0xff]  ;;  %1057 = vst [vmem:[%s4304_s8 + $0x540] sm:$0xff] %v1056_v40  ;;  %1059 = vst [vmem:[%s4304_s8 + $0x548] sm:$0xff] %v1058_v41  ;;  %v1062_v43 = vld [vmem:[%s4299_s7 + $0xab0] sm:$0xff] }
  0x6e   : > { %1061 = vst [vmem:[%s4304_s8 + $0x550] sm:$0xff] %v1060_v42  ;;  %v1064_v44 = vld [vmem:[%s4299_s7 + $0xac0] sm:$0xff]  ;;  %v1066_v45 = vld [vmem:[%s4299_s7 + $0xad0] sm:$0xff]  ;;  %1063 = vst [vmem:[%s4304_s8 + $0x558] sm:$0xff] %v1062_v43 }
  0x6f   : > { %1065 = vst [vmem:[%s4304_s8 + $0x560] sm:$0xff] %v1064_v44  ;;  %1067 = vst [vmem:[%s4304_s8 + $0x568] sm:$0xff] %v1066_v45  ;;  %v1068_v46 = vld [vmem:[%s4299_s7 + $0xae0] sm:$0xff]  ;;  %v1070_v47 = vld [vmem:[%s4299_s7 + $0xaf0] sm:$0xff] }
  0x70   : > { %v1072_v48 = vld [vmem:[%s4299_s7 + $0xb00] sm:$0xff]  ;;  %1069 = vst [vmem:[%s4304_s8 + $0x570] sm:$0xff] %v1068_v46  ;;  %1071 = vst [vmem:[%s4304_s8 + $0x578] sm:$0xff] %v1070_v47  ;;  %v1074_v49 = vld [vmem:[%s4299_s7 + $0xb10] sm:$0xff] }
  0x71   : > { %1073 = vst [vmem:[%s4304_s8 + $0x580] sm:$0xff] %v1072_v48  ;;  %v1076_v50 = vld [vmem:[%s4299_s7 + $0xb20] sm:$0xff]  ;;  %v1078_v51 = vld [vmem:[%s4299_s7 + $0xb30] sm:$0xff]  ;;  %1075 = vst [vmem:[%s4304_s8 + $0x588] sm:$0xff] %v1074_v49 }
  0x72   : > { %1077 = vst [vmem:[%s4304_s8 + $0x590] sm:$0xff] %v1076_v50  ;;  %1079 = vst [vmem:[%s4304_s8 + $0x598] sm:$0xff] %v1078_v51  ;;  %v1080_v52 = vld [vmem:[%s4299_s7 + $0xb40] sm:$0xff]  ;;  %v1082_v53 = vld [vmem:[%s4299_s7 + $0xb50] sm:$0xff] }
  0x73   : > { %v1084_v54 = vld [vmem:[%s4299_s7 + $0xb60] sm:$0xff]  ;;  %1081 = vst [vmem:[%s4304_s8 + $0x5a0] sm:$0xff] %v1080_v52  ;;  %1083 = vst [vmem:[%s4304_s8 + $0x5a8] sm:$0xff] %v1082_v53  ;;  %v1086_v55 = vld [vmem:[%s4299_s7 + $0xb70] sm:$0xff] }
  0x74   : > { %1085 = vst [vmem:[%s4304_s8 + $0x5b0] sm:$0xff] %v1084_v54  ;;  %v1088_v56 = vld [vmem:[%s4299_s7 + $0xb80] sm:$0xff]  ;;  %v1090_v57 = vld [vmem:[%s4299_s7 + $0xb90] sm:$0xff]  ;;  %1087 = vst [vmem:[%s4304_s8 + $0x5b8] sm:$0xff] %v1086_v55 }
  0x75   : > { %1089 = vst [vmem:[%s4304_s8 + $0x5c0] sm:$0xff] %v1088_v56  ;;  %1091 = vst [vmem:[%s4304_s8 + $0x5c8] sm:$0xff] %v1090_v57  ;;  %v1092_v58 = vld [vmem:[%s4299_s7 + $0xba0] sm:$0xff]  ;;  %v1094_v59 = vld [vmem:[%s4299_s7 + $0xbb0] sm:$0xff] }
  0x76   : > { %v1096_v60 = vld [vmem:[%s4299_s7 + $0xbc0] sm:$0xff]  ;;  %1093 = vst [vmem:[%s4304_s8 + $0x5d0] sm:$0xff] %v1092_v58  ;;  %1095 = vst [vmem:[%s4304_s8 + $0x5d8] sm:$0xff] %v1094_v59  ;;  %v1098_v61 = vld [vmem:[%s4299_s7 + $0xbd0] sm:$0xff] }
  0x77   : > { %1097 = vst [vmem:[%s4304_s8 + $0x5e0] sm:$0xff] %v1096_v60  ;;  %v1100_v62 = vld [vmem:[%s4299_s7 + $0xbe0] sm:$0xff]  ;;  %v1102_v63 = vld [vmem:[%s4299_s7 + $0xbf0] sm:$0xff]  ;;  %1099 = vst [vmem:[%s4304_s8 + $0x5e8] sm:$0xff] %v1098_v61 }
  0x78   : > { %1101 = vst [vmem:[%s4304_s8 + $0x5f0] sm:$0xff] %v1100_v62  ;;  %1103 = vst [vmem:[%s4304_s8 + $0x5f8] sm:$0xff] %v1102_v63  ;;  %v1104_v0 = vld [vmem:[%s4299_s7 + $0xc00] sm:$0xff]  ;;  %v1106_v1 = vld [vmem:[%s4299_s7 + $0xc10] sm:$0xff] }
  0x79   : > { %v1108_v2 = vld [vmem:[%s4299_s7 + $0xc20] sm:$0xff]  ;;  %1105 = vst [vmem:[%s4304_s8 + $0x600] sm:$0xff] %v1104_v0  ;;  %1107 = vst [vmem:[%s4304_s8 + $0x608] sm:$0xff] %v1106_v1  ;;  %v1110_v3 = vld [vmem:[%s4299_s7 + $0xc30] sm:$0xff] }
  0x7a   : > { %1109 = vst [vmem:[%s4304_s8 + $0x610] sm:$0xff] %v1108_v2  ;;  %v1112_v4 = vld [vmem:[%s4299_s7 + $0xc40] sm:$0xff]  ;;  %v1114_v5 = vld [vmem:[%s4299_s7 + $0xc50] sm:$0xff]  ;;  %1111 = vst [vmem:[%s4304_s8 + $0x618] sm:$0xff] %v1110_v3 }
  0x7b   : > { %1113 = vst [vmem:[%s4304_s8 + $0x620] sm:$0xff] %v1112_v4  ;;  %1115 = vst [vmem:[%s4304_s8 + $0x628] sm:$0xff] %v1114_v5  ;;  %v1116_v6 = vld [vmem:[%s4299_s7 + $0xc60] sm:$0xff]  ;;  %v1118_v7 = vld [vmem:[%s4299_s7 + $0xc70] sm:$0xff] }
  0x7c   : > { %v1120_v8 = vld [vmem:[%s4299_s7 + $0xc80] sm:$0xff]  ;;  %1117 = vst [vmem:[%s4304_s8 + $0x630] sm:$0xff] %v1116_v6  ;;  %1119 = vst [vmem:[%s4304_s8 + $0x638] sm:$0xff] %v1118_v7  ;;  %v1122_v9 = vld [vmem:[%s4299_s7 + $0xc90] sm:$0xff] }
  0x7d   : > { %1121 = vst [vmem:[%s4304_s8 + $0x640] sm:$0xff] %v1120_v8  ;;  %v1124_v10 = vld [vmem:[%s4299_s7 + $0xca0] sm:$0xff]  ;;  %v1126_v11 = vld [vmem:[%s4299_s7 + $0xcb0] sm:$0xff]  ;;  %1123 = vst [vmem:[%s4304_s8 + $0x648] sm:$0xff] %v1122_v9 }
  0x7e   : > { %1125 = vst [vmem:[%s4304_s8 + $0x650] sm:$0xff] %v1124_v10  ;;  %1127 = vst [vmem:[%s4304_s8 + $0x658] sm:$0xff] %v1126_v11  ;;  %v1128_v12 = vld [vmem:[%s4299_s7 + $0xcc0] sm:$0xff]  ;;  %v1130_v13 = vld [vmem:[%s4299_s7 + $0xcd0] sm:$0xff] }
  0x7f   : > { %v1132_v14 = vld [vmem:[%s4299_s7 + $0xce0] sm:$0xff]  ;;  %1129 = vst [vmem:[%s4304_s8 + $0x660] sm:$0xff] %v1128_v12  ;;  %1131 = vst [vmem:[%s4304_s8 + $0x668] sm:$0xff] %v1130_v13  ;;  %v1134_v15 = vld [vmem:[%s4299_s7 + $0xcf0] sm:$0xff] }
  0x80   : > { %1133 = vst [vmem:[%s4304_s8 + $0x670] sm:$0xff] %v1132_v14  ;;  %v1136_v16 = vld [vmem:[%s4299_s7 + $0xd00] sm:$0xff]  ;;  %v1138_v17 = vld [vmem:[%s4299_s7 + $0xd10] sm:$0xff]  ;;  %1135 = vst [vmem:[%s4304_s8 + $0x678] sm:$0xff] %v1134_v15 }
  0x81   : > { %1137 = vst [vmem:[%s4304_s8 + $0x680] sm:$0xff] %v1136_v16  ;;  %1139 = vst [vmem:[%s4304_s8 + $0x688] sm:$0xff] %v1138_v17  ;;  %v1140_v18 = vld [vmem:[%s4299_s7 + $0xd20] sm:$0xff]  ;;  %v1142_v19 = vld [vmem:[%s4299_s7 + $0xd30] sm:$0xff] }
  0x82   : > { %v1144_v20 = vld [vmem:[%s4299_s7 + $0xd40] sm:$0xff]  ;;  %1141 = vst [vmem:[%s4304_s8 + $0x690] sm:$0xff] %v1140_v18  ;;  %1143 = vst [vmem:[%s4304_s8 + $0x698] sm:$0xff] %v1142_v19  ;;  %v1146_v21 = vld [vmem:[%s4299_s7 + $0xd50] sm:$0xff] }
  0x83   : > { %1145 = vst [vmem:[%s4304_s8 + $0x6a0] sm:$0xff] %v1144_v20  ;;  %v1148_v22 = vld [vmem:[%s4299_s7 + $0xd60] sm:$0xff]  ;;  %v1150_v23 = vld [vmem:[%s4299_s7 + $0xd70] sm:$0xff]  ;;  %1147 = vst [vmem:[%s4304_s8 + $0x6a8] sm:$0xff] %v1146_v21 }
  0x84   : > { %1149 = vst [vmem:[%s4304_s8 + $0x6b0] sm:$0xff] %v1148_v22  ;;  %1151 = vst [vmem:[%s4304_s8 + $0x6b8] sm:$0xff] %v1150_v23  ;;  %v1152_v24 = vld [vmem:[%s4299_s7 + $0xd80] sm:$0xff]  ;;  %v1154_v25 = vld [vmem:[%s4299_s7 + $0xd90] sm:$0xff] }
  0x85   : > { %v1156_v26 = vld [vmem:[%s4299_s7 + $0xda0] sm:$0xff]  ;;  %1153 = vst [vmem:[%s4304_s8 + $0x6c0] sm:$0xff] %v1152_v24  ;;  %1155 = vst [vmem:[%s4304_s8 + $0x6c8] sm:$0xff] %v1154_v25  ;;  %v1158_v27 = vld [vmem:[%s4299_s7 + $0xdb0] sm:$0xff] }
  0x86   : > { %1157 = vst [vmem:[%s4304_s8 + $0x6d0] sm:$0xff] %v1156_v26  ;;  %v1160_v28 = vld [vmem:[%s4299_s7 + $0xdc0] sm:$0xff]  ;;  %v1162_v29 = vld [vmem:[%s4299_s7 + $0xdd0] sm:$0xff]  ;;  %1159 = vst [vmem:[%s4304_s8 + $0x6d8] sm:$0xff] %v1158_v27 }
  0x87   : > { %1161 = vst [vmem:[%s4304_s8 + $0x6e0] sm:$0xff] %v1160_v28  ;;  %1163 = vst [vmem:[%s4304_s8 + $0x6e8] sm:$0xff] %v1162_v29  ;;  %v1164_v30 = vld [vmem:[%s4299_s7 + $0xde0] sm:$0xff]  ;;  %v1166_v31 = vld [vmem:[%s4299_s7 + $0xdf0] sm:$0xff] }
  0x88   : > { %v1168_v32 = vld [vmem:[%s4299_s7 + $0xe00] sm:$0xff]  ;;  %1165 = vst [vmem:[%s4304_s8 + $0x6f0] sm:$0xff] %v1164_v30  ;;  %1167 = vst [vmem:[%s4304_s8 + $0x6f8] sm:$0xff] %v1166_v31  ;;  %v1170_v33 = vld [vmem:[%s4299_s7 + $0xe10] sm:$0xff] }
  0x89   : > { %1169 = vst [vmem:[%s4304_s8 + $0x700] sm:$0xff] %v1168_v32  ;;  %v1172_v34 = vld [vmem:[%s4299_s7 + $0xe20] sm:$0xff]  ;;  %v1174_v35 = vld [vmem:[%s4299_s7 + $0xe30] sm:$0xff]  ;;  %1171 = vst [vmem:[%s4304_s8 + $0x708] sm:$0xff] %v1170_v33 }
  0x8a   : > { %1173 = vst [vmem:[%s4304_s8 + $0x710] sm:$0xff] %v1172_v34  ;;  %1175 = vst [vmem:[%s4304_s8 + $0x718] sm:$0xff] %v1174_v35  ;;  %v1176_v36 = vld [vmem:[%s4299_s7 + $0xe40] sm:$0xff]  ;;  %v1178_v37 = vld [vmem:[%s4299_s7 + $0xe50] sm:$0xff] }
  0x8b   : > { %v1180_v38 = vld [vmem:[%s4299_s7 + $0xe60] sm:$0xff]  ;;  %1177 = vst [vmem:[%s4304_s8 + $0x720] sm:$0xff] %v1176_v36  ;;  %1179 = vst [vmem:[%s4304_s8 + $0x728] sm:$0xff] %v1178_v37  ;;  %v1182_v39 = vld [vmem:[%s4299_s7 + $0xe70] sm:$0xff] }
  0x8c   : > { %1181 = vst [vmem:[%s4304_s8 + $0x730] sm:$0xff] %v1180_v38  ;;  %v1184_v40 = vld [vmem:[%s4299_s7 + $0xe80] sm:$0xff]  ;;  %v1186_v41 = vld [vmem:[%s4299_s7 + $0xe90] sm:$0xff]  ;;  %1183 = vst [vmem:[%s4304_s8 + $0x738] sm:$0xff] %v1182_v39 }
  0x8d   : > { %1185 = vst [vmem:[%s4304_s8 + $0x740] sm:$0xff] %v1184_v40  ;;  %1187 = vst [vmem:[%s4304_s8 + $0x748] sm:$0xff] %v1186_v41  ;;  %v1188_v42 = vld [vmem:[%s4299_s7 + $0xea0] sm:$0xff]  ;;  %v1190_v43 = vld [vmem:[%s4299_s7 + $0xeb0] sm:$0xff] }
  0x8e   : > { %v1192_v44 = vld [vmem:[%s4299_s7 + $0xec0] sm:$0xff]  ;;  %1189 = vst [vmem:[%s4304_s8 + $0x750] sm:$0xff] %v1188_v42  ;;  %1191 = vst [vmem:[%s4304_s8 + $0x758] sm:$0xff] %v1190_v43  ;;  %v1194_v45 = vld [vmem:[%s4299_s7 + $0xed0] sm:$0xff] }
  0x8f   : > { %1193 = vst [vmem:[%s4304_s8 + $0x760] sm:$0xff] %v1192_v44  ;;  %v1196_v46 = vld [vmem:[%s4299_s7 + $0xee0] sm:$0xff]  ;;  %v1198_v47 = vld [vmem:[%s4299_s7 + $0xef0] sm:$0xff]  ;;  %1195 = vst [vmem:[%s4304_s8 + $0x768] sm:$0xff] %v1194_v45 }
  0x90   : > { %1197 = vst [vmem:[%s4304_s8 + $0x770] sm:$0xff] %v1196_v46  ;;  %1199 = vst [vmem:[%s4304_s8 + $0x778] sm:$0xff] %v1198_v47  ;;  %v1200_v48 = vld [vmem:[%s4299_s7 + $0xf00] sm:$0xff]  ;;  %v1202_v49 = vld [vmem:[%s4299_s7 + $0xf10] sm:$0xff] }
  0x91   : > { %v1204_v50 = vld [vmem:[%s4299_s7 + $0xf20] sm:$0xff]  ;;  %1201 = vst [vmem:[%s4304_s8 + $0x780] sm:$0xff] %v1200_v48  ;;  %1203 = vst [vmem:[%s4304_s8 + $0x788] sm:$0xff] %v1202_v49  ;;  %v1206_v51 = vld [vmem:[%s4299_s7 + $0xf30] sm:$0xff] }
  0x92   : > { %1205 = vst [vmem:[%s4304_s8 + $0x790] sm:$0xff] %v1204_v50  ;;  %v1208_v52 = vld [vmem:[%s4299_s7 + $0xf40] sm:$0xff]  ;;  %v1210_v53 = vld [vmem:[%s4299_s7 + $0xf50] sm:$0xff]  ;;  %1207 = vst [vmem:[%s4304_s8 + $0x798] sm:$0xff] %v1206_v51 }
  0x93   : > { %1209 = vst [vmem:[%s4304_s8 + $0x7a0] sm:$0xff] %v1208_v52  ;;  %1211 = vst [vmem:[%s4304_s8 + $0x7a8] sm:$0xff] %v1210_v53  ;;  %v1212_v54 = vld [vmem:[%s4299_s7 + $0xf60] sm:$0xff]  ;;  %v1214_v55 = vld [vmem:[%s4299_s7 + $0xf70] sm:$0xff] }
  0x94   : > { %v1216_v56 = vld [vmem:[%s4299_s7 + $0xf80] sm:$0xff]  ;;  %1213 = vst [vmem:[%s4304_s8 + $0x7b0] sm:$0xff] %v1212_v54  ;;  %1215 = vst [vmem:[%s4304_s8 + $0x7b8] sm:$0xff] %v1214_v55  ;;  %v1218_v57 = vld [vmem:[%s4299_s7 + $0xf90] sm:$0xff] }
  0x95   : > { %1217 = vst [vmem:[%s4304_s8 + $0x7c0] sm:$0xff] %v1216_v56  ;;  %v1220_v58 = vld [vmem:[%s4299_s7 + $0xfa0] sm:$0xff]  ;;  %v1222_v59 = vld [vmem:[%s4299_s7 + $0xfb0] sm:$0xff]  ;;  %1219 = vst [vmem:[%s4304_s8 + $0x7c8] sm:$0xff] %v1218_v57 }
  0x96   : > { %1221 = vst [vmem:[%s4304_s8 + $0x7d0] sm:$0xff] %v1220_v58  ;;  %1223 = vst [vmem:[%s4304_s8 + $0x7d8] sm:$0xff] %v1222_v59  ;;  %v1224_v60 = vld [vmem:[%s4299_s7 + $0xfc0] sm:$0xff]  ;;  %v1226_v61 = vld [vmem:[%s4299_s7 + $0xfd0] sm:$0xff] }
  0x97   : > { %v1228_v62 = vld [vmem:[%s4299_s7 + $0xfe0] sm:$0xff]  ;;  %1225 = vst [vmem:[%s4304_s8 + $0x7e0] sm:$0xff] %v1224_v60  ;;  %1227 = vst [vmem:[%s4304_s8 + $0x7e8] sm:$0xff] %v1226_v61  ;;  %v1230_v63 = vld [vmem:[%s4299_s7 + $0xff0] sm:$0xff] }
  0x98   : > { %1229 = vst [vmem:[%s4304_s8 + $0x7f0] sm:$0xff] %v1228_v62  ;;  %1231 = vst [vmem:[%s4304_s8 + $0x7f8] sm:$0xff] %v1230_v63 }
  0x99 PF: > { %p3419_p7 = scmp.ge.s32.totalorder %s4216_s18, 1  ;;  %p1244_p8 = scmp.lt.s32.totalorder %s4216_s18, 5 }
  0x9b   : > { %p1245_p9 = pnand %p3419_p7, %p1244_p8 }
  0x9c   : > { %s1251_s9 = sand.u32 (!%p1245_p9), 1, %s4192_s12   ;;  %s3421_s10 = sshll.u32 (!%p1245_p9), %s4200_s14, 4 }
  0x9d   : > { %1248 = sbr.rel (%p1245_p9) target bundleno = 663 (0x297), region = 66  ;;  %s3420_s11 = sshll.u32 (!%p1245_p9), %s1251_s9, 11 }
  0x9e   : > { %p1294_p10 = scmp.lt.s32.totalorder (!%p1245_p9), %s3421_s10, 31  ;;  %s3423_s21 = sshll.u32 (!%p1245_p9), %s4204_s15, 1 }
  0x9f   : > { %p1304_p11 = scmp.lt.s32.totalorder (!%p1245_p9), %s3423_s21, 3  ;;  %s4837_s5 = scalar_lea.vmem (!%p1245_p9), [#allocation3], %s3420_s11 }
  0xa0   : > { %p3426_p12 = scmp.ne.s32.totalorder (!%p1245_p9), %s4200_s14, 0 }
  0xa4   : > { %s5185_s10 = smov (!%p1294_p10, %s3421_s10), 31  ;;  %s5187_s21 = smov (!%p1304_p11, %s3423_s21), 3 }
  0xa5   : > { %s3422_s22 = sshll.u32 %s5185_s10, 2  ;;  %s1306_s12 = scalar_lea.vmem %s5170_s2, %s5187_s21  ;;  %v4218_v0 = vmov (!%p3426_p12), 0.0  }
  0xa6   : > { %s4823_s26 = scalar_lea.vmem %s5168_s0, %s3422_s22  ;;  %s3425_s29 = sshll.u32 %s5187_s21, 2  ;;  %1322 = vst [vmem:[#allocation2] sm:$0xff] (!%p3426_p12), %v4218_v0  ;;  %1323 = vst [vmem:[#allocation2 + $0x8] sm:$0xff] (!%p3426_p12), %v4218_v0 }
  0xa7   : > { %s4835_s15 = scalar_lea.vmem %s5171_s3, %s3425_s29  ;;  %1321 = sbr.rel (%p3426_p12) target bundleno = 174 (0xae), region = 74 }
  0xae PF: > { %v3762_v1 = vld [vmem:[%s4837_s5 + $0x4] ss:$8 sps:$4 sm:$0xff]   ;;  %v3766_v3 = vld [vmem:[%s4837_s5] ss:$8 sps:$4 sm:$0xff]   ;;  %v3768_v5 = vld [vmem:[%s4837_s5 + $0x14] ss:$8 sps:$4 sm:$0xff]  }
  0xaf   : > { %v3764_v2 = vld [vmem:[%s4837_s5 + $0x104] ss:$8 sps:$4 sm:$0xff]   ;;  %2926 = vmatprep.subr.bf16.mxu0 %v3762_v1  ;;  %v3767_v4 = vld [vmem:[%s4837_s5 + $0x100] ss:$8 sps:$4 sm:$0xff]   ;;  %v3770_v6 = vld [vmem:[%s4837_s5 + $0x114] ss:$8 sps:$4 sm:$0xff]  }
  0xb0   : > { %2967 = vmatprep.subr.bf16.mxu1 %v3764_v2  ;;  %2927 = vmatpush1.bf16.msra.mxu0 %v3766_v3  ;;  %v3772_v7 = vld [vmem:[%s4837_s5 + $0x10] ss:$8 sps:$4 sm:$0xff]   ;;  %v3774_v9 = vld [vmem:[%s4837_s5 + $0x24] ss:$8 sps:$4 sm:$0xff]   ;;  %v3778_v11 = vld [vmem:[%s4837_s5 + $0x20] ss:$8 sps:$4 sm:$0xff]  }
  0xb1   : > { %2968 = vmatpush1.bf16.msra.mxu1 %v3767_v4  ;;  %2928 = vmatprep.subr.bf16.mxu0 %v3768_v5  ;;  %v3773_v8 = vld [vmem:[%s4837_s5 + $0x110] ss:$8 sps:$4 sm:$0xff]   ;;  %v3776_v10 = vld [vmem:[%s4837_s5 + $0x124] ss:$8 sps:$4 sm:$0xff]   ;;  %v3779_v12 = vld [vmem:[%s4837_s5 + $0x120] ss:$8 sps:$4 sm:$0xff]  }
  0xb2   : > { %2969 = vmatprep.subr.bf16.mxu1 %v3770_v6  ;;  %v3780_v13 = vld [vmem:[%s4837_s5 + $0x34] ss:$8 sps:$4 sm:$0xff]   ;;  %v3784_v15 = vld [vmem:[%s4837_s5 + $0x30] ss:$8 sps:$4 sm:$0xff]   ;;  %v3786_v17 = vld [vmem:[%s4837_s5 + $0x44] ss:$8 sps:$4 sm:$0xff]  }
  0xb3   : > { %v3782_v14 = vld [vmem:[%s4837_s5 + $0x134] ss:$8 sps:$4 sm:$0xff]   ;;  %v3785_v16 = vld [vmem:[%s4837_s5 + $0x130] ss:$8 sps:$4 sm:$0xff]   ;;  %v3788_v18 = vld [vmem:[%s4837_s5 + $0x144] ss:$8 sps:$4 sm:$0xff]  }
  0xb4   : > { %2929 = vmatpush1.bf16.msra.mxu0 %v3772_v7  ;;  %v3790_v19 = vld [vmem:[%s4837_s5 + $0x40] ss:$8 sps:$4 sm:$0xff]   ;;  %v3792_v21 = vld [vmem:[%s4837_s5 + $0x54] ss:$8 sps:$4 sm:$0xff]   ;;  %v3796_v23 = vld [vmem:[%s4837_s5 + $0x50] ss:$8 sps:$4 sm:$0xff]  }
  0xb5   : > { %2970 = vmatpush1.bf16.msra.mxu1 %v3773_v8  ;;  %2930 = vmatprep.subr.bf16.mxu0 %v3774_v9  ;;  %v3791_v20 = vld [vmem:[%s4837_s5 + $0x140] ss:$8 sps:$4 sm:$0xff]   ;;  %v3794_v22 = vld [vmem:[%s4837_s5 + $0x154] ss:$8 sps:$4 sm:$0xff]   ;;  %v3797_v24 = vld [vmem:[%s4837_s5 + $0x150] ss:$8 sps:$4 sm:$0xff]  }
  0xb6   : > { %2971 = vmatprep.subr.bf16.mxu1 %v3776_v10  ;;  %v3798_v25 = vld [vmem:[%s4837_s5 + $0x64] ss:$8 sps:$4 sm:$0xff]   ;;  %v3802_v27 = vld [vmem:[%s4837_s5 + $0x60] ss:$8 sps:$4 sm:$0xff]   ;;  %v3804_v29 = vld [vmem:[%s4837_s5 + $0x74] ss:$8 sps:$4 sm:$0xff]  }
  0xb7   : > { %v3800_v26 = vld [vmem:[%s4837_s5 + $0x164] ss:$8 sps:$4 sm:$0xff]   ;;  %v3803_v28 = vld [vmem:[%s4837_s5 + $0x160] ss:$8 sps:$4 sm:$0xff]   ;;  %v3806_v30 = vld [vmem:[%s4837_s5 + $0x174] ss:$8 sps:$4 sm:$0xff]  }
  0xb8   : > { %2931 = vmatpush1.bf16.msra.mxu0 %v3778_v11  ;;  %v3808_v31 = vld [vmem:[%s4837_s5 + $0x70] ss:$8 sps:$4 sm:$0xff]   ;;  %v3810_v33 = vld [vmem:[%s4837_s5 + $0x84] ss:$8 sps:$4 sm:$0xff]   ;;  %v3814_v35 = vld [vmem:[%s4837_s5 + $0x80] ss:$8 sps:$4 sm:$0xff]  }
  0xb9   : > { %2972 = vmatpush1.bf16.msra.mxu1 %v3779_v12  ;;  %2932 = vmatprep.subr.bf16.mxu0 %v3780_v13  ;;  %v3809_v32 = vld [vmem:[%s4837_s5 + $0x170] ss:$8 sps:$4 sm:$0xff]   ;;  %v3812_v34 = vld [vmem:[%s4837_s5 + $0x184] ss:$8 sps:$4 sm:$0xff]   ;;  %v3815_v36 = vld [vmem:[%s4837_s5 + $0x180] ss:$8 sps:$4 sm:$0xff]  }
  0xba   : > { %2973 = vmatprep.subr.bf16.mxu1 %v3782_v14  ;;  %v3816_v37 = vld [vmem:[%s4837_s5 + $0x94] ss:$8 sps:$4 sm:$0xff]   ;;  %v3820_v39 = vld [vmem:[%s4837_s5 + $0x90] ss:$8 sps:$4 sm:$0xff]   ;;  %v3822_v41 = vld [vmem:[%s4837_s5 + $0xa4] ss:$8 sps:$4 sm:$0xff]  }
  0xbb   : > { %v3818_v38 = vld [vmem:[%s4837_s5 + $0x194] ss:$8 sps:$4 sm:$0xff]   ;;  %v3821_v40 = vld [vmem:[%s4837_s5 + $0x190] ss:$8 sps:$4 sm:$0xff]   ;;  %v3824_v42 = vld [vmem:[%s4837_s5 + $0x1a4] ss:$8 sps:$4 sm:$0xff]  }
  0xbc   : > { %2933 = vmatpush1.bf16.msra.mxu0 %v3784_v15  ;;  %v3826_v43 = vld [vmem:[%s4837_s5 + $0xa0] ss:$8 sps:$4 sm:$0xff]   ;;  %v3828_v45 = vld [vmem:[%s4837_s5 + $0xb4] ss:$8 sps:$4 sm:$0xff]   ;;  %v3832_v50 = vld [vmem:[%s4837_s5 + $0xb0] ss:$8 sps:$4 sm:$0xff]  }
  0xbd   : > { %2974 = vmatpush1.bf16.msra.mxu1 %v3785_v16  ;;  %2934 = vmatprep.subr.bf16.mxu0 %v3786_v17  ;;  %v3827_v44 = vld [vmem:[%s4837_s5 + $0x1a0] ss:$8 sps:$4 sm:$0xff]   ;;  %v3830_v46 = vld [vmem:[%s4837_s5 + $0x1b4] ss:$8 sps:$4 sm:$0xff]   ;;  %v3833_v51 = vld [vmem:[%s4837_s5 + $0x1b0] ss:$8 sps:$4 sm:$0xff]  }
  0xbe   : > { %2975 = vmatprep.subr.bf16.mxu1 %v3788_v18  ;;  %v1326_v47 = vld [vmem:[%s4823_s26] sm:$0xff]  ;;  %v1327_v49 = vld [vmem:[%s4823_s26 + $0x8] sm:$0xff]  ;;  %v3834_v53 = vld [vmem:[%s4837_s5 + $0xc4] ss:$8 sps:$4 sm:$0xff]   ;;  %p3699_p13 = scmp.ne.s32.totalorder %s4200_s14, 1 }
  0xbf   : > { %v3428_v48 = vcombine.high %v1326_v47, %v1326_v47  ;;  %v3430_v52 = vcombine.high %v1327_v49, %v1327_v49  ;;  %v3836_v54 = vld [vmem:[%s4837_s5 + $0x1c4] ss:$8 sps:$4 sm:$0xff]   ;;  %v3838_v55 = vld [vmem:[%s4837_s5 + $0xc0] ss:$8 sps:$4 sm:$0xff]   ;;  %v3840_v57 = vld [vmem:[%s4837_s5 + $0xd4] ss:$8 sps:$4 sm:$0xff]   ;;  %v3427_v7 = vcombine.low %v1326_v47, %v1326_v47  ;;  %v3429_v8 = vcombine.low %v1327_v49, %v1327_v49 }
  0xc0   : > { %2935 = vmatpush1.bf16.msra.mxu0 %v3790_v19  ;;  %v3839_v56 = vld [vmem:[%s4837_s5 + $0x1c0] ss:$8 sps:$4 sm:$0xff]   ;;  %v3842_v58 = vld [vmem:[%s4837_s5 + $0x1d4] ss:$8 sps:$4 sm:$0xff]   ;;  %v3844_v59 = vld [vmem:[%s4837_s5 + $0xd0] ss:$8 sps:$4 sm:$0xff]  }
  0xc1   : > { %2976 = vmatpush1.bf16.msra.mxu1 %v3791_v20  ;;  %2936 = vmatprep.subr.bf16.mxu0 %v3792_v21  ;;  %v3845_v60 = vld [vmem:[%s4837_s5 + $0x1d0] ss:$8 sps:$4 sm:$0xff]   ;;  %v3846_v61 = vld [vmem:[%s4837_s5 + $0xe4] ss:$8 sps:$4 sm:$0xff]   ;;  %v3850_v63 = vld [vmem:[%s4837_s5 + $0xe0] ss:$8 sps:$4 sm:$0xff]  }
  0xc2   : > { %2977 = vmatprep.subr.bf16.mxu1 %v3794_v22  ;;  %2958 = vmatprep.mubr.bf16.mxu0 %v3428_v48  ;;  %v3848_v62 = vld [vmem:[%s4837_s5 + $0x1e4] ss:$8 sps:$4 sm:$0xff]   ;;  %v3851_v0 = vld [vmem:[%s4837_s5 + $0x1e0] ss:$8 sps:$4 sm:$0xff]   ;;  %v3852_v1 = vld [vmem:[%s4837_s5 + $0xf4] ss:$8 sps:$4 sm:$0xff]  }
  0xc3   : > { %2999 = vmatprep.mubr.bf16.mxu1 %v3430_v52  ;;  %v3854_v2 = vld [vmem:[%s4837_s5 + $0x1f4] ss:$8 sps:$4 sm:$0xff]   ;;  %v3856_v3 = vld [vmem:[%s4837_s5 + $0xf0] ss:$8 sps:$4 sm:$0xff]   ;;  %v3864_v5 = vld [vmem:[%s4837_s5 + $0x204] ss:$8 sps:$4 sm:$0xff]  }
  0xc4   : > { %2937 = vmatpush1.bf16.msra.mxu0 %v3796_v23  ;;  %v3857_v4 = vld [vmem:[%s4837_s5 + $0x1f0] ss:$8 sps:$4 sm:$0xff]   ;;  %v3867_v6 = vld [vmem:[%s4837_s5 + $0x304] ss:$8 sps:$4 sm:$0xff]   ;;  %v3862_v9 = vld [vmem:[%s4837_s5 + $0x200] ss:$8 sps:$4 sm:$0xff]  }
  0xc5   : > { %2978 = vmatpush1.bf16.msra.mxu1 %v3797_v24  ;;  %2938 = vmatprep.subr.bf16.mxu0 %v3798_v25  ;;  %v3865_v10 = vld [vmem:[%s4837_s5 + $0x300] ss:$8 sps:$4 sm:$0xff]   ;;  %v3870_v11 = vld [vmem:[%s4837_s5 + $0x214] ss:$8 sps:$4 sm:$0xff]   ;;  %v3868_v13 = vld [vmem:[%s4837_s5 + $0x210] ss:$8 sps:$4 sm:$0xff]  }
  0xc6   : > { %2979 = vmatprep.subr.bf16.mxu1 %v3800_v26  ;;  %v3873_v12 = vld [vmem:[%s4837_s5 + $0x314] ss:$8 sps:$4 sm:$0xff]   ;;  %v3871_v14 = vld [vmem:[%s4837_s5 + $0x310] ss:$8 sps:$4 sm:$0xff]   ;;  %v3876_v15 = vld [vmem:[%s4837_s5 + $0x224] ss:$8 sps:$4 sm:$0xff]  }
  0xc7   : > { %v3879_v16 = vld [vmem:[%s4837_s5 + $0x324] ss:$8 sps:$4 sm:$0xff]   ;;  %v3874_v17 = vld [vmem:[%s4837_s5 + $0x220] ss:$8 sps:$4 sm:$0xff]   ;;  %v3882_v19 = vld [vmem:[%s4837_s5 + $0x234] ss:$8 sps:$4 sm:$0xff]  }
  0xc8   : > { %2939 = vmatpush1.bf16.msra.mxu0 %v3802_v27  ;;  %v3877_v18 = vld [vmem:[%s4837_s5 + $0x320] ss:$8 sps:$4 sm:$0xff]   ;;  %v3885_v20 = vld [vmem:[%s4837_s5 + $0x334] ss:$8 sps:$4 sm:$0xff]   ;;  %v3880_v21 = vld [vmem:[%s4837_s5 + $0x230] ss:$8 sps:$4 sm:$0xff]  }
  0xc9   : > { %2980 = vmatpush1.bf16.msra.mxu1 %v3803_v28  ;;  %2940 = vmatprep.subr.bf16.mxu0 %v3804_v29  ;;  %v3883_v22 = vld [vmem:[%s4837_s5 + $0x330] ss:$8 sps:$4 sm:$0xff]   ;;  %v3888_v23 = vld [vmem:[%s4837_s5 + $0x244] ss:$8 sps:$4 sm:$0xff]   ;;  %v3886_v25 = vld [vmem:[%s4837_s5 + $0x240] ss:$8 sps:$4 sm:$0xff]  }
  0xca   : > { %2981 = vmatprep.subr.bf16.mxu1 %v3806_v30  ;;  %v3891_v24 = vld [vmem:[%s4837_s5 + $0x344] ss:$8 sps:$4 sm:$0xff]   ;;  %v3889_v26 = vld [vmem:[%s4837_s5 + $0x340] ss:$8 sps:$4 sm:$0xff]   ;;  %v3894_v27 = vld [vmem:[%s4837_s5 + $0x254] ss:$8 sps:$4 sm:$0xff]  }
  0xcb   : > { %v3897_v28 = vld [vmem:[%s4837_s5 + $0x354] ss:$8 sps:$4 sm:$0xff]   ;;  %v3892_v29 = vld [vmem:[%s4837_s5 + $0x250] ss:$8 sps:$4 sm:$0xff]   ;;  %v3927_v52 = vld [vmem:[%s4837_s5 + $0x3a4] ss:$8 sps:$4 sm:$0xff]  }
  0xcc   : > { %2941 = vmatpush1.bf16.msra.mxu0 %v3808_v31  ;;  %v3895_v30 = vld [vmem:[%s4837_s5 + $0x350] ss:$8 sps:$4 sm:$0xff]   ;;  %v3900_v31 = vld [vmem:[%s4837_s5 + $0x264] ss:$8 sps:$4 sm:$0xff]   ;;  %v3918_v47 = vld [vmem:[%s4837_s5 + $0x294] ss:$8 sps:$4 sm:$0xff]  }
  0xcd   : > { %2982 = vmatpush1.bf16.msra.mxu1 %v3809_v32  ;;  %2942 = vmatprep.subr.bf16.mxu0 %v3810_v33  ;;  %v3903_v32 = vld [vmem:[%s4837_s5 + $0x364] ss:$8 sps:$4 sm:$0xff]   ;;  %v3921_v48 = vld [vmem:[%s4837_s5 + $0x394] ss:$8 sps:$4 sm:$0xff]   ;;  %v3916_v49 = vld [vmem:[%s4837_s5 + $0x290] ss:$8 sps:$4 sm:$0xff]  }
  0xce   : > { %2983 = vmatprep.subr.bf16.mxu1 %v3812_v34  ;;  %v4933_v33 = vld [vmem:[%s4823_s26 + $0x10] sm:$0xff]  ;;  %v4936_v34 = vld [vmem:[%s4823_s26 + $0x18] sm:$0xff] }
  0xd0   : > { %2943 = vmatpush1.bf16.msra.mxu0 %v3814_v35  ;;  %v3898_v35 = vld [vmem:[%s4837_s5 + $0x260] ss:$8 sps:$4 sm:$0xff]  }
  0xd1   : > { %2984 = vmatpush1.bf16.msra.mxu1 %v3815_v36  ;;  %2944 = vmatprep.subr.bf16.mxu0 %v3816_v37  ;;  %v3901_v36 = vld [vmem:[%s4837_s5 + $0x360] ss:$8 sps:$4 sm:$0xff]   ;;  %v3432_v37 = vcombine.high %v4933_v33, %v4933_v33 }
  0xd2   : > { %2985 = vmatprep.subr.bf16.mxu1 %v3818_v38  ;;  %v3434_v38 = vcombine.high %v4936_v34, %v4936_v34 }
  0xd4   : > { %2945 = vmatpush1.bf16.msra.mxu0 %v3820_v39  ;;  %v3906_v39 = vld [vmem:[%s4837_s5 + $0x274] ss:$8 sps:$4 sm:$0xff]  }
  0xd5   : > { %2986 = vmatpush1.bf16.msra.mxu1 %v3821_v40  ;;  %2946 = vmatprep.subr.bf16.mxu0 %v3822_v41  ;;  %v3909_v40 = vld [vmem:[%s4837_s5 + $0x374] ss:$8 sps:$4 sm:$0xff]   ;;  %v3904_v41 = vld [vmem:[%s4837_s5 + $0x270] ss:$8 sps:$4 sm:$0xff]  }
  0xd6   : > { %2987 = vmatprep.subr.bf16.mxu1 %v3824_v42  ;;  %v3907_v42 = vld [vmem:[%s4837_s5 + $0x370] ss:$8 sps:$4 sm:$0xff]  }
  0xd8   : > { %2947 = vmatpush1.bf16.msra.mxu0 %v3826_v43  ;;  %v3912_v43 = vld [vmem:[%s4837_s5 + $0x284] ss:$8 sps:$4 sm:$0xff]  }
  0xd9   : > { %2988 = vmatpush1.bf16.msra.mxu1 %v3827_v44  ;;  %2948 = vmatprep.subr.bf16.mxu0 %v3828_v45  ;;  %v3915_v44 = vld [vmem:[%s4837_s5 + $0x384] ss:$8 sps:$4 sm:$0xff]   ;;  %v3910_v45 = vld [vmem:[%s4837_s5 + $0x280] ss:$8 sps:$4 sm:$0xff]  }
  0xda   : > { %2989 = vmatprep.subr.bf16.mxu1 %v3830_v46  ;;  %v3913_v46 = vld [vmem:[%s4837_s5 + $0x380] ss:$8 sps:$4 sm:$0xff]  }
  0xdc   : > { %2949 = vmatpush1.bf16.msra.mxu0 %v3832_v50  ;;  %v3919_v50 = vld [vmem:[%s4837_s5 + $0x390] ss:$8 sps:$4 sm:$0xff]  }
  0xdd   : > { %2990 = vmatpush1.bf16.msra.mxu1 %v3833_v51  ;;  %2950 = vmatprep.subr.bf16.mxu0 %v3834_v53  ;;  %v3924_v51 = vld [vmem:[%s4837_s5 + $0x2a4] ss:$8 sps:$4 sm:$0xff]   ;;  %v3922_v53 = vld [vmem:[%s4837_s5 + $0x2a0] ss:$8 sps:$4 sm:$0xff]  }
  0xde   : > { %2991 = vmatprep.subr.bf16.mxu1 %v3836_v54  ;;  %v3925_v54 = vld [vmem:[%s4837_s5 + $0x3a0] ss:$8 sps:$4 sm:$0xff]  }
  0xe0   : > { %2951 = vmatpush1.bf16.msra.mxu0 %v3838_v55  ;;  %v3930_v55 = vld [vmem:[%s4837_s5 + $0x2b4] ss:$8 sps:$4 sm:$0xff]  }
  0xe1   : > { %2992 = vmatpush1.bf16.msra.mxu1 %v3839_v56  ;;  %2952 = vmatprep.subr.bf16.mxu0 %v3840_v57  ;;  %v3933_v56 = vld [vmem:[%s4837_s5 + $0x3b4] ss:$8 sps:$4 sm:$0xff]   ;;  %v3928_v57 = vld [vmem:[%s4837_s5 + $0x2b0] ss:$8 sps:$4 sm:$0xff]  }
  0xe2   : > { %2993 = vmatprep.subr.bf16.mxu1 %v3842_v58  ;;  %v3931_v58 = vld [vmem:[%s4837_s5 + $0x3b0] ss:$8 sps:$4 sm:$0xff]  }
  0xe4   : > { %2953 = vmatpush1.bf16.msra.mxu0 %v3844_v59  ;;  %v3936_v59 = vld [vmem:[%s4837_s5 + $0x2c4] ss:$8 sps:$4 sm:$0xff]  }
  0xe5   : > { %2994 = vmatpush1.bf16.msra.mxu1 %v3845_v60  ;;  %2954 = vmatprep.subr.bf16.mxu0 %v3846_v61  ;;  %v3939_v60 = vld [vmem:[%s4837_s5 + $0x3c4] ss:$8 sps:$4 sm:$0xff]   ;;  %v3934_v61 = vld [vmem:[%s4837_s5 + $0x2c0] ss:$8 sps:$4 sm:$0xff]  }
  0xe6   : > { %2995 = vmatprep.subr.bf16.mxu1 %v3848_v62  ;;  %v3937_v62 = vld [vmem:[%s4837_s5 + $0x3c0] ss:$8 sps:$4 sm:$0xff]  }
  0xe8   : > { %2955 = vmatpush1.bf16.msra.mxu0 %v3850_v63  ;;  %v3942_v63 = vld [vmem:[%s4837_s5 + $0x2d4] ss:$8 sps:$4 sm:$0xff]  }
  0xe9   : > { %2996 = vmatpush1.bf16.msra.mxu1 %v3851_v0  ;;  %2956 = vmatprep.subr.bf16.mxu0 %v3852_v1  ;;  %v3945_v0 = vld [vmem:[%s4837_s5 + $0x3d4] ss:$8 sps:$4 sm:$0xff]   ;;  %v3940_v1 = vld [vmem:[%s4837_s5 + $0x2d0] ss:$8 sps:$4 sm:$0xff]  }
  0xea   : > { %2997 = vmatprep.subr.bf16.mxu1 %v3854_v2  ;;  %v3943_v2 = vld [vmem:[%s4837_s5 + $0x3d0] ss:$8 sps:$4 sm:$0xff]  }
  0xec   : > { %2957 = vmatpush1.bf16.msra.mxu0 %v3856_v3  ;;  %v3948_v3 = vld [vmem:[%s4837_s5 + $0x2e4] ss:$8 sps:$4 sm:$0xff]  }
  0xed   : > { %2998 = vmatpush1.bf16.msra.mxu1 %v3857_v4  ;;  %3008 = vmatprep.subr.bf16.mxu0 %v3864_v5  ;;  %v3951_v4 = vld [vmem:[%s4837_s5 + $0x3e4] ss:$8 sps:$4 sm:$0xff]   ;;  %v3946_v5 = vld [vmem:[%s4837_s5 + $0x2e0] ss:$8 sps:$4 sm:$0xff]  }
  0xee   : > { %3049 = vmatprep.subr.bf16.mxu1 %v3867_v6  ;;  %v3949_v6 = vld [vmem:[%s4837_s5 + $0x3e0] ss:$8 sps:$4 sm:$0xff]  }
  0xef   : > { %2959 = vmatmul.mubr.bf16.vlgmr.msra.gmra.mrb[0].mxu0 %v3427_v7  ;;  %v3954_v7 = vld [vmem:[%s4837_s5 + $0x2f4] ss:$8 sps:$4 sm:$0xff]  }
  0xf0   : > { %3000 = vmatmul.mubr.bf16.vlgmr.msra.gmra.mrb[0].mxu1 %v3429_v8  ;;  %3009 = vmatpush1.bf16.msra.mxu0 %v3862_v9  ;;  %v3957_v8 = vld [vmem:[%s4837_s5 + $0x3f4] ss:$8 sps:$4 sm:$0xff]   ;;  %v3952_v9 = vld [vmem:[%s4837_s5 + $0x2f0] ss:$8 sps:$4 sm:$0xff]  }
  0xf1   : > { %3050 = vmatpush1.bf16.msra.mxu1 %v3865_v10  ;;  %3010 = vmatprep.subr.bf16.mxu0 %v3870_v11  ;;  %v3955_v10 = vld [vmem:[%s4837_s5 + $0x3f0] ss:$8 sps:$4 sm:$0xff]   ;;  %v3964_v11 = vld [vmem:[%s4837_s5 + $0x404] ss:$8 sps:$4 sm:$0xff]  }
  0xf2   : > { %3051 = vmatprep.subr.bf16.mxu1 %v3873_v12  ;;  %3040 = vmatprep.mubr.bf16.mxu0 %v3432_v37  ;;  %v3967_v12 = vld [vmem:[%s4837_s5 + $0x504] ss:$8 sps:$4 sm:$0xff]   ;;  %v3994_v37 = vld [vmem:[%s4837_s5 + $0x454] ss:$8 sps:$4 sm:$0xff]  }
  0xf3   : > { %3081 = vmatprep.mubr.bf16.mxu1 %v3434_v38  ;;  %v3997_v38 = vld [vmem:[%s4837_s5 + $0x554] ss:$8 sps:$4 sm:$0xff]  }
  0xf4   : > { %3011 = vmatpush1.bf16.msra.mxu0 %v3868_v13  ;;  %v3431_v13 = vcombine.low %v4933_v33, %v4933_v33  ;;  %v3988_v33 = vld [vmem:[%s4837_s5 + $0x444] ss:$8 sps:$4 sm:$0xff]  }
  0xf5   : > { %3052 = vmatpush1.bf16.msra.mxu1 %v3871_v14  ;;  %3012 = vmatprep.subr.bf16.mxu0 %v3876_v15  ;;  %v3433_v14 = vcombine.low %v4936_v34, %v4936_v34  ;;  %v3962_v15 = vld [vmem:[%s4837_s5 + $0x400] ss:$8 sps:$4 sm:$0xff]   ;;  %v3991_v34 = vld [vmem:[%s4837_s5 + $0x544] ss:$8 sps:$4 sm:$0xff]  }
  0xf6   : > { %3053 = vmatprep.subr.bf16.mxu1 %v3879_v16  ;;  %v3965_v16 = vld [vmem:[%s4837_s5 + $0x500] ss:$8 sps:$4 sm:$0xff]  }
  0xf8   : > { %3013 = vmatpush1.bf16.msra.mxu0 %v3874_v17  ;;  %v3970_v17 = vld [vmem:[%s4837_s5 + $0x414] ss:$8 sps:$4 sm:$0xff]  }
  0xf9   : > { %3054 = vmatpush1.bf16.msra.mxu1 %v3877_v18  ;;  %3014 = vmatprep.subr.bf16.mxu0 %v3882_v19  ;;  %v3973_v18 = vld [vmem:[%s4837_s5 + $0x514] ss:$8 sps:$4 sm:$0xff]  }
  0xfa   : > { %3055 = vmatprep.subr.bf16.mxu1 %v3885_v20  ;;  %v4991_v19 = vld [vmem:[%s4823_s26 + $0x20] sm:$0xff]  ;;  %v4994_v20 = vld [vmem:[%s4823_s26 + $0x28] sm:$0xff] }
  0xfc   : > { %3015 = vmatpush1.bf16.msra.mxu0 %v3880_v21  ;;  %v3436_v21 = vcombine.high %v4991_v19, %v4991_v19 }
  0xfd   : > { %3056 = vmatpush1.bf16.msra.mxu1 %v3883_v22  ;;  %3016 = vmatprep.subr.bf16.mxu0 %v3888_v23  ;;  %v3438_v22 = vcombine.high %v4994_v20, %v4994_v20  ;;  %v3968_v23 = vld [vmem:[%s4837_s5 + $0x410] ss:$8 sps:$4 sm:$0xff]  }
  0xfe   : > { %3057 = vmatprep.subr.bf16.mxu1 %v3891_v24  ;;  %v3971_v24 = vld [vmem:[%s4837_s5 + $0x510] ss:$8 sps:$4 sm:$0xff]  }
 0x100   : > { %3017 = vmatpush1.bf16.msra.mxu0 %v3886_v25  ;;  %v3976_v25 = vld [vmem:[%s4837_s5 + $0x424] ss:$8 sps:$4 sm:$0xff]  }
 0x101   : > { %3058 = vmatpush1.bf16.msra.mxu1 %v3889_v26  ;;  %3018 = vmatprep.subr.bf16.mxu0 %v3894_v27  ;;  %v3979_v26 = vld [vmem:[%s4837_s5 + $0x524] ss:$8 sps:$4 sm:$0xff]   ;;  %v3974_v27 = vld [vmem:[%s4837_s5 + $0x420] ss:$8 sps:$4 sm:$0xff]  }
 0x102   : > { %3059 = vmatprep.subr.bf16.mxu1 %v3897_v28  ;;  %v3977_v28 = vld [vmem:[%s4837_s5 + $0x520] ss:$8 sps:$4 sm:$0xff]  }
 0x104   : > { %3019 = vmatpush1.bf16.msra.mxu0 %v3892_v29  ;;  %v3982_v29 = vld [vmem:[%s4837_s5 + $0x434] ss:$8 sps:$4 sm:$0xff]  }
 0x105   : > { %3060 = vmatpush1.bf16.msra.mxu1 %v3895_v30  ;;  %3020 = vmatprep.subr.bf16.mxu0 %v3900_v31  ;;  %v3985_v30 = vld [vmem:[%s4837_s5 + $0x534] ss:$8 sps:$4 sm:$0xff]   ;;  %v3980_v31 = vld [vmem:[%s4837_s5 + $0x430] ss:$8 sps:$4 sm:$0xff]  }
 0x106   : > { %3061 = vmatprep.subr.bf16.mxu1 %v3903_v32  ;;  %v3983_v32 = vld [vmem:[%s4837_s5 + $0x530] ss:$8 sps:$4 sm:$0xff]  }
 0x108   : > { %3021 = vmatpush1.bf16.msra.mxu0 %v3898_v35  ;;  %v3986_v35 = vld [vmem:[%s4837_s5 + $0x440] ss:$8 sps:$4 sm:$0xff]  }
 0x109   : > { %3062 = vmatpush1.bf16.msra.mxu1 %v3901_v36  ;;  %3022 = vmatprep.subr.bf16.mxu0 %v3906_v39  ;;  %v3989_v36 = vld [vmem:[%s4837_s5 + $0x540] ss:$8 sps:$4 sm:$0xff]   ;;  %v3992_v39 = vld [vmem:[%s4837_s5 + $0x450] ss:$8 sps:$4 sm:$0xff]  }
 0x10a   : > { %3063 = vmatprep.subr.bf16.mxu1 %v3909_v40  ;;  %v3995_v40 = vld [vmem:[%s4837_s5 + $0x550] ss:$8 sps:$4 sm:$0xff]  }
 0x10c   : > { %3023 = vmatpush1.bf16.msra.mxu0 %v3904_v41  ;;  %v4000_v41 = vld [vmem:[%s4837_s5 + $0x464] ss:$8 sps:$4 sm:$0xff]  }
 0x10d   : > { %3064 = vmatpush1.bf16.msra.mxu1 %v3907_v42  ;;  %3024 = vmatprep.subr.bf16.mxu0 %v3912_v43  ;;  %v4003_v42 = vld [vmem:[%s4837_s5 + $0x564] ss:$8 sps:$4 sm:$0xff]   ;;  %v3998_v43 = vld [vmem:[%s4837_s5 + $0x460] ss:$8 sps:$4 sm:$0xff]  }
 0x10e   : > { %3065 = vmatprep.subr.bf16.mxu1 %v3915_v44  ;;  %v4001_v44 = vld [vmem:[%s4837_s5 + $0x560] ss:$8 sps:$4 sm:$0xff]  }
 0x110   : > { %3025 = vmatpush1.bf16.msra.mxu0 %v3910_v45  ;;  %v4006_v45 = vld [vmem:[%s4837_s5 + $0x474] ss:$8 sps:$4 sm:$0xff]  }
 0x111   : > { %3066 = vmatpush1.bf16.msra.mxu1 %v3913_v46  ;;  %3026 = vmatprep.subr.bf16.mxu0 %v3918_v47  ;;  %v4009_v46 = vld [vmem:[%s4837_s5 + $0x574] ss:$8 sps:$4 sm:$0xff]   ;;  %v4004_v47 = vld [vmem:[%s4837_s5 + $0x470] ss:$8 sps:$4 sm:$0xff]  }
 0x112   : > { %3067 = vmatprep.subr.bf16.mxu1 %v3921_v48  ;;  %v4007_v48 = vld [vmem:[%s4837_s5 + $0x570] ss:$8 sps:$4 sm:$0xff]  }
 0x114   : > { %3027 = vmatpush1.bf16.msra.mxu0 %v3916_v49  ;;  %v4012_v49 = vld [vmem:[%s4837_s5 + $0x484] ss:$8 sps:$4 sm:$0xff]  }
 0x115   : > { %3068 = vmatpush1.bf16.msra.mxu1 %v3919_v50  ;;  %3028 = vmatprep.subr.bf16.mxu0 %v3924_v51  ;;  %v4015_v50 = vld [vmem:[%s4837_s5 + $0x584] ss:$8 sps:$4 sm:$0xff]   ;;  %v4010_v51 = vld [vmem:[%s4837_s5 + $0x480] ss:$8 sps:$4 sm:$0xff]  }
 0x116   : > { %3069 = vmatprep.subr.bf16.mxu1 %v3927_v52  ;;  %v4013_v52 = vld [vmem:[%s4837_s5 + $0x580] ss:$8 sps:$4 sm:$0xff]  }
 0x118   : > { %3029 = vmatpush1.bf16.msra.mxu0 %v3922_v53  ;;  %v4018_v53 = vld [vmem:[%s4837_s5 + $0x494] ss:$8 sps:$4 sm:$0xff]  }
 0x119   : > { %3070 = vmatpush1.bf16.msra.mxu1 %v3925_v54  ;;  %3030 = vmatprep.subr.bf16.mxu0 %v3930_v55  ;;  %v4021_v54 = vld [vmem:[%s4837_s5 + $0x594] ss:$8 sps:$4 sm:$0xff]   ;;  %v4016_v55 = vld [vmem:[%s4837_s5 + $0x490] ss:$8 sps:$4 sm:$0xff]  }
 0x11a   : > { %3071 = vmatprep.subr.bf16.mxu1 %v3933_v56  ;;  %v4019_v56 = vld [vmem:[%s4837_s5 + $0x590] ss:$8 sps:$4 sm:$0xff]  }
 0x11c   : > { %3031 = vmatpush1.bf16.msra.mxu0 %v3928_v57  ;;  %v4024_v57 = vld [vmem:[%s4837_s5 + $0x4a4] ss:$8 sps:$4 sm:$0xff]  }
 0x11d   : > { %3072 = vmatpush1.bf16.msra.mxu1 %v3931_v58  ;;  %3032 = vmatprep.subr.bf16.mxu0 %v3936_v59  ;;  %v4027_v58 = vld [vmem:[%s4837_s5 + $0x5a4] ss:$8 sps:$4 sm:$0xff]   ;;  %v4022_v59 = vld [vmem:[%s4837_s5 + $0x4a0] ss:$8 sps:$4 sm:$0xff]  }
 0x11e   : > { %3073 = vmatprep.subr.bf16.mxu1 %v3939_v60  ;;  %v4025_v60 = vld [vmem:[%s4837_s5 + $0x5a0] ss:$8 sps:$4 sm:$0xff]  }
 0x120   : > { %3033 = vmatpush1.bf16.msra.mxu0 %v3934_v61  ;;  %v4030_v61 = vld [vmem:[%s4837_s5 + $0x4b4] ss:$8 sps:$4 sm:$0xff]  }
 0x121   : > { %3074 = vmatpush1.bf16.msra.mxu1 %v3937_v62  ;;  %3034 = vmatprep.subr.bf16.mxu0 %v3942_v63  ;;  %v4033_v62 = vld [vmem:[%s4837_s5 + $0x5b4] ss:$8 sps:$4 sm:$0xff]   ;;  %v4028_v63 = vld [vmem:[%s4837_s5 + $0x4b0] ss:$8 sps:$4 sm:$0xff]  }
 0x122   : > { %3075 = vmatprep.subr.bf16.mxu1 %v3945_v0  ;;  %v4031_v0 = vld [vmem:[%s4837_s5 + $0x5b0] ss:$8 sps:$4 sm:$0xff]  }
 0x124   : > { %3035 = vmatpush1.bf16.msra.mxu0 %v3940_v1  ;;  %v4036_v1 = vld [vmem:[%s4837_s5 + $0x4c4] ss:$8 sps:$4 sm:$0xff]  }
 0x125   : > { %3076 = vmatpush1.bf16.msra.mxu1 %v3943_v2  ;;  %3036 = vmatprep.subr.bf16.mxu0 %v3948_v3  ;;  %v4039_v2 = vld [vmem:[%s4837_s5 + $0x5c4] ss:$8 sps:$4 sm:$0xff]   ;;  %v4034_v3 = vld [vmem:[%s4837_s5 + $0x4c0] ss:$8 sps:$4 sm:$0xff]  }
 0x126   : > { %3077 = vmatprep.subr.bf16.mxu1 %v3951_v4  ;;  %v4037_v4 = vld [vmem:[%s4837_s5 + $0x5c0] ss:$8 sps:$4 sm:$0xff]  }
 0x128   : > { %3037 = vmatpush1.bf16.msra.mxu0 %v3946_v5  ;;  %v4042_v5 = vld [vmem:[%s4837_s5 + $0x4d4] ss:$8 sps:$4 sm:$0xff]  }
 0x129   : > { %3078 = vmatpush1.bf16.msra.mxu1 %v3949_v6  ;;  %3038 = vmatprep.subr.bf16.mxu0 %v3954_v7  ;;  %v4045_v6 = vld [vmem:[%s4837_s5 + $0x5d4] ss:$8 sps:$4 sm:$0xff]   ;;  %v4040_v7 = vld [vmem:[%s4837_s5 + $0x4d0] ss:$8 sps:$4 sm:$0xff]  }
 0x12a   : > { %3079 = vmatprep.subr.bf16.mxu1 %v3957_v8  ;;  %v4043_v8 = vld [vmem:[%s4837_s5 + $0x5d0] ss:$8 sps:$4 sm:$0xff]  }
 0x12c   : > { %3039 = vmatpush1.bf16.msra.mxu0 %v3952_v9  ;;  %v4048_v9 = vld [vmem:[%s4837_s5 + $0x4e4] ss:$8 sps:$4 sm:$0xff]  }
 0x12d   : > { %3080 = vmatpush1.bf16.msra.mxu1 %v3955_v10  ;;  %3090 = vmatprep.subr.bf16.mxu0 %v3964_v11  ;;  %v4051_v10 = vld [vmem:[%s4837_s5 + $0x5e4] ss:$8 sps:$4 sm:$0xff]   ;;  %v4046_v11 = vld [vmem:[%s4837_s5 + $0x4e0] ss:$8 sps:$4 sm:$0xff]  }
 0x12e   : > { %3131 = vmatprep.subr.bf16.mxu1 %v3967_v12  ;;  %v4049_v12 = vld [vmem:[%s4837_s5 + $0x5e0] ss:$8 sps:$4 sm:$0xff]  }
 0x12f   : > { %3041 = vmatmul.mubr.bf16.vlgmr.msra.gmra.mrb[4].mxu0 %v3431_v13  ;;  %v4054_v13 = vld [vmem:[%s4837_s5 + $0x4f4] ss:$8 sps:$4 sm:$0xff]  }
 0x130   : > { %3082 = vmatmul.mubr.bf16.vlgmr.msra.gmra.mrb[4].mxu1 %v3433_v14  ;;  %3091 = vmatpush1.bf16.msra.mxu0 %v3962_v15  ;;  %v4057_v14 = vld [vmem:[%s4837_s5 + $0x5f4] ss:$8 sps:$4 sm:$0xff]   ;;  %v4052_v15 = vld [vmem:[%s4837_s5 + $0x4f0] ss:$8 sps:$4 sm:$0xff]  }
 0x131   : > { %3132 = vmatpush1.bf16.msra.mxu1 %v3965_v16  ;;  %3092 = vmatprep.subr.bf16.mxu0 %v3970_v17  ;;  %v4055_v16 = vld [vmem:[%s4837_s5 + $0x5f0] ss:$8 sps:$4 sm:$0xff]   ;;  %v4064_v17 = vld [vmem:[%s4837_s5 + $0x604] ss:$8 sps:$4 sm:$0xff]  }
 0x132   : > { %3133 = vmatprep.subr.bf16.mxu1 %v3973_v18  ;;  %3122 = vmatprep.mubr.bf16.mxu0 %v3436_v21  ;;  %v4067_v18 = vld [vmem:[%s4837_s5 + $0x704] ss:$8 sps:$4 sm:$0xff]   ;;  %v3435_v21 = vcombine.low %v4991_v19, %v4991_v19 }
 0x133   : > { %3163 = vmatprep.mubr.bf16.mxu1 %v3438_v22  ;;  %v3437_v22 = vcombine.low %v4994_v20, %v4994_v20 }
 0x134   : > { %3093 = vmatpush1.bf16.msra.mxu0 %v3968_v23  ;;  %v5065_v23 = vld [vmem:[%s4823_s26 + $0x30] sm:$0xff] }
 0x135   : > { %3134 = vmatpush1.bf16.msra.mxu1 %v3971_v24  ;;  %3094 = vmatprep.subr.bf16.mxu0 %v3976_v25  ;;  %v5068_v24 = vld [vmem:[%s4823_s26 + $0x38] sm:$0xff]  ;;  %v3440_v19 = vcombine.high %v5065_v23, %v5065_v23 }
 0x136   : > { %3135 = vmatprep.subr.bf16.mxu1 %v3979_v26  ;;  %v4062_v25 = vld [vmem:[%s4837_s5 + $0x600] ss:$8 sps:$4 sm:$0xff]   ;;  %v3442_v20 = vcombine.high %v5068_v24, %v5068_v24 }
 0x137   : > { %v4065_v26 = vld [vmem:[%s4837_s5 + $0x700] ss:$8 sps:$4 sm:$0xff]  }
 0x138   : > { %3095 = vmatpush1.bf16.msra.mxu0 %v3974_v27  ;;  %v4070_v27 = vld [vmem:[%s4837_s5 + $0x614] ss:$8 sps:$4 sm:$0xff]  }
 0x139   : > { %3136 = vmatpush1.bf16.msra.mxu1 %v3977_v28  ;;  %3096 = vmatprep.subr.bf16.mxu0 %v3982_v29  ;;  %v4073_v28 = vld [vmem:[%s4837_s5 + $0x714] ss:$8 sps:$4 sm:$0xff]   ;;  %v4068_v29 = vld [vmem:[%s4837_s5 + $0x610] ss:$8 sps:$4 sm:$0xff]  }
 0x13a   : > { %3137 = vmatprep.subr.bf16.mxu1 %v3985_v30  ;;  %v4071_v30 = vld [vmem:[%s4837_s5 + $0x710] ss:$8 sps:$4 sm:$0xff]  }
 0x13c   : > { %3097 = vmatpush1.bf16.msra.mxu0 %v3980_v31  ;;  %v4076_v31 = vld [vmem:[%s4837_s5 + $0x624] ss:$8 sps:$4 sm:$0xff]  }
 0x13d   : > { %3138 = vmatpush1.bf16.msra.mxu1 %v3983_v32  ;;  %3098 = vmatprep.subr.bf16.mxu0 %v3988_v33  ;;  %v4079_v32 = vld [vmem:[%s4837_s5 + $0x724] ss:$8 sps:$4 sm:$0xff]   ;;  %v4074_v33 = vld [vmem:[%s4837_s5 + $0x620] ss:$8 sps:$4 sm:$0xff]  }
 0x13e   : > { %3139 = vmatprep.subr.bf16.mxu1 %v3991_v34  ;;  %v4077_v34 = vld [vmem:[%s4837_s5 + $0x720] ss:$8 sps:$4 sm:$0xff]  }
 0x140   : > { %3099 = vmatpush1.bf16.msra.mxu0 %v3986_v35  ;;  %v4082_v35 = vld [vmem:[%s4837_s5 + $0x634] ss:$8 sps:$4 sm:$0xff]  }
 0x141   : > { %3140 = vmatpush1.bf16.msra.mxu1 %v3989_v36  ;;  %3100 = vmatprep.subr.bf16.mxu0 %v3994_v37  ;;  %v4085_v36 = vld [vmem:[%s4837_s5 + $0x734] ss:$8 sps:$4 sm:$0xff]   ;;  %v4080_v37 = vld [vmem:[%s4837_s5 + $0x630] ss:$8 sps:$4 sm:$0xff]  }
 0x142   : > { %3141 = vmatprep.subr.bf16.mxu1 %v3997_v38  ;;  %v4083_v38 = vld [vmem:[%s4837_s5 + $0x730] ss:$8 sps:$4 sm:$0xff]  }
 0x144   : > { %3101 = vmatpush1.bf16.msra.mxu0 %v3992_v39  ;;  %v4088_v39 = vld [vmem:[%s4837_s5 + $0x644] ss:$8 sps:$4 sm:$0xff]  }
 0x145   : > { %3142 = vmatpush1.bf16.msra.mxu1 %v3995_v40  ;;  %3102 = vmatprep.subr.bf16.mxu0 %v4000_v41  ;;  %v4091_v40 = vld [vmem:[%s4837_s5 + $0x744] ss:$8 sps:$4 sm:$0xff]   ;;  %v4086_v41 = vld [vmem:[%s4837_s5 + $0x640] ss:$8 sps:$4 sm:$0xff]  }
 0x146   : > { %3143 = vmatprep.subr.bf16.mxu1 %v4003_v42  ;;  %v4089_v42 = vld [vmem:[%s4837_s5 + $0x740] ss:$8 sps:$4 sm:$0xff]  }
 0x148   : > { %3103 = vmatpush1.bf16.msra.mxu0 %v3998_v43  ;;  %v4094_v43 = vld [vmem:[%s4837_s5 + $0x654] ss:$8 sps:$4 sm:$0xff]  }
 0x149   : > { %3144 = vmatpush1.bf16.msra.mxu1 %v4001_v44  ;;  %3104 = vmatprep.subr.bf16.mxu0 %v4006_v45  ;;  %v4097_v44 = vld [vmem:[%s4837_s5 + $0x754] ss:$8 sps:$4 sm:$0xff]   ;;  %v4092_v45 = vld [vmem:[%s4837_s5 + $0x650] ss:$8 sps:$4 sm:$0xff]  }
 0x14a   : > { %3145 = vmatprep.subr.bf16.mxu1 %v4009_v46  ;;  %v4095_v46 = vld [vmem:[%s4837_s5 + $0x750] ss:$8 sps:$4 sm:$0xff]  }
 0x14c   : > { %3105 = vmatpush1.bf16.msra.mxu0 %v4004_v47  ;;  %v4100_v47 = vld [vmem:[%s4837_s5 + $0x664] ss:$8 sps:$4 sm:$0xff]  }
 0x14d   : > { %3146 = vmatpush1.bf16.msra.mxu1 %v4007_v48  ;;  %3106 = vmatprep.subr.bf16.mxu0 %v4012_v49  ;;  %v4103_v48 = vld [vmem:[%s4837_s5 + $0x764] ss:$8 sps:$4 sm:$0xff]   ;;  %v4098_v49 = vld [vmem:[%s4837_s5 + $0x660] ss:$8 sps:$4 sm:$0xff]  }
 0x14e   : > { %3147 = vmatprep.subr.bf16.mxu1 %v4015_v50  ;;  %v4101_v50 = vld [vmem:[%s4837_s5 + $0x760] ss:$8 sps:$4 sm:$0xff]  }
 0x150   : > { %3107 = vmatpush1.bf16.msra.mxu0 %v4010_v51  ;;  %v4106_v51 = vld [vmem:[%s4837_s5 + $0x674] ss:$8 sps:$4 sm:$0xff]  }
 0x151   : > { %3148 = vmatpush1.bf16.msra.mxu1 %v4013_v52  ;;  %3108 = vmatprep.subr.bf16.mxu0 %v4018_v53  ;;  %v4109_v52 = vld [vmem:[%s4837_s5 + $0x774] ss:$8 sps:$4 sm:$0xff]   ;;  %v4104_v53 = vld [vmem:[%s4837_s5 + $0x670] ss:$8 sps:$4 sm:$0xff]  }
 0x152   : > { %3149 = vmatprep.subr.bf16.mxu1 %v4021_v54  ;;  %v4107_v54 = vld [vmem:[%s4837_s5 + $0x770] ss:$8 sps:$4 sm:$0xff]  }
 0x154   : > { %3109 = vmatpush1.bf16.msra.mxu0 %v4016_v55  ;;  %v4112_v55 = vld [vmem:[%s4837_s5 + $0x684] ss:$8 sps:$4 sm:$0xff]  }
 0x155   : > { %3150 = vmatpush1.bf16.msra.mxu1 %v4019_v56  ;;  %3110 = vmatprep.subr.bf16.mxu0 %v4024_v57  ;;  %v4115_v56 = vld [vmem:[%s4837_s5 + $0x784] ss:$8 sps:$4 sm:$0xff]   ;;  %v4110_v57 = vld [vmem:[%s4837_s5 + $0x680] ss:$8 sps:$4 sm:$0xff]  }
 0x156   : > { %3151 = vmatprep.subr.bf16.mxu1 %v4027_v58  ;;  %v4113_v58 = vld [vmem:[%s4837_s5 + $0x780] ss:$8 sps:$4 sm:$0xff]  }
 0x158   : > { %3111 = vmatpush1.bf16.msra.mxu0 %v4022_v59  ;;  %v4118_v59 = vld [vmem:[%s4837_s5 + $0x694] ss:$8 sps:$4 sm:$0xff]  }
 0x159   : > { %3152 = vmatpush1.bf16.msra.mxu1 %v4025_v60  ;;  %3112 = vmatprep.subr.bf16.mxu0 %v4030_v61  ;;  %v4121_v60 = vld [vmem:[%s4837_s5 + $0x794] ss:$8 sps:$4 sm:$0xff]   ;;  %v4116_v61 = vld [vmem:[%s4837_s5 + $0x690] ss:$8 sps:$4 sm:$0xff]  }
 0x15a   : > { %3153 = vmatprep.subr.bf16.mxu1 %v4033_v62  ;;  %v4119_v62 = vld [vmem:[%s4837_s5 + $0x790] ss:$8 sps:$4 sm:$0xff]  }
 0x15c   : > { %3113 = vmatpush1.bf16.msra.mxu0 %v4028_v63  ;;  %v4124_v63 = vld [vmem:[%s4837_s5 + $0x6a4] ss:$8 sps:$4 sm:$0xff]  }
 0x15d   : > { %3154 = vmatpush1.bf16.msra.mxu1 %v4031_v0  ;;  %3114 = vmatprep.subr.bf16.mxu0 %v4036_v1  ;;  %v4127_v0 = vld [vmem:[%s4837_s5 + $0x7a4] ss:$8 sps:$4 sm:$0xff]   ;;  %v4122_v1 = vld [vmem:[%s4837_s5 + $0x6a0] ss:$8 sps:$4 sm:$0xff]  }
 0x15e   : > { %3155 = vmatprep.subr.bf16.mxu1 %v4039_v2  ;;  %v4125_v2 = vld [vmem:[%s4837_s5 + $0x7a0] ss:$8 sps:$4 sm:$0xff]  }
 0x160   : > { %3115 = vmatpush1.bf16.msra.mxu0 %v4034_v3  ;;  %v4130_v3 = vld [vmem:[%s4837_s5 + $0x6b4] ss:$8 sps:$4 sm:$0xff]  }
 0x161   : > { %3156 = vmatpush1.bf16.msra.mxu1 %v4037_v4  ;;  %3116 = vmatprep.subr.bf16.mxu0 %v4042_v5  ;;  %v4133_v4 = vld [vmem:[%s4837_s5 + $0x7b4] ss:$8 sps:$4 sm:$0xff]   ;;  %v4128_v5 = vld [vmem:[%s4837_s5 + $0x6b0] ss:$8 sps:$4 sm:$0xff]  }
 0x162   : > { %3157 = vmatprep.subr.bf16.mxu1 %v4045_v6  ;;  %v4131_v6 = vld [vmem:[%s4837_s5 + $0x7b0] ss:$8 sps:$4 sm:$0xff]  }
 0x164   : > { %3117 = vmatpush1.bf16.msra.mxu0 %v4040_v7  ;;  %v4136_v7 = vld [vmem:[%s4837_s5 + $0x6c4] ss:$8 sps:$4 sm:$0xff]  }
 0x165   : > { %3158 = vmatpush1.bf16.msra.mxu1 %v4043_v8  ;;  %3118 = vmatprep.subr.bf16.mxu0 %v4048_v9  ;;  %v4139_v8 = vld [vmem:[%s4837_s5 + $0x7c4] ss:$8 sps:$4 sm:$0xff]   ;;  %v4134_v9 = vld [vmem:[%s4837_s5 + $0x6c0] ss:$8 sps:$4 sm:$0xff]  }
 0x166   : > { %3159 = vmatprep.subr.bf16.mxu1 %v4051_v10  ;;  %v4137_v10 = vld [vmem:[%s4837_s5 + $0x7c0] ss:$8 sps:$4 sm:$0xff]  }
 0x168   : > { %3119 = vmatpush1.bf16.msra.mxu0 %v4046_v11  ;;  %v4142_v11 = vld [vmem:[%s4837_s5 + $0x6d4] ss:$8 sps:$4 sm:$0xff]  }
 0x169   : > { %3160 = vmatpush1.bf16.msra.mxu1 %v4049_v12  ;;  %3120 = vmatprep.subr.bf16.mxu0 %v4054_v13  ;;  %v4145_v12 = vld [vmem:[%s4837_s5 + $0x7d4] ss:$8 sps:$4 sm:$0xff]   ;;  %v4140_v13 = vld [vmem:[%s4837_s5 + $0x6d0] ss:$8 sps:$4 sm:$0xff]  }
 0x16a   : > { %3161 = vmatprep.subr.bf16.mxu1 %v4057_v14  ;;  %v4143_v14 = vld [vmem:[%s4837_s5 + $0x7d0] ss:$8 sps:$4 sm:$0xff]  }
 0x16c   : > { %3121 = vmatpush1.bf16.msra.mxu0 %v4052_v15  ;;  %v4148_v15 = vld [vmem:[%s4837_s5 + $0x6e4] ss:$8 sps:$4 sm:$0xff]  }
 0x16d   : > { %3162 = vmatpush1.bf16.msra.mxu1 %v4055_v16  ;;  %3172 = vmatprep.subr.bf16.mxu0 %v4064_v17  ;;  %v4151_v16 = vld [vmem:[%s4837_s5 + $0x7e4] ss:$8 sps:$4 sm:$0xff]   ;;  %v4146_v17 = vld [vmem:[%s4837_s5 + $0x6e0] ss:$8 sps:$4 sm:$0xff]  }
 0x16e   : > { %3213 = vmatprep.subr.bf16.mxu1 %v4067_v18  ;;  %v4149_v18 = vld [vmem:[%s4837_s5 + $0x7e0] ss:$8 sps:$4 sm:$0xff]  }
 0x16f   : > { %3123 = vmatmul.mubr.bf16.vlgmr.msra.gmra.mrb[8].mxu0 %v3435_v21  ;;  %v4154_v21 = vld [vmem:[%s4837_s5 + $0x6f4] ss:$8 sps:$4 sm:$0xff]  }
 0x170   : > { %3164 = vmatmul.mubr.bf16.vlgmr.msra.gmra.mrb[8].mxu1 %v3437_v22  ;;  %3173 = vmatpush1.bf16.msra.mxu0 %v4062_v25  ;;  %v4157_v22 = vld [vmem:[%s4837_s5 + $0x7f4] ss:$8 sps:$4 sm:$0xff]   ;;  %v4152_v25 = vld [vmem:[%s4837_s5 + $0x6f0] ss:$8 sps:$4 sm:$0xff]  }
 0x171   : > { %3214 = vmatpush1.bf16.msra.mxu1 %v4065_v26  ;;  %3174 = vmatprep.subr.bf16.mxu0 %v4070_v27  ;;  %v4155_v26 = vld [vmem:[%s4837_s5 + $0x7f0] ss:$8 sps:$4 sm:$0xff]   ;;  %v3439_v27 = vcombine.low %v5065_v23, %v5065_v23 }
 0x172   : > { %3215 = vmatprep.subr.bf16.mxu1 %v4073_v28  ;;  %3204 = vmatprep.mubr.bf16.mxu0 %v3440_v19  ;;  %v3441_v28 = vcombine.low %v5068_v24, %v5068_v24 }
 0x173   : > { %3245 = vmatprep.mubr.bf16.mxu1 %v3442_v20 }
 0x174   : > { %3175 = vmatpush1.bf16.msra.mxu0 %v4068_v29 }
 0x175   : > { %3216 = vmatpush1.bf16.msra.mxu1 %v4071_v30  ;;  %3176 = vmatprep.subr.bf16.mxu0 %v4076_v31 }
 0x176   : > { %3217 = vmatprep.subr.bf16.mxu1 %v4079_v32 }
 0x178   : > { %3177 = vmatpush1.bf16.msra.mxu0 %v4074_v33 }
 0x179   : > { %3218 = vmatpush1.bf16.msra.mxu1 %v4077_v34  ;;  %3178 = vmatprep.subr.bf16.mxu0 %v4082_v35 }
 0x17a   : > { %3219 = vmatprep.subr.bf16.mxu1 %v4085_v36 }
 0x17c   : > { %3179 = vmatpush1.bf16.msra.mxu0 %v4080_v37 }
 0x17d   : > { %3220 = vmatpush1.bf16.msra.mxu1 %v4083_v38  ;;  %3180 = vmatprep.subr.bf16.mxu0 %v4088_v39 }
 0x17e   : > { %3221 = vmatprep.subr.bf16.mxu1 %v4091_v40 }
 0x180   : > { %3181 = vmatpush1.bf16.msra.mxu0 %v4086_v41 }
 0x181   : > { %3222 = vmatpush1.bf16.msra.mxu1 %v4089_v42  ;;  %3182 = vmatprep.subr.bf16.mxu0 %v4094_v43 }
 0x182   : > { %3223 = vmatprep.subr.bf16.mxu1 %v4097_v44 }
 0x184   : > { %3183 = vmatpush1.bf16.msra.mxu0 %v4092_v45 }
 0x185   : > { %3224 = vmatpush1.bf16.msra.mxu1 %v4095_v46  ;;  %3184 = vmatprep.subr.bf16.mxu0 %v4100_v47 }
 0x186   : > { %3225 = vmatprep.subr.bf16.mxu1 %v4103_v48 }
 0x188   : > { %3185 = vmatpush1.bf16.msra.mxu0 %v4098_v49 }
 0x189   : > { %3226 = vmatpush1.bf16.msra.mxu1 %v4101_v50  ;;  %3186 = vmatprep.subr.bf16.mxu0 %v4106_v51 }
 0x18a   : > { %3227 = vmatprep.subr.bf16.mxu1 %v4109_v52 }
 0x18c   : > { %3187 = vmatpush1.bf16.msra.mxu0 %v4104_v53 }
 0x18d   : > { %3228 = vmatpush1.bf16.msra.mxu1 %v4107_v54  ;;  %3188 = vmatprep.subr.bf16.mxu0 %v4112_v55 }
 0x18e   : > { %3229 = vmatprep.subr.bf16.mxu1 %v4115_v56 }
 0x190   : > { %3189 = vmatpush1.bf16.msra.mxu0 %v4110_v57 }
 0x191   : > { %3230 = vmatpush1.bf16.msra.mxu1 %v4113_v58  ;;  %3190 = vmatprep.subr.bf16.mxu0 %v4118_v59 }
 0x192   : > { %3231 = vmatprep.subr.bf16.mxu1 %v4121_v60 }
 0x194   : > { %3191 = vmatpush1.bf16.msra.mxu0 %v4116_v61 }
 0x195   : > { %3232 = vmatpush1.bf16.msra.mxu1 %v4119_v62  ;;  %3192 = vmatprep.subr.bf16.mxu0 %v4124_v63 }
 0x196   : > { %3233 = vmatprep.subr.bf16.mxu1 %v4127_v0  ;;  %v1324_v0 = vld [vmem:[#allocation2] sm:$0xff] }
 0x198   : > { %3193 = vmatpush1.bf16.msra.mxu0 %v4122_v1 }
 0x199   : > { %3234 = vmatpush1.bf16.msra.mxu1 %v4125_v2  ;;  %3194 = vmatprep.subr.bf16.mxu0 %v4130_v3 }
 0x19a   : > { %3235 = vmatprep.subr.bf16.mxu1 %v4133_v4 }
 0x19c   : > { %3195 = vmatpush1.bf16.msra.mxu0 %v4128_v5  ;;  %v1325_v5 = vld [vmem:[#allocation2 + $0x8] sm:$0xff] }
 0x19d   : > { %3236 = vmatpush1.bf16.msra.mxu1 %v4131_v6  ;;  %3196 = vmatprep.subr.bf16.mxu0 %v4136_v7 }
 0x19e   : > { %3237 = vmatprep.subr.bf16.mxu1 %v4139_v8 }
 0x1a0   : > { %3197 = vmatpush1.bf16.msra.mxu0 %v4134_v9 }
 0x1a1   : > { %3238 = vmatpush1.bf16.msra.mxu1 %v4137_v10  ;;  %3198 = vmatprep.subr.bf16.mxu0 %v4142_v11  ;;  %v3266_v11 = vlaneseq (!%p3699_p13) }
 0x1a2   : > { %3239 = vmatprep.subr.bf16.mxu1 %v4145_v12 }
 0x1a3   : > { %v3267_v12 = vshrl.u32 (!%p3699_p13), %v3266_v11, 7 }
 0x1a4   : > { %3199 = vmatpush1.bf16.msra.mxu0 %v4140_v13  ;;  %v3264_v13 = vld [vmem:[%s1306_s12] sm:$0x3] (!%p3699_p13) }
 0x1a5   : > { %3240 = vmatpush1.bf16.msra.mxu1 %v4143_v14  ;;  %3200 = vmatprep.subr.bf16.mxu0 %v4148_v15  ;;  %v3268_v14 = vsub.s32 (!%p3699_p13), 0, %v3267_v12  ;;  %v3272_v15 = vsub.s32 (!%p3699_p13), 1, %v3267_v12 }
 0x1a6   : > { %3241 = vmatprep.subr.bf16.mxu1 %v4151_v16 }
 0x1a8   : > { %3201 = vmatpush1.bf16.msra.mxu0 %v4146_v17 }
 0x1a9   : > { %3242 = vmatpush1.bf16.msra.mxu1 %v4149_v18  ;;  %3202 = vmatprep.subr.bf16.mxu0 %v4154_v21  ;;  %v3269_v18 = vrot.slane (!%p3699_p13), %v3264_v13, %v3268_v14  ;;  %v3273_v21 = vrot.slane (!%p3699_p13), %v3264_v13, %v3272_v15 }
 0x1aa   : > { %3243 = vmatprep.subr.bf16.mxu1 %v4157_v22 }
 0x1ac   : > { %3203 = vmatpush1.bf16.msra.mxu0 %v4152_v25 }
 0x1ad   : > { %3244 = vmatpush1.bf16.msra.mxu1 %v4155_v26 }
 0x1af   : > { %3205 = vmatmul.mubr.bf16.vlgmr.msra.gmra.mrb[12].mxu0 %v3439_v27 }
 0x1b0   : > { %3246 = vmatmul.mubr.bf16.vlgmr.msra.gmra.mrb[12].mxu1 %v3441_v28 }
 0x1c2   : > { %v2960_v19 = vpop.f32.mrb[0].mxu0 }
 0x1c3   : > { %v3001_v20 = vpop.f32.mrb[0].mxu1  ;;  %v2962_v30 = vpop.f32.mrb[1].mxu0 }
 0x1c4   : > { %v3002_v29 = vadd.f32 %v3001_v20, %v2960_v19  ;;  %v3003_v31 = vpop.f32.mrb[1].mxu1  ;;  %v2964_v33 = vpop.f32.mrb[2].mxu0 }
 0x1c5   : > { %v3004_v32 = vadd.f32 %v3003_v31, %v2962_v30  ;;  %v3005_v34 = vpop.f32.mrb[2].mxu1  ;;  %v2965_v35 = vpop.f32.mrb[3].mxu0 }
 0x1c6   : > { %v3006_v36 = vpop.f32.mrb[3].mxu1 }
 0x202   : > { %v3042_v37 = vpop.f32.mrb[4].mxu0 }
 0x203   : > { %v3083_v38 = vpop.f32.mrb[4].mxu1  ;;  %v3043_v23 = vadd.f32 %v3042_v37, %v3002_v29  ;;  %v3044_v39 = vpop.f32.mrb[5].mxu0 }
 0x204   : > { %v3085_v40 = vpop.f32.mrb[5].mxu1  ;;  %v3045_v24 = vadd.f32 %v3044_v39, %v3004_v32  ;;  %v3046_v41 = vpop.f32.mrb[6].mxu0 }
 0x205   : > { %v3087_v42 = vpop.f32.mrb[6].mxu1  ;;  %v3084_v43 = vadd.f32 %v3083_v38, %v3043_v23  ;;  %v3047_v44 = vpop.f32.mrb[7].mxu0 }
 0x206   : > { %v3088_v45 = vpop.f32.mrb[7].mxu1  ;;  %v3086_v46 = vadd.f32 %v3085_v40, %v3045_v24 }
 0x242   : > { %v3124_v47 = vpop.f32.mrb[8].mxu0 }
 0x243   : > { %v3165_v48 = vpop.f32.mrb[8].mxu1  ;;  %v3125_v49 = vadd.f32 %v3124_v47, %v3084_v43  ;;  %v3126_v50 = vpop.f32.mrb[9].mxu0 }
 0x244   : > { %v3167_v51 = vpop.f32.mrb[9].mxu1  ;;  %v3127_v52 = vadd.f32 %v3126_v50, %v3086_v46  ;;  %v3128_v53 = vpop.f32.mrb[10].mxu0 }
 0x245   : > { %v3169_v54 = vpop.f32.mrb[10].mxu1  ;;  %v3166_v55 = vadd.f32 %v3165_v48, %v3125_v49  ;;  %v3129_v56 = vpop.f32.mrb[11].mxu0 }
 0x246   : > { %v3170_v57 = vpop.f32.mrb[11].mxu1  ;;  %v3168_v58 = vadd.f32 %v3167_v51, %v3127_v52 }
 0x282   : > { %v3206_v59 = vpop.f32.mrb[12].mxu0 }
 0x283   : > { %v3247_v60 = vpop.f32.mrb[12].mxu1  ;;  %v3207_v61 = vadd.f32 %v3206_v59, %v3166_v55  ;;  %v3208_v62 = vpop.f32.mrb[13].mxu0 }
 0x284   : > { %v3249_v63 = vpop.f32.mrb[13].mxu1  ;;  %v3209_v1 = vadd.f32 %v3208_v62, %v3168_v58  ;;  %v3210_v2 = vpop.f32.mrb[14].mxu0  ;;  %3261 = sbr.rel (%p3699_p13) target bundleno = 663 (0x297), region = 78 }
 0x285   : > { %v3251_v3 = vpop.f32.mrb[14].mxu1  ;;  %v3248_v4 = vadd.f32 %v3247_v60, %v3207_v61  ;;  %v3211_v6 = vpop.f32.mrb[15].mxu0 }
 0x286   : > { %v3252_v7 = vpop.f32.mrb[15].mxu1  ;;  %v3250_v8 = vadd.f32 %v3249_v63, %v3209_v1 }
 0x287   : > { %v3254_v9 = vadd.f32 %v3248_v4, %v1324_v0 }
 0x288   : > { %v3255_v10 = vadd.f32 %v3250_v8, %v1325_v5 }
 0x289   : > { %3256 = vst [vmem:[#allocation2] sm:$0xff] %v3254_v9 }
 0x28a   : > { %3257 = vst [vmem:[#allocation2 + $0x8] sm:$0xff] %v3255_v10 }
 0x290   : > { %v3262_v16 = vld [vmem:[#allocation2] sm:$0xff] }
 0x291   : > { %v3263_v17 = vld [vmem:[#allocation2 + $0x8] sm:$0xff]  ;;  %v3276_v22 = vadd.f32 %v3269_v18, %v3262_v16 }
 0x292   : > { %v3277_v25 = vadd.f32 %v3273_v21, %v3263_v17 }
 0x294   : > { %v3704_v26 = vpack.c.bf16 %v3277_v25, %v3276_v22 }
 0x296   : > { %3286 = vst [vmem:[%s4835_s15] sm:$0xff] %v3704_v26 }
 0x297 PF: > { %s13_s18 = sadd.s32 1, %s4216_s18   ;;  %s5172_s12 = smov %s4196_s13 }
 0x298   : > { %p10_p0 = scmp.ge.s32.totalorder %s13_s18, 6   ;;  %s5173_s13 = smov %s4290_s25 }
 0x299   : > { %s5174_s14 = smov %s4208_s16  ;;  %s5175_s15 = smov %s4212_s17 }
 0x29a   : > { %s5176_s16 = smov %s5179_s19  ;;  %s5177_s17 = smov %s5183_s20 }
 0x29b   :  { %12 = sbr.rel (!%p10_p0) target bundleno = 4 (0x4), region = 119 }

// kernel: discriminator_forward.15
= control target key start
LH: loop header
LB: loop body
LE: loop exit
PB: predicated region body
PF: predicated region fallthrough
CT: control target
= control target key end

     0   :  { %s566_s9 = smov 0   ;;  %s568_s10 = smov 0   ;;  %s661_s0 = inlined_call_operand.vmem [shape: bf16[2,1,8192], index: 0, kind: input, shape index: {}]   ;;  %s662_s1 = inlined_call_operand.vmem [shape: bf16[1,8192], index: 1, kind: input, shape index: {}]   ;;  %s663_s2 = inlined_call_operand.vmem [shape: f32[2,1,128], index: 2, kind: output, shape index: {}]  }
   0x1   :  { %s570_s11 = smov 0   ;;  %s572_s12 = smov 0  }
   0x2   :  { %s574_s13 = smov 0  }
   0x3 LB: > { %s21_s14 = sadd.s32 1, %s539_s11  ;;  %s24_s15 = sadd.s32 1, %s543_s12  ;;  %s547_s13 = sphi %s574_s13, %s12_s13   ;;  %s543_s12 = sphi %s572_s12, %s667_s12   ;;  %s539_s11 = sphi %s570_s11, %s666_s11   ;;  %s535_s10 = sphi %s568_s10, %s665_s10   ;;  %s531_s9 = sphi %s566_s9, %s664_s9  }
   0x4   : > { %p22_p0 = scmp.ge.s32.totalorder %s21_s14, 4  ;;  %p457_p1 = scmp.ge.s32.totalorder %s547_s13, 1 }
   0x5   : > { %p140_p2 = scmp.lt.s32.totalorder %s547_s13, 9 }
   0x6   : > { %s669_s14 = smov (%p22_p0, %s21_s14), 0  ;;  %s671_s15 = smov (!%p22_p0, %s24_s15), %s543_s12 }
   0x7   : > { %p141_p3 = pnand %p457_p1, %p140_p2  ;;  %p26_p4 = scmp.ge.s32.totalorder %s671_s15, 2 }
   0x8   : > { %s458_s16 = sshll.u32 (!%p141_p3), %s531_s9, 4  ;;  %p168_p5 = scmp.lt.s32.totalorder (!%p141_p3), %s535_s10, 1 }
   0x9   : > { %s673_s15 = smov (%p26_p4, %s671_s15), 0  ;;  %144 = sbr.rel (%p141_p3) target bundleno = 286 (0x11e), region = 28 }
   0xa   : > { %p170_p6 = scmp.lt.s32.totalorder (!%p141_p3), %s458_s16, 63  ;;  %p461_p7 = scmp.ne.s32.totalorder (!%p141_p3), %s531_s9, 0 }
  0x10   : > { %s675_s10 = smov (!%p168_p5, %s535_s10), 1  ;;  %s677_s16 = smov (!%p170_p6, %s458_s16), 63 }
  0x11   : > { %s459_s17 = sshll.u32 %s675_s10, 6  ;;  %s183_s20 = scalar_lea.vmem %s663_s2, %s675_s10  ;;  %v549_v0 = vmov (!%p461_p7), 0.0  }
  0x12   : > { %s173_s21 = sadd.s32 %s459_s17, %s677_s16  ;;  %s179_s24 = scalar_lea.vmem %s662_s1, %s677_s16  ;;  %188 = vst [vmem:[#allocation2] sm:$0xff] (!%p461_p7), %v549_v0  ;;  %189 = vst [vmem:[#allocation2 + $0x8] sm:$0xff] (!%p461_p7), %v549_v0 }
  0x13   : > { %s174_s27 = scalar_lea.vmem %s661_s0, %s173_s21  ;;  %187 = sbr.rel (%p461_p7) target bundleno = 26 (0x1a), region = 32 }
  0x1a PF: > { %v190_v1 = vld [vmem:[%s174_s27] sm:$0xff]  ;;  %v219_v3 = vlaneseq  ;;  %v191_v8 = vld [vmem:[%s174_s27 + $0x8] sm:$0xff]  ;;  %v550_v10 = vmov 1966171168   ;;  %p462_p8 = scmp.ne.s32.totalorder %s531_s9, 3 }
  0x1b   : > { %v196_v2 = vld [vmem:[%s179_s24] sm:$0xff]  ;;  %v192_v4 = vunpack.c.l.bf16 %v190_v1  ;;  %v193_v5 = vunpack.c.h.bf16 %v190_v1  ;;  %v197_v9 = vld [vmem:[%s179_s24 + $0x8] sm:$0xff]  ;;  %v217_v11 = vunpack.c.l.s4 %v550_v10  ;;  %v194_v13 = vunpack.c.l.bf16 %v191_v8 }
  0x1c   : > { %v198_v6 = vunpack.c.l.bf16 %v196_v2  ;;  %v199_v7 = vunpack.c.h.bf16 %v196_v2  ;;  %v613_v12 = vshrl.u32 %v219_v3, 7  ;;  %v195_v14 = vunpack.c.h.bf16 %v191_v8  ;;  %v202_v27 = vld [vmem:[#allocation2] sm:$0xff]  ;;  %v203_v28 = vld [vmem:[#allocation2 + $0x8] sm:$0xff] }
  0x1d   : > { %v200_v15 = vunpack.c.l.bf16 %v197_v9  ;;  %v201_v16 = vunpack.c.h.bf16 %v197_v9  ;;  %v218_v19 = vunpack.c.0.s8 %v217_v11  ;;  %vm340_vm0 = vcmask (!%p462_p8), 1040384  }
  0x1e   : > { %v204_v17 = vmul.f32 %v198_v6, %v192_v4  ;;  %v205_v18 = vmul.f32 %v199_v7, %v193_v5  ;;  %v262_v34 = vsub.s32 (!%p462_p8), 0, %v613_v12  ;;  %v266_v35 = vsub.s32 (!%p462_p8), 1, %v613_v12 }
  0x1f   : > { %v206_v20 = vmul.f32 %v200_v15, %v194_v13  ;;  %v207_v21 = vmul.f32 %v201_v16, %v195_v14  ;;  %v221_v22 = vsub.s32 %v218_v19, %v613_v12  ;;  %v270_v36 = vsub.s32 (!%p462_p8), 2, %v613_v12 }
  0x20   : > { %v274_v37 = vsub.s32 (!%p462_p8), 3, %v613_v12  ;;  %v278_v41 = vsub.s32 (!%p462_p8), 4, %v613_v12  ;;  %v282_v43 = vsub.s32 (!%p462_p8), 5, %v613_v12  ;;  %v286_v44 = vsub.s32 (!%p462_p8), 6, %v613_v12 }
  0x21   : > { %v222_v23 = vrot.slane %v204_v17, %v221_v22  ;;  %v229_v24 = vrot.slane %v205_v18, %v221_v22  ;;  %v237_v25 = vrot.slane %v206_v20, %v221_v22  ;;  %v244_v26 = vrot.slane %v207_v21, %v221_v22  ;;  %255 = sbr.rel (%p462_p8) target bundleno = 286 (0x11e), region = 36 }
  0x22   : > { %v290_v51 = vsub.s32 (!%p462_p8), 7, %v613_v12 }
  0x23   : > { %v230_v29 = vcombine.low %v222_v23, %v229_v24  ;;  %v245_v30 = vcombine.low %v237_v25, %v244_v26 }
  0x25   : > { %v248_v31 = vadd.f32 %v230_v29, %v202_v27  ;;  %v249_v32 = vadd.f32 %v245_v30, %v203_v28 }
  0x27   : > { %250 = vst [vmem:[#allocation2] sm:$0xff] %v248_v31  ;;  %251 = vst [vmem:[#allocation2 + $0x8] sm:$0xff] %v249_v32 }
  0x2e   : > { %v256_v33 = vld [vmem:[#allocation2] sm:$0xff]  ;;  %v257_v56 = vld [vmem:[#allocation2 + $0x8] sm:$0xff] }
  0x2f   : > { %v263_v38 = vrot.slane %v256_v33, %v262_v34  ;;  %v267_v39 = vrot.slane %v256_v33, %v266_v35  ;;  %v271_v40 = vrot.slane %v256_v33, %v270_v36  ;;  %v275_v42 = vrot.slane %v256_v33, %v274_v37 }
  0x30   : > { %v279_v45 = vrot.slane %v256_v33, %v278_v41  ;;  %v283_v50 = vrot.slane %v256_v33, %v282_v43  ;;  %v287_v54 = vrot.slane %v256_v33, %v286_v44  ;;  %v291_v58 = vrot.slane %v256_v33, %v290_v51 }
  0x31   : > { %v341_v46 = vsel %vm340_vm0, %v263_v38, 0.0  ;;  %v342_v47 = vsel %vm340_vm0, %v267_v39, 0.0  ;;  %v344_v48 = vsel %vm340_vm0, %v271_v40, 0.0  ;;  %v346_v52 = vsel %vm340_vm0, %v275_v42, 0.0 }
  0x32   : > { %v343_v49 = vadd.f32 %v342_v47, %v341_v46  ;;  %v348_v55 = vsel %vm340_vm0, %v279_v45, 0.0  ;;  %v350_v59 = vsel %vm340_vm0, %v283_v50, 0.0  ;;  %v295_v61 = vrot.slane %v257_v56, %v262_v34 }
  0x33   : > { %v352_v62 = vsel %vm340_vm0, %v287_v54, 0.0  ;;  %v299_v0 = vrot.slane %v257_v56, %v266_v35  ;;  %v354_v1 = vsel %vm340_vm0, %v291_v58, 0.0  ;;  %v303_v3 = vrot.slane %v257_v56, %v270_v36 }
  0x34   : > { %v345_v53 = vadd.f32 %v344_v48, %v343_v49  ;;  %v356_v4 = vsel %vm340_vm0, %v295_v61, 0.0  ;;  %v307_v6 = vrot.slane %v257_v56, %v274_v37  ;;  %v311_v9 = vrot.slane %v257_v56, %v278_v41 }
  0x35   : > { %v358_v7 = vsel %vm340_vm0, %v299_v0, 0.0  ;;  %v360_v10 = vsel %vm340_vm0, %v303_v3, 0.0  ;;  %v315_v12 = vrot.slane %v257_v56, %v282_v43  ;;  %v319_v15 = vrot.slane %v257_v56, %v286_v44 }
  0x36   : > { %v347_v57 = vadd.f32 %v346_v52, %v345_v53  ;;  %v362_v13 = vsel %vm340_vm0, %v307_v6, 0.0  ;;  %v364_v16 = vsel %vm340_vm0, %v311_v9, 0.0  ;;  %v323_v18 = vrot.slane %v257_v56, %v290_v51 }
  0x37   : > { %v366_v19 = vsel %vm340_vm0, %v315_v12, 0.0  ;;  %v368_v21 = vsel %vm340_vm0, %v319_v15, 0.0 }
  0x38   : > { %v349_v60 = vadd.f32 %v348_v55, %v347_v57  ;;  %v370_v23 = vsel %vm340_vm0, %v323_v18, 0.0 }
  0x3a   : > { %v351_v63 = vadd.f32 %v350_v59, %v349_v60 }
  0x3c   : > { %v353_v2 = vadd.f32 %v352_v62, %v351_v63 }
  0x3e   : > { %v355_v5 = vadd.f32 %v354_v1, %v353_v2 }
  0x40   : > { %v357_v8 = vadd.f32 %v356_v4, %v355_v5 }
  0x42   : > { %v359_v11 = vadd.f32 %v358_v7, %v357_v8 }
  0x44   : > { %v361_v14 = vadd.f32 %v360_v10, %v359_v11 }
  0x46   : > { %v363_v17 = vadd.f32 %v362_v13, %v361_v14 }
  0x48   : > { %v365_v20 = vadd.f32 %v364_v16, %v363_v17 }
  0x4a   : > { %v367_v22 = vadd.f32 %v366_v19, %v365_v20 }
  0x4c   : > { %v369_v24 = vadd.f32 %v368_v21, %v367_v22 }
  0x4e   : > { %v371_v25 = vadd.f32 %v370_v23, %v369_v24 }
  0x50   : > { %372 = vadd.xlane.f32.xlu0 %v371_v25 }
  0xdd   : > { %v373_v26 = vpop.xlane.xlu0 %372 }
  0xde   : > { %v374_v27 = vrot.slane %v373_v26, 4 }
  0xe0   : > { %v375_v28 = vadd.f32 %v374_v27, %v373_v26 }
  0xe2   : > { %v376_v29 = vrot.slane %v375_v28, 2 }
  0xe4   : > { %v377_v30 = vadd.f32 %v376_v29, %v375_v28 }
  0xe6   : > { %v378_v31 = vrot.slane %v377_v30, 1 }
  0xe8   : > { %v379_v32 = vadd.f32 %v378_v31, %v377_v30 }
  0xea   : > { %465 = vpush %v379_v32 }
 0x11b   : > { %s466_s28 = spop %465 }
 0x11c   : > { %v381_v33 = vstv %s466_s28 }
 0x11d   : > { %382 = vst [vmem:[%s183_s20] sm:$0x1] %v381_v33 }
 0x11e PF: > { %s12_s13 = sadd.s32 1, %s547_s13   ;;  %s664_s9 = smov %s539_s11 }
 0x11f   : > { %p9_p9 = scmp.ge.s32.totalorder %s12_s13, 10   ;;  %s665_s10 = smov %s543_s12 }
 0x120   : > { %s666_s11 = smov %s669_s14  ;;  %s667_s12 = smov %s673_s15 }
 0x121   :  { %11 = sbr.rel (!%p9_p9) target bundleno = 3 (0x3), region = 69 }

</bundles_post_ra>
